<compile_context>
chip_gen: v7x
topology: tpu7x:2x2x1
jax: 0.10.0
libtpu: 0.0.40
codegen_flags: <defaults>
</compile_context>

<pallas_src>
import jax
import jax.numpy as jnp
from jax.experimental import pallas as pl
from jax.experimental.pallas import tpu as pltpu

_PAD_ROWS = 8   # sublane-aligned halo block above/below the interior rows


def _decoder_kernel(x_ref, t1_ref, b1_ref, t2_ref, b2_ref, t3_ref, b3_ref,
                    o_ref, pad_ref):
    # x_ref : (1, H, W*32) f32   one batch element, lane-dense (H, W*C) layout
    # tX_ref: (k, W*Cin, W*Cout) bf16 banded (Toeplitz-along-W) weights
    # bX_ref: (1, W*Cout) f32 bias row (per-channel bias tiled over W)
    # o_ref : (1, H, W*C_out) f32 lane-dense output slab
    # pad_ref: shared VMEM scratch (8 + H + 8, max W*Cin) f32; interior rows
    #          [8, 8+H) hold the current layer's activation, halo rows stay zero.
    H = x_ref.shape[1]
    rows = pad_ref.shape[0]
    lanes = pad_ref.shape[1]

    # Zero only the two aligned halo row-blocks (the interior rows are always fully
    # overwritten by each layer's activation store below).
    pad_ref[0:_PAD_ROWS, :] = jnp.zeros((_PAD_ROWS, lanes), jnp.float32)
    pad_ref[_PAD_ROWS + H:rows, :] = jnp.zeros((rows - _PAD_ROWS - H, lanes),
                                               jnp.float32)

    def conv_layer(act, t_ref, b_ref):
        # act: (H, W*Cin) f32. One "same" conv == k deep-K matmuls: for kernel row kh,
        # the LHS is the activation shifted by (kh - p) rows (rows read from the
        # zero-row-padded scratch), the RHS is the banded (W*Cin, W*Cout) weight matrix
        # that already encodes all kw taps and the W-boundary zeros.
        k, kdim, ndim = t_ref.shape
        p = k // 2
        pad_ref[_PAD_ROWS:_PAD_ROWS + H, 0:kdim] = act   # aligned interior store
        acc = jnp.zeros((H, ndim), jnp.float32)
        for kh in range(k):
            r0 = _PAD_ROWS - p + kh
            lhs = pad_ref[r0:r0 + H, 0:kdim].astype(jnp.bfloat16)
            acc = acc + jnp.dot(lhs, t_ref[kh],
                                preferred_element_type=jnp.float32)
        return acc + b_ref[...]

    act = x_ref[0]                               # (H, W*32)
    act = conv_layer(act, t1_ref, b1_ref)        # 32 -> 32, k=7   (H, W*32)
    act = conv_layer(act, t2_ref, b2_ref)        # 32 -> 16, k=5   (H, W*16)
    act = conv_layer(act, t3_ref, b3_ref)        # 16 -> C,  k=5   (H, W*C)
    o_ref[0] = act.astype(o_ref.dtype)


def _make_row_toeplitz(w_hwio, width):
    """(k, k, Cin, Cout) conv weights -> (k, W*Cin, W*Cout) banded matrices.

    T[kh][wi*Cin + ci, wo*Cout + co] = w[kh, wi - wo + p, ci, co] (0 outside the band),
    so `act_row @ T[kh]` applies all kw taps and the W-boundary zero padding of a
    "same" convolution for one kernel row kh.
    """
    k, _, cin, cout = w_hwio.shape
    p = k // 2
    wi = jnp.arange(width)[:, None]
    wo = jnp.arange(width)[None, :]
    kw = wi - wo + p                                      # (W, W)
    valid = (kw >= 0) & (kw < k)
    t = w_hwio[:, jnp.clip(kw, 0, k - 1), :, :]           # (k, W, W, Cin, Cout)
    t = jnp.where(valid[None, :, :, None, None], t, 0.0)
    t = t.transpose(0, 1, 3, 2, 4)                        # (k, W_in, Cin, W_out, Cout)
    return t.reshape(k, width * cin, width * cout)


def prepare_decoder_params(params, width):
    """One-time prep (outside the hot path): banded bf16 weights + tiled f32 biases."""
    prepped = []
    for w, b in params:
        t = _make_row_toeplitz(w, width).astype(jnp.bfloat16)
        bias = jnp.tile(b.astype(jnp.float32), width).reshape(1, -1)
        prepped.append((t, bias))
    return prepped


@jax.jit
def decoder_forward(prepped, x_nchw):
    """Pallas implementation of Decoder.forward. Input/output are NCHW."""
    (t1, b1), (t2, b2), (t3, b3) = prepped
    n, cin, h, w = x_nchw.shape
    x = jnp.transpose(x_nchw, (0, 2, 3, 1)).reshape(n, h, w * cin)
    x = x.astype(jnp.float32)

    out_lanes = t3.shape[-1]            # W * C_out
    c_out = out_lanes // w
    pad_lanes = max(t1.shape[1], t2.shape[1], t3.shape[1])

    out = pl.pallas_call(
        _decoder_kernel,
        out_shape=jax.ShapeDtypeStruct((n, h, out_lanes), jnp.float32),
        grid=(n,),
        in_specs=[
            pl.BlockSpec((1, h, w * cin), lambda i: (i, 0, 0)),
            pl.BlockSpec(t1.shape, lambda i: (0, 0, 0)),
            pl.BlockSpec(b1.shape, lambda i: (0, 0)),
            pl.BlockSpec(t2.shape, lambda i: (0, 0, 0)),
            pl.BlockSpec(b2.shape, lambda i: (0, 0)),
            pl.BlockSpec(t3.shape, lambda i: (0, 0, 0)),
            pl.BlockSpec(b3.shape, lambda i: (0, 0)),
        ],
        out_specs=pl.BlockSpec((1, h, out_lanes), lambda i: (i, 0, 0)),
        scratch_shapes=[
            pltpu.VMEM((_PAD_ROWS + h + _PAD_ROWS, pad_lanes), jnp.float32),
        ],
        compiler_params=pltpu.CompilerParams(
            dimension_semantics=("parallel",)),   # batch axis -> both v7x TensorCores
    )(x, t1, b1, t2, b2, t3, b3)

    # Lane-dense (N, H, W*C_out) slab -> NCHW in the wrapper (layout plumbing only).
    return jnp.transpose(out.reshape(n, h, w, c_out), (0, 3, 1, 2))


def init_decoder_params(key, in_channels):
    """Deterministic init mirroring Conv2d default (uniform +/- 1/sqrt(fan_in)).
    Weights are stored in HWIO layout (k, k, Cin, Cout)."""
    specs = [  # (Cin, Cout, kernel_size)
        (32, 32, 7),
        (32, 16, 5),
        (16, in_channels, 5),
    ]
    params = []
    for i, (cin, cout, k) in enumerate(specs):
        kw_key, kb_key = jax.random.split(jax.random.fold_in(key, i))
        bound = 1.0 / float(cin * k * k) ** 0.5
        w = jax.random.uniform(kw_key, (k, k, cin, cout), jnp.float32, -bound, bound)
        b = jax.random.uniform(kb_key, (cout,), jnp.float32, -bound, bound)
        params.append((w, b))
    return params


def decoder_reference(params, x_nchw):
    """Plain-JAX fp32 reference (lax.conv, HIGHEST precision) for correctness checks."""
    x = jnp.transpose(x_nchw, (0, 2, 3, 1))
    for w, b in params:
        k = w.shape[0]
        p = k // 2
        x = jax.lax.conv_general_dilated(
            x, w, window_strides=(1, 1), padding=[(p, p), (p, p)],
            dimension_numbers=("NHWC", "HWIO", "NHWC"),
            precision=jax.lax.Precision.HIGHEST,
        ) + b
    return jnp.transpose(x, (0, 3, 1, 2))


if __name__ == "__main__":
    key = jax.random.PRNGKey(0)
    in_channels = 4          # Decoder(in_channels=4)
    N, H, W = 2, 16, 16      # decoder input must have 32 channels

    params = init_decoder_params(key, in_channels)
    prepped = prepare_decoder_params(params, W)
    x = jax.random.normal(jax.random.fold_in(key, 100), (N, 32, H, W), jnp.float32)

    out = jax.block_until_ready(decoder_forward(prepped, x))
    assert out.shape == (N, in_channels, H, W), out.shape

    ref = jax.block_until_ready(decoder_reference(params, x))
    # Kernel matmuls run bf16 multiplies with fp32 accumulation (matches default MXU
    # precision); the reference is fp32-HIGHEST, so allow bf16-level error.
    max_err = float(jnp.max(jnp.abs(out - ref)))
    assert jnp.allclose(out, ref, rtol=2e-2, atol=2e-2), max_err

    print("KERNEL_OK")
</pallas_src>

<mosaic_0001>
module attributes {stable_mosaic.version = 11 : i64} {
  func.func @_decoder_kernel(%arg0: i32, %arg1: memref<1x16x512xf32, #tpu.memory_space<vmem>>, %arg2: memref<7x512x512xbf16, #tpu.memory_space<vmem>>, %arg3: memref<1x512xf32, #tpu.memory_space<vmem>>, %arg4: memref<5x512x256xbf16, #tpu.memory_space<vmem>>, %arg5: memref<1x256xf32, #tpu.memory_space<vmem>>, %arg6: memref<5x256x64xbf16, #tpu.memory_space<vmem>>, %arg7: memref<1x64xf32, #tpu.memory_space<vmem>>, %arg8: memref<1x16x64xf32, #tpu.memory_space<vmem>>, %arg9: memref<32x512xf32, #tpu.memory_space<vmem>>) attributes {dimension_semantics = [#tpu.dimension_semantics<parallel>], iteration_bounds = array<i64: 2>, scalar_prefetch = 0 : i64, scratch_operands = 1 : i64, tpu.core_type = #tpu.core_type<tc>, window_params = [{transform_indices = @transform_0, window_bounds = array<i64: 1, 16, 512>}, {pipeline_mode = #tpu.pipeline_mode<synchronous>, transform_indices = @transform_1, window_bounds = array<i64: 7, 512, 512>}, {pipeline_mode = #tpu.pipeline_mode<synchronous>, transform_indices = @transform_2, window_bounds = array<i64: 1, 512>}, {pipeline_mode = #tpu.pipeline_mode<synchronous>, transform_indices = @transform_3, window_bounds = array<i64: 5, 512, 256>}, {pipeline_mode = #tpu.pipeline_mode<synchronous>, transform_indices = @transform_4, window_bounds = array<i64: 1, 256>}, {pipeline_mode = #tpu.pipeline_mode<synchronous>, transform_indices = @transform_5, window_bounds = array<i64: 5, 256, 64>}, {pipeline_mode = #tpu.pipeline_mode<synchronous>, transform_indices = @transform_6, window_bounds = array<i64: 1, 64>}, {transform_indices = @transform_7, window_bounds = array<i64: 1, 16, 64>}]} {
    %cst = arith.constant 0.000000e+00 : f32
    %0 = vector.broadcast %cst : f32 to vector<8x512xf32>
    %c0 = arith.constant 0 : index
    %c0_0 = arith.constant 0 : index
    %1 = vector.load %arg9[%c0, %c0_0] : memref<32x512xf32, #tpu.memory_space<vmem>>, vector<8x512xf32>
    tpu.vector_store %arg9[%c0, %c0_0], %0 {strides = array<i32>} : memref<32x512xf32, #tpu.memory_space<vmem>>, vector<8x512xf32>,
    %cst_1 = arith.constant 0.000000e+00 : f32
    %2 = vector.broadcast %cst_1 : f32 to vector<8x512xf32>
    %c24 = arith.constant 24 : index
    %c0_2 = arith.constant 0 : index
    %3 = vector.load %arg9[%c24, %c0_2] : memref<32x512xf32, #tpu.memory_space<vmem>>, vector<8x512xf32>
    tpu.vector_store %arg9[%c24, %c0_2], %2 {strides = array<i32>} : memref<32x512xf32, #tpu.memory_space<vmem>>, vector<8x512xf32>,
    %c0_3 = arith.constant 0 : index
    %c0_4 = arith.constant 0 : index
    %c0_5 = arith.constant 0 : index
    %4 = vector.load %arg1[%c0_3, %c0_4, %c0_5] : memref<1x16x512xf32, #tpu.memory_space<vmem>>, vector<1x16x512xf32>
    %5 = vector.shape_cast %4 : vector<1x16x512xf32> to vector<16x512xf32>
    %c8 = arith.constant 8 : index
    %c0_6 = arith.constant 0 : index
    %6 = vector.load %arg9[%c8, %c0_6] : memref<32x512xf32, #tpu.memory_space<vmem>>, vector<16x512xf32>
    tpu.vector_store %arg9[%c8, %c0_6], %5 {strides = array<i32>} : memref<32x512xf32, #tpu.memory_space<vmem>>, vector<16x512xf32>,
    %cst_7 = arith.constant 0.000000e+00 : f32
    %7 = vector.broadcast %cst_7 : f32 to vector<16x512xf32>
    %c5 = arith.constant 5 : index
    %c0_8 = arith.constant 0 : index
    %8 = vector.load %arg9[%c5, %c0_8] : memref<32x512xf32, #tpu.memory_space<vmem>>, vector<16x512xf32>
    %9 = arith.truncf %8 : vector<16x512xf32> to vector<16x512xbf16>
    %c0_9 = arith.constant 0 : index
    %c0_10 = arith.constant 0 : index
    %c0_11 = arith.constant 0 : index
    %10 = vector.load %arg2[%c0_9, %c0_10, %c0_11] : memref<7x512x512xbf16, #tpu.memory_space<vmem>>, vector<1x512x512xbf16>
    %11 = vector.shape_cast %10 : vector<1x512x512xbf16> to vector<512x512xbf16>
    %cst_12 = arith.constant dense<0.000000e+00> : vector<16x512xf32>
    %12 = tpu.matmul %9, %11, %cst_12 {dimension_numbers = #tpu.dot_dimension_numbers<[1], [0], [0], [1], [0, 0, 1, 1], [], []>} : vector<16x512xbf16>, vector<512x512xbf16>, vector<16x512xf32> -> vector<16x512xf32>
    %13 = arith.addf %7, %12 : vector<16x512xf32>
    %c6 = arith.constant 6 : index
    %c0_13 = arith.constant 0 : index
    %14 = vector.load %arg9[%c6, %c0_13] : memref<32x512xf32, #tpu.memory_space<vmem>>, vector<16x512xf32>
    %15 = arith.truncf %14 : vector<16x512xf32> to vector<16x512xbf16>
    %c1 = arith.constant 1 : index
    %c0_14 = arith.constant 0 : index
    %c0_15 = arith.constant 0 : index
    %16 = vector.load %arg2[%c1, %c0_14, %c0_15] : memref<7x512x512xbf16, #tpu.memory_space<vmem>>, vector<1x512x512xbf16>
    %17 = vector.shape_cast %16 : vector<1x512x512xbf16> to vector<512x512xbf16>
    %cst_16 = arith.constant dense<0.000000e+00> : vector<16x512xf32>
    %18 = tpu.matmul %15, %17, %cst_16 {dimension_numbers = #tpu.dot_dimension_numbers<[1], [0], [0], [1], [0, 0, 1, 1], [], []>} : vector<16x512xbf16>, vector<512x512xbf16>, vector<16x512xf32> -> vector<16x512xf32>
    %19 = arith.addf %13, %18 : vector<16x512xf32>
    %c7 = arith.constant 7 : index
    %c0_17 = arith.constant 0 : index
    %20 = vector.load %arg9[%c7, %c0_17] : memref<32x512xf32, #tpu.memory_space<vmem>>, vector<16x512xf32>
    %21 = arith.truncf %20 : vector<16x512xf32> to vector<16x512xbf16>
    %c2 = arith.constant 2 : index
    %c0_18 = arith.constant 0 : index
    %c0_19 = arith.constant 0 : index
    %22 = vector.load %arg2[%c2, %c0_18, %c0_19] : memref<7x512x512xbf16, #tpu.memory_space<vmem>>, vector<1x512x512xbf16>
    %23 = vector.shape_cast %22 : vector<1x512x512xbf16> to vector<512x512xbf16>
    %cst_20 = arith.constant dense<0.000000e+00> : vector<16x512xf32>
    %24 = tpu.matmul %21, %23, %cst_20 {dimension_numbers = #tpu.dot_dimension_numbers<[1], [0], [0], [1], [0, 0, 1, 1], [], []>} : vector<16x512xbf16>, vector<512x512xbf16>, vector<16x512xf32> -> vector<16x512xf32>
    %25 = arith.addf %19, %24 : vector<16x512xf32>
    %c8_21 = arith.constant 8 : index
    %c0_22 = arith.constant 0 : index
    %26 = vector.load %arg9[%c8_21, %c0_22] : memref<32x512xf32, #tpu.memory_space<vmem>>, vector<16x512xf32>
    %27 = arith.truncf %26 : vector<16x512xf32> to vector<16x512xbf16>
    %c3 = arith.constant 3 : index
    %c0_23 = arith.constant 0 : index
    %c0_24 = arith.constant 0 : index
    %28 = vector.load %arg2[%c3, %c0_23, %c0_24] : memref<7x512x512xbf16, #tpu.memory_space<vmem>>, vector<1x512x512xbf16>
    %29 = vector.shape_cast %28 : vector<1x512x512xbf16> to vector<512x512xbf16>
    %cst_25 = arith.constant dense<0.000000e+00> : vector<16x512xf32>
    %30 = tpu.matmul %27, %29, %cst_25 {dimension_numbers = #tpu.dot_dimension_numbers<[1], [0], [0], [1], [0, 0, 1, 1], [], []>} : vector<16x512xbf16>, vector<512x512xbf16>, vector<16x512xf32> -> vector<16x512xf32>
    %31 = arith.addf %25, %30 : vector<16x512xf32>
    %c9 = arith.constant 9 : index
    %c0_26 = arith.constant 0 : index
    %32 = vector.load %arg9[%c9, %c0_26] : memref<32x512xf32, #tpu.memory_space<vmem>>, vector<16x512xf32>
    %33 = arith.truncf %32 : vector<16x512xf32> to vector<16x512xbf16>
    %c4 = arith.constant 4 : index
    %c0_27 = arith.constant 0 : index
    %c0_28 = arith.constant 0 : index
    %34 = vector.load %arg2[%c4, %c0_27, %c0_28] : memref<7x512x512xbf16, #tpu.memory_space<vmem>>, vector<1x512x512xbf16>
    %35 = vector.shape_cast %34 : vector<1x512x512xbf16> to vector<512x512xbf16>
    %cst_29 = arith.constant dense<0.000000e+00> : vector<16x512xf32>
    %36 = tpu.matmul %33, %35, %cst_29 {dimension_numbers = #tpu.dot_dimension_numbers<[1], [0], [0], [1], [0, 0, 1, 1], [], []>} : vector<16x512xbf16>, vector<512x512xbf16>, vector<16x512xf32> -> vector<16x512xf32>
    %37 = arith.addf %31, %36 : vector<16x512xf32>
    %c10 = arith.constant 10 : index
    %c0_30 = arith.constant 0 : index
    %38 = vector.load %arg9[%c10, %c0_30] : memref<32x512xf32, #tpu.memory_space<vmem>>, vector<16x512xf32>
    %39 = arith.truncf %38 : vector<16x512xf32> to vector<16x512xbf16>
    %c5_31 = arith.constant 5 : index
    %c0_32 = arith.constant 0 : index
    %c0_33 = arith.constant 0 : index
    %40 = vector.load %arg2[%c5_31, %c0_32, %c0_33] : memref<7x512x512xbf16, #tpu.memory_space<vmem>>, vector<1x512x512xbf16>
    %41 = vector.shape_cast %40 : vector<1x512x512xbf16> to vector<512x512xbf16>
    %cst_34 = arith.constant dense<0.000000e+00> : vector<16x512xf32>
    %42 = tpu.matmul %39, %41, %cst_34 {dimension_numbers = #tpu.dot_dimension_numbers<[1], [0], [0], [1], [0, 0, 1, 1], [], []>} : vector<16x512xbf16>, vector<512x512xbf16>, vector<16x512xf32> -> vector<16x512xf32>
    %43 = arith.addf %37, %42 : vector<16x512xf32>
    %c11 = arith.constant 11 : index
    %c0_35 = arith.constant 0 : index
    %44 = vector.load %arg9[%c11, %c0_35] : memref<32x512xf32, #tpu.memory_space<vmem>>, vector<16x512xf32>
    %45 = arith.truncf %44 : vector<16x512xf32> to vector<16x512xbf16>
    %c6_36 = arith.constant 6 : index
    %c0_37 = arith.constant 0 : index
    %c0_38 = arith.constant 0 : index
    %46 = vector.load %arg2[%c6_36, %c0_37, %c0_38] : memref<7x512x512xbf16, #tpu.memory_space<vmem>>, vector<1x512x512xbf16>
    %47 = vector.shape_cast %46 : vector<1x512x512xbf16> to vector<512x512xbf16>
    %cst_39 = arith.constant dense<0.000000e+00> : vector<16x512xf32>
    %48 = tpu.matmul %45, %47, %cst_39 {dimension_numbers = #tpu.dot_dimension_numbers<[1], [0], [0], [1], [0, 0, 1, 1], [], []>} : vector<16x512xbf16>, vector<512x512xbf16>, vector<16x512xf32> -> vector<16x512xf32>
    %49 = arith.addf %43, %48 : vector<16x512xf32>
    %c0_40 = arith.constant 0 : index
    %c0_41 = arith.constant 0 : index
    %50 = vector.load %arg3[%c0_40, %c0_41] : memref<1x512xf32, #tpu.memory_space<vmem>>, vector<1x512xf32>
    %51 = vector.broadcast %50 : vector<1x512xf32> to vector<16x512xf32>
    %52 = arith.addf %49, %51 : vector<16x512xf32>
    %c8_42 = arith.constant 8 : index
    %c0_43 = arith.constant 0 : index
    %53 = vector.load %arg9[%c8_42, %c0_43] : memref<32x512xf32, #tpu.memory_space<vmem>>, vector<16x512xf32>
    tpu.vector_store %arg9[%c8_42, %c0_43], %52 {strides = array<i32>} : memref<32x512xf32, #tpu.memory_space<vmem>>, vector<16x512xf32>,
    %cst_44 = arith.constant 0.000000e+00 : f32
    %54 = vector.broadcast %cst_44 : f32 to vector<16x256xf32>
    %c6_45 = arith.constant 6 : index
    %c0_46 = arith.constant 0 : index
    %55 = vector.load %arg9[%c6_45, %c0_46] : memref<32x512xf32, #tpu.memory_space<vmem>>, vector<16x512xf32>
    %56 = arith.truncf %55 : vector<16x512xf32> to vector<16x512xbf16>
    %c0_47 = arith.constant 0 : index
    %c0_48 = arith.constant 0 : index
    %c0_49 = arith.constant 0 : index
    %57 = vector.load %arg4[%c0_47, %c0_48, %c0_49] : memref<5x512x256xbf16, #tpu.memory_space<vmem>>, vector<1x512x256xbf16>
    %58 = vector.shape_cast %57 : vector<1x512x256xbf16> to vector<512x256xbf16>
    %cst_50 = arith.constant dense<0.000000e+00> : vector<16x256xf32>
    %59 = tpu.matmul %56, %58, %cst_50 {dimension_numbers = #tpu.dot_dimension_numbers<[1], [0], [0], [1], [0, 0, 1, 1], [], []>} : vector<16x512xbf16>, vector<512x256xbf16>, vector<16x256xf32> -> vector<16x256xf32>
    %60 = arith.addf %54, %59 : vector<16x256xf32>
    %c7_51 = arith.constant 7 : index
    %c0_52 = arith.constant 0 : index
    %61 = vector.load %arg9[%c7_51, %c0_52] : memref<32x512xf32, #tpu.memory_space<vmem>>, vector<16x512xf32>
    %62 = arith.truncf %61 : vector<16x512xf32> to vector<16x512xbf16>
    %c1_53 = arith.constant 1 : index
    %c0_54 = arith.constant 0 : index
    %c0_55 = arith.constant 0 : index
    %63 = vector.load %arg4[%c1_53, %c0_54, %c0_55] : memref<5x512x256xbf16, #tpu.memory_space<vmem>>, vector<1x512x256xbf16>
    %64 = vector.shape_cast %63 : vector<1x512x256xbf16> to vector<512x256xbf16>
    %cst_56 = arith.constant dense<0.000000e+00> : vector<16x256xf32>
    %65 = tpu.matmul %62, %64, %cst_56 {dimension_numbers = #tpu.dot_dimension_numbers<[1], [0], [0], [1], [0, 0, 1, 1], [], []>} : vector<16x512xbf16>, vector<512x256xbf16>, vector<16x256xf32> -> vector<16x256xf32>
    %66 = arith.addf %60, %65 : vector<16x256xf32>
    %c8_57 = arith.constant 8 : index
    %c0_58 = arith.constant 0 : index
    %67 = vector.load %arg9[%c8_57, %c0_58] : memref<32x512xf32, #tpu.memory_space<vmem>>, vector<16x512xf32>
    %68 = arith.truncf %67 : vector<16x512xf32> to vector<16x512xbf16>
    %c2_59 = arith.constant 2 : index
    %c0_60 = arith.constant 0 : index
    %c0_61 = arith.constant 0 : index
    %69 = vector.load %arg4[%c2_59, %c0_60, %c0_61] : memref<5x512x256xbf16, #tpu.memory_space<vmem>>, vector<1x512x256xbf16>
    %70 = vector.shape_cast %69 : vector<1x512x256xbf16> to vector<512x256xbf16>
    %cst_62 = arith.constant dense<0.000000e+00> : vector<16x256xf32>
    %71 = tpu.matmul %68, %70, %cst_62 {dimension_numbers = #tpu.dot_dimension_numbers<[1], [0], [0], [1], [0, 0, 1, 1], [], []>} : vector<16x512xbf16>, vector<512x256xbf16>, vector<16x256xf32> -> vector<16x256xf32>
    %72 = arith.addf %66, %71 : vector<16x256xf32>
    %c9_63 = arith.constant 9 : index
    %c0_64 = arith.constant 0 : index
    %73 = vector.load %arg9[%c9_63, %c0_64] : memref<32x512xf32, #tpu.memory_space<vmem>>, vector<16x512xf32>
    %74 = arith.truncf %73 : vector<16x512xf32> to vector<16x512xbf16>
    %c3_65 = arith.constant 3 : index
    %c0_66 = arith.constant 0 : index
    %c0_67 = arith.constant 0 : index
    %75 = vector.load %arg4[%c3_65, %c0_66, %c0_67] : memref<5x512x256xbf16, #tpu.memory_space<vmem>>, vector<1x512x256xbf16>
    %76 = vector.shape_cast %75 : vector<1x512x256xbf16> to vector<512x256xbf16>
    %cst_68 = arith.constant dense<0.000000e+00> : vector<16x256xf32>
    %77 = tpu.matmul %74, %76, %cst_68 {dimension_numbers = #tpu.dot_dimension_numbers<[1], [0], [0], [1], [0, 0, 1, 1], [], []>} : vector<16x512xbf16>, vector<512x256xbf16>, vector<16x256xf32> -> vector<16x256xf32>
    %78 = arith.addf %72, %77 : vector<16x256xf32>
    %c10_69 = arith.constant 10 : index
    %c0_70 = arith.constant 0 : index
    %79 = vector.load %arg9[%c10_69, %c0_70] : memref<32x512xf32, #tpu.memory_space<vmem>>, vector<16x512xf32>
    %80 = arith.truncf %79 : vector<16x512xf32> to vector<16x512xbf16>
    %c4_71 = arith.constant 4 : index
    %c0_72 = arith.constant 0 : index
    %c0_73 = arith.constant 0 : index
    %81 = vector.load %arg4[%c4_71, %c0_72, %c0_73] : memref<5x512x256xbf16, #tpu.memory_space<vmem>>, vector<1x512x256xbf16>
    %82 = vector.shape_cast %81 : vector<1x512x256xbf16> to vector<512x256xbf16>
    %cst_74 = arith.constant dense<0.000000e+00> : vector<16x256xf32>
    %83 = tpu.matmul %80, %82, %cst_74 {dimension_numbers = #tpu.dot_dimension_numbers<[1], [0], [0], [1], [0, 0, 1, 1], [], []>} : vector<16x512xbf16>, vector<512x256xbf16>, vector<16x256xf32> -> vector<16x256xf32>
    %84 = arith.addf %78, %83 : vector<16x256xf32>
    %c0_75 = arith.constant 0 : index
    %c0_76 = arith.constant 0 : index
    %85 = vector.load %arg5[%c0_75, %c0_76] : memref<1x256xf32, #tpu.memory_space<vmem>>, vector<1x256xf32>
    %86 = vector.broadcast %85 : vector<1x256xf32> to vector<16x256xf32>
    %87 = arith.addf %84, %86 : vector<16x256xf32>
    %c8_77 = arith.constant 8 : index
    %c0_78 = arith.constant 0 : index
    %88 = vector.load %arg9[%c8_77, %c0_78] : memref<32x512xf32, #tpu.memory_space<vmem>>, vector<16x256xf32>
    tpu.vector_store %arg9[%c8_77, %c0_78], %87 {strides = array<i32>} : memref<32x512xf32, #tpu.memory_space<vmem>>, vector<16x256xf32>,
    %cst_79 = arith.constant 0.000000e+00 : f32
    %89 = vector.broadcast %cst_79 : f32 to vector<16x64xf32>
    %c6_80 = arith.constant 6 : index
    %c0_81 = arith.constant 0 : index
    %90 = vector.load %arg9[%c6_80, %c0_81] : memref<32x512xf32, #tpu.memory_space<vmem>>, vector<16x256xf32>
    %91 = arith.truncf %90 : vector<16x256xf32> to vector<16x256xbf16>
    %c0_82 = arith.constant 0 : index
    %c0_83 = arith.constant 0 : index
    %c0_84 = arith.constant 0 : index
    %92 = vector.load %arg6[%c0_82, %c0_83, %c0_84] : memref<5x256x64xbf16, #tpu.memory_space<vmem>>, vector<1x256x64xbf16>
    %93 = vector.shape_cast %92 : vector<1x256x64xbf16> to vector<256x64xbf16>
    %cst_85 = arith.constant dense<0.000000e+00> : vector<16x64xf32>
    %94 = tpu.matmul %91, %93, %cst_85 {dimension_numbers = #tpu.dot_dimension_numbers<[1], [0], [0], [1], [0, 0, 1, 1], [], []>} : vector<16x256xbf16>, vector<256x64xbf16>, vector<16x64xf32> -> vector<16x64xf32>
    %95 = arith.addf %89, %94 : vector<16x64xf32>
    %c7_86 = arith.constant 7 : index
    %c0_87 = arith.constant 0 : index
    %96 = vector.load %arg9[%c7_86, %c0_87] : memref<32x512xf32, #tpu.memory_space<vmem>>, vector<16x256xf32>
    %97 = arith.truncf %96 : vector<16x256xf32> to vector<16x256xbf16>
    %c1_88 = arith.constant 1 : index
    %c0_89 = arith.constant 0 : index
    %c0_90 = arith.constant 0 : index
    %98 = vector.load %arg6[%c1_88, %c0_89, %c0_90] : memref<5x256x64xbf16, #tpu.memory_space<vmem>>, vector<1x256x64xbf16>
    %99 = vector.shape_cast %98 : vector<1x256x64xbf16> to vector<256x64xbf16>
    %cst_91 = arith.constant dense<0.000000e+00> : vector<16x64xf32>
    %100 = tpu.matmul %97, %99, %cst_91 {dimension_numbers = #tpu.dot_dimension_numbers<[1], [0], [0], [1], [0, 0, 1, 1], [], []>} : vector<16x256xbf16>, vector<256x64xbf16>, vector<16x64xf32> -> vector<16x64xf32>
    %101 = arith.addf %95, %100 : vector<16x64xf32>
    %c8_92 = arith.constant 8 : index
    %c0_93 = arith.constant 0 : index
    %102 = vector.load %arg9[%c8_92, %c0_93] : memref<32x512xf32, #tpu.memory_space<vmem>>, vector<16x256xf32>
    %103 = arith.truncf %102 : vector<16x256xf32> to vector<16x256xbf16>
    %c2_94 = arith.constant 2 : index
    %c0_95 = arith.constant 0 : index
    %c0_96 = arith.constant 0 : index
    %104 = vector.load %arg6[%c2_94, %c0_95, %c0_96] : memref<5x256x64xbf16, #tpu.memory_space<vmem>>, vector<1x256x64xbf16>
    %105 = vector.shape_cast %104 : vector<1x256x64xbf16> to vector<256x64xbf16>
    %cst_97 = arith.constant dense<0.000000e+00> : vector<16x64xf32>
    %106 = tpu.matmul %103, %105, %cst_97 {dimension_numbers = #tpu.dot_dimension_numbers<[1], [0], [0], [1], [0, 0, 1, 1], [], []>} : vector<16x256xbf16>, vector<256x64xbf16>, vector<16x64xf32> -> vector<16x64xf32>
    %107 = arith.addf %101, %106 : vector<16x64xf32>
    %c9_98 = arith.constant 9 : index
    %c0_99 = arith.constant 0 : index
    %108 = vector.load %arg9[%c9_98, %c0_99] : memref<32x512xf32, #tpu.memory_space<vmem>>, vector<16x256xf32>
    %109 = arith.truncf %108 : vector<16x256xf32> to vector<16x256xbf16>
    %c3_100 = arith.constant 3 : index
    %c0_101 = arith.constant 0 : index
    %c0_102 = arith.constant 0 : index
    %110 = vector.load %arg6[%c3_100, %c0_101, %c0_102] : memref<5x256x64xbf16, #tpu.memory_space<vmem>>, vector<1x256x64xbf16>
    %111 = vector.shape_cast %110 : vector<1x256x64xbf16> to vector<256x64xbf16>
    %cst_103 = arith.constant dense<0.000000e+00> : vector<16x64xf32>
    %112 = tpu.matmul %109, %111, %cst_103 {dimension_numbers = #tpu.dot_dimension_numbers<[1], [0], [0], [1], [0, 0, 1, 1], [], []>} : vector<16x256xbf16>, vector<256x64xbf16>, vector<16x64xf32> -> vector<16x64xf32>
    %113 = arith.addf %107, %112 : vector<16x64xf32>
    %c10_104 = arith.constant 10 : index
    %c0_105 = arith.constant 0 : index
    %114 = vector.load %arg9[%c10_104, %c0_105] : memref<32x512xf32, #tpu.memory_space<vmem>>, vector<16x256xf32>
    %115 = arith.truncf %114 : vector<16x256xf32> to vector<16x256xbf16>
    %c4_106 = arith.constant 4 : index
    %c0_107 = arith.constant 0 : index
    %c0_108 = arith.constant 0 : index
    %116 = vector.load %arg6[%c4_106, %c0_107, %c0_108] : memref<5x256x64xbf16, #tpu.memory_space<vmem>>, vector<1x256x64xbf16>
    %117 = vector.shape_cast %116 : vector<1x256x64xbf16> to vector<256x64xbf16>
    %cst_109 = arith.constant dense<0.000000e+00> : vector<16x64xf32>
    %118 = tpu.matmul %115, %117, %cst_109 {dimension_numbers = #tpu.dot_dimension_numbers<[1], [0], [0], [1], [0, 0, 1, 1], [], []>} : vector<16x256xbf16>, vector<256x64xbf16>, vector<16x64xf32> -> vector<16x64xf32>
    %119 = arith.addf %113, %118 : vector<16x64xf32>
    %c0_110 = arith.constant 0 : index
    %c0_111 = arith.constant 0 : index
    %120 = vector.load %arg7[%c0_110, %c0_111] : memref<1x64xf32, #tpu.memory_space<vmem>>, vector<1x64xf32>
    %121 = vector.broadcast %120 : vector<1x64xf32> to vector<16x64xf32>
    %122 = arith.addf %119, %121 : vector<16x64xf32>
    %c0_112 = arith.constant 0 : index
    %c0_113 = arith.constant 0 : index
    %c0_114 = arith.constant 0 : index
    %123 = vector.load %arg8[%c0_112, %c0_113, %c0_114] : memref<1x16x64xf32, #tpu.memory_space<vmem>>, vector<1x16x64xf32>
    %124 = vector.shape_cast %123 : vector<1x16x64xf32> to vector<16x64xf32>
    %125 = vector.shape_cast %122 : vector<16x64xf32> to vector<1x16x64xf32>
    tpu.vector_store %arg8[%c0_112, %c0_113, %c0_114], %125 {strides = array<i32>} : memref<1x16x64xf32, #tpu.memory_space<vmem>>, vector<1x16x64xf32>,
    return
  }
  func.func @transform_0(%arg0: i32) -> (i32, i32, i32) {
    %c0_i32 = arith.constant 0 : i32
    %c0_i32_0 = arith.constant 0 : i32
    %c0_i32_1 = arith.constant 0 : i32
    return %arg0, %c0_i32, %c0_i32_0 : i32, i32, i32
  }
  func.func @transform_1(%arg0: i32) -> (i32, i32, i32) {
    %c0_i32 = arith.constant 0 : i32
    %c0_i32_0 = arith.constant 0 : i32
    %c0_i32_1 = arith.constant 0 : i32
    %c0_i32_2 = arith.constant 0 : i32
    return %c0_i32, %c0_i32_0, %c0_i32_1 : i32, i32, i32
  }
  func.func @transform_2(%arg0: i32) -> (i32, i32) {
    %c0_i32 = arith.constant 0 : i32
    %c0_i32_0 = arith.constant 0 : i32
    %c0_i32_1 = arith.constant 0 : i32
    return %c0_i32, %c0_i32_0 : i32, i32
  }
  func.func @transform_3(%arg0: i32) -> (i32, i32, i32) {
    %c0_i32 = arith.constant 0 : i32
    %c0_i32_0 = arith.constant 0 : i32
    %c0_i32_1 = arith.constant 0 : i32
    %c0_i32_2 = arith.constant 0 : i32
    return %c0_i32, %c0_i32_0, %c0_i32_1 : i32, i32, i32
  }
  func.func @transform_4(%arg0: i32) -> (i32, i32) {
    %c0_i32 = arith.constant 0 : i32
    %c0_i32_0 = arith.constant 0 : i32
    %c0_i32_1 = arith.constant 0 : i32
    return %c0_i32, %c0_i32_0 : i32, i32
  }
  func.func @transform_5(%arg0: i32) -> (i32, i32, i32) {
    %c0_i32 = arith.constant 0 : i32
    %c0_i32_0 = arith.constant 0 : i32
    %c0_i32_1 = arith.constant 0 : i32
    %c0_i32_2 = arith.constant 0 : i32
    return %c0_i32, %c0_i32_0, %c0_i32_1 : i32, i32, i32
  }
  func.func @transform_6(%arg0: i32) -> (i32, i32) {
    %c0_i32 = arith.constant 0 : i32
    %c0_i32_0 = arith.constant 0 : i32
    %c0_i32_1 = arith.constant 0 : i32
    return %c0_i32, %c0_i32_0 : i32, i32
  }
  func.func @transform_7(%arg0: i32) -> (i32, i32, i32) {
    %c0_i32 = arith.constant 0 : i32
    %c0_i32_0 = arith.constant 0 : i32
    %c0_i32_1 = arith.constant 0 : i32
    return %arg0, %c0_i32, %c0_i32_0 : i32, i32, i32
  }
}

</mosaic_0001>

<bundles_post_ra>
// kernel: decoder_forward.1
= control target key start
LH: loop header
LB: loop body
LE: loop exit
PB: predicated region body
PF: predicated region fallthrough
CT: control target
= control target key end

     0   :  { %12 = vsyncpa [#allocation4], 0  ;;  %s15835_s0 = inlined_call_operand.vmem [shape: f32[2,16,512], index: 0, kind: input, shape index: {}]   ;;  %s15836_s1 = inlined_call_operand.hbm [shape: bf16[7,512,512], index: 1, kind: input, shape index: {}]   ;;  %s15837_s2 = inlined_call_operand.hbm [shape: f32[1,512], index: 2, kind: input, shape index: {}]   ;;  %s15838_s3 = inlined_call_operand.hbm [shape: bf16[5,512,256], index: 3, kind: input, shape index: {}]   ;;  %s15839_s4 = inlined_call_operand.hbm [shape: f32[1,256], index: 4, kind: input, shape index: {}]   ;;  %s15840_s5 = inlined_call_operand.vmem [shape: bf16[5,256,64], index: 5, kind: input, shape index: {}]   ;;  %s15841_s6 = inlined_call_operand.hbm [shape: f32[1,64], index: 6, kind: input, shape index: {}]   ;;  %s15842_s7 = inlined_call_operand.vmem [shape: f32[2,16,64], index: 7, kind: output, shape index: {}]  }
   0x1   :  { %13 = vsyncpa [#allocation6], 0 }
   0x2   :  { %14 = vsyncpa [#allocation9], 0  ;;  %s15096_s24 = smov 0  }
   0x3 LB: > { %s15046_s25 = smov [#allocation5]   ;;  %s15102_s27 = sadd.s32 4294967295, %s15044_s24   ;;  %s15044_s24 = sphi %s15096_s24, %s20_s24  }
   0x4   : > { %s229_s26 = sshll.u32 %s15046_s25, 4  ;;  %p11207_p0 = scmp.ge.s32.totalorder %s15044_s24, 1  ;;  %s15107_s26 = int_to_ptr.vmem [resolvable:$true] %s229_s26 }
   0x5   : > { %p203_p1 = scmp.lt.s32.totalorder %s15044_s24, 3  ;;  %p15843_p2 = scmp.eq.s32.totalorder %s15102_s27, 0 }
   0x6   : > { %s15047_s29 = smov [#allocation8]   ;;  %s15048_s8 = smov [#allocation3]  }
   0x7   : > { %p15109_p3 = pnand %p11207_p0, %p203_p1  ;;  %s253_s30 = sshll.u32 %s15047_s29, 4  ;;  %s15115_s30 = int_to_ptr.vmem [resolvable:$true] %s253_s30 }
   0x8   : > { %s215_s9 = sshll.u32 %s15048_s8, 4  ;;  %s15049_s11 = smov [#allocation7]   ;;  %s15123_s9 = int_to_ptr.vmem [resolvable:$true] %s215_s9 }
   0x9   : > { %s15845_s28 = scalar_select %p15109_p3, 1, 0 }
   0xa   : > { %p12923_p4 = pneg %p15109_p3  ;;  %s15125_s12 = sshll.u32 %s15049_s11, 4  ;;  %s240_s12 = int_to_ptr.vmem [resolvable:$true] %s15125_s12 }
   0xb   : > { %s14886_s15 = scalar_lea.hbm %s15837_s2, 64 }
   0xc   : > { %p15119_p5 = pnand %p15843_p2, %p12923_p4  ;;  %p14887_p6 = scmp.ne.s32.totalorder %s15837_s2, %s14886_s15 }
   0xd   : > { %p14893_p10 = scmp.lt.u32.totalorder %s14886_s15, %s15837_s2 }
   0xe   : > { %p15135_p7 = pneg %p15119_p5 }
  0x10   : > { %p14889_p8 = pnand %p15135_p7, %p14887_p6 }
  0x12   : > { %p14890_p9 = pneg %p14889_p8 }
  0x14   : > { %p14895_p11 = pnand %p14893_p10, %p14890_p9 }
  0x16   : > { %14898 = shalt.err (!%p14895_p11)
}
  0x17   : > { %s14899_s21 = scalar_lea.vmem %s15107_s26, 64  ;;  %p14907_p1 = scmp.lt.s32.totalorder %s15107_s26, %s15107_s26 }
  0x18   : > { %p14900_p12 = scmp.ne.s32.totalorder %s15107_s26, %s14899_s21  ;;  %p14908_p4 = scmp.lt.s32.totalorder %s14899_s21, %s14899_s21 }
  0x1a   : > { %p14902_p13 = pnand %p14900_p12, %p15135_p7  ;;  %p14909_p6 = por %p14908_p4, %p14907_p1 }
  0x1c   : > { %p14903_p0 = pneg %p14902_p13 }
  0x1e   : > { %p14910_p8 = pnand %p14909_p6, %p14903_p0 }
  0x20   : > { %14913 = shalt.err (!%p14910_p8)
}
  0x21   : > { %12929 = dma.hbm_to_vmem [thread:$0]  (!%p15119_p5), %s15837_s2, 64, %s15107_s26, [#allocation6]  }
  0x22   : > { %s14914_s8 = scalar_lea.hbm %s15839_s4, 32 }
  0x23   : > { %p14915_p9 = scmp.ne.s32.totalorder %s15839_s4, %s14914_s8  ;;  %p14921_p12 = scmp.lt.u32.totalorder %s14914_s8, %s15839_s4 }
  0x25   : > { %p14917_p10 = pnand %p14915_p9, %p15135_p7 }
  0x27   : > { %p14918_p11 = pneg %p14917_p10 }
  0x29   : > { %p14923_p13 = pnand %p14921_p12, %p14918_p11 }
  0x2b   : > { %14926 = shalt.err (!%p14923_p13)
}
  0x2c   : > { %s14927_s26 = scalar_lea.vmem %s15115_s30, 32  ;;  %p14935_p6 = scmp.lt.s32.totalorder %s15115_s30, %s15115_s30 }
  0x2d   : > { %p14928_p0 = scmp.ne.s32.totalorder %s15115_s30, %s14927_s26  ;;  %p14936_p8 = scmp.lt.s32.totalorder %s14927_s26, %s14927_s26 }
  0x2f   : > { %p14930_p1 = pnand %p14928_p0, %p15135_p7  ;;  %p14937_p9 = por %p14936_p8, %p14935_p6 }
  0x31   : > { %p14931_p4 = pneg %p14930_p1 }
  0x33   : > { %p14938_p10 = pnand %p14937_p9, %p14931_p4 }
  0x35   : > { %14941 = shalt.err (!%p14938_p10)
}
  0x36   : > { %12935 = dma.hbm_to_vmem [thread:$0]  (!%p15119_p5), %s15839_s4, 32, %s15115_s30, [#allocation9]  }
  0x37   : > { %s14942_s21 = scalar_lea.hbm %s15836_s1, 114688 }
  0x38   : > { %p14943_p11 = scmp.ne.s32.totalorder %s15836_s1, %s14942_s21  ;;  %p14949_p0 = scmp.lt.u32.totalorder %s14942_s21, %s15836_s1 }
  0x3a   : > { %p14945_p12 = pnand %p14943_p11, %p15135_p7 }
  0x3c   : > { %p14946_p13 = pneg %p14945_p12 }
  0x3e   : > { %p14951_p1 = pnand %p14949_p0, %p14946_p13 }
  0x40   : > { %14954 = shalt.err (!%p14951_p1)
}
  0x41   : > { %s14955_s30 = scalar_lea.vmem %s15123_s9, 114688  ;;  %p14963_p9 = scmp.lt.s32.totalorder %s15123_s9, %s15123_s9 }
  0x42   : > { %p14956_p4 = scmp.ne.s32.totalorder %s15123_s9, %s14955_s30  ;;  %p14964_p10 = scmp.lt.s32.totalorder %s14955_s30, %s14955_s30 }
  0x44   : > { %p14958_p6 = pnand %p14956_p4, %p15135_p7  ;;  %p14965_p11 = por %p14964_p10, %p14963_p9 }
  0x46   : > { %p14959_p8 = pneg %p14958_p6 }
  0x48   : > { %p14966_p12 = pnand %p14965_p11, %p14959_p8 }
  0x4a   : > { %14969 = shalt.err (!%p14966_p12)
}
  0x4b   : > { %s15050_s8 = smov 256   ;;  %s15051_s11 = smov 16  }
  0x4c   : > { %12926 = dma.hbm_to_vmem [thread:$0]  (!%p15119_p5), %s15836_s1, 114688, %s15123_s9, [#allocation4], %s15050_s8, %s15050_s8, %s15051_s11  }
  0x4d   : > { %s14970_s16 = scalar_lea.hbm %s15838_s3, 40960 }
  0x4e   : > { %p14971_p13 = scmp.ne.s32.totalorder %s15838_s3, %s14970_s16  ;;  %p14977_p4 = scmp.lt.u32.totalorder %s14970_s16, %s15838_s3 }
  0x50   : > { %p14973_p0 = pnand %p14971_p13, %p15135_p7 }
  0x52   : > { %p14974_p1 = pneg %p14973_p0 }
  0x54   : > { %p14979_p6 = pnand %p14977_p4, %p14974_p1 }
  0x56   : > { %14982 = shalt.err (!%p14979_p6)
}
  0x57   : > { %s14983_s22 = scalar_lea.vmem %s240_s12, 40960  ;;  %p14991_p11 = scmp.lt.s32.totalorder %s240_s12, %s240_s12 }
  0x58   : > { %p14984_p8 = scmp.ne.s32.totalorder %s240_s12, %s14983_s22  ;;  %p14992_p12 = scmp.lt.s32.totalorder %s14983_s22, %s14983_s22 }
  0x5a   : > { %p14986_p9 = pnand %p14984_p8, %p15135_p7  ;;  %p14993_p2 = por %p14992_p12, %p14991_p11 }
  0x5c   : > { %p14987_p10 = pneg %p14986_p9 }
  0x5e   : > { %p14994_p3 = pnand %p14993_p2, %p14987_p10 }
  0x60   : > { %14997 = shalt.err (!%p14994_p3)
}
  0x61   : > { %s15052_s9 = smov 128   ;;  %s15053_s23 = smov 8  }
  0x62   : > { %12932 = dma.hbm_to_vmem [thread:$0]  (!%p15119_p5), %s15838_s3, 40960, %s240_s12, [#allocation6], %s15052_s9, %s15052_s9, %s15053_s23  }
  0x63   : > { %s15054_s30 = smov [#allocation10]   ;;  %s14998_s14 = scalar_lea.hbm %s15841_s6, 16 }
  0x64   : > { %s267_s8 = sshll.u32 %s15054_s30, 4  ;;  %p14999_p2 = scmp.ne.s32.totalorder %s15841_s6, %s14998_s14  ;;  %s268_s8 = int_to_ptr.vmem [resolvable:$true] %s267_s8 }
  0x65   : > { %p15005_p0 = scmp.lt.u32.totalorder %s14998_s14, %s15841_s6 }
  0x66   : > { %p15001_p3 = pnand %p14999_p2, %p15135_p7 }
  0x68   : > { %p15002_p13 = pneg %p15001_p3 }
  0x6a   : > { %p15007_p1 = pnand %p15005_p0, %p15002_p13 }
  0x6c   : > { %15010 = shalt.err (!%p15007_p1)
}
  0x6d   : > { %s15011_s12 = scalar_lea.vmem %s268_s8, 16  ;;  %s15018_s19 = scalar_lea.vmem %s268_s8, 32 }
  0x6e   : > { %p15012_p4 = scmp.ne.s32.totalorder %s268_s8, %s15011_s12  ;;  %p15019_p9 = scmp.lt.s32.totalorder %s268_s8, %s268_s8 }
  0x6f   : > { %p15020_p10 = scmp.lt.s32.totalorder %s15018_s19, %s15011_s12 }
  0x70   : > { %p15014_p6 = pnand %p15012_p4, %p15135_p7 }
  0x71   : > { %p15021_p11 = por %p15020_p10, %p15019_p9 }
  0x72   : > { %p15015_p8 = pneg %p15014_p6 }
  0x74   : > { %p15022_p12 = pnand %p15021_p11, %p15015_p8 }
  0x76   : > { %15025 = shalt.err (!%p15022_p12)
}
  0x77   : > { %12938 = dma.hbm_to_vmem [thread:$0]  (!%p15119_p5), %s15841_s6, 16, %s268_s8, [#allocation9]  }
  0x78   : > { %p15848_p2 = scmp.ne.s32.totalorder %s15845_s28, 0 }
  0x79   : > { %p15849_p3 = scmp.eq.s32.totalorder (!%p15848_p2), %s15102_s27, 0 }
  0x7a   : > { %288 = sbr.rel (%p15848_p2) target bundleno = 2622 (0xa3e), region = 48 }
  0x81   : > { %15031 = dma.done.wait (%p15849_p3), [#allocation4], 114688   ;;  %p15850_p7 = pmov %p15849_p3 }
  0x82   : > { %p15851_p13 = pmov %p15849_p3 }
  0x83   : > { %15033 = vsyncadd (%p15850_p7), [#allocation4], 4294852608 }
  0x84   : > { %15035 = dma.done.wait (%p15851_p13), [#allocation6], 41024   ;;  %p15852_p0 = pmov %p15849_p3 }
  0x86   : > { %15037 = vsyncadd (%p15852_p0), [#allocation6], 4294926272  ;;  %p15853_p1 = pmov %p15852_p0 }
  0x87   : > { %p15854_p5 = pmov %p15852_p0 }
  0x88   : > { %15039 = dma.done.wait (%p15853_p1), [#allocation9], 48  }
  0x89   : > { %15041 = vsyncadd (%p15854_p5), [#allocation9], 4294967248  ;;  %v15055_v0 = vmov 0.0   ;;  %v12967_v1 = vld [vmem:[#allocation3 + $0x404] ss:$16 sps:$4 sm:$0xff]   ;;  %p336_p4 = scmp.lt.s32.totalorder %s15102_s27, 1 }
  0x8a   : > { %348 = vst [vmem:[#allocation2 + $0x8] sm:$0xff] %v15055_v0  ;;  %347 = vst [vmem:[#allocation2] sm:$0xff] %v15055_v0  ;;  %v12969_v2 = vld [vmem:[#allocation3 + $0x804] ss:$16 sps:$4 sm:$0xff]   ;;  %1329 = vmatprep.subr.bf16.mxu1 %v12967_v1  ;;  %v12971_v3 = vld [vmem:[#allocation3 + $0x400] ss:$16 sps:$4 sm:$0xff]  }
  0x8b   : > { %349 = vst [vmem:[#allocation2 + $0x10] sm:$0xff] %v15055_v0  ;;  %350 = vst [vmem:[#allocation2 + $0x18] sm:$0xff] %v15055_v0  ;;  %v12972_v4 = vld [vmem:[#allocation3 + $0x800] ss:$16 sps:$4 sm:$0xff]   ;;  %3244 = vmatprep.subr.bf16.mxu0 %v12969_v2  ;;  %v12973_v5 = vld [vmem:[#allocation3 + $0x424] ss:$16 sps:$4 sm:$0xff]   ;;  %1330 = vmatpush1.bf16.msra.mxu1 %v12971_v3 }
  0x8c   : > { %351 = vst [vmem:[#allocation2 + $0x60] sm:$0xff] %v15055_v0  ;;  %352 = vst [vmem:[#allocation2 + $0x68] sm:$0xff] %v15055_v0  ;;  %3245 = vmatpush1.bf16.msra.mxu0 %v12972_v4  ;;  %v12975_v6 = vld [vmem:[#allocation3 + $0x824] ss:$16 sps:$4 sm:$0xff]   ;;  %v12977_v7 = vld [vmem:[#allocation3 + $0x420] ss:$16 sps:$4 sm:$0xff]   ;;  %1331 = vmatprep.subr.bf16.mxu1 %v12973_v5 }
  0x8d   : > { %353 = vst [vmem:[#allocation2 + $0x70] sm:$0xff] %v15055_v0  ;;  %354 = vst [vmem:[#allocation2 + $0x78] sm:$0xff] %v15055_v0  ;;  %v12978_v8 = vld [vmem:[#allocation3 + $0x820] ss:$16 sps:$4 sm:$0xff]   ;;  %3246 = vmatprep.subr.bf16.mxu0 %v12975_v6  ;;  %v12979_v9 = vld [vmem:[#allocation3 + $0x444] ss:$16 sps:$4 sm:$0xff]  }
  0x8e   : > { %v12981_v10 = vld [vmem:[#allocation3 + $0x844] ss:$16 sps:$4 sm:$0xff]   ;;  %v12983_v11 = vld [vmem:[#allocation3 + $0x440] ss:$16 sps:$4 sm:$0xff]   ;;  %s15856_s27 = smov (!%p336_p4, %s15102_s27), 1  ;;  %vm672_vm1 = vcmask 1044480  }
  0x8f   : > { %v12984_v12 = vld [vmem:[#allocation3 + $0x840] ss:$16 sps:$4 sm:$0xff]   ;;  %1332 = vmatpush1.bf16.msra.mxu1 %v12977_v7  ;;  %v12985_v13 = vld [vmem:[#allocation3 + $0x464] ss:$16 sps:$4 sm:$0xff]   ;;  %s12651_s28 = sshll.u32 %s15856_s27, 6  ;;  %vm5556_vm4 = vcmask 1046528  }
  0x90   : > { %3247 = vmatpush1.bf16.msra.mxu0 %v12978_v8  ;;  %1333 = vmatprep.subr.bf16.mxu1 %v12979_v9  ;;  %v12987_v14 = vld [vmem:[#allocation3 + $0x864] ss:$16 sps:$4 sm:$0xff]   ;;  %v12989_v15 = vld [vmem:[#allocation3 + $0x460] ss:$16 sps:$4 sm:$0xff]   ;;  %s15261_s22 = scalar_lea.vmem %s15835_s0, %s12651_s28  ;;  %vm2531_vm0 = vsmask.f32 4352 }
  0x91   : > { %3248 = vmatprep.subr.bf16.mxu0 %v12981_v10  ;;  %v12990_v16 = vld [vmem:[#allocation3 + $0x860] ss:$16 sps:$4 sm:$0xff]   ;;  %v12991_v17 = vld [vmem:[#allocation3 + $0x484] ss:$16 sps:$4 sm:$0xff]   ;;  %v15264_v49 = vld [vmem:[%s15261_s22 + $0x8] sm:$0xff]  ;;  %s12652_s12 = sshll.u32 %s15856_s27, 4 }
  0x92   : > { %v12993_v18 = vld [vmem:[#allocation3 + $0x884] ss:$16 sps:$4 sm:$0xff]   ;;  %v12995_v19 = vld [vmem:[#allocation3 + $0x480] ss:$16 sps:$4 sm:$0xff]   ;;  %v15267_v51 = vld [vmem:[%s15261_s22 + $0x28] sm:$0xff]  ;;  %364 = vst [vmem:[#allocation2 + $0x28] sm:$0xff] %v15264_v49  ;;  %s345_s21 = scalar_lea.vmem %s15842_s7, %s12652_s12 }
  0x93   : > { %1334 = vmatpush1.bf16.msra.mxu1 %v12983_v11  ;;  %v12996_v20 = vld [vmem:[#allocation3 + $0x880] ss:$16 sps:$4 sm:$0xff]   ;;  %v12997_v21 = vld [vmem:[#allocation3 + $0x4a4] ss:$16 sps:$4 sm:$0xff]   ;;  %368 = vst [vmem:[#allocation2 + $0x48] sm:$0xff] %v15267_v51  ;;  %vm11097_vm6 = vcmask 523264  }
  0x94   : > { %3249 = vmatpush1.bf16.msra.mxu0 %v12984_v12  ;;  %1335 = vmatprep.subr.bf16.mxu1 %v12985_v13  ;;  %v12999_v22 = vld [vmem:[#allocation3 + $0x8a4] ss:$16 sps:$4 sm:$0xff]   ;;  %v13001_v23 = vld [vmem:[#allocation3 + $0x4a0] ss:$16 sps:$4 sm:$0xff]   ;;  %v520_v53 = vld [vmem:[#allocation2 + $0x8] sm:$0xc0] }
  0x95   : > { %3250 = vmatprep.subr.bf16.mxu0 %v12987_v14  ;;  %v13002_v24 = vld [vmem:[#allocation3 + $0x8a0] ss:$16 sps:$4 sm:$0xff]   ;;  %v13003_v25 = vld [vmem:[#allocation3 + $0x4c4] ss:$16 sps:$4 sm:$0xff]   ;;  %v2387_v54 = vld [vmem:[#allocation2 + $0x8] sm:$0x80]  ;;  %v528_v62 = vpack.c.bf16 %v15264_v49, %v520_v53 }
  0x96   : > { %v13005_v26 = vld [vmem:[#allocation3 + $0x8c4] ss:$16 sps:$4 sm:$0xff]   ;;  %v13007_v27 = vld [vmem:[#allocation3 + $0x4c0] ss:$16 sps:$4 sm:$0xff]   ;;  %v2395_v56 = vpack.c.bf16 %v15264_v49, %v2387_v54  ;;  %vm1501_vm2 = vsmask.f32 5376 }
  0x97   : > { %1336 = vmatpush1.bf16.msra.mxu1 %v12989_v15  ;;  %v13008_v28 = vld [vmem:[#allocation3 + $0x8c0] ss:$16 sps:$4 sm:$0xff]   ;;  %v13009_v29 = vld [vmem:[#allocation3 + $0x4e4] ss:$16 sps:$4 sm:$0xff]   ;;  %v676_v11 = vrot.slane %v528_v62, 3 }
  0x98   : > { %3251 = vmatpush1.bf16.msra.mxu0 %v12990_v16  ;;  %1337 = vmatprep.subr.bf16.mxu1 %v12991_v17  ;;  %v13011_v30 = vld [vmem:[#allocation3 + $0x8e4] ss:$16 sps:$4 sm:$0xff]   ;;  %v13013_v31 = vld [vmem:[#allocation3 + $0x4e0] ss:$16 sps:$4 sm:$0xff]   ;;  %v2550_v63 = vshrl.u32 %v2395_v56, 16  ;;  %v2553_v0 = vshll.u32 %v2395_v56, 16 }
  0x99   : > { %3252 = vmatprep.subr.bf16.mxu0 %v12993_v18  ;;  %v13014_v32 = vld [vmem:[#allocation3 + $0x8e0] ss:$16 sps:$4 sm:$0xff]   ;;  %v13015_v33 = vld [vmem:[#allocation3 + $0x504] ss:$16 sps:$4 sm:$0xff]   ;;  %vm4530_vm3 = vsmask.f32 7424 }
  0x9a   : > { %v13017_v34 = vld [vmem:[#allocation3 + $0x904] ss:$16 sps:$4 sm:$0xff]   ;;  %v13019_v35 = vld [vmem:[#allocation3 + $0x500] ss:$16 sps:$4 sm:$0xff]   ;;  %v2552_v5 = vrot.slane %v2550_v63, 3  ;;  %v2555_v8 = vrot.slane %v2553_v0, 4 }
  0x9b   : > { %1338 = vmatpush1.bf16.msra.mxu1 %v12995_v19  ;;  %v13020_v36 = vld [vmem:[#allocation3 + $0x900] ss:$16 sps:$4 sm:$0xff]   ;;  %v13021_v37 = vld [vmem:[#allocation3 + $0x524] ss:$16 sps:$4 sm:$0xff]   ;;  %v524_v6 = vld [vmem:[#allocation2 + $0x48] sm:$0x3f] }
  0x9c   : > { %3253 = vmatpush1.bf16.msra.mxu0 %v12996_v20  ;;  %1339 = vmatprep.subr.bf16.mxu1 %v12997_v21  ;;  %v13023_v38 = vld [vmem:[#allocation3 + $0x924] ss:$16 sps:$4 sm:$0xff]   ;;  %v13025_v39 = vld [vmem:[#allocation3 + $0x520] ss:$16 sps:$4 sm:$0xff]   ;;  %v2391_v7 = vld [vmem:[#allocation2 + $0x48] sm:$0x7f]  ;;  %v532_v10 = vpack.c.bf16 %v524_v6, %v524_v6 }
  0x9d   : > { %3254 = vmatprep.subr.bf16.mxu0 %v12999_v22  ;;  %v13026_v40 = vld [vmem:[#allocation3 + $0x920] ss:$16 sps:$4 sm:$0xff]   ;;  %v13027_v41 = vld [vmem:[#allocation3 + $0x544] ss:$16 sps:$4 sm:$0xff]   ;;  %v2399_v12 = vpack.c.bf16 %v2391_v7, %v2391_v7  ;;  %v2556_v22 = vor.u32 %v2555_v8, %v2552_v5  ;;  %vm6538_vm5 = vsmask.f32 6400 }
  0x9e   : > { %v13029_v42 = vld [vmem:[#allocation3 + $0x944] ss:$16 sps:$4 sm:$0xff]   ;;  %v13031_v43 = vld [vmem:[#allocation3 + $0x540] ss:$16 sps:$4 sm:$0xff]   ;;  %v677_v18 = vrot.slane %v532_v10, 3 }
  0x9f   : > { %1340 = vmatpush1.bf16.msra.mxu1 %v13001_v23  ;;  %v13032_v44 = vld [vmem:[#allocation3 + $0x940] ss:$16 sps:$4 sm:$0xff]   ;;  %v13033_v45 = vld [vmem:[#allocation3 + $0x564] ss:$16 sps:$4 sm:$0xff]   ;;  %v2558_v19 = vshrl.u32 %v2399_v12, 16  ;;  %v2561_v20 = vshll.u32 %v2399_v12, 16 }
  0xa0   : > { %3255 = vmatpush1.bf16.msra.mxu0 %v13002_v24  ;;  %1341 = vmatprep.subr.bf16.mxu1 %v13003_v25  ;;  %v13035_v46 = vld [vmem:[#allocation3 + $0x964] ss:$16 sps:$4 sm:$0xff]   ;;  %v13037_v47 = vld [vmem:[#allocation3 + $0x560] ss:$16 sps:$4 sm:$0xff]  }
  0xa1   : > { %3256 = vmatprep.subr.bf16.mxu0 %v13005_v26  ;;  %v13038_v48 = vld [vmem:[#allocation3 + $0x960] ss:$16 sps:$4 sm:$0xff]   ;;  %v13039_v50 = vld [vmem:[#allocation3 + $0x584] ss:$16 sps:$4 sm:$0xff]  }
  0xa2   : > { %v13041_v52 = vld [vmem:[#allocation3 + $0x984] ss:$16 sps:$4 sm:$0xff]   ;;  %v13043_v55 = vld [vmem:[#allocation3 + $0x580] ss:$16 sps:$4 sm:$0xff]  }
  0xa3   : > { %1342 = vmatpush1.bf16.msra.mxu1 %v13007_v27  ;;  %v15273_v57 = vld [vmem:[%s15261_s22] sm:$0xff]  ;;  %v15281_v27 = vsel %vm672_vm1, %v676_v11, %v677_v18 }
  0xa4   : > { %3257 = vmatpush1.bf16.msra.mxu0 %v13008_v28  ;;  %1343 = vmatprep.subr.bf16.mxu1 %v13009_v29  ;;  %v13044_v58 = vld [vmem:[#allocation3 + $0x980] ss:$16 sps:$4 sm:$0xff]   ;;  %363 = vst [vmem:[#allocation2 + $0x20] sm:$0xff] %v15273_v57  ;;  %v2386_v60 = vld [vmem:[#allocation2] sm:$0x80]  ;;  %v2560_v28 = vrot.slane %v2558_v19, 3 }
  0xa5   : > { %3258 = vmatprep.subr.bf16.mxu0 %v13011_v30  ;;  %v359_v59 = vld [vmem:[%s15261_s22 + $0x20] sm:$0xff]  ;;  %v2394_v2 = vpack.c.bf16 %v15273_v57, %v2386_v60  ;;  %v2563_v29 = vrot.slane %v2561_v20, 4  ;;  %1361 = vmatprep.mubr.bf16.mxu1 %v15281_v27  ;;  %v15297_v19 = vld [vmem:[%s15261_s22 + $0x18] sm:$0xff] }
  0xa6   : > { %v13045_v61 = vld [vmem:[#allocation3 + $0x5a4] ss:$16 sps:$4 sm:$0xff]   ;;  %367 = vst [vmem:[#allocation2 + $0x40] sm:$0xff] %v359_v59  ;;  %v13049_v3 = vld [vmem:[#allocation3 + $0x5a0] ss:$16 sps:$4 sm:$0xff]   ;;  %366 = vst [vmem:[#allocation2 + $0x38] sm:$0xff] %v15297_v19 }
  0xa7   : > { %1344 = vmatpush1.bf16.msra.mxu1 %v13013_v31  ;;  %v13047_v1 = vld [vmem:[#allocation3 + $0x9a4] ss:$16 sps:$4 sm:$0xff]   ;;  %v13050_v4 = vld [vmem:[#allocation3 + $0x9a0] ss:$16 sps:$4 sm:$0xff]   ;;  %v2533_v15 = vshrl.u32 %v2394_v2, 16  ;;  %v2536_v16 = vshll.u32 %v2394_v2, 16 }
  0xa8   : > { %3259 = vmatpush1.bf16.msra.mxu0 %v13014_v32  ;;  %1345 = vmatprep.subr.bf16.mxu1 %v13015_v33  ;;  %v13051_v9 = vld [vmem:[#allocation3 + $0x5c4] ss:$16 sps:$4 sm:$0xff]   ;;  %v13055_v17 = vld [vmem:[#allocation3 + $0x5c0] ss:$16 sps:$4 sm:$0xff]  }
  0xa9   : > { %3260 = vmatprep.subr.bf16.mxu0 %v13017_v34  ;;  %v519_v13 = vld [vmem:[#allocation2] sm:$0xc0]  ;;  %v13056_v21 = vld [vmem:[#allocation3 + $0x9c0] ss:$16 sps:$4 sm:$0xff]   ;;  %v2535_v33 = vrot.slane %v2533_v15, 3  ;;  %v2538_v34 = vrot.slane %v2536_v16, 4 }
  0xaa   : > { %v13053_v14 = vld [vmem:[#allocation3 + $0x9c4] ss:$16 sps:$4 sm:$0xff]   ;;  %v527_v24 = vpack.c.bf16 %v15273_v57, %v519_v13  ;;  %v13069_v57 = vld [vmem:[#allocation3 + $0x620] ss:$16 sps:$4 sm:$0xff]  }
  0xab   : > { %1346 = vmatpush1.bf16.msra.mxu1 %v13019_v35  ;;  %v13057_v26 = vld [vmem:[#allocation3 + $0x5e4] ss:$16 sps:$4 sm:$0xff]   ;;  %v2564_v35 = vor.u32 %v2563_v29, %v2560_v28  ;;  %v13078_v62 = vld [vmem:[#allocation3 + $0xa40] ss:$16 sps:$4 sm:$0xff]  }
  0xac   : > { %3261 = vmatpush1.bf16.msra.mxu0 %v13020_v36  ;;  %1347 = vmatprep.subr.bf16.mxu1 %v13021_v37  ;;  %v13059_v31 = vld [vmem:[#allocation3 + $0x9e4] ss:$16 sps:$4 sm:$0xff]   ;;  %v13061_v36 = vld [vmem:[#allocation3 + $0x5e0] ss:$16 sps:$4 sm:$0xff]  }
  0xad   : > { %3262 = vmatprep.subr.bf16.mxu0 %v13023_v38  ;;  %v523_v23 = vld [vmem:[#allocation2 + $0x40] sm:$0x3f] }
  0xae   : > { %v2390_v25 = vld [vmem:[#allocation2 + $0x40] sm:$0x7f]  ;;  %v531_v30 = vpack.c.bf16 %v523_v23, %v523_v23  ;;  %v522_v23 = vld [vmem:[#allocation2 + $0x18] sm:$0xc0] }
  0xaf   : > { %1348 = vmatpush1.bf16.msra.mxu1 %v13025_v39  ;;  %v2398_v32 = vpack.c.bf16 %v2390_v25, %v2390_v25  ;;  %v13062_v37 = vld [vmem:[#allocation3 + $0x9e0] ss:$16 sps:$4 sm:$0xff]   ;;  %v13071_v54 = vld [vmem:[#allocation3 + $0x624] ss:$16 sps:$4 sm:$0xff]  }
  0xb0   : > { %3263 = vmatpush1.bf16.msra.mxu0 %v13026_v40  ;;  %1349 = vmatprep.subr.bf16.mxu1 %v13027_v41  ;;  %v13065_v40 = vld [vmem:[#allocation3 + $0x604] ss:$16 sps:$4 sm:$0xff]   ;;  %v15285_v41 = vsel %vm2531_vm0, %v2556_v22, %v2564_v35  ;;  %v13084_v2 = vld [vmem:[#allocation3 + $0xa60] ss:$16 sps:$4 sm:$0xff]  }
  0xb1   : > { %3264 = vmatprep.subr.bf16.mxu0 %v13029_v42  ;;  %v2541_v38 = vshrl.u32 %v2398_v32, 16  ;;  %v2544_v39 = vshll.u32 %v2398_v32, 16  ;;  %v673_v42 = vrot.slane %v527_v24, 3  ;;  %3276 = vmatprep.mubr.bf16.mxu0 %v15285_v41  ;;  %v13074_v56 = vld [vmem:[#allocation3 + $0xa24] ss:$16 sps:$4 sm:$0xff]  }
  0xb2   : > { %v13077_v59 = vld [vmem:[#allocation3 + $0x644] ss:$16 sps:$4 sm:$0xff]   ;;  %v13087_v5 = vld [vmem:[#allocation3 + $0x680] ss:$16 sps:$4 sm:$0xff]   ;;  %v2389_v24 = vld [vmem:[#allocation2 + $0x18] sm:$0x80] }
  0xb3   : > { %1350 = vmatpush1.bf16.msra.mxu1 %v13031_v43  ;;  %v674_v43 = vrot.slane %v531_v30, 3  ;;  %v13080_v60 = vld [vmem:[#allocation3 + $0xa44] ss:$16 sps:$4 sm:$0xff]   ;;  %v13090_v6 = vld [vmem:[#allocation3 + $0xa80] ss:$16 sps:$4 sm:$0xff]   ;;  %v2397_v25 = vpack.c.bf16 %v15297_v19, %v2389_v24  ;;  %v530_v30 = vpack.c.bf16 %v15297_v19, %v522_v23 }
  0xb4   : > { %3265 = vmatpush1.bf16.msra.mxu0 %v13032_v44  ;;  %1351 = vmatprep.subr.bf16.mxu1 %v13033_v45  ;;  %v13068_v44 = vld [vmem:[#allocation3 + $0xa04] ss:$16 sps:$4 sm:$0xff]   ;;  %v2539_v45 = vor.u32 %v2538_v34, %v2535_v33  ;;  %v13096_v10 = vld [vmem:[#allocation3 + $0xaa0] ss:$16 sps:$4 sm:$0xff]  }
  0xb5   : > { %3266 = vmatprep.subr.bf16.mxu0 %v13035_v46  ;;  %v2543_v46 = vrot.slane %v2541_v38, 3  ;;  %v15289_v53 = vsel %vm672_vm1, %v673_v42, %v674_v43  ;;  %v13083_v63 = vld [vmem:[#allocation3 + $0x664] ss:$16 sps:$4 sm:$0xff]   ;;  %v13099_v13 = vld [vmem:[#allocation3 + $0x6c0] ss:$16 sps:$4 sm:$0xff]   ;;  %v2584_v33 = vshrl.u32 %v2397_v25, 16 }
  0xb6   : > { %v13086_v0 = vld [vmem:[#allocation3 + $0xa64] ss:$16 sps:$4 sm:$0xff]   ;;  %v13108_v18 = vld [vmem:[#allocation3 + $0xae0] ss:$16 sps:$4 sm:$0xff]   ;;  %v2587_v34 = vshll.u32 %v2397_v25, 16 }
  0xb7   : > { %1352 = vmatpush1.bf16.msra.mxu1 %v13037_v47  ;;  %v2546_v47 = vrot.slane %v2544_v39, 4  ;;  %v13095_v7 = vld [vmem:[#allocation3 + $0x6a4] ss:$16 sps:$4 sm:$0xff]   ;;  %v13111_v28 = vld [vmem:[#allocation3 + $0x700] ss:$16 sps:$4 sm:$0xff]   ;;  %v682_v39 = vrot.slane %v530_v30, 3 }
  0xb8   : > { %3267 = vmatpush1.bf16.msra.mxu0 %v13038_v48  ;;  %1353 = vmatprep.subr.bf16.mxu1 %v13039_v50  ;;  %v13063_v48 = vld [vmem:[#allocation3 + $0x600] ss:$16 sps:$4 sm:$0xff]   ;;  %v13098_v8 = vld [vmem:[#allocation3 + $0xaa4] ss:$16 sps:$4 sm:$0xff]  }
  0xb9   : > { %3268 = vmatprep.subr.bf16.mxu0 %v13041_v52  ;;  %v13066_v50 = vld [vmem:[#allocation3 + $0xa00] ss:$16 sps:$4 sm:$0xff]   ;;  %v2547_v52 = vor.u32 %v2546_v47, %v2543_v46  ;;  %v13101_v11 = vld [vmem:[#allocation3 + $0x6c4] ss:$16 sps:$4 sm:$0xff]   ;;  %v2589_v46 = vrot.slane %v2587_v34, 4 }
  0xba   : > { %v13104_v12 = vld [vmem:[#allocation3 + $0xac4] ss:$16 sps:$4 sm:$0xff]   ;;  %v13114_v29 = vld [vmem:[#allocation3 + $0xb00] ss:$16 sps:$4 sm:$0xff]  }
  0xbb   : > { %1354 = vmatpush1.bf16.msra.mxu1 %v13043_v55  ;;  %v15292_v55 = vsel %vm2531_vm0, %v2539_v45, %v2547_v52  ;;  %v13107_v15 = vld [vmem:[#allocation3 + $0x6e4] ss:$16 sps:$4 sm:$0xff]   ;;  %v2586_v45 = vrot.slane %v2584_v33, 3  ;;  %v13147_v25 = vld [vmem:[#allocation3 + $0x7c0] ss:$16 sps:$4 sm:$0xff]  }
  0xbc   : > { %3269 = vmatpush1.bf16.msra.mxu0 %v13044_v58  ;;  %1355 = vmatprep.subr.bf16.mxu1 %v13045_v61  ;;  %v13072_v58 = vld [vmem:[#allocation3 + $0xa20] ss:$16 sps:$4 sm:$0xff]   ;;  %v13110_v16 = vld [vmem:[#allocation3 + $0xae4] ss:$16 sps:$4 sm:$0xff]  }
  0xbd   : > { %3270 = vmatprep.subr.bf16.mxu0 %v13047_v1  ;;  %v13075_v61 = vld [vmem:[#allocation3 + $0x640] ss:$16 sps:$4 sm:$0xff]   ;;  %v13113_v20 = vld [vmem:[#allocation3 + $0x704] ss:$16 sps:$4 sm:$0xff]  }
  0xbe   : > { %v13081_v1 = vld [vmem:[#allocation3 + $0x660] ss:$16 sps:$4 sm:$0xff]   ;;  %v13116_v22 = vld [vmem:[#allocation3 + $0xb04] ss:$16 sps:$4 sm:$0xff]  }
  0xbf   : > { %1356 = vmatpush1.bf16.msra.mxu1 %v13049_v3  ;;  %v13089_v3 = vld [vmem:[#allocation3 + $0x684] ss:$16 sps:$4 sm:$0xff]  }
  0xc0   : > { %3271 = vmatpush1.bf16.msra.mxu0 %v13050_v4  ;;  %1357 = vmatprep.subr.bf16.mxu1 %v13051_v9  ;;  %v13092_v4 = vld [vmem:[#allocation3 + $0xa84] ss:$16 sps:$4 sm:$0xff]   ;;  %v13093_v9 = vld [vmem:[#allocation3 + $0x6a0] ss:$16 sps:$4 sm:$0xff]  }
  0xc1   : > { %3272 = vmatprep.subr.bf16.mxu0 %v13053_v14  ;;  %v13102_v14 = vld [vmem:[#allocation3 + $0xac0] ss:$16 sps:$4 sm:$0xff]   ;;  %v13119_v32 = vld [vmem:[#allocation3 + $0x724] ss:$16 sps:$4 sm:$0xff]  }
  0xc2   : > { %v13122_v35 = vld [vmem:[#allocation3 + $0xb24] ss:$16 sps:$4 sm:$0xff]  }
  0xc3   : > { %1358 = vmatpush1.bf16.msra.mxu1 %v13055_v17  ;;  %v13105_v17 = vld [vmem:[#allocation3 + $0x6e0] ss:$16 sps:$4 sm:$0xff]   ;;  %v13125_v42 = vld [vmem:[#allocation3 + $0x744] ss:$16 sps:$4 sm:$0xff]  }
  0xc4   : > { %3273 = vmatpush1.bf16.msra.mxu0 %v13056_v21  ;;  %1359 = vmatprep.subr.bf16.mxu1 %v13057_v26  ;;  %v15300_v21 = vld [vmem:[%s15261_s22 + $0x38] sm:$0xff]  ;;  %v15306_v26 = vld [vmem:[%s15261_s22 + $0x10] sm:$0xff] }
  0xc5   : > { %3274 = vmatprep.subr.bf16.mxu0 %v13059_v31  ;;  %370 = vst [vmem:[#allocation2 + $0x58] sm:$0xff] %v15300_v21  ;;  %v361_v31 = vld [vmem:[%s15261_s22 + $0x30] sm:$0xff]  ;;  %365 = vst [vmem:[#allocation2 + $0x30] sm:$0xff] %v15306_v26 }
  0xc6   : > { %369 = vst [vmem:[#allocation2 + $0x50] sm:$0xff] %v361_v31  ;;  %v13128_v47 = vld [vmem:[#allocation3 + $0xb44] ss:$16 sps:$4 sm:$0xff]  }
  0xc7   : > { %1360 = vmatpush1.bf16.msra.mxu1 %v13061_v36  ;;  %v13117_v36 = vld [vmem:[#allocation3 + $0x720] ss:$16 sps:$4 sm:$0xff]  }
  0xc8   : > { %3275 = vmatpush1.bf16.msra.mxu0 %v13062_v37  ;;  %1372 = vmatprep.subr.bf16.mxu1 %v13065_v40  ;;  %v13120_v37 = vld [vmem:[#allocation3 + $0xb20] ss:$16 sps:$4 sm:$0xff]  }
  0xc9   : > { %3287 = vmatprep.subr.bf16.mxu0 %v13068_v44 }
  0xca   : > { %1362 = vmatmul.mubr.bf16.vlgmr.msra.gmra.mrb[0].mxu1 %v15289_v53 }
  0xcb   : > { %3277 = vmatmul.mubr.bf16.vlgmr.msra.gmra.mrb[0].mxu0 %v15292_v55  ;;  %1373 = vmatpush1.bf16.msra.mxu1 %v13063_v48 }
  0xcc   : > { %3288 = vmatpush1.bf16.msra.mxu0 %v13066_v50  ;;  %1374 = vmatprep.subr.bf16.mxu1 %v13071_v54  ;;  %v526_v38 = vld [vmem:[#allocation2 + $0x58] sm:$0x3f]  ;;  %v13123_v54 = vld [vmem:[#allocation3 + $0x740] ss:$16 sps:$4 sm:$0xff]  }
  0xcd   : > { %3289 = vmatprep.subr.bf16.mxu0 %v13074_v56  ;;  %v2393_v40 = vld [vmem:[#allocation2 + $0x58] sm:$0x7f]  ;;  %v534_v43 = vpack.c.bf16 %v526_v38, %v526_v38  ;;  %v13126_v56 = vld [vmem:[#allocation3 + $0xb40] ss:$16 sps:$4 sm:$0xff]  }
  0xce   : > { %v2401_v44 = vpack.c.bf16 %v2393_v40, %v2393_v40  ;;  %v525_v24 = vld [vmem:[#allocation2 + $0x50] sm:$0x3f] }
  0xcf   : > { %1375 = vmatpush1.bf16.msra.mxu1 %v13069_v57  ;;  %v683_v48 = vrot.slane %v534_v43, 3  ;;  %v13156_v38 = vld [vmem:[#allocation3 + $0xbe0] ss:$16 sps:$4 sm:$0xff]  }
  0xd0   : > { %3290 = vmatpush1.bf16.msra.mxu0 %v13072_v58  ;;  %1376 = vmatprep.subr.bf16.mxu1 %v13077_v59  ;;  %v2592_v50 = vshrl.u32 %v2401_v44, 16  ;;  %v2595_v52 = vshll.u32 %v2401_v44, 16  ;;  %v2590_v58 = vor.u32 %v2589_v46, %v2586_v45  ;;  %v13159_v45 = vld [vmem:[#allocation3 + $0x408] ss:$16 sps:$4 sm:$0xff]   ;;  %v13162_v46 = vld [vmem:[#allocation3 + $0xc00] ss:$16 sps:$4 sm:$0xff]  }
  0xd1   : > { %3291 = vmatprep.subr.bf16.mxu0 %v13080_v60  ;;  %v15312_v57 = vsel %vm672_vm1, %v682_v39, %v683_v48  ;;  %v13161_v39 = vld [vmem:[#allocation3 + $0x40c] ss:$16 sps:$4 sm:$0xff]  }
  0xd2   : > { %v2594_v59 = vrot.slane %v2592_v50, 3  ;;  %v2597_v60 = vrot.slane %v2595_v52, 4  ;;  %1404 = vmatprep.mubr.bf16.mxu1 %v15312_v57  ;;  %v13167_v50 = vld [vmem:[#allocation3 + $0x42c] ss:$16 sps:$4 sm:$0xff]   ;;  %v13170_v52 = vld [vmem:[#allocation3 + $0xc24] ss:$16 sps:$4 sm:$0xff]  }
  0xd3   : > { %1377 = vmatpush1.bf16.msra.mxu1 %v13075_v61  ;;  %v13131_v61 = vld [vmem:[#allocation3 + $0x764] ss:$16 sps:$4 sm:$0xff]  }
  0xd4   : > { %3292 = vmatpush1.bf16.msra.mxu0 %v13078_v62  ;;  %1378 = vmatprep.subr.bf16.mxu1 %v13083_v63  ;;  %v13134_v62 = vld [vmem:[#allocation3 + $0xb64] ss:$16 sps:$4 sm:$0xff]   ;;  %v13129_v63 = vld [vmem:[#allocation3 + $0x760] ss:$16 sps:$4 sm:$0xff]  }
  0xd5   : > { %3293 = vmatprep.subr.bf16.mxu0 %v13086_v0  ;;  %v2598_v0 = vor.u32 %v2597_v60, %v2594_v59  ;;  %v13173_v59 = vld [vmem:[#allocation3 + $0x44c] ss:$16 sps:$4 sm:$0xff]   ;;  %v13176_v60 = vld [vmem:[#allocation3 + $0xc44] ss:$16 sps:$4 sm:$0xff]  }
  0xd7   : > { %1379 = vmatpush1.bf16.msra.mxu1 %v13081_v1  ;;  %v13132_v1 = vld [vmem:[#allocation3 + $0xb60] ss:$16 sps:$4 sm:$0xff]  }
  0xd8   : > { %3294 = vmatpush1.bf16.msra.mxu0 %v13084_v2  ;;  %1380 = vmatprep.subr.bf16.mxu1 %v13089_v3  ;;  %v13137_v2 = vld [vmem:[#allocation3 + $0x784] ss:$16 sps:$4 sm:$0xff]  }
  0xd9   : > { %3295 = vmatprep.subr.bf16.mxu0 %v13092_v4  ;;  %v13140_v3 = vld [vmem:[#allocation3 + $0xb84] ss:$16 sps:$4 sm:$0xff]   ;;  %v15316_v4 = vsel %vm2531_vm0, %v2590_v58, %v2598_v0  ;;  %v13168_v58 = vld [vmem:[#allocation3 + $0xc20] ss:$16 sps:$4 sm:$0xff]  }
  0xda   : > { %3319 = vmatprep.mubr.bf16.mxu0 %v15316_v4  ;;  %v13180_v0 = vld [vmem:[#allocation3 + $0xc60] ss:$16 sps:$4 sm:$0xff]  }
  0xdb   : > { %1381 = vmatpush1.bf16.msra.mxu1 %v13087_v5  ;;  %v2388_v5 = vld [vmem:[#allocation2 + $0x10] sm:$0x80] }
  0xdc   : > { %3296 = vmatpush1.bf16.msra.mxu0 %v13090_v6  ;;  %1382 = vmatprep.subr.bf16.mxu1 %v13095_v7  ;;  %v2392_v6 = vld [vmem:[#allocation2 + $0x50] sm:$0x7f] }
  0xdd   : > { %3297 = vmatprep.subr.bf16.mxu0 %v13098_v8  ;;  %v13135_v7 = vld [vmem:[#allocation3 + $0x780] ss:$16 sps:$4 sm:$0xff]  }
  0xde   : > { %v13138_v8 = vld [vmem:[#allocation3 + $0xb80] ss:$16 sps:$4 sm:$0xff]  }
  0xdf   : > { %1383 = vmatpush1.bf16.msra.mxu1 %v13093_v9  ;;  %v2396_v9 = vpack.c.bf16 %v15306_v26, %v2388_v5  ;;  %v13191_v5 = vld [vmem:[#allocation3 + $0x4ac] ss:$16 sps:$4 sm:$0xff]  }
  0xe0   : > { %3298 = vmatpush1.bf16.msra.mxu0 %v13096_v10  ;;  %1384 = vmatprep.subr.bf16.mxu1 %v13101_v11  ;;  %v13143_v10 = vld [vmem:[#allocation3 + $0x7a4] ss:$16 sps:$4 sm:$0xff]   ;;  %v2400_v11 = vpack.c.bf16 %v2392_v6, %v2392_v6 }
  0xe1   : > { %3299 = vmatprep.subr.bf16.mxu0 %v13104_v12  ;;  %v13146_v12 = vld [vmem:[#allocation3 + $0xba4] ss:$16 sps:$4 sm:$0xff]  }
  0xe2   : > { %v2578_v23 = vshll.u32 %v2400_v11, 16  ;;  %v13194_v6 = vld [vmem:[#allocation3 + $0xca4] ss:$16 sps:$4 sm:$0xff]  }
  0xe3   : > { %1385 = vmatpush1.bf16.msra.mxu1 %v13099_v13  ;;  %v13141_v13 = vld [vmem:[#allocation3 + $0x7a0] ss:$16 sps:$4 sm:$0xff]  }
  0xe4   : > { %3300 = vmatpush1.bf16.msra.mxu0 %v13102_v14  ;;  %1386 = vmatprep.subr.bf16.mxu1 %v13107_v15  ;;  %v13144_v14 = vld [vmem:[#allocation3 + $0xba0] ss:$16 sps:$4 sm:$0xff]   ;;  %v13149_v15 = vld [vmem:[#allocation3 + $0x7c4] ss:$16 sps:$4 sm:$0xff]  }
  0xe5   : > { %3301 = vmatprep.subr.bf16.mxu0 %v13110_v16  ;;  %v13152_v16 = vld [vmem:[#allocation3 + $0xbc4] ss:$16 sps:$4 sm:$0xff]  }
  0xe7   : > { %1387 = vmatpush1.bf16.msra.mxu1 %v13105_v17  ;;  %v521_v17 = vld [vmem:[#allocation2 + $0x10] sm:$0xc0] }
  0xe8   : > { %3302 = vmatpush1.bf16.msra.mxu0 %v13108_v18  ;;  %1388 = vmatprep.subr.bf16.mxu1 %v13113_v20  ;;  %v2567_v18 = vshrl.u32 %v2396_v9, 16  ;;  %v2570_v20 = vshll.u32 %v2396_v9, 16  ;;  %v529_v30 = vpack.c.bf16 %v15306_v26, %v521_v17  ;;  %v13164_v26 = vld [vmem:[#allocation3 + $0xc04] ss:$16 sps:$4 sm:$0xff]   ;;  %v13197_v9 = vld [vmem:[#allocation3 + $0x4cc] ss:$16 sps:$4 sm:$0xff]  }
  0xe9   : > { %3303 = vmatprep.subr.bf16.mxu0 %v13116_v22  ;;  %v2575_v22 = vshrl.u32 %v2400_v11, 16  ;;  %v13195_v11 = vld [vmem:[#allocation3 + $0x4c8] ss:$16 sps:$4 sm:$0xff]   ;;  %v13209_v17 = vld [vmem:[#allocation3 + $0x50c] ss:$16 sps:$4 sm:$0xff]  }
  0xea   : > { %v2569_v31 = vrot.slane %v2567_v18, 3  ;;  %v2572_v33 = vrot.slane %v2570_v20, 4  ;;  %v679_v40 = vrot.slane %v529_v30, 3  ;;  %v13212_v18 = vld [vmem:[#allocation3 + $0xd04] ss:$16 sps:$4 sm:$0xff]  }
  0xeb   : > { %1389 = vmatpush1.bf16.msra.mxu1 %v13111_v28  ;;  %v13150_v28 = vld [vmem:[#allocation3 + $0xbc0] ss:$16 sps:$4 sm:$0xff]   ;;  %v2577_v34 = vrot.slane %v2575_v22, 3  ;;  %v13207_v20 = vld [vmem:[#allocation3 + $0x508] ss:$16 sps:$4 sm:$0xff]  }
  0xec   : > { %3304 = vmatpush1.bf16.msra.mxu0 %v13114_v29  ;;  %1390 = vmatprep.subr.bf16.mxu1 %v13119_v32  ;;  %v13155_v29 = vld [vmem:[#allocation3 + $0x7e4] ss:$16 sps:$4 sm:$0xff]   ;;  %v533_v32 = vpack.c.bf16 %v525_v24, %v525_v24  ;;  %v2573_v43 = vor.u32 %v2572_v33, %v2569_v31  ;;  %v13210_v22 = vld [vmem:[#allocation3 + $0xd00] ss:$16 sps:$4 sm:$0xff]   ;;  %v13219_v31 = vld [vmem:[#allocation3 + $0x548] ss:$16 sps:$4 sm:$0xff]  }
  0xed   : > { %3305 = vmatprep.subr.bf16.mxu0 %v13122_v35  ;;  %v2580_v35 = vrot.slane %v2578_v23, 4  ;;  %v13215_v23 = vld [vmem:[#allocation3 + $0x52c] ss:$16 sps:$4 sm:$0xff]   ;;  %v13218_v24 = vld [vmem:[#allocation3 + $0xd24] ss:$16 sps:$4 sm:$0xff]  }
  0xee   : > { %v13224_v30 = vld [vmem:[#allocation3 + $0xd44] ss:$16 sps:$4 sm:$0xff]   ;;  %v13227_v33 = vld [vmem:[#allocation3 + $0x56c] ss:$16 sps:$4 sm:$0xff]  }
  0xef   : > { %1391 = vmatpush1.bf16.msra.mxu1 %v13117_v36  ;;  %v13158_v36 = vld [vmem:[#allocation3 + $0xbe4] ss:$16 sps:$4 sm:$0xff]   ;;  %v2581_v44 = vor.u32 %v2580_v35, %v2577_v34  ;;  %v13225_v35 = vld [vmem:[#allocation3 + $0x568] ss:$16 sps:$4 sm:$0xff]  }
  0xf0   : > { %3306 = vmatpush1.bf16.msra.mxu0 %v13120_v37  ;;  %1392 = vmatprep.subr.bf16.mxu1 %v13125_v42  ;;  %v13153_v37 = vld [vmem:[#allocation3 + $0x7e0] ss:$16 sps:$4 sm:$0xff]   ;;  %v680_v42 = vrot.slane %v533_v32, 3  ;;  %v13230_v34 = vld [vmem:[#allocation3 + $0xd64] ss:$16 sps:$4 sm:$0xff]  }
  0xf1   : > { %3307 = vmatprep.subr.bf16.mxu0 %v13128_v47  ;;  %v15325_v48 = vsel %vm2531_vm0, %v2573_v43, %v2581_v44  ;;  %v13222_v32 = vld [vmem:[#allocation3 + $0xd40] ss:$16 sps:$4 sm:$0xff]   ;;  %v13242_v43 = vld [vmem:[#allocation3 + $0xda4] ss:$16 sps:$4 sm:$0xff]   ;;  %v13237_v44 = vld [vmem:[#allocation3 + $0x5a8] ss:$16 sps:$4 sm:$0xff]  }
  0xf2   : > { %v15322_v47 = vsel %vm672_vm1, %v679_v40, %v680_v42  ;;  %v13234_v40 = vld [vmem:[#allocation3 + $0xd80] ss:$16 sps:$4 sm:$0xff]   ;;  %v13239_v42 = vld [vmem:[#allocation3 + $0x5ac] ss:$16 sps:$4 sm:$0xff]  }
  0xf3   : > { %1393 = vmatpush1.bf16.msra.mxu1 %v13123_v54  ;;  %v15329_v54 = vpack.c.bf16 %v15267_v51, %v15264_v49  ;;  %v13179_v49 = vld [vmem:[#allocation3 + $0x46c] ss:$16 sps:$4 sm:$0xff]   ;;  %v13182_v51 = vld [vmem:[#allocation3 + $0xc64] ss:$16 sps:$4 sm:$0xff]  }
  0xf4   : > { %3308 = vmatpush1.bf16.msra.mxu0 %v13126_v56  ;;  %1394 = vmatprep.subr.bf16.mxu1 %v13131_v61  ;;  %v13165_v56 = vld [vmem:[#allocation3 + $0x428] ss:$16 sps:$4 sm:$0xff]  }
  0xf5   : > { %3309 = vmatprep.subr.bf16.mxu0 %v13134_v62  ;;  %v13171_v61 = vld [vmem:[#allocation3 + $0x448] ss:$16 sps:$4 sm:$0xff]   ;;  %v13174_v62 = vld [vmem:[#allocation3 + $0xc40] ss:$16 sps:$4 sm:$0xff]  }
  0xf7   : > { %1395 = vmatpush1.bf16.msra.mxu1 %v13129_v63  ;;  %v13177_v63 = vld [vmem:[#allocation3 + $0x468] ss:$16 sps:$4 sm:$0xff]  }
  0xf8   : > { %3310 = vmatpush1.bf16.msra.mxu0 %v13132_v1  ;;  %1396 = vmatprep.subr.bf16.mxu1 %v13137_v2  ;;  %v13185_v1 = vld [vmem:[#allocation3 + $0x48c] ss:$16 sps:$4 sm:$0xff]   ;;  %v13188_v2 = vld [vmem:[#allocation3 + $0xc84] ss:$16 sps:$4 sm:$0xff]  }
  0xf9   : > { %3311 = vmatprep.subr.bf16.mxu0 %v13140_v3  ;;  %v13183_v3 = vld [vmem:[#allocation3 + $0x488] ss:$16 sps:$4 sm:$0xff]  }
  0xfb   : > { %1397 = vmatpush1.bf16.msra.mxu1 %v13135_v7  ;;  %v13189_v7 = vld [vmem:[#allocation3 + $0x4a8] ss:$16 sps:$4 sm:$0xff]  }
  0xfc   : > { %3312 = vmatpush1.bf16.msra.mxu0 %v13138_v8  ;;  %1398 = vmatprep.subr.bf16.mxu1 %v13143_v10  ;;  %v13192_v8 = vld [vmem:[#allocation3 + $0xca0] ss:$16 sps:$4 sm:$0xff]   ;;  %v13200_v10 = vld [vmem:[#allocation3 + $0xcc4] ss:$16 sps:$4 sm:$0xff]  }
  0xfd   : > { %3313 = vmatprep.subr.bf16.mxu0 %v13146_v12  ;;  %v13198_v12 = vld [vmem:[#allocation3 + $0xcc0] ss:$16 sps:$4 sm:$0xff]  }
  0xff   : > { %1399 = vmatpush1.bf16.msra.mxu1 %v13141_v13  ;;  %v13203_v13 = vld [vmem:[#allocation3 + $0x4ec] ss:$16 sps:$4 sm:$0xff]  }
 0x100   : > { %3314 = vmatpush1.bf16.msra.mxu0 %v13144_v14  ;;  %1400 = vmatprep.subr.bf16.mxu1 %v13149_v15  ;;  %v13206_v14 = vld [vmem:[#allocation3 + $0xce4] ss:$16 sps:$4 sm:$0xff]   ;;  %v13201_v15 = vld [vmem:[#allocation3 + $0x4e8] ss:$16 sps:$4 sm:$0xff]  }
 0x101   : > { %3315 = vmatprep.subr.bf16.mxu0 %v13152_v16  ;;  %v13204_v16 = vld [vmem:[#allocation3 + $0xce0] ss:$16 sps:$4 sm:$0xff]  }
 0x103   : > { %1401 = vmatpush1.bf16.msra.mxu1 %v13147_v25  ;;  %v13213_v25 = vld [vmem:[#allocation3 + $0x528] ss:$16 sps:$4 sm:$0xff]  }
 0x104   : > { %3316 = vmatpush1.bf16.msra.mxu0 %v13150_v28  ;;  %1402 = vmatprep.subr.bf16.mxu1 %v13155_v29  ;;  %v13216_v28 = vld [vmem:[#allocation3 + $0xd20] ss:$16 sps:$4 sm:$0xff]   ;;  %v13221_v29 = vld [vmem:[#allocation3 + $0x54c] ss:$16 sps:$4 sm:$0xff]  }
 0x105   : > { %3317 = vmatprep.subr.bf16.mxu0 %v13158_v36  ;;  %v13228_v36 = vld [vmem:[#allocation3 + $0xd60] ss:$16 sps:$4 sm:$0xff]  }
 0x107   : > { %1403 = vmatpush1.bf16.msra.mxu1 %v13153_v37  ;;  %v13233_v37 = vld [vmem:[#allocation3 + $0x58c] ss:$16 sps:$4 sm:$0xff]  }
 0x108   : > { %3318 = vmatpush1.bf16.msra.mxu0 %v13156_v38  ;;  %1415 = vmatprep.subr.bf16.mxu1 %v13161_v39  ;;  %v13236_v38 = vld [vmem:[#allocation3 + $0xd84] ss:$16 sps:$4 sm:$0xff]   ;;  %v13231_v39 = vld [vmem:[#allocation3 + $0x588] ss:$16 sps:$4 sm:$0xff]  }
 0x109   : > { %4201 = vmatprep.subr.bf16.mxu0 %v13164_v26  ;;  %v13240_v26 = vld [vmem:[#allocation3 + $0xda0] ss:$16 sps:$4 sm:$0xff]  }
 0x10a   : > { %1405 = vmatmul.mubr.bf16.vlgmr.msra.gmra.mrb[0].mxu1 %v15322_v47 }
 0x10b   : > { %3320 = vmatmul.mubr.bf16.vlgmr.msra.gmra.mrb[0].mxu0 %v15325_v48  ;;  %1416 = vmatpush1.bf16.msra.mxu1 %v13159_v45  ;;  %v13245_v45 = vld [vmem:[#allocation3 + $0x5cc] ss:$16 sps:$4 sm:$0xff]  }
 0x10c   : > { %4202 = vmatpush1.bf16.msra.mxu0 %v13162_v46  ;;  %1417 = vmatprep.subr.bf16.mxu1 %v13167_v50  ;;  %v13248_v46 = vld [vmem:[#allocation3 + $0xdc4] ss:$16 sps:$4 sm:$0xff]   ;;  %v13243_v50 = vld [vmem:[#allocation3 + $0x5c8] ss:$16 sps:$4 sm:$0xff]  }
 0x10d   : > { %4203 = vmatprep.subr.bf16.mxu0 %v13170_v52  ;;  %1447 = vmatprep.mubr.bf16.mxu1 %v15281_v27  ;;  %v13186_v27 = vld [vmem:[#allocation3 + $0xc80] ss:$16 sps:$4 sm:$0xff]  }
 0x10e   : > { %4233 = vmatprep.mubr.bf16.mxu0 %v15329_v54  ;;  %v13246_v52 = vld [vmem:[#allocation3 + $0xdc0] ss:$16 sps:$4 sm:$0xff]  }
 0x10f   : > { %1418 = vmatpush1.bf16.msra.mxu1 %v13165_v56  ;;  %v13251_v56 = vld [vmem:[#allocation3 + $0x5ec] ss:$16 sps:$4 sm:$0xff]  }
 0x110   : > { %4204 = vmatpush1.bf16.msra.mxu0 %v13168_v58  ;;  %1419 = vmatprep.subr.bf16.mxu1 %v13173_v59  ;;  %v13254_v58 = vld [vmem:[#allocation3 + $0xde4] ss:$16 sps:$4 sm:$0xff]   ;;  %v13249_v59 = vld [vmem:[#allocation3 + $0x5e8] ss:$16 sps:$4 sm:$0xff]  }
 0x111   : > { %4205 = vmatprep.subr.bf16.mxu0 %v13176_v60  ;;  %v13252_v60 = vld [vmem:[#allocation3 + $0xde0] ss:$16 sps:$4 sm:$0xff]  }
 0x113   : > { %1420 = vmatpush1.bf16.msra.mxu1 %v13171_v61  ;;  %v13257_v61 = vld [vmem:[#allocation3 + $0x60c] ss:$16 sps:$4 sm:$0xff]  }
 0x114   : > { %4206 = vmatpush1.bf16.msra.mxu0 %v13174_v62  ;;  %1421 = vmatprep.subr.bf16.mxu1 %v13179_v49  ;;  %v13260_v62 = vld [vmem:[#allocation3 + $0xe04] ss:$16 sps:$4 sm:$0xff]   ;;  %v13255_v49 = vld [vmem:[#allocation3 + $0x608] ss:$16 sps:$4 sm:$0xff]  }
 0x115   : > { %4207 = vmatprep.subr.bf16.mxu0 %v13182_v51  ;;  %v13258_v51 = vld [vmem:[#allocation3 + $0xe00] ss:$16 sps:$4 sm:$0xff]  }
 0x117   : > { %1422 = vmatpush1.bf16.msra.mxu1 %v13177_v63  ;;  %v15335_v63 = vld [vmem:[#allocation2 + $0x20] sm:$0xff] }
 0x118   : > { %4208 = vmatpush1.bf16.msra.mxu0 %v13180_v0  ;;  %1423 = vmatprep.subr.bf16.mxu1 %v13185_v1  ;;  %v14872_v0 = vld [vmem:[#allocation2 + $0x40] sm:$0xff] }
 0x119   : > { %4209 = vmatprep.subr.bf16.mxu0 %v13188_v2  ;;  %v15338_v1 = vpack.c.bf16 %v14872_v0, %v15335_v63  ;;  %v13263_v2 = vld [vmem:[#allocation3 + $0x62c] ss:$16 sps:$4 sm:$0xff]  }
 0x11a   : > { %v14873_v0 = vld [vmem:[#allocation2 + $0x28] sm:$0xff] }
 0x11b   : > { %1424 = vmatpush1.bf16.msra.mxu1 %v13183_v3  ;;  %v13266_v3 = vld [vmem:[#allocation3 + $0xe24] ss:$16 sps:$4 sm:$0xff]  }
 0x11c   : > { %4210 = vmatpush1.bf16.msra.mxu0 %v13186_v27  ;;  %1425 = vmatprep.subr.bf16.mxu1 %v13191_v5  ;;  %v15342_v27 = vpack.c.bf16 %v15300_v21, %v15297_v19  ;;  %v13261_v5 = vld [vmem:[#allocation3 + $0x628] ss:$16 sps:$4 sm:$0xff]   ;;  %v13275_v19 = vld [vmem:[#allocation3 + $0x66c] ss:$16 sps:$4 sm:$0xff]  }
 0x11d   : > { %4211 = vmatprep.subr.bf16.mxu0 %v13194_v6  ;;  %v13264_v6 = vld [vmem:[#allocation3 + $0xe20] ss:$16 sps:$4 sm:$0xff]   ;;  %v13273_v21 = vld [vmem:[#allocation3 + $0x668] ss:$16 sps:$4 sm:$0xff]  }
 0x11f   : > { %1426 = vmatpush1.bf16.msra.mxu1 %v13189_v7  ;;  %v13269_v7 = vld [vmem:[#allocation3 + $0x64c] ss:$16 sps:$4 sm:$0xff]  }
 0x120   : > { %4212 = vmatpush1.bf16.msra.mxu0 %v13192_v8  ;;  %1427 = vmatprep.subr.bf16.mxu1 %v13197_v9  ;;  %v13272_v8 = vld [vmem:[#allocation3 + $0xe44] ss:$16 sps:$4 sm:$0xff]   ;;  %v13267_v9 = vld [vmem:[#allocation3 + $0x648] ss:$16 sps:$4 sm:$0xff]  }
 0x121   : > { %4213 = vmatprep.subr.bf16.mxu0 %v13200_v10  ;;  %v13270_v10 = vld [vmem:[#allocation3 + $0xe40] ss:$16 sps:$4 sm:$0xff]  }
 0x123   : > { %1428 = vmatpush1.bf16.msra.mxu1 %v13195_v11  ;;  %v13276_v11 = vld [vmem:[#allocation3 + $0xe60] ss:$16 sps:$4 sm:$0xff]  }
 0x124   : > { %4214 = vmatpush1.bf16.msra.mxu0 %v13198_v12  ;;  %1429 = vmatprep.subr.bf16.mxu1 %v13203_v13  ;;  %v13281_v12 = vld [vmem:[#allocation3 + $0x68c] ss:$16 sps:$4 sm:$0xff]   ;;  %v13284_v13 = vld [vmem:[#allocation3 + $0xe84] ss:$16 sps:$4 sm:$0xff]  }
 0x125   : > { %4215 = vmatprep.subr.bf16.mxu0 %v13206_v14  ;;  %v13279_v14 = vld [vmem:[#allocation3 + $0x688] ss:$16 sps:$4 sm:$0xff]  }
 0x127   : > { %1430 = vmatpush1.bf16.msra.mxu1 %v13201_v15  ;;  %v13287_v15 = vld [vmem:[#allocation3 + $0x6ac] ss:$16 sps:$4 sm:$0xff]  }
 0x128   : > { %4216 = vmatpush1.bf16.msra.mxu0 %v13204_v16  ;;  %1431 = vmatprep.subr.bf16.mxu1 %v13209_v17  ;;  %v13290_v16 = vld [vmem:[#allocation3 + $0xea4] ss:$16 sps:$4 sm:$0xff]   ;;  %v13285_v17 = vld [vmem:[#allocation3 + $0x6a8] ss:$16 sps:$4 sm:$0xff]  }
 0x129   : > { %4217 = vmatprep.subr.bf16.mxu0 %v13212_v18  ;;  %v13288_v18 = vld [vmem:[#allocation3 + $0xea0] ss:$16 sps:$4 sm:$0xff]  }
 0x12b   : > { %1432 = vmatpush1.bf16.msra.mxu1 %v13207_v20  ;;  %v13293_v20 = vld [vmem:[#allocation3 + $0x6cc] ss:$16 sps:$4 sm:$0xff]  }
 0x12c   : > { %4218 = vmatpush1.bf16.msra.mxu0 %v13210_v22  ;;  %1433 = vmatprep.subr.bf16.mxu1 %v13215_v23  ;;  %v13296_v22 = vld [vmem:[#allocation3 + $0xec4] ss:$16 sps:$4 sm:$0xff]   ;;  %v13291_v23 = vld [vmem:[#allocation3 + $0x6c8] ss:$16 sps:$4 sm:$0xff]  }
 0x12d   : > { %4219 = vmatprep.subr.bf16.mxu0 %v13218_v24  ;;  %v13294_v24 = vld [vmem:[#allocation3 + $0xec0] ss:$16 sps:$4 sm:$0xff]  }
 0x12f   : > { %1434 = vmatpush1.bf16.msra.mxu1 %v13213_v25  ;;  %v13299_v25 = vld [vmem:[#allocation3 + $0x6ec] ss:$16 sps:$4 sm:$0xff]  }
 0x130   : > { %4220 = vmatpush1.bf16.msra.mxu0 %v13216_v28  ;;  %1435 = vmatprep.subr.bf16.mxu1 %v13221_v29  ;;  %v13302_v28 = vld [vmem:[#allocation3 + $0xee4] ss:$16 sps:$4 sm:$0xff]   ;;  %v13297_v29 = vld [vmem:[#allocation3 + $0x6e8] ss:$16 sps:$4 sm:$0xff]  }
 0x131   : > { %4221 = vmatprep.subr.bf16.mxu0 %v13224_v30  ;;  %v13300_v30 = vld [vmem:[#allocation3 + $0xee0] ss:$16 sps:$4 sm:$0xff]  }
 0x133   : > { %1436 = vmatpush1.bf16.msra.mxu1 %v13219_v31  ;;  %v13305_v31 = vld [vmem:[#allocation3 + $0x70c] ss:$16 sps:$4 sm:$0xff]  }
 0x134   : > { %4222 = vmatpush1.bf16.msra.mxu0 %v13222_v32  ;;  %1437 = vmatprep.subr.bf16.mxu1 %v13227_v33  ;;  %v13308_v32 = vld [vmem:[#allocation3 + $0xf04] ss:$16 sps:$4 sm:$0xff]   ;;  %v13303_v33 = vld [vmem:[#allocation3 + $0x708] ss:$16 sps:$4 sm:$0xff]  }
 0x135   : > { %4223 = vmatprep.subr.bf16.mxu0 %v13230_v34  ;;  %v13306_v34 = vld [vmem:[#allocation3 + $0xf00] ss:$16 sps:$4 sm:$0xff]  }
 0x137   : > { %1438 = vmatpush1.bf16.msra.mxu1 %v13225_v35  ;;  %v13311_v35 = vld [vmem:[#allocation3 + $0x72c] ss:$16 sps:$4 sm:$0xff]  }
 0x138   : > { %4224 = vmatpush1.bf16.msra.mxu0 %v13228_v36  ;;  %1439 = vmatprep.subr.bf16.mxu1 %v13233_v37  ;;  %v13314_v36 = vld [vmem:[#allocation3 + $0xf24] ss:$16 sps:$4 sm:$0xff]   ;;  %v13309_v37 = vld [vmem:[#allocation3 + $0x728] ss:$16 sps:$4 sm:$0xff]  }
 0x139   : > { %4225 = vmatprep.subr.bf16.mxu0 %v13236_v38  ;;  %v13312_v38 = vld [vmem:[#allocation3 + $0xf20] ss:$16 sps:$4 sm:$0xff]  }
 0x13b   : > { %1440 = vmatpush1.bf16.msra.mxu1 %v13231_v39  ;;  %v13317_v39 = vld [vmem:[#allocation3 + $0x74c] ss:$16 sps:$4 sm:$0xff]  }
 0x13c   : > { %4226 = vmatpush1.bf16.msra.mxu0 %v13234_v40  ;;  %1441 = vmatprep.subr.bf16.mxu1 %v13239_v42  ;;  %v13320_v40 = vld [vmem:[#allocation3 + $0xf44] ss:$16 sps:$4 sm:$0xff]   ;;  %v13315_v42 = vld [vmem:[#allocation3 + $0x748] ss:$16 sps:$4 sm:$0xff]  }
 0x13d   : > { %4227 = vmatprep.subr.bf16.mxu0 %v13242_v43  ;;  %v13318_v43 = vld [vmem:[#allocation3 + $0xf40] ss:$16 sps:$4 sm:$0xff]  }
 0x13f   : > { %1442 = vmatpush1.bf16.msra.mxu1 %v13237_v44  ;;  %v13323_v44 = vld [vmem:[#allocation3 + $0x76c] ss:$16 sps:$4 sm:$0xff]  }
 0x140   : > { %4228 = vmatpush1.bf16.msra.mxu0 %v13240_v26  ;;  %1443 = vmatprep.subr.bf16.mxu1 %v13245_v45  ;;  %v13326_v26 = vld [vmem:[#allocation3 + $0xf64] ss:$16 sps:$4 sm:$0xff]   ;;  %v13321_v45 = vld [vmem:[#allocation3 + $0x768] ss:$16 sps:$4 sm:$0xff]  }
 0x141   : > { %4229 = vmatprep.subr.bf16.mxu0 %v13248_v46  ;;  %v13324_v46 = vld [vmem:[#allocation3 + $0xf60] ss:$16 sps:$4 sm:$0xff]  }
 0x143   : > { %1444 = vmatpush1.bf16.msra.mxu1 %v13243_v50  ;;  %v13329_v50 = vld [vmem:[#allocation3 + $0x78c] ss:$16 sps:$4 sm:$0xff]  }
 0x144   : > { %4230 = vmatpush1.bf16.msra.mxu0 %v13246_v52  ;;  %1445 = vmatprep.subr.bf16.mxu1 %v13251_v56  ;;  %v13332_v52 = vld [vmem:[#allocation3 + $0xf84] ss:$16 sps:$4 sm:$0xff]   ;;  %v13327_v56 = vld [vmem:[#allocation3 + $0x788] ss:$16 sps:$4 sm:$0xff]  }
 0x145   : > { %4231 = vmatprep.subr.bf16.mxu0 %v13254_v58  ;;  %v13330_v58 = vld [vmem:[#allocation3 + $0xf80] ss:$16 sps:$4 sm:$0xff]  }
 0x147   : > { %1446 = vmatpush1.bf16.msra.mxu1 %v13249_v59  ;;  %v13335_v59 = vld [vmem:[#allocation3 + $0x7ac] ss:$16 sps:$4 sm:$0xff]  }
 0x148   : > { %4232 = vmatpush1.bf16.msra.mxu0 %v13252_v60  ;;  %1458 = vmatprep.subr.bf16.mxu1 %v13257_v61  ;;  %v372_v60 = vld [vmem:[#allocation2 + $0x8] sm:$0xe0]  ;;  %v380_v61 = vld [vmem:[#allocation2 + $0x48] sm:$0x1f] }
 0x149   : > { %4244 = vmatprep.subr.bf16.mxu0 %v13260_v62  ;;  %v4382_v62 = vld [vmem:[#allocation2 + $0x28] sm:$0xfe] }
 0x14a   : > { %1448 = vmatmul.mubr.bf16.vlgmr.msra.gmra.mrb[4].mxu1 %v15289_v53  ;;  %v13278_v53 = vld [vmem:[#allocation3 + $0xe64] ss:$16 sps:$4 sm:$0xff]  }
 0x14b   : > { %4234 = vmatmul.mubr.bf16.vlgmr.msra.gmra.mrb[0].mxu0 %v15338_v1  ;;  %1459 = vmatpush1.bf16.msra.mxu1 %v13255_v49  ;;  %v4386_v49 = vld [vmem:[#allocation2 + $0x48] sm:$0xff] }
 0x14c   : > { %4245 = vmatpush1.bf16.msra.mxu0 %v13258_v51  ;;  %1460 = vmatprep.subr.bf16.mxu1 %v13263_v2  ;;  %v13338_v51 = vld [vmem:[#allocation3 + $0xfa4] ss:$16 sps:$4 sm:$0xff]   ;;  %v384_v2 = vpack.c.bf16 %v14873_v0, %v372_v60  ;;  %v13369_v60 = vld [vmem:[#allocation3 + $0x60] ss:$16 sps:$4 sm:$0xff]  }
 0x14d   : > { %4246 = vmatprep.subr.bf16.mxu0 %v13266_v3  ;;  %1490 = vmatprep.mubr.bf16.mxu1 %v15312_v57  ;;  %v13282_v57 = vld [vmem:[#allocation3 + $0xe80] ss:$16 sps:$4 sm:$0xff]   ;;  %v388_v3 = vpack.c.bf16 %v380_v61, %v380_v61 }
 0x14e   : > { %4276 = vmatprep.mubr.bf16.mxu0 %v15342_v27  ;;  %v13372_v61 = vld [vmem:[#allocation3 + $0x1060] ss:$16 sps:$4 sm:$0xff]  }
 0x14f   : > { %1461 = vmatpush1.bf16.msra.mxu1 %v13261_v5  ;;  %v13333_v5 = vld [vmem:[#allocation3 + $0x7a8] ss:$16 sps:$4 sm:$0xff]   ;;  %v13378_v0 = vld [vmem:[#allocation3 + $0x1080] ss:$16 sps:$4 sm:$0xff]  }
 0x150   : > { %4247 = vmatpush1.bf16.msra.mxu0 %v13264_v6  ;;  %1462 = vmatprep.subr.bf16.mxu1 %v13269_v7  ;;  %v13336_v6 = vld [vmem:[#allocation3 + $0xfa0] ss:$16 sps:$4 sm:$0xff]   ;;  %v4394_v7 = vpack.c.bf16 %v4386_v49, %v4382_v62  ;;  %v13377_v62 = vld [vmem:[#allocation3 + $0x84] ss:$16 sps:$4 sm:$0xff]  }
 0x151   : > { %4248 = vmatprep.subr.bf16.mxu0 %v13272_v8  ;;  %v13341_v8 = vld [vmem:[#allocation3 + $0x7cc] ss:$16 sps:$4 sm:$0xff]   ;;  %v13380_v49 = vld [vmem:[#allocation3 + $0x1084] ss:$16 sps:$4 sm:$0xff]  }
 0x153   : > { %1463 = vmatpush1.bf16.msra.mxu1 %v13267_v9  ;;  %v4390_v9 = vld [vmem:[#allocation2 + $0x68] sm:$0x1] }
 0x154   : > { %4249 = vmatpush1.bf16.msra.mxu0 %v13270_v10  ;;  %1464 = vmatprep.subr.bf16.mxu1 %v13275_v19  ;;  %v13344_v10 = vld [vmem:[#allocation3 + $0xfc4] ss:$16 sps:$4 sm:$0xff]   ;;  %v1520_v19 = vshrl.u32 %v384_v2, 16 }
 0x155   : > { %4250 = vmatprep.subr.bf16.mxu0 %v13278_v53  ;;  %v1523_v53 = vshll.u32 %v384_v2, 16  ;;  %v13383_v2 = vld [vmem:[#allocation3 + $0xa4] ss:$16 sps:$4 sm:$0xff]  }
 0x157   : > { %1465 = vmatpush1.bf16.msra.mxu1 %v13273_v21  ;;  %v1528_v21 = vshrl.u32 %v388_v3, 16 }
 0x158   : > { %4251 = vmatpush1.bf16.msra.mxu0 %v13276_v11  ;;  %1466 = vmatprep.subr.bf16.mxu1 %v13281_v12  ;;  %v13339_v11 = vld [vmem:[#allocation3 + $0x7c8] ss:$16 sps:$4 sm:$0xff]   ;;  %v1531_v12 = vshll.u32 %v388_v3, 16  ;;  %v13386_v3 = vld [vmem:[#allocation3 + $0x10a4] ss:$16 sps:$4 sm:$0xff]  }
 0x159   : > { %4252 = vmatprep.subr.bf16.mxu0 %v13284_v13  ;;  %v4398_v13 = vpack.c.bf16 %v4390_v9, %v4390_v9  ;;  %v13387_v9 = vld [vmem:[#allocation3 + $0xc0] ss:$16 sps:$4 sm:$0xff]  }
 0x15b   : > { %1467 = vmatpush1.bf16.msra.mxu1 %v13279_v14  ;;  %v4546_v14 = vshll.u32 %v4394_v7, 16 }
 0x15c   : > { %4253 = vmatpush1.bf16.msra.mxu0 %v13282_v57  ;;  %1468 = vmatprep.subr.bf16.mxu1 %v13287_v15  ;;  %v13342_v57 = vld [vmem:[#allocation3 + $0xfc0] ss:$16 sps:$4 sm:$0xff]   ;;  %v13347_v15 = vld [vmem:[#allocation3 + $0x7ec] ss:$16 sps:$4 sm:$0xff]  }
 0x15d   : > { %4254 = vmatprep.subr.bf16.mxu0 %v13290_v16  ;;  %v13350_v16 = vld [vmem:[#allocation3 + $0xfe4] ss:$16 sps:$4 sm:$0xff]  }
 0x15f   : > { %1469 = vmatpush1.bf16.msra.mxu1 %v13285_v17  ;;  %v13345_v17 = vld [vmem:[#allocation3 + $0x7e8] ss:$16 sps:$4 sm:$0xff]  }
 0x160   : > { %4255 = vmatpush1.bf16.msra.mxu0 %v13288_v18  ;;  %1470 = vmatprep.subr.bf16.mxu1 %v13293_v20  ;;  %v1522_v18 = vrot.slane %v1520_v19, 2  ;;  %v1525_v20 = vrot.slane %v1523_v53, 3  ;;  %v13395_v19 = vld [vmem:[#allocation3 + $0xe4] ss:$16 sps:$4 sm:$0xff]  }
 0x161   : > { %4256 = vmatprep.subr.bf16.mxu0 %v13296_v22  ;;  %v1530_v22 = vrot.slane %v1528_v21, 2  ;;  %v13398_v53 = vld [vmem:[#allocation3 + $0x10e4] ss:$16 sps:$4 sm:$0xff]   ;;  %v13393_v21 = vld [vmem:[#allocation3 + $0xe0] ss:$16 sps:$4 sm:$0xff]  }
 0x163   : > { %1471 = vmatpush1.bf16.msra.mxu1 %v13291_v23  ;;  %v1533_v23 = vrot.slane %v1531_v12, 3  ;;  %v13401_v12 = vld [vmem:[#allocation3 + $0x104] ss:$16 sps:$4 sm:$0xff]  }
 0x164   : > { %4257 = vmatpush1.bf16.msra.mxu0 %v13294_v24  ;;  %1472 = vmatprep.subr.bf16.mxu1 %v13299_v25  ;;  %v4544_v24 = vshrl.u32 %v4394_v7, 16  ;;  %v4548_v25 = vrot.slane %v4546_v14, 1  ;;  %v13389_v7 = vld [vmem:[#allocation3 + $0xc4] ss:$16 sps:$4 sm:$0xff]   ;;  %v13399_v14 = vld [vmem:[#allocation3 + $0x100] ss:$16 sps:$4 sm:$0xff]  }
 0x165   : > { %4258 = vmatprep.subr.bf16.mxu0 %v13302_v28  ;;  %v4551_v28 = vshll.u32 %v4398_v13, 16  ;;  %v13404_v13 = vld [vmem:[#allocation3 + $0x1104] ss:$16 sps:$4 sm:$0xff]  }
 0x167   : > { %1473 = vmatpush1.bf16.msra.mxu1 %v13297_v29  ;;  %v13348_v29 = vld [vmem:[#allocation3 + $0xfe0] ss:$16 sps:$4 sm:$0xff]  }
 0x168   : > { %4259 = vmatpush1.bf16.msra.mxu0 %v13300_v30  ;;  %1474 = vmatprep.subr.bf16.mxu1 %v13305_v31  ;;  %v13353_v30 = vld [vmem:[#allocation3 + $0x4] ss:$16 sps:$4 sm:$0xff]  }
 0x169   : > { %4260 = vmatprep.subr.bf16.mxu0 %v13308_v32  ;;  %v13356_v31 = vld [vmem:[#allocation3 + $0x1004] ss:$16 sps:$4 sm:$0xff]   ;;  %v13351_v32 = vld [vmem:[#allocation3] ss:$16 sps:$4 sm:$0xff]  }
 0x16b   : > { %1475 = vmatpush1.bf16.msra.mxu1 %v13303_v33  ;;  %v15348_v33 = vld [vmem:[#allocation2 + $0x30] sm:$0xff] }
 0x16c   : > { %4261 = vmatpush1.bf16.msra.mxu0 %v13306_v34  ;;  %1476 = vmatprep.subr.bf16.mxu1 %v13311_v35  ;;  %v14875_v34 = vld [vmem:[#allocation2 + $0x50] sm:$0xff] }
 0x16d   : > { %4262 = vmatprep.subr.bf16.mxu0 %v13314_v36  ;;  %v15351_v35 = vpack.c.bf16 %v14875_v34, %v15348_v33  ;;  %v13354_v36 = vld [vmem:[#allocation3 + $0x1000] ss:$16 sps:$4 sm:$0xff]   ;;  %v13428_v34 = vld [vmem:[#allocation3 + $0x1184] ss:$16 sps:$4 sm:$0xff]  }
 0x16f   : > { %1477 = vmatpush1.bf16.msra.mxu1 %v13309_v37  ;;  %v13359_v37 = vld [vmem:[#allocation3 + $0x24] ss:$16 sps:$4 sm:$0xff]  }
 0x170   : > { %4263 = vmatpush1.bf16.msra.mxu0 %v13312_v38  ;;  %1478 = vmatprep.subr.bf16.mxu1 %v13317_v39  ;;  %v1526_v38 = vor.u32 %v1525_v20, %v1522_v18  ;;  %v1534_v39 = vor.u32 %v1533_v23, %v1530_v22  ;;  %v13408_v18 = vld [vmem:[#allocation3 + $0x1120] ss:$16 sps:$4 sm:$0xff]   ;;  %v13413_v20 = vld [vmem:[#allocation3 + $0x144] ss:$16 sps:$4 sm:$0xff]  }
 0x171   : > { %4264 = vmatprep.subr.bf16.mxu0 %v13320_v40  ;;  %v4549_v40 = vor.u32 %v4548_v25, %v4544_v24  ;;  %v13416_v22 = vld [vmem:[#allocation3 + $0x1144] ss:$16 sps:$4 sm:$0xff]   ;;  %v13411_v23 = vld [vmem:[#allocation3 + $0x140] ss:$16 sps:$4 sm:$0xff]  }
 0x172   : > { %v13414_v24 = vld [vmem:[#allocation3 + $0x1140] ss:$16 sps:$4 sm:$0xff]   ;;  %v13419_v25 = vld [vmem:[#allocation3 + $0x164] ss:$16 sps:$4 sm:$0xff]  }
 0x173   : > { %1479 = vmatpush1.bf16.msra.mxu1 %v13315_v42  ;;  %v4553_v42 = vrot.slane %v4551_v28, 1  ;;  %v13422_v28 = vld [vmem:[#allocation3 + $0x1164] ss:$16 sps:$4 sm:$0xff]  }
 0x174   : > { %4265 = vmatpush1.bf16.msra.mxu0 %v13318_v43  ;;  %1480 = vmatprep.subr.bf16.mxu1 %v13323_v44  ;;  %v13362_v43 = vld [vmem:[#allocation3 + $0x1024] ss:$16 sps:$4 sm:$0xff]   ;;  %v13357_v44 = vld [vmem:[#allocation3 + $0x20] ss:$16 sps:$4 sm:$0xff]  }
 0x175   : > { %4266 = vmatprep.subr.bf16.mxu0 %v13326_v26  ;;  %v15356_v26 = vsel %vm1501_vm2, %v1526_v38, %v1534_v39  ;;  %v4385_v39 = vld [vmem:[#allocation2 + $0x40] sm:$0xff] }
 0x177   : > { %1481 = vmatpush1.bf16.msra.mxu1 %v13321_v45  ;;  %v15359_v45 = vsel %vm4530_vm3, %v4549_v40, %v4553_v42  ;;  %v13423_v40 = vld [vmem:[#allocation3 + $0x180] ss:$16 sps:$4 sm:$0xff]  }
 0x178   : > { %4267 = vmatpush1.bf16.msra.mxu0 %v13324_v46  ;;  %1482 = vmatprep.subr.bf16.mxu1 %v13329_v50  ;;  %v13360_v46 = vld [vmem:[#allocation3 + $0x1020] ss:$16 sps:$4 sm:$0xff]   ;;  %v13365_v50 = vld [vmem:[#allocation3 + $0x44] ss:$16 sps:$4 sm:$0xff]  }
 0x179   : > { %4268 = vmatprep.subr.bf16.mxu0 %v13332_v52  ;;  %v13368_v52 = vld [vmem:[#allocation3 + $0x1044] ss:$16 sps:$4 sm:$0xff]   ;;  %v13426_v42 = vld [vmem:[#allocation3 + $0x1180] ss:$16 sps:$4 sm:$0xff]  }
 0x17b   : > { %1483 = vmatpush1.bf16.msra.mxu1 %v13327_v56  ;;  %v13366_v56 = vld [vmem:[#allocation3 + $0x1040] ss:$16 sps:$4 sm:$0xff]  }
 0x17c   : > { %4269 = vmatpush1.bf16.msra.mxu0 %v13330_v58  ;;  %1484 = vmatprep.subr.bf16.mxu1 %v13335_v59  ;;  %v13371_v58 = vld [vmem:[#allocation3 + $0x64] ss:$16 sps:$4 sm:$0xff]  }
 0x17d   : > { %4270 = vmatprep.subr.bf16.mxu0 %v13338_v51  ;;  %v13374_v59 = vld [vmem:[#allocation3 + $0x1064] ss:$16 sps:$4 sm:$0xff]   ;;  %v13375_v51 = vld [vmem:[#allocation3 + $0x80] ss:$16 sps:$4 sm:$0xff]  }
 0x17f   : > { %1485 = vmatpush1.bf16.msra.mxu1 %v13333_v5  ;;  %v13381_v5 = vld [vmem:[#allocation3 + $0xa0] ss:$16 sps:$4 sm:$0xff]  }
 0x180   : > { %4271 = vmatpush1.bf16.msra.mxu0 %v13336_v6  ;;  %1486 = vmatprep.subr.bf16.mxu1 %v13341_v8  ;;  %v13384_v6 = vld [vmem:[#allocation3 + $0x10a0] ss:$16 sps:$4 sm:$0xff]   ;;  %v13392_v8 = vld [vmem:[#allocation3 + $0x10c4] ss:$16 sps:$4 sm:$0xff]  }
 0x181   : > { %4272 = vmatprep.subr.bf16.mxu0 %v13344_v10  ;;  %v13390_v10 = vld [vmem:[#allocation3 + $0x10c0] ss:$16 sps:$4 sm:$0xff]  }
 0x183   : > { %1487 = vmatpush1.bf16.msra.mxu1 %v13339_v11  ;;  %v13396_v11 = vld [vmem:[#allocation3 + $0x10e0] ss:$16 sps:$4 sm:$0xff]  }
 0x184   : > { %4273 = vmatpush1.bf16.msra.mxu0 %v13342_v57  ;;  %1488 = vmatprep.subr.bf16.mxu1 %v13347_v15  ;;  %v13402_v57 = vld [vmem:[#allocation3 + $0x1100] ss:$16 sps:$4 sm:$0xff]   ;;  %v13407_v15 = vld [vmem:[#allocation3 + $0x124] ss:$16 sps:$4 sm:$0xff]  }
 0x185   : > { %4274 = vmatprep.subr.bf16.mxu0 %v13350_v16  ;;  %v13410_v16 = vld [vmem:[#allocation3 + $0x1124] ss:$16 sps:$4 sm:$0xff]  }
 0x187   : > { %1489 = vmatpush1.bf16.msra.mxu1 %v13345_v17  ;;  %v13405_v17 = vld [vmem:[#allocation3 + $0x120] ss:$16 sps:$4 sm:$0xff]  }
 0x188   : > { %4275 = vmatpush1.bf16.msra.mxu0 %v13348_v29  ;;  %2214 = vmatprep.subr.bf16.mxu1 %v13353_v30  ;;  %v13417_v29 = vld [vmem:[#allocation3 + $0x160] ss:$16 sps:$4 sm:$0xff]  }
 0x189   : > { %5223 = vmatprep.subr.bf16.mxu0 %v13356_v31  ;;  %v13420_v30 = vld [vmem:[#allocation3 + $0x1160] ss:$16 sps:$4 sm:$0xff]   ;;  %v371_v31 = vld [vmem:[#allocation2] sm:$0xe0] }
 0x18a   : > { %1491 = vmatmul.mubr.bf16.vlgmr.msra.gmra.mrb[4].mxu1 %v15322_v47  ;;  %v13363_v47 = vld [vmem:[#allocation3 + $0x40] ss:$16 sps:$4 sm:$0xff]   ;;  %v383_v38 = vpack.c.bf16 %v15335_v63, %v371_v31  ;;  %v14876_v63 = vld [vmem:[#allocation2 + $0x38] sm:$0xff] }
 0x18b   : > { %4277 = vmatmul.mubr.bf16.vlgmr.msra.gmra.mrb[0].mxu0 %v15351_v35  ;;  %2215 = vmatpush1.bf16.msra.mxu1 %v13351_v32  ;;  %v13425_v32 = vld [vmem:[#allocation3 + $0x184] ss:$16 sps:$4 sm:$0xff]  }
 0x18c   : > { %5224 = vmatpush1.bf16.msra.mxu0 %v13354_v36  ;;  %2216 = vmatprep.subr.bf16.mxu1 %v13359_v37  ;;  %v379_v36 = vld [vmem:[#allocation2 + $0x40] sm:$0x1f] }
 0x18d   : > { %5225 = vmatprep.subr.bf16.mxu0 %v13362_v43  ;;  %2246 = vmatprep.mubr.bf16.mxu1 %v15356_v26  ;;  %v4381_v37 = vld [vmem:[#allocation2 + $0x20] sm:$0xfe]  ;;  %v374_v43 = vld [vmem:[#allocation2 + $0x18] sm:$0xe0] }
 0x18e   : > { %5255 = vmatprep.mubr.bf16.mxu0 %v15359_v45 }
 0x18f   : > { %2217 = vmatpush1.bf16.msra.mxu1 %v13357_v44  ;;  %v13431_v44 = vld [vmem:[#allocation3 + $0x1a4] ss:$16 sps:$4 sm:$0xff]  }
 0x190   : > { %5226 = vmatpush1.bf16.msra.mxu0 %v13360_v46  ;;  %2218 = vmatprep.subr.bf16.mxu1 %v13365_v50  ;;  %v13434_v46 = vld [vmem:[#allocation3 + $0x11a4] ss:$16 sps:$4 sm:$0xff]   ;;  %v387_v50 = vpack.c.bf16 %v379_v36, %v379_v36 }
 0x191   : > { %5227 = vmatprep.subr.bf16.mxu0 %v13368_v52  ;;  %v382_v52 = vld [vmem:[#allocation2 + $0x58] sm:$0x1f] }
 0x193   : > { %2219 = vmatpush1.bf16.msra.mxu1 %v13363_v47  ;;  %v4384_v47 = vld [vmem:[#allocation2 + $0x38] sm:$0xfe] }
 0x194   : > { %5228 = vmatpush1.bf16.msra.mxu0 %v13366_v56  ;;  %2220 = vmatprep.subr.bf16.mxu1 %v13371_v58  ;;  %v4393_v56 = vpack.c.bf16 %v4385_v39, %v4381_v37  ;;  %v4388_v58 = vld [vmem:[#allocation2 + $0x58] sm:$0xff]  ;;  %v13449_v39 = vld [vmem:[#allocation3 + $0x204] ss:$16 sps:$4 sm:$0xff]  }
 0x195   : > { %5229 = vmatprep.subr.bf16.mxu0 %v13374_v59  ;;  %v1503_v59 = vshrl.u32 %v383_v38, 16 }
 0x197   : > { %2221 = vmatpush1.bf16.msra.mxu1 %v13369_v60  ;;  %v4389_v60 = vld [vmem:[#allocation2 + $0x60] sm:$0x1] }
 0x198   : > { %5230 = vmatpush1.bf16.msra.mxu0 %v13372_v61  ;;  %2222 = vmatprep.subr.bf16.mxu1 %v13377_v62  ;;  %v13429_v61 = vld [vmem:[#allocation3 + $0x1a0] ss:$16 sps:$4 sm:$0xff]   ;;  %v1506_v62 = vshll.u32 %v383_v38, 16 }
 0x199   : > { %5231 = vmatprep.subr.bf16.mxu0 %v13380_v49  ;;  %v386_v49 = vpack.c.bf16 %v14876_v63, %v374_v43  ;;  %v13458_v63 = vld [vmem:[#allocation3 + $0x1224] ss:$16 sps:$4 sm:$0xff]  }
 0x19b   : > { %2223 = vmatpush1.bf16.msra.mxu1 %v13375_v51  ;;  %v390_v51 = vpack.c.bf16 %v382_v52, %v382_v52  ;;  %v13450_v52 = vld [vmem:[#allocation3 + $0x1200] ss:$16 sps:$4 sm:$0xff]  }
 0x19c   : > { %5232 = vmatpush1.bf16.msra.mxu0 %v13378_v0  ;;  %2224 = vmatprep.subr.bf16.mxu1 %v13383_v2  ;;  %v13432_v0 = vld [vmem:[#allocation3 + $0x11a0] ss:$16 sps:$4 sm:$0xff]   ;;  %v13437_v2 = vld [vmem:[#allocation3 + $0x1c4] ss:$16 sps:$4 sm:$0xff]  }
 0x19d   : > { %5233 = vmatprep.subr.bf16.mxu0 %v13386_v3  ;;  %v1511_v3 = vshrl.u32 %v387_v50, 16 }
 0x19f   : > { %2225 = vmatpush1.bf16.msra.mxu1 %v13381_v5  ;;  %v4396_v5 = vpack.c.bf16 %v4388_v58, %v4384_v47 }
 0x1a0   : > { %5234 = vmatpush1.bf16.msra.mxu0 %v13384_v6  ;;  %2226 = vmatprep.subr.bf16.mxu1 %v13389_v7  ;;  %v1514_v6 = vshll.u32 %v387_v50, 16  ;;  %v4397_v7 = vpack.c.bf16 %v4389_v60, %v4389_v60  ;;  %v13447_v50 = vld [vmem:[#allocation3 + $0x200] ss:$16 sps:$4 sm:$0xff]  }
 0x1a1   : > { %5235 = vmatprep.subr.bf16.mxu0 %v13392_v8  ;;  %v4534_v8 = vshll.u32 %v4393_v56, 16  ;;  %v4568_v36 = vshrl.u32 %v4396_v5, 16 }
 0x1a3   : > { %2227 = vmatpush1.bf16.msra.mxu1 %v13387_v9  ;;  %v4392_v9 = vld [vmem:[#allocation2 + $0x78] sm:$0x1] }
 0x1a4   : > { %5236 = vmatpush1.bf16.msra.mxu0 %v13390_v10  ;;  %2228 = vmatprep.subr.bf16.mxu1 %v13395_v19  ;;  %v13440_v10 = vld [vmem:[#allocation3 + $0x11c4] ss:$16 sps:$4 sm:$0xff]   ;;  %v1505_v19 = vrot.slane %v1503_v59, 2 }
 0x1a5   : > { %5237 = vmatprep.subr.bf16.mxu0 %v13398_v53  ;;  %v13435_v53 = vld [vmem:[#allocation3 + $0x1c0] ss:$16 sps:$4 sm:$0xff]  }
 0x1a7   : > { %2229 = vmatpush1.bf16.msra.mxu1 %v13393_v21  ;;  %v13438_v21 = vld [vmem:[#allocation3 + $0x11c0] ss:$16 sps:$4 sm:$0xff]  }
 0x1a8   : > { %5238 = vmatpush1.bf16.msra.mxu0 %v13396_v11  ;;  %2230 = vmatprep.subr.bf16.mxu1 %v13401_v12  ;;  %v1508_v11 = vrot.slane %v1506_v62, 3  ;;  %v1554_v12 = vshrl.u32 %v386_v49, 16  ;;  %v13455_v62 = vld [vmem:[#allocation3 + $0x224] ss:$16 sps:$4 sm:$0xff]  }
 0x1a9   : > { %5239 = vmatprep.subr.bf16.mxu0 %v13404_v13  ;;  %v1557_v13 = vshll.u32 %v386_v49, 16 }
 0x1ab   : > { %2231 = vmatpush1.bf16.msra.mxu1 %v13399_v14  ;;  %v1562_v14 = vshrl.u32 %v390_v51, 16  ;;  %v1559_v31 = vrot.slane %v1557_v13, 3  ;;  %v13479_v13 = vld [vmem:[#allocation3 + $0x2a4] ss:$16 sps:$4 sm:$0xff]  }
 0x1ac   : > { %5240 = vmatpush1.bf16.msra.mxu0 %v13402_v57  ;;  %2232 = vmatprep.subr.bf16.mxu1 %v13407_v15  ;;  %v13443_v57 = vld [vmem:[#allocation3 + $0x1e4] ss:$16 sps:$4 sm:$0xff]   ;;  %v4532_v15 = vshrl.u32 %v4393_v56, 16 }
 0x1ad   : > { %5241 = vmatprep.subr.bf16.mxu0 %v13410_v16  ;;  %v1565_v16 = vshll.u32 %v390_v51, 16 }
 0x1af   : > { %2233 = vmatpush1.bf16.msra.mxu1 %v13405_v17  ;;  %v4400_v17 = vpack.c.bf16 %v4392_v9, %v4392_v9  ;;  %v13470_v9 = vld [vmem:[#allocation3 + $0x1264] ss:$16 sps:$4 sm:$0xff]  }
 0x1b0   : > { %5242 = vmatpush1.bf16.msra.mxu0 %v13408_v18  ;;  %2234 = vmatprep.subr.bf16.mxu1 %v13413_v20  ;;  %v4570_v18 = vshll.u32 %v4396_v5, 16  ;;  %v1513_v20 = vrot.slane %v1511_v3, 2  ;;  %v13461_v3 = vld [vmem:[#allocation3 + $0x244] ss:$16 sps:$4 sm:$0xff]  }
 0x1b1   : > { %5243 = vmatprep.subr.bf16.mxu0 %v13416_v22  ;;  %v1516_v22 = vrot.slane %v1514_v6, 3  ;;  %v4575_v38 = vshll.u32 %v4400_v17, 16  ;;  %v13464_v5 = vld [vmem:[#allocation3 + $0x1244] ss:$16 sps:$4 sm:$0xff]   ;;  %v13459_v6 = vld [vmem:[#allocation3 + $0x240] ss:$16 sps:$4 sm:$0xff]  }
 0x1b2   : > { %v4572_v37 = vrot.slane %v4570_v18, 1  ;;  %v13488_v17 = vld [vmem:[#allocation3 + $0x12c4] ss:$16 sps:$4 sm:$0xff]   ;;  %v13483_v18 = vld [vmem:[#allocation3 + $0x2c0] ss:$16 sps:$4 sm:$0xff]  }
 0x1b3   : > { %2235 = vmatpush1.bf16.msra.mxu1 %v13411_v23  ;;  %v4536_v23 = vrot.slane %v4534_v8, 1  ;;  %v4577_v59 = vrot.slane %v4575_v38, 1  ;;  %v13467_v8 = vld [vmem:[#allocation3 + $0x264] ss:$16 sps:$4 sm:$0xff]  }
 0x1b4   : > { %5244 = vmatpush1.bf16.msra.mxu0 %v13414_v24  ;;  %2236 = vmatprep.subr.bf16.mxu1 %v13419_v25  ;;  %v4539_v24 = vshll.u32 %v4397_v7, 16  ;;  %v13446_v25 = vld [vmem:[#allocation3 + $0x11e4] ss:$16 sps:$4 sm:$0xff]   ;;  %v4573_v58 = vor.u32 %v4572_v37, %v4568_v36  ;;  %v13462_v7 = vld [vmem:[#allocation3 + $0x1240] ss:$16 sps:$4 sm:$0xff]  }
 0x1b5   : > { %5245 = vmatprep.subr.bf16.mxu0 %v13422_v28  ;;  %v13441_v28 = vld [vmem:[#allocation3 + $0x1e0] ss:$16 sps:$4 sm:$0xff]   ;;  %v4537_v43 = vor.u32 %v4536_v23, %v4532_v15  ;;  %v13494_v23 = vld [vmem:[#allocation3 + $0x12e4] ss:$16 sps:$4 sm:$0xff]  }
 0x1b6   : > { %v15376_v51 = vsel %vm4530_vm3, %v4573_v58, %v4577_v59  ;;  %v13480_v15 = vld [vmem:[#allocation3 + $0x12a0] ss:$16 sps:$4 sm:$0xff]   ;;  %v13509_v38 = vld [vmem:[#allocation3 + $0x344] ss:$16 sps:$4 sm:$0xff]  }
 0x1b7   : > { %2237 = vmatpush1.bf16.msra.mxu1 %v13417_v29  ;;  %v13444_v29 = vld [vmem:[#allocation3 + $0x11e0] ss:$16 sps:$4 sm:$0xff]   ;;  %v13524_v58 = vld [vmem:[#allocation3 + $0x1384] ss:$16 sps:$4 sm:$0xff]  }
 0x1b8   : > { %5246 = vmatpush1.bf16.msra.mxu0 %v13420_v30  ;;  %2238 = vmatprep.subr.bf16.mxu1 %v13425_v32  ;;  %v1556_v30 = vrot.slane %v1554_v12, 2  ;;  %v1564_v32 = vrot.slane %v1562_v14, 2  ;;  %v13474_v12 = vld [vmem:[#allocation3 + $0x1280] ss:$16 sps:$4 sm:$0xff]   ;;  %v13482_v14 = vld [vmem:[#allocation3 + $0x12a4] ss:$16 sps:$4 sm:$0xff]  }
 0x1b9   : > { %5247 = vmatprep.subr.bf16.mxu0 %v13428_v34  ;;  %v1567_v34 = vrot.slane %v1565_v16, 3  ;;  %v13485_v16 = vld [vmem:[#allocation3 + $0x2c4] ss:$16 sps:$4 sm:$0xff]   ;;  %v13501_v36 = vld [vmem:[#allocation3 + $0x320] ss:$16 sps:$4 sm:$0xff]  }
 0x1ba   : > { %v1560_v47 = vor.u32 %v1559_v31, %v1556_v30  ;;  %v13495_v30 = vld [vmem:[#allocation3 + $0x300] ss:$16 sps:$4 sm:$0xff]  }
 0x1bb   : > { %2239 = vmatpush1.bf16.msra.mxu1 %v13423_v40  ;;  %v1509_v40 = vor.u32 %v1508_v11, %v1505_v19  ;;  %v1568_v56 = vor.u32 %v1567_v34, %v1564_v32  ;;  %v13468_v19 = vld [vmem:[#allocation3 + $0x1260] ss:$16 sps:$4 sm:$0xff]   ;;  %v13503_v32 = vld [vmem:[#allocation3 + $0x324] ss:$16 sps:$4 sm:$0xff]  }
 0x1bc   : > { %5248 = vmatpush1.bf16.msra.mxu0 %v13426_v42  ;;  %2240 = vmatprep.subr.bf16.mxu1 %v13431_v44  ;;  %v1517_v42 = vor.u32 %v1516_v22, %v1513_v20  ;;  %v4541_v44 = vrot.slane %v4539_v24, 1  ;;  %v13471_v11 = vld [vmem:[#allocation3 + $0x280] ss:$16 sps:$4 sm:$0xff]   ;;  %v13491_v22 = vld [vmem:[#allocation3 + $0x2e4] ss:$16 sps:$4 sm:$0xff]  }
 0x1bd   : > { %5249 = vmatprep.subr.bf16.mxu0 %v13434_v46  ;;  %v13452_v46 = vld [vmem:[#allocation3 + $0x1204] ss:$16 sps:$4 sm:$0xff]   ;;  %v15373_v49 = vsel %vm1501_vm2, %v1560_v47, %v1568_v56  ;;  %v13486_v20 = vld [vmem:[#allocation3 + $0x12c0] ss:$16 sps:$4 sm:$0xff]  }
 0x1be   : > { %v15365_v60 = vsel %vm1501_vm2, %v1509_v40, %v1517_v42  ;;  %v13489_v24 = vld [vmem:[#allocation3 + $0x2e0] ss:$16 sps:$4 sm:$0xff]   ;;  %v13506_v34 = vld [vmem:[#allocation3 + $0x1324] ss:$16 sps:$4 sm:$0xff]  }
 0x1bf   : > { %2241 = vmatpush1.bf16.msra.mxu1 %v13429_v61  ;;  %v15368_v61 = vsel %vm4530_vm3, %v4537_v43, %v4541_v44  ;;  %v13498_v31 = vld [vmem:[#allocation3 + $0x1300] ss:$16 sps:$4 sm:$0xff]   ;;  %v13515_v43 = vld [vmem:[#allocation3 + $0x364] ss:$16 sps:$4 sm:$0xff]  }
 0x1c0   : > { %5250 = vmatpush1.bf16.msra.mxu0 %v13432_v0  ;;  %2242 = vmatprep.subr.bf16.mxu1 %v13437_v2  ;;  %v13453_v0 = vld [vmem:[#allocation3 + $0x220] ss:$16 sps:$4 sm:$0xff]   ;;  %v13518_v44 = vld [vmem:[#allocation3 + $0x1364] ss:$16 sps:$4 sm:$0xff]  }
 0x1c1   : > { %5251 = vmatprep.subr.bf16.mxu0 %v13440_v10  ;;  %v13456_v2 = vld [vmem:[#allocation3 + $0x1220] ss:$16 sps:$4 sm:$0xff]   ;;  %v13521_v56 = vld [vmem:[#allocation3 + $0x384] ss:$16 sps:$4 sm:$0xff]  }
 0x1c2   : > { %v13465_v10 = vld [vmem:[#allocation3 + $0x260] ss:$16 sps:$4 sm:$0xff]  }
 0x1c3   : > { %2243 = vmatpush1.bf16.msra.mxu1 %v13435_v53  ;;  %v13473_v53 = vld [vmem:[#allocation3 + $0x284] ss:$16 sps:$4 sm:$0xff]   ;;  %v13504_v37 = vld [vmem:[#allocation3 + $0x1320] ss:$16 sps:$4 sm:$0xff]  }
 0x1c4   : > { %5252 = vmatpush1.bf16.msra.mxu0 %v13438_v21  ;;  %2244 = vmatprep.subr.bf16.mxu1 %v13443_v57  ;;  %v13476_v21 = vld [vmem:[#allocation3 + $0x1284] ss:$16 sps:$4 sm:$0xff]   ;;  %v13477_v57 = vld [vmem:[#allocation3 + $0x2a0] ss:$16 sps:$4 sm:$0xff]  }
 0x1c5   : > { %5253 = vmatprep.subr.bf16.mxu0 %v13446_v25  ;;  %v13492_v25 = vld [vmem:[#allocation3 + $0x12e0] ss:$16 sps:$4 sm:$0xff]  }
 0x1c6   : > { %v13507_v40 = vld [vmem:[#allocation3 + $0x340] ss:$16 sps:$4 sm:$0xff]  }
 0x1c7   : > { %2245 = vmatpush1.bf16.msra.mxu1 %v13441_v28  ;;  %v13497_v28 = vld [vmem:[#allocation3 + $0x304] ss:$16 sps:$4 sm:$0xff]   ;;  %v13510_v42 = vld [vmem:[#allocation3 + $0x1340] ss:$16 sps:$4 sm:$0xff]  }
 0x1c8   : > { %5254 = vmatpush1.bf16.msra.mxu0 %v13444_v29  ;;  %2257 = vmatprep.subr.bf16.mxu1 %v13449_v39  ;;  %v13500_v29 = vld [vmem:[#allocation3 + $0x1304] ss:$16 sps:$4 sm:$0xff]   ;;  %v13516_v47 = vld [vmem:[#allocation3 + $0x1360] ss:$16 sps:$4 sm:$0xff]  }
 0x1c9   : > { %5266 = vmatprep.subr.bf16.mxu0 %v13452_v46  ;;  %v13512_v39 = vld [vmem:[#allocation3 + $0x1344] ss:$16 sps:$4 sm:$0xff]  }
 0x1ca   : > { %2247 = vmatmul.mubr.bf16.vlgmr.msra.gmra.mrb[0].mxu1 %v15365_v60  ;;  %v373_v46 = vld [vmem:[#allocation2 + $0x10] sm:$0xe0] }
 0x1cb   : > { %5256 = vmatmul.mubr.bf16.vlgmr.msra.gmra.mrb[0].mxu0 %v15368_v61  ;;  %2258 = vmatpush1.bf16.msra.mxu1 %v13447_v50  ;;  %v381_v50 = vld [vmem:[#allocation2 + $0x50] sm:$0x1f] }
 0x1cc   : > { %5267 = vmatpush1.bf16.msra.mxu0 %v13450_v52  ;;  %2259 = vmatprep.subr.bf16.mxu1 %v13455_v62  ;;  %v13513_v52 = vld [vmem:[#allocation3 + $0x360] ss:$16 sps:$4 sm:$0xff]  }
 0x1cd   : > { %5268 = vmatprep.subr.bf16.mxu0 %v13458_v63  ;;  %2289 = vmatprep.mubr.bf16.mxu1 %v15373_v49  ;;  %v4383_v59 = vld [vmem:[#allocation2 + $0x30] sm:$0xfe] }
 0x1ce   : > { %5298 = vmatprep.mubr.bf16.mxu0 %v15376_v51  ;;  %v4387_v62 = vld [vmem:[#allocation2 + $0x50] sm:$0xff] }
 0x1cf   : > { %2260 = vmatpush1.bf16.msra.mxu1 %v13453_v0  ;;  %v13519_v63 = vld [vmem:[#allocation3 + $0x380] ss:$16 sps:$4 sm:$0xff]   ;;  %v385_v0 = vpack.c.bf16 %v15348_v33, %v373_v46 }
 0x1d0   : > { %5269 = vmatpush1.bf16.msra.mxu0 %v13456_v2  ;;  %2261 = vmatprep.subr.bf16.mxu1 %v13461_v3  ;;  %v389_v2 = vpack.c.bf16 %v381_v50, %v381_v50  ;;  %v13522_v3 = vld [vmem:[#allocation3 + $0x1380] ss:$16 sps:$4 sm:$0xff]  }
 0x1d1   : > { %5270 = vmatprep.subr.bf16.mxu0 %v13464_v5  ;;  %v4391_v5 = vld [vmem:[#allocation2 + $0x70] sm:$0x1] }
 0x1d3   : > { %2262 = vmatpush1.bf16.msra.mxu1 %v13459_v6  ;;  %v4395_v6 = vpack.c.bf16 %v4387_v62, %v4383_v59  ;;  %v13551_v59 = vld [vmem:[#allocation3 + $0x2c] ss:$16 sps:$4 sm:$0xff]   ;;  %v13554_v62 = vld [vmem:[#allocation3 + $0x1424] ss:$16 sps:$4 sm:$0xff]  }
 0x1d4   : > { %5271 = vmatpush1.bf16.msra.mxu0 %v13462_v7  ;;  %2263 = vmatprep.subr.bf16.mxu1 %v13467_v8  ;;  %v13527_v7 = vld [vmem:[#allocation3 + $0x3a4] ss:$16 sps:$4 sm:$0xff]  }
 0x1d5   : > { %5272 = vmatprep.subr.bf16.mxu0 %v13470_v9  ;;  %v13530_v8 = vld [vmem:[#allocation3 + $0x13a4] ss:$16 sps:$4 sm:$0xff]   ;;  %v1537_v9 = vshrl.u32 %v385_v0, 16  ;;  %v4558_v33 = vshll.u32 %v4395_v6, 16 }
 0x1d7   : > { %2264 = vmatpush1.bf16.msra.mxu1 %v13465_v10  ;;  %v1540_v10 = vshll.u32 %v385_v0, 16  ;;  %v13549_v0 = vld [vmem:[#allocation3 + $0x28] ss:$16 sps:$4 sm:$0xff]  }
 0x1d8   : > { %5273 = vmatpush1.bf16.msra.mxu0 %v13468_v19  ;;  %2265 = vmatprep.subr.bf16.mxu1 %v13473_v53  ;;  %v1545_v19 = vshrl.u32 %v389_v2, 16  ;;  %v1548_v53 = vshll.u32 %v389_v2, 16  ;;  %v13552_v2 = vld [vmem:[#allocation3 + $0x1420] ss:$16 sps:$4 sm:$0xff]  }
 0x1d9   : > { %5274 = vmatprep.subr.bf16.mxu0 %v13476_v21  ;;  %v4399_v21 = vpack.c.bf16 %v4391_v5, %v4391_v5  ;;  %v13560_v5 = vld [vmem:[#allocation3 + $0x1444] ss:$16 sps:$4 sm:$0xff]  }
 0x1db   : > { %2266 = vmatpush1.bf16.msra.mxu1 %v13471_v11  ;;  %v13525_v11 = vld [vmem:[#allocation3 + $0x3a0] ss:$16 sps:$4 sm:$0xff]  }
 0x1dc   : > { %5275 = vmatpush1.bf16.msra.mxu0 %v13474_v12  ;;  %2267 = vmatprep.subr.bf16.mxu1 %v13479_v13  ;;  %v13528_v12 = vld [vmem:[#allocation3 + $0x13a0] ss:$16 sps:$4 sm:$0xff]   ;;  %v13533_v13 = vld [vmem:[#allocation3 + $0x3c4] ss:$16 sps:$4 sm:$0xff]  }
 0x1dd   : > { %5276 = vmatprep.subr.bf16.mxu0 %v13482_v14  ;;  %v13536_v14 = vld [vmem:[#allocation3 + $0x13c4] ss:$16 sps:$4 sm:$0xff]  }
 0x1df   : > { %2268 = vmatpush1.bf16.msra.mxu1 %v13477_v57  ;;  %v13531_v57 = vld [vmem:[#allocation3 + $0x3c0] ss:$16 sps:$4 sm:$0xff]  }
 0x1e0   : > { %5277 = vmatpush1.bf16.msra.mxu0 %v13480_v15  ;;  %2269 = vmatprep.subr.bf16.mxu1 %v13485_v16  ;;  %v13534_v15 = vld [vmem:[#allocation3 + $0x13c0] ss:$16 sps:$4 sm:$0xff]   ;;  %v1539_v16 = vrot.slane %v1537_v9, 2  ;;  %v13566_v9 = vld [vmem:[#allocation3 + $0x1464] ss:$16 sps:$4 sm:$0xff]  }
 0x1e1   : > { %5278 = vmatprep.subr.bf16.mxu0 %v13488_v17  ;;  %v1542_v17 = vrot.slane %v1540_v10, 3  ;;  %v13561_v10 = vld [vmem:[#allocation3 + $0x68] ss:$16 sps:$4 sm:$0xff]  }
 0x1e3   : > { %2270 = vmatpush1.bf16.msra.mxu1 %v13483_v18  ;;  %v1547_v18 = vrot.slane %v1545_v19, 2  ;;  %v13564_v19 = vld [vmem:[#allocation3 + $0x1460] ss:$16 sps:$4 sm:$0xff]  }
 0x1e4   : > { %5279 = vmatpush1.bf16.msra.mxu0 %v13486_v20  ;;  %2271 = vmatprep.subr.bf16.mxu1 %v13491_v22  ;;  %v1550_v20 = vrot.slane %v1548_v53, 3  ;;  %v4556_v22 = vshrl.u32 %v4395_v6, 16  ;;  %v13555_v6 = vld [vmem:[#allocation3 + $0x48] ss:$16 sps:$4 sm:$0xff]   ;;  %v13569_v53 = vld [vmem:[#allocation3 + $0x8c] ss:$16 sps:$4 sm:$0xff]  }
 0x1e5   : > { %5280 = vmatprep.subr.bf16.mxu0 %v13494_v23  ;;  %v4563_v23 = vshll.u32 %v4399_v21, 16  ;;  %v13572_v21 = vld [vmem:[#allocation3 + $0x1484] ss:$16 sps:$4 sm:$0xff]  }
 0x1e7   : > { %2272 = vmatpush1.bf16.msra.mxu1 %v13489_v24  ;;  %v4560_v24 = vrot.slane %v4558_v33, 1  ;;  %v13578_v33 = vld [vmem:[#allocation3 + $0x14a4] ss:$16 sps:$4 sm:$0xff]  }
 0x1e8   : > { %5281 = vmatpush1.bf16.msra.mxu0 %v13492_v25  ;;  %2273 = vmatprep.subr.bf16.mxu1 %v13497_v28  ;;  %v5404_v25 = vld [vmem:[#allocation2 + $0x28] sm:$0xfc]  ;;  %v5408_v28 = vld [vmem:[#allocation2 + $0x68] sm:$0x3] }
 0x1e9   : > { %5282 = vmatprep.subr.bf16.mxu0 %v13500_v29  ;;  %v13539_v29 = vld [vmem:[#allocation3 + $0x3e4] ss:$16 sps:$4 sm:$0xff]  }
 0x1eb   : > { %2274 = vmatpush1.bf16.msra.mxu1 %v13495_v30  ;;  %v13542_v30 = vld [vmem:[#allocation3 + $0x13e4] ss:$16 sps:$4 sm:$0xff]  }
 0x1ec   : > { %5283 = vmatpush1.bf16.msra.mxu0 %v13498_v31  ;;  %2275 = vmatprep.subr.bf16.mxu1 %v13503_v32  ;;  %v15381_v31 = vld [vmem:[#allocation2 + $0x48] sm:$0xff] }
 0x1ed   : > { %5284 = vmatprep.subr.bf16.mxu0 %v13506_v34  ;;  %v5412_v32 = vpack.c.bf16 %v15381_v31, %v5404_v25  ;;  %v5416_v34 = vpack.c.bf16 %v5408_v28, %v5408_v28  ;;  %v13596_v25 = vld [vmem:[#allocation3 + $0x1504] ss:$16 sps:$4 sm:$0xff]   ;;  %v13591_v28 = vld [vmem:[#allocation3 + $0x108] ss:$16 sps:$4 sm:$0xff]  }
 0x1ef   : > { %2276 = vmatpush1.bf16.msra.mxu1 %v13501_v36  ;;  %v13537_v36 = vld [vmem:[#allocation3 + $0x3e0] ss:$16 sps:$4 sm:$0xff]   ;;  %v5560_v46 = vrot.slane %v5412_v32, 1  ;;  %v5561_v50 = vrot.slane %v5416_v34, 1  ;;  %v13602_v32 = vld [vmem:[#allocation3 + $0x1524] ss:$16 sps:$4 sm:$0xff]  }
 0x1f0   : > { %5285 = vmatpush1.bf16.msra.mxu0 %v13504_v37  ;;  %2277 = vmatprep.subr.bf16.mxu1 %v13509_v38  ;;  %v13540_v37 = vld [vmem:[#allocation3 + $0x13e0] ss:$16 sps:$4 sm:$0xff]   ;;  %v1543_v38 = vor.u32 %v1542_v17, %v1539_v16  ;;  %v13579_v16 = vld [vmem:[#allocation3 + $0xc8] ss:$16 sps:$4 sm:$0xff]  }
 0x1f1   : > { %5286 = vmatprep.subr.bf16.mxu0 %v13512_v39  ;;  %v1551_v39 = vor.u32 %v1550_v20, %v1547_v18  ;;  %v13582_v17 = vld [vmem:[#allocation3 + $0x14c0] ss:$16 sps:$4 sm:$0xff]   ;;  %v13587_v18 = vld [vmem:[#allocation3 + $0xec] ss:$16 sps:$4 sm:$0xff]   ;;  %v13590_v20 = vld [vmem:[#allocation3 + $0x14e4] ss:$16 sps:$4 sm:$0xff]  }
 0x1f2   : > { %v13597_v34 = vld [vmem:[#allocation3 + $0x128] ss:$16 sps:$4 sm:$0xff]  }
 0x1f3   : > { %2278 = vmatpush1.bf16.msra.mxu1 %v13507_v40  ;;  %v4561_v40 = vor.u32 %v4560_v24, %v4556_v22  ;;  %v13585_v22 = vld [vmem:[#allocation3 + $0xe8] ss:$16 sps:$4 sm:$0xff]   ;;  %v13593_v24 = vld [vmem:[#allocation3 + $0x10c] ss:$16 sps:$4 sm:$0xff]  }
 0x1f4   : > { %5287 = vmatpush1.bf16.msra.mxu0 %v13510_v42  ;;  %2279 = vmatprep.subr.bf16.mxu1 %v13515_v43  ;;  %v4565_v42 = vrot.slane %v4563_v23, 1  ;;  %v13545_v43 = vld [vmem:[#allocation3 + $0xc] ss:$16 sps:$4 sm:$0xff]   ;;  %v13588_v23 = vld [vmem:[#allocation3 + $0x14e0] ss:$16 sps:$4 sm:$0xff]  }
 0x1f5   : > { %5288 = vmatprep.subr.bf16.mxu0 %v13518_v44  ;;  %v13548_v44 = vld [vmem:[#allocation3 + $0x1404] ss:$16 sps:$4 sm:$0xff]  }
 0x1f7   : > { %2280 = vmatpush1.bf16.msra.mxu1 %v13513_v52  ;;  %v15385_v52 = vsel %vm1501_vm2, %v1543_v38, %v1551_v39  ;;  %v13608_v38 = vld [vmem:[#allocation3 + $0x1544] ss:$16 sps:$4 sm:$0xff]   ;;  %v13603_v39 = vld [vmem:[#allocation3 + $0x148] ss:$16 sps:$4 sm:$0xff]  }
 0x1f8   : > { %5289 = vmatpush1.bf16.msra.mxu0 %v13516_v47  ;;  %2281 = vmatprep.subr.bf16.mxu1 %v13521_v56  ;;  %v13543_v47 = vld [vmem:[#allocation3 + $0x8] ss:$16 sps:$4 sm:$0xff]   ;;  %v13546_v56 = vld [vmem:[#allocation3 + $0x1400] ss:$16 sps:$4 sm:$0xff]  }
 0x1f9   : > { %5290 = vmatprep.subr.bf16.mxu0 %v13524_v58  ;;  %v15388_v58 = vsel %vm4530_vm3, %v4561_v40, %v4565_v42  ;;  %v13606_v40 = vld [vmem:[#allocation3 + $0x1540] ss:$16 sps:$4 sm:$0xff]   ;;  %v13611_v42 = vld [vmem:[#allocation3 + $0x16c] ss:$16 sps:$4 sm:$0xff]  }
 0x1fb   : > { %2282 = vmatpush1.bf16.msra.mxu1 %v13519_v63  ;;  %v15393_v63 = vsel %vm5556_vm4, %v5560_v46, %v5561_v50  ;;  %v13612_v46 = vld [vmem:[#allocation3 + $0x1560] ss:$16 sps:$4 sm:$0xff]   ;;  %v13617_v50 = vld [vmem:[#allocation3 + $0x18c] ss:$16 sps:$4 sm:$0xff]  }
 0x1fc   : > { %5291 = vmatpush1.bf16.msra.mxu0 %v13522_v3  ;;  %2283 = vmatprep.subr.bf16.mxu1 %v13527_v7  ;;  %v13557_v3 = vld [vmem:[#allocation3 + $0x4c] ss:$16 sps:$4 sm:$0xff]   ;;  %v13558_v7 = vld [vmem:[#allocation3 + $0x1440] ss:$16 sps:$4 sm:$0xff]  }
 0x1fd   : > { %5292 = vmatprep.subr.bf16.mxu0 %v13530_v8  ;;  %v13563_v8 = vld [vmem:[#allocation3 + $0x6c] ss:$16 sps:$4 sm:$0xff]  }
 0x1ff   : > { %2284 = vmatpush1.bf16.msra.mxu1 %v13525_v11  ;;  %v13570_v11 = vld [vmem:[#allocation3 + $0x1480] ss:$16 sps:$4 sm:$0xff]  }
 0x200   : > { %5293 = vmatpush1.bf16.msra.mxu0 %v13528_v12  ;;  %2285 = vmatprep.subr.bf16.mxu1 %v13533_v13  ;;  %v13575_v12 = vld [vmem:[#allocation3 + $0xac] ss:$16 sps:$4 sm:$0xff]   ;;  %v13573_v13 = vld [vmem:[#allocation3 + $0xa8] ss:$16 sps:$4 sm:$0xff]  }
 0x201   : > { %5294 = vmatprep.subr.bf16.mxu0 %v13536_v14  ;;  %v13576_v14 = vld [vmem:[#allocation3 + $0x14a0] ss:$16 sps:$4 sm:$0xff]  }
 0x203   : > { %2286 = vmatpush1.bf16.msra.mxu1 %v13531_v57  ;;  %v13581_v57 = vld [vmem:[#allocation3 + $0xcc] ss:$16 sps:$4 sm:$0xff]  }
 0x204   : > { %5295 = vmatpush1.bf16.msra.mxu0 %v13534_v15  ;;  %2287 = vmatprep.subr.bf16.mxu1 %v13539_v29  ;;  %v13584_v15 = vld [vmem:[#allocation3 + $0x14c4] ss:$16 sps:$4 sm:$0xff]   ;;  %v13594_v29 = vld [vmem:[#allocation3 + $0x1500] ss:$16 sps:$4 sm:$0xff]  }
 0x205   : > { %5296 = vmatprep.subr.bf16.mxu0 %v13542_v30  ;;  %v13599_v30 = vld [vmem:[#allocation3 + $0x12c] ss:$16 sps:$4 sm:$0xff]  }
 0x207   : > { %2288 = vmatpush1.bf16.msra.mxu1 %v13537_v36  ;;  %v13600_v36 = vld [vmem:[#allocation3 + $0x1520] ss:$16 sps:$4 sm:$0xff]  }
 0x208   : > { %5297 = vmatpush1.bf16.msra.mxu0 %v13540_v37  ;;  %2300 = vmatprep.subr.bf16.mxu1 %v13545_v43  ;;  %v13605_v37 = vld [vmem:[#allocation3 + $0x14c] ss:$16 sps:$4 sm:$0xff]   ;;  %v13614_v43 = vld [vmem:[#allocation3 + $0x1564] ss:$16 sps:$4 sm:$0xff]  }
 0x209   : > { %6213 = vmatprep.subr.bf16.mxu0 %v13548_v44  ;;  %v13609_v44 = vld [vmem:[#allocation3 + $0x168] ss:$16 sps:$4 sm:$0xff]  }
 0x20a   : > { %2290 = vmatmul.mubr.bf16.vlgmr.msra.gmra.mrb[0].mxu1 %v15385_v52 }
 0x20b   : > { %5299 = vmatmul.mubr.bf16.vlgmr.msra.gmra.mrb[0].mxu0 %v15388_v58  ;;  %2301 = vmatpush1.bf16.msra.mxu1 %v13543_v47  ;;  %v13620_v47 = vld [vmem:[#allocation3 + $0x1584] ss:$16 sps:$4 sm:$0xff]  }
 0x20c   : > { %6214 = vmatpush1.bf16.msra.mxu0 %v13546_v56  ;;  %2302 = vmatprep.subr.bf16.mxu1 %v13551_v59  ;;  %v13615_v56 = vld [vmem:[#allocation3 + $0x188] ss:$16 sps:$4 sm:$0xff]   ;;  %v13618_v59 = vld [vmem:[#allocation3 + $0x1580] ss:$16 sps:$4 sm:$0xff]  }
 0x20d   : > { %6215 = vmatprep.subr.bf16.mxu0 %v13554_v62  ;;  %2332 = vmatprep.mubr.bf16.mxu1 %v15356_v26  ;;  %v13567_v26 = vld [vmem:[#allocation3 + $0x88] ss:$16 sps:$4 sm:$0xff]   ;;  %v13623_v62 = vld [vmem:[#allocation3 + $0x1ac] ss:$16 sps:$4 sm:$0xff]  }
 0x20e   : > { %6245 = vmatprep.mubr.bf16.mxu0 %v15393_v63 }
 0x20f   : > { %2303 = vmatpush1.bf16.msra.mxu1 %v13549_v0  ;;  %v13626_v0 = vld [vmem:[#allocation3 + $0x15a4] ss:$16 sps:$4 sm:$0xff]  }
 0x210   : > { %6216 = vmatpush1.bf16.msra.mxu0 %v13552_v2  ;;  %2304 = vmatprep.subr.bf16.mxu1 %v13557_v3  ;;  %v13621_v2 = vld [vmem:[#allocation3 + $0x1a8] ss:$16 sps:$4 sm:$0xff]   ;;  %v13624_v3 = vld [vmem:[#allocation3 + $0x15a0] ss:$16 sps:$4 sm:$0xff]  }
 0x211   : > { %6217 = vmatprep.subr.bf16.mxu0 %v13560_v5  ;;  %v13629_v5 = vld [vmem:[#allocation3 + $0x1cc] ss:$16 sps:$4 sm:$0xff]  }
 0x213   : > { %2305 = vmatpush1.bf16.msra.mxu1 %v13555_v6  ;;  %v13632_v6 = vld [vmem:[#allocation3 + $0x15c4] ss:$16 sps:$4 sm:$0xff]  }
 0x214   : > { %6218 = vmatpush1.bf16.msra.mxu0 %v13558_v7  ;;  %2306 = vmatprep.subr.bf16.mxu1 %v13563_v8  ;;  %v5403_v7 = vld [vmem:[#allocation2 + $0x20] sm:$0xfc]  ;;  %v5407_v8 = vld [vmem:[#allocation2 + $0x60] sm:$0x3] }
 0x215   : > { %6219 = vmatprep.subr.bf16.mxu0 %v13566_v9  ;;  %v13627_v9 = vld [vmem:[#allocation3 + $0x1c8] ss:$16 sps:$4 sm:$0xff]  }
 0x217   : > { %2307 = vmatpush1.bf16.msra.mxu1 %v13561_v10  ;;  %v13630_v10 = vld [vmem:[#allocation3 + $0x15c0] ss:$16 sps:$4 sm:$0xff]  }
 0x218   : > { %6220 = vmatpush1.bf16.msra.mxu0 %v13564_v19  ;;  %2308 = vmatprep.subr.bf16.mxu1 %v13569_v53  ;;  %v14878_v19 = vld [vmem:[#allocation2 + $0x40] sm:$0xff] }
 0x219   : > { %6221 = vmatprep.subr.bf16.mxu0 %v13572_v21  ;;  %v5411_v53 = vpack.c.bf16 %v14878_v19, %v5403_v7  ;;  %v5415_v21 = vpack.c.bf16 %v5407_v8, %v5407_v8  ;;  %v13678_v7 = vld [vmem:[#allocation3 + $0x16c0] ss:$16 sps:$4 sm:$0xff]   ;;  %v13683_v8 = vld [vmem:[#allocation3 + $0x2ec] ss:$16 sps:$4 sm:$0xff]  }
 0x21a   : > { %v13684_v19 = vld [vmem:[#allocation3 + $0x16e0] ss:$16 sps:$4 sm:$0xff]  }
 0x21b   : > { %2309 = vmatpush1.bf16.msra.mxu1 %v13567_v26  ;;  %v5406_v26 = vld [vmem:[#allocation2 + $0x38] sm:$0xfc] }
 0x21c   : > { %6222 = vmatpush1.bf16.msra.mxu0 %v13570_v11  ;;  %2310 = vmatprep.subr.bf16.mxu1 %v13575_v12  ;;  %v5410_v11 = vld [vmem:[#allocation2 + $0x78] sm:$0x3]  ;;  %v13635_v12 = vld [vmem:[#allocation3 + $0x1ec] ss:$16 sps:$4 sm:$0xff]  }
 0x21d   : > { %6223 = vmatprep.subr.bf16.mxu0 %v13578_v33  ;;  %v13638_v33 = vld [vmem:[#allocation3 + $0x15e4] ss:$16 sps:$4 sm:$0xff]  }
 0x21f   : > { %2311 = vmatpush1.bf16.msra.mxu1 %v13573_v13  ;;  %v14879_v13 = vld [vmem:[#allocation2 + $0x58] sm:$0xff] }
 0x220   : > { %6224 = vmatpush1.bf16.msra.mxu0 %v13576_v14  ;;  %2312 = vmatprep.subr.bf16.mxu1 %v13581_v57  ;;  %v5414_v14 = vpack.c.bf16 %v14879_v13, %v5406_v26  ;;  %v5418_v57 = vpack.c.bf16 %v5410_v11, %v5410_v11  ;;  %v13687_v26 = vld [vmem:[#allocation3 + $0x308] ss:$16 sps:$4 sm:$0xff]   ;;  %v13690_v11 = vld [vmem:[#allocation3 + $0x1700] ss:$16 sps:$4 sm:$0xff]  }
 0x221   : > { %6225 = vmatprep.subr.bf16.mxu0 %v13584_v15  ;;  %v13633_v15 = vld [vmem:[#allocation3 + $0x1e8] ss:$16 sps:$4 sm:$0xff]  }
 0x222   : > { %v13693_v13 = vld [vmem:[#allocation3 + $0x328] ss:$16 sps:$4 sm:$0xff]  }
 0x223   : > { %2313 = vmatpush1.bf16.msra.mxu1 %v13579_v16  ;;  %v13636_v16 = vld [vmem:[#allocation3 + $0x15e0] ss:$16 sps:$4 sm:$0xff]  }
 0x224   : > { %6226 = vmatpush1.bf16.msra.mxu0 %v13582_v17  ;;  %2314 = vmatprep.subr.bf16.mxu1 %v13587_v18  ;;  %v5557_v17 = vrot.slane %v5411_v53, 1  ;;  %v5558_v18 = vrot.slane %v5415_v21, 1  ;;  %v13689_v53 = vld [vmem:[#allocation3 + $0x30c] ss:$16 sps:$4 sm:$0xff]   ;;  %v13692_v21 = vld [vmem:[#allocation3 + $0x1704] ss:$16 sps:$4 sm:$0xff]  }
 0x225   : > { %6227 = vmatprep.subr.bf16.mxu0 %v13590_v20  ;;  %v13641_v20 = vld [vmem:[#allocation3 + $0x20c] ss:$16 sps:$4 sm:$0xff]  }
 0x227   : > { %2315 = vmatpush1.bf16.msra.mxu1 %v13585_v22  ;;  %v13644_v22 = vld [vmem:[#allocation3 + $0x1604] ss:$16 sps:$4 sm:$0xff]  }
 0x228   : > { %6228 = vmatpush1.bf16.msra.mxu0 %v13588_v23  ;;  %2316 = vmatprep.subr.bf16.mxu1 %v13593_v24  ;;  %v5566_v23 = vrot.slane %v5414_v14, 1  ;;  %v5567_v24 = vrot.slane %v5418_v57, 1  ;;  %v13696_v14 = vld [vmem:[#allocation3 + $0x1720] ss:$16 sps:$4 sm:$0xff]   ;;  %v13701_v57 = vld [vmem:[#allocation3 + $0x34c] ss:$16 sps:$4 sm:$0xff]  }
 0x229   : > { %6229 = vmatprep.subr.bf16.mxu0 %v13596_v25  ;;  %v13639_v25 = vld [vmem:[#allocation3 + $0x208] ss:$16 sps:$4 sm:$0xff]  }
 0x22b   : > { %2317 = vmatpush1.bf16.msra.mxu1 %v13591_v28  ;;  %v13642_v28 = vld [vmem:[#allocation3 + $0x1600] ss:$16 sps:$4 sm:$0xff]  }
 0x22c   : > { %6230 = vmatpush1.bf16.msra.mxu0 %v13594_v29  ;;  %2318 = vmatprep.subr.bf16.mxu1 %v13599_v30  ;;  %v15398_v29 = vsel %vm5556_vm4, %v5557_v17, %v5558_v18  ;;  %v13647_v30 = vld [vmem:[#allocation3 + $0x22c] ss:$16 sps:$4 sm:$0xff]   ;;  %v13702_v17 = vld [vmem:[#allocation3 + $0x1740] ss:$16 sps:$4 sm:$0xff]  }
 0x22d   : > { %6231 = vmatprep.subr.bf16.mxu0 %v13602_v32  ;;  %v13650_v32 = vld [vmem:[#allocation3 + $0x1624] ss:$16 sps:$4 sm:$0xff]   ;;  %v13707_v18 = vld [vmem:[#allocation3 + $0x36c] ss:$16 sps:$4 sm:$0xff]  }
 0x22f   : > { %2319 = vmatpush1.bf16.msra.mxu1 %v13597_v34  ;;  %v15403_v34 = vsel %vm5556_vm4, %v5566_v23, %v5567_v24  ;;  %v13708_v23 = vld [vmem:[#allocation3 + $0x1760] ss:$16 sps:$4 sm:$0xff]   ;;  %v13713_v24 = vld [vmem:[#allocation3 + $0x38c] ss:$16 sps:$4 sm:$0xff]  }
 0x230   : > { %6232 = vmatpush1.bf16.msra.mxu0 %v13600_v36  ;;  %2320 = vmatprep.subr.bf16.mxu1 %v13605_v37  ;;  %v13645_v36 = vld [vmem:[#allocation3 + $0x228] ss:$16 sps:$4 sm:$0xff]   ;;  %v13648_v37 = vld [vmem:[#allocation3 + $0x1620] ss:$16 sps:$4 sm:$0xff]  }
 0x231   : > { %6233 = vmatprep.subr.bf16.mxu0 %v13608_v38  ;;  %v13653_v38 = vld [vmem:[#allocation3 + $0x24c] ss:$16 sps:$4 sm:$0xff]  }
 0x233   : > { %2321 = vmatpush1.bf16.msra.mxu1 %v13603_v39  ;;  %v13656_v39 = vld [vmem:[#allocation3 + $0x1644] ss:$16 sps:$4 sm:$0xff]  }
 0x234   : > { %6234 = vmatpush1.bf16.msra.mxu0 %v13606_v40  ;;  %2322 = vmatprep.subr.bf16.mxu1 %v13611_v42  ;;  %v13654_v40 = vld [vmem:[#allocation3 + $0x1640] ss:$16 sps:$4 sm:$0xff]   ;;  %v13659_v42 = vld [vmem:[#allocation3 + $0x26c] ss:$16 sps:$4 sm:$0xff]  }
 0x235   : > { %6235 = vmatprep.subr.bf16.mxu0 %v13614_v43  ;;  %v13662_v43 = vld [vmem:[#allocation3 + $0x1664] ss:$16 sps:$4 sm:$0xff]  }
 0x237   : > { %2323 = vmatpush1.bf16.msra.mxu1 %v13609_v44  ;;  %v13657_v44 = vld [vmem:[#allocation3 + $0x268] ss:$16 sps:$4 sm:$0xff]  }
 0x238   : > { %6236 = vmatpush1.bf16.msra.mxu0 %v13612_v46  ;;  %2324 = vmatprep.subr.bf16.mxu1 %v13617_v50  ;;  %v13660_v46 = vld [vmem:[#allocation3 + $0x1660] ss:$16 sps:$4 sm:$0xff]   ;;  %v13665_v50 = vld [vmem:[#allocation3 + $0x28c] ss:$16 sps:$4 sm:$0xff]  }
 0x239   : > { %6237 = vmatprep.subr.bf16.mxu0 %v13620_v47  ;;  %v13668_v47 = vld [vmem:[#allocation3 + $0x1684] ss:$16 sps:$4 sm:$0xff]  }
 0x23b   : > { %2325 = vmatpush1.bf16.msra.mxu1 %v13615_v56  ;;  %v13666_v56 = vld [vmem:[#allocation3 + $0x1680] ss:$16 sps:$4 sm:$0xff]  }
 0x23c   : > { %6238 = vmatpush1.bf16.msra.mxu0 %v13618_v59  ;;  %2326 = vmatprep.subr.bf16.mxu1 %v13623_v62  ;;  %v13671_v59 = vld [vmem:[#allocation3 + $0x2ac] ss:$16 sps:$4 sm:$0xff]   ;;  %v13674_v62 = vld [vmem:[#allocation3 + $0x16a4] ss:$16 sps:$4 sm:$0xff]  }
 0x23d   : > { %6239 = vmatprep.subr.bf16.mxu0 %v13626_v0  ;;  %v13669_v0 = vld [vmem:[#allocation3 + $0x2a8] ss:$16 sps:$4 sm:$0xff]  }
 0x23f   : > { %2327 = vmatpush1.bf16.msra.mxu1 %v13621_v2  ;;  %v13672_v2 = vld [vmem:[#allocation3 + $0x16a0] ss:$16 sps:$4 sm:$0xff]  }
 0x240   : > { %6240 = vmatpush1.bf16.msra.mxu0 %v13624_v3  ;;  %2328 = vmatprep.subr.bf16.mxu1 %v13629_v5  ;;  %v13677_v3 = vld [vmem:[#allocation3 + $0x2cc] ss:$16 sps:$4 sm:$0xff]   ;;  %v13680_v5 = vld [vmem:[#allocation3 + $0x16c4] ss:$16 sps:$4 sm:$0xff]  }
 0x241   : > { %6241 = vmatprep.subr.bf16.mxu0 %v13632_v6  ;;  %v13675_v6 = vld [vmem:[#allocation3 + $0x2c8] ss:$16 sps:$4 sm:$0xff]  }
 0x243   : > { %2329 = vmatpush1.bf16.msra.mxu1 %v13627_v9  ;;  %v13686_v9 = vld [vmem:[#allocation3 + $0x16e4] ss:$16 sps:$4 sm:$0xff]  }
 0x244   : > { %6242 = vmatpush1.bf16.msra.mxu0 %v13630_v10  ;;  %2330 = vmatprep.subr.bf16.mxu1 %v13635_v12  ;;  %v13681_v10 = vld [vmem:[#allocation3 + $0x2e8] ss:$16 sps:$4 sm:$0xff]   ;;  %v13695_v12 = vld [vmem:[#allocation3 + $0x32c] ss:$16 sps:$4 sm:$0xff]  }
 0x245   : > { %6243 = vmatprep.subr.bf16.mxu0 %v13638_v33  ;;  %v13698_v33 = vld [vmem:[#allocation3 + $0x1724] ss:$16 sps:$4 sm:$0xff]  }
 0x247   : > { %2331 = vmatpush1.bf16.msra.mxu1 %v13633_v15  ;;  %v13704_v15 = vld [vmem:[#allocation3 + $0x1744] ss:$16 sps:$4 sm:$0xff]  }
 0x248   : > { %6244 = vmatpush1.bf16.msra.mxu0 %v13636_v16  ;;  %2343 = vmatprep.subr.bf16.mxu1 %v13641_v20  ;;  %v13699_v16 = vld [vmem:[#allocation3 + $0x348] ss:$16 sps:$4 sm:$0xff]   ;;  %v13710_v20 = vld [vmem:[#allocation3 + $0x1764] ss:$16 sps:$4 sm:$0xff]  }
 0x249   : > { %6256 = vmatprep.subr.bf16.mxu0 %v13644_v22  ;;  %v13705_v22 = vld [vmem:[#allocation3 + $0x368] ss:$16 sps:$4 sm:$0xff]  }
 0x24a   : > { %2333 = vmatmul.mubr.bf16.vlgmr.msra.gmra.mrb[4].mxu1 %v15365_v60  ;;  %v13651_v60 = vld [vmem:[#allocation3 + $0x248] ss:$16 sps:$4 sm:$0xff]  }
 0x24b   : > { %6246 = vmatmul.mubr.bf16.vlgmr.msra.gmra.mrb[0].mxu0 %v15398_v29  ;;  %2344 = vmatpush1.bf16.msra.mxu1 %v13639_v25  ;;  %v13716_v25 = vld [vmem:[#allocation3 + $0x1784] ss:$16 sps:$4 sm:$0xff]  }
 0x24c   : > { %6257 = vmatpush1.bf16.msra.mxu0 %v13642_v28  ;;  %2345 = vmatprep.subr.bf16.mxu1 %v13647_v30  ;;  %v6394_v28 = vld [vmem:[#allocation2 + $0x28] sm:$0xf8] }
 0x24d   : > { %6258 = vmatprep.subr.bf16.mxu0 %v13650_v32  ;;  %2375 = vmatprep.mubr.bf16.mxu1 %v15373_v49  ;;  %v13663_v49 = vld [vmem:[#allocation3 + $0x288] ss:$16 sps:$4 sm:$0xff]   ;;  %v13714_v32 = vld [vmem:[#allocation3 + $0x1780] ss:$16 sps:$4 sm:$0xff]  }
 0x24e   : > { %6288 = vmatprep.mubr.bf16.mxu0 %v15403_v34  ;;  %v13711_v30 = vld [vmem:[#allocation3 + $0x388] ss:$16 sps:$4 sm:$0xff]  }
 0x24f   : > { %2346 = vmatpush1.bf16.msra.mxu1 %v13645_v36  ;;  %v6398_v36 = vld [vmem:[#allocation2 + $0x68] sm:$0x7] }
 0x250   : > { %6259 = vmatpush1.bf16.msra.mxu0 %v13648_v37  ;;  %2347 = vmatprep.subr.bf16.mxu1 %v13653_v38  ;;  %v13719_v37 = vld [vmem:[#allocation3 + $0x3ac] ss:$16 sps:$4 sm:$0xff]   ;;  %v13722_v38 = vld [vmem:[#allocation3 + $0x17a4] ss:$16 sps:$4 sm:$0xff]  }
 0x251   : > { %6260 = vmatprep.subr.bf16.mxu0 %v13656_v39  ;;  %v13717_v39 = vld [vmem:[#allocation3 + $0x3a8] ss:$16 sps:$4 sm:$0xff]  }
 0x253   : > { %2348 = vmatpush1.bf16.msra.mxu1 %v13651_v60  ;;  %v13720_v60 = vld [vmem:[#allocation3 + $0x17a0] ss:$16 sps:$4 sm:$0xff]  }
 0x254   : > { %6261 = vmatpush1.bf16.msra.mxu0 %v13654_v40  ;;  %2349 = vmatprep.subr.bf16.mxu1 %v13659_v42  ;;  %v6402_v40 = vpack.c.bf16 %v15381_v31, %v6394_v28  ;;  %v6406_v42 = vpack.c.bf16 %v6398_v36, %v6398_v36  ;;  %v13750_v28 = vld [vmem:[#allocation3 + $0x1840] ss:$16 sps:$4 sm:$0xff]  }
 0x255   : > { %6262 = vmatprep.subr.bf16.mxu0 %v13662_v43  ;;  %v13725_v43 = vld [vmem:[#allocation3 + $0x3cc] ss:$16 sps:$4 sm:$0xff]   ;;  %v13756_v36 = vld [vmem:[#allocation3 + $0x1860] ss:$16 sps:$4 sm:$0xff]  }
 0x257   : > { %2350 = vmatpush1.bf16.msra.mxu1 %v13657_v44  ;;  %v13728_v44 = vld [vmem:[#allocation3 + $0x17c4] ss:$16 sps:$4 sm:$0xff]  }
 0x258   : > { %6263 = vmatpush1.bf16.msra.mxu0 %v13660_v46  ;;  %2351 = vmatprep.subr.bf16.mxu1 %v13665_v50  ;;  %v5405_v46 = vld [vmem:[#allocation2 + $0x30] sm:$0xfc]  ;;  %v5409_v50 = vld [vmem:[#allocation2 + $0x70] sm:$0x3] }
 0x259   : > { %6264 = vmatprep.subr.bf16.mxu0 %v13668_v47  ;;  %v6557_v47 = vshrl.u32 %v6402_v40, 16  ;;  %v5417_v31 = vpack.c.bf16 %v5409_v50, %v5409_v50  ;;  %v13771_v50 = vld [vmem:[#allocation3 + $0x8c8] ss:$16 sps:$4 sm:$0xff]  }
 0x25b   : > { %2352 = vmatpush1.bf16.msra.mxu1 %v13663_v49  ;;  %v6560_v49 = vshll.u32 %v6402_v40, 16  ;;  %v13770_v40 = vld [vmem:[#allocation3 + $0x18a4] ss:$16 sps:$4 sm:$0xff]  }
 0x25c   : > { %6265 = vmatpush1.bf16.msra.mxu0 %v13666_v56  ;;  %2353 = vmatprep.subr.bf16.mxu1 %v13671_v59  ;;  %v6565_v56 = vshrl.u32 %v6406_v42, 16  ;;  %v6568_v59 = vshll.u32 %v6406_v42, 16  ;;  %v13765_v42 = vld [vmem:[#allocation3 + $0x8a8] ss:$16 sps:$4 sm:$0xff]  }
 0x25d   : > { %6266 = vmatprep.subr.bf16.mxu0 %v13674_v62  ;;  %v13723_v62 = vld [vmem:[#allocation3 + $0x3c8] ss:$16 sps:$4 sm:$0xff]  }
 0x25f   : > { %2354 = vmatpush1.bf16.msra.mxu1 %v13669_v0  ;;  %v13726_v0 = vld [vmem:[#allocation3 + $0x17c0] ss:$16 sps:$4 sm:$0xff]  }
 0x260   : > { %6267 = vmatpush1.bf16.msra.mxu0 %v13672_v2  ;;  %2355 = vmatprep.subr.bf16.mxu1 %v13677_v3  ;;  %v14880_v2 = vld [vmem:[#allocation2 + $0x50] sm:$0xff] }
 0x261   : > { %6268 = vmatprep.subr.bf16.mxu0 %v13680_v5  ;;  %v5413_v3 = vpack.c.bf16 %v14880_v2, %v5405_v46  ;;  %v13731_v5 = vld [vmem:[#allocation3 + $0x3ec] ss:$16 sps:$4 sm:$0xff]   ;;  %v13776_v46 = vld [vmem:[#allocation3 + $0x18c4] ss:$16 sps:$4 sm:$0xff]  }
 0x262   : > { %v13788_v2 = vld [vmem:[#allocation3 + $0x1904] ss:$16 sps:$4 sm:$0xff]  }
 0x263   : > { %2356 = vmatpush1.bf16.msra.mxu1 %v13675_v6  ;;  %v13734_v6 = vld [vmem:[#allocation3 + $0x17e4] ss:$16 sps:$4 sm:$0xff]  }
 0x264   : > { %6269 = vmatpush1.bf16.msra.mxu0 %v13678_v7  ;;  %2357 = vmatprep.subr.bf16.mxu1 %v13683_v8  ;;  %v6559_v7 = vrot.slane %v6557_v47, 1  ;;  %v6562_v8 = vrot.slane %v6560_v49, 2  ;;  %v13774_v47 = vld [vmem:[#allocation3 + $0x18c0] ss:$16 sps:$4 sm:$0xff]   ;;  %v13779_v49 = vld [vmem:[#allocation3 + $0x8ec] ss:$16 sps:$4 sm:$0xff]  }
 0x265   : > { %6270 = vmatprep.subr.bf16.mxu0 %v13686_v9  ;;  %v6567_v9 = vrot.slane %v6565_v56, 1  ;;  %v13782_v56 = vld [vmem:[#allocation3 + $0x18e4] ss:$16 sps:$4 sm:$0xff]  }
 0x267   : > { %2358 = vmatpush1.bf16.msra.mxu1 %v13681_v10  ;;  %v6570_v10 = vrot.slane %v6568_v59, 2  ;;  %v13777_v59 = vld [vmem:[#allocation3 + $0x8e8] ss:$16 sps:$4 sm:$0xff]  }
 0x268   : > { %6271 = vmatpush1.bf16.msra.mxu0 %v13684_v19  ;;  %2359 = vmatprep.subr.bf16.mxu1 %v13689_v53  ;;  %v13729_v19 = vld [vmem:[#allocation3 + $0x3e8] ss:$16 sps:$4 sm:$0xff]   ;;  %v13732_v53 = vld [vmem:[#allocation3 + $0x17e0] ss:$16 sps:$4 sm:$0xff]  }
 0x269   : > { %6272 = vmatprep.subr.bf16.mxu0 %v13692_v21  ;;  %v5563_v21 = vrot.slane %v5413_v3, 1  ;;  %v13783_v3 = vld [vmem:[#allocation3 + $0x908] ss:$16 sps:$4 sm:$0xff]  }
 0x26b   : > { %2360 = vmatpush1.bf16.msra.mxu1 %v13687_v26  ;;  %v5564_v26 = vrot.slane %v5417_v31, 1  ;;  %v13786_v31 = vld [vmem:[#allocation3 + $0x1900] ss:$16 sps:$4 sm:$0xff]  }
 0x26c   : > { %6273 = vmatpush1.bf16.msra.mxu0 %v13690_v11  ;;  %2361 = vmatprep.subr.bf16.mxu1 %v13695_v12  ;;  %v13737_v11 = vld [vmem:[#allocation3 + $0x80c] ss:$16 sps:$4 sm:$0xff]   ;;  %v13740_v12 = vld [vmem:[#allocation3 + $0x1804] ss:$16 sps:$4 sm:$0xff]  }
 0x26d   : > { %6274 = vmatprep.subr.bf16.mxu0 %v13698_v33  ;;  %v13735_v33 = vld [vmem:[#allocation3 + $0x808] ss:$16 sps:$4 sm:$0xff]  }
 0x26f   : > { %2362 = vmatpush1.bf16.msra.mxu1 %v13693_v13  ;;  %v13738_v13 = vld [vmem:[#allocation3 + $0x1800] ss:$16 sps:$4 sm:$0xff]  }
 0x270   : > { %6275 = vmatpush1.bf16.msra.mxu0 %v13696_v14  ;;  %2363 = vmatprep.subr.bf16.mxu1 %v13701_v57  ;;  %v6563_v14 = vor.u32 %v6562_v8, %v6559_v7  ;;  %v6571_v57 = vor.u32 %v6570_v10, %v6567_v9  ;;  %v13789_v7 = vld [vmem:[#allocation3 + $0x928] ss:$16 sps:$4 sm:$0xff]   ;;  %v13792_v8 = vld [vmem:[#allocation3 + $0x1920] ss:$16 sps:$4 sm:$0xff]   ;;  %v13797_v9 = vld [vmem:[#allocation3 + $0x94c] ss:$16 sps:$4 sm:$0xff]  }
 0x271   : > { %6276 = vmatprep.subr.bf16.mxu0 %v13704_v15  ;;  %v15409_v15 = vsel %vm5556_vm4, %v5563_v21, %v5564_v26  ;;  %v13800_v10 = vld [vmem:[#allocation3 + $0x1944] ss:$16 sps:$4 sm:$0xff]   ;;  %v13803_v21 = vld [vmem:[#allocation3 + $0x96c] ss:$16 sps:$4 sm:$0xff]  }
 0x272   : > { %v13806_v26 = vld [vmem:[#allocation3 + $0x1964] ss:$16 sps:$4 sm:$0xff]  }
 0x273   : > { %2364 = vmatpush1.bf16.msra.mxu1 %v13699_v16  ;;  %v13743_v16 = vld [vmem:[#allocation3 + $0x82c] ss:$16 sps:$4 sm:$0xff]  }
 0x274   : > { %6277 = vmatpush1.bf16.msra.mxu0 %v13702_v17  ;;  %2365 = vmatprep.subr.bf16.mxu1 %v13707_v18  ;;  %v13746_v17 = vld [vmem:[#allocation3 + $0x1824] ss:$16 sps:$4 sm:$0xff]   ;;  %v13741_v18 = vld [vmem:[#allocation3 + $0x828] ss:$16 sps:$4 sm:$0xff]  }
 0x275   : > { %6278 = vmatprep.subr.bf16.mxu0 %v13710_v20  ;;  %v13744_v20 = vld [vmem:[#allocation3 + $0x1820] ss:$16 sps:$4 sm:$0xff]  }
 0x277   : > { %2366 = vmatpush1.bf16.msra.mxu1 %v13705_v22  ;;  %v15414_v22 = vsel %vm6538_vm5, %v6563_v14, %v6571_v57  ;;  %v6393_v14 = vld [vmem:[#allocation2 + $0x20] sm:$0xf8]  ;;  %v6397_v57 = vld [vmem:[#allocation2 + $0x60] sm:$0x7] }
 0x278   : > { %6279 = vmatpush1.bf16.msra.mxu0 %v13708_v23  ;;  %2367 = vmatprep.subr.bf16.mxu1 %v13713_v24  ;;  %v13749_v23 = vld [vmem:[#allocation3 + $0x84c] ss:$16 sps:$4 sm:$0xff]   ;;  %v13752_v24 = vld [vmem:[#allocation3 + $0x1844] ss:$16 sps:$4 sm:$0xff]  }
 0x279   : > { %6280 = vmatprep.subr.bf16.mxu0 %v13716_v25  ;;  %v13747_v25 = vld [vmem:[#allocation3 + $0x848] ss:$16 sps:$4 sm:$0xff]  }
 0x27b   : > { %2368 = vmatpush1.bf16.msra.mxu1 %v13711_v30  ;;  %v13758_v30 = vld [vmem:[#allocation3 + $0x1864] ss:$16 sps:$4 sm:$0xff]  }
 0x27c   : > { %6281 = vmatpush1.bf16.msra.mxu0 %v13714_v32  ;;  %2369 = vmatprep.subr.bf16.mxu1 %v13719_v37  ;;  %v13753_v32 = vld [vmem:[#allocation3 + $0x868] ss:$16 sps:$4 sm:$0xff]   ;;  %v13761_v37 = vld [vmem:[#allocation3 + $0x88c] ss:$16 sps:$4 sm:$0xff]  }
 0x27d   : > { %6282 = vmatprep.subr.bf16.mxu0 %v13722_v38  ;;  %v13764_v38 = vld [vmem:[#allocation3 + $0x1884] ss:$16 sps:$4 sm:$0xff]  }
 0x27f   : > { %2370 = vmatpush1.bf16.msra.mxu1 %v13717_v39  ;;  %v13759_v39 = vld [vmem:[#allocation3 + $0x888] ss:$16 sps:$4 sm:$0xff]  }
 0x280   : > { %6283 = vmatpush1.bf16.msra.mxu0 %v13720_v60  ;;  %2371 = vmatprep.subr.bf16.mxu1 %v13725_v43  ;;  %v13762_v60 = vld [vmem:[#allocation3 + $0x1880] ss:$16 sps:$4 sm:$0xff]  }
 0x281   : > { %6284 = vmatprep.subr.bf16.mxu0 %v13728_v44  ;;  %v13768_v43 = vld [vmem:[#allocation3 + $0x18a0] ss:$16 sps:$4 sm:$0xff]   ;;  %v13773_v44 = vld [vmem:[#allocation3 + $0x8cc] ss:$16 sps:$4 sm:$0xff]  }
 0x283   : > { %2372 = vmatpush1.bf16.msra.mxu1 %v13723_v62  ;;  %v13780_v62 = vld [vmem:[#allocation3 + $0x18e0] ss:$16 sps:$4 sm:$0xff]  }
 0x284   : > { %6285 = vmatpush1.bf16.msra.mxu0 %v13726_v0  ;;  %2373 = vmatprep.subr.bf16.mxu1 %v13731_v5  ;;  %v13785_v0 = vld [vmem:[#allocation3 + $0x90c] ss:$16 sps:$4 sm:$0xff]  }
 0x285   : > { %6286 = vmatprep.subr.bf16.mxu0 %v13734_v6  ;;  %v13791_v5 = vld [vmem:[#allocation3 + $0x92c] ss:$16 sps:$4 sm:$0xff]   ;;  %v13794_v6 = vld [vmem:[#allocation3 + $0x1924] ss:$16 sps:$4 sm:$0xff]  }
 0x287   : > { %2374 = vmatpush1.bf16.msra.mxu1 %v13729_v19  ;;  %v13795_v19 = vld [vmem:[#allocation3 + $0x948] ss:$16 sps:$4 sm:$0xff]  }
 0x288   : > { %6287 = vmatpush1.bf16.msra.mxu0 %v13732_v53  ;;  %3330 = vmatprep.subr.bf16.mxu1 %v13737_v11  ;;  %v13798_v53 = vld [vmem:[#allocation3 + $0x1940] ss:$16 sps:$4 sm:$0xff]   ;;  %v13801_v11 = vld [vmem:[#allocation3 + $0x968] ss:$16 sps:$4 sm:$0xff]  }
 0x289   : > { %7251 = vmatprep.subr.bf16.mxu0 %v13740_v12  ;;  %v13804_v12 = vld [vmem:[#allocation3 + $0x1960] ss:$16 sps:$4 sm:$0xff]  }
 0x28a   : > { %2376 = vmatmul.mubr.bf16.vlgmr.msra.gmra.mrb[4].mxu1 %v15385_v52  ;;  %v13755_v52 = vld [vmem:[#allocation3 + $0x86c] ss:$16 sps:$4 sm:$0xff]  }
 0x28b   : > { %6289 = vmatmul.mubr.bf16.vlgmr.msra.gmra.mrb[0].mxu0 %v15409_v15  ;;  %3331 = vmatpush1.bf16.msra.mxu1 %v13735_v33  ;;  %v13809_v33 = vld [vmem:[#allocation3 + $0x98c] ss:$16 sps:$4 sm:$0xff]  }
 0x28c   : > { %7252 = vmatpush1.bf16.msra.mxu0 %v13738_v13  ;;  %3332 = vmatprep.subr.bf16.mxu1 %v13743_v16  ;;  %v13812_v13 = vld [vmem:[#allocation3 + $0x1984] ss:$16 sps:$4 sm:$0xff]   ;;  %v6396_v16 = vld [vmem:[#allocation2 + $0x38] sm:$0xf8] }
 0x28d   : > { %7253 = vmatprep.subr.bf16.mxu0 %v13746_v17  ;;  %3362 = vmatprep.mubr.bf16.mxu1 %v15285_v41  ;;  %v13767_v41 = vld [vmem:[#allocation3 + $0x8ac] ss:$16 sps:$4 sm:$0xff]   ;;  %v13807_v17 = vld [vmem:[#allocation3 + $0x988] ss:$16 sps:$4 sm:$0xff]  }
 0x28e   : > { %7283 = vmatprep.mubr.bf16.mxu0 %v15414_v22 }
 0x28f   : > { %3333 = vmatpush1.bf16.msra.mxu1 %v13741_v18  ;;  %v13810_v18 = vld [vmem:[#allocation3 + $0x1980] ss:$16 sps:$4 sm:$0xff]  }
 0x290   : > { %7254 = vmatpush1.bf16.msra.mxu0 %v13744_v20  ;;  %3334 = vmatprep.subr.bf16.mxu1 %v13749_v23  ;;  %v13815_v20 = vld [vmem:[#allocation3 + $0x9ac] ss:$16 sps:$4 sm:$0xff]   ;;  %v13818_v23 = vld [vmem:[#allocation3 + $0x19a4] ss:$16 sps:$4 sm:$0xff]  }
 0x291   : > { %7255 = vmatprep.subr.bf16.mxu0 %v13752_v24  ;;  %v14881_v24 = vld [vmem:[#allocation2 + $0x40] sm:$0xff] }
 0x293   : > { %3335 = vmatpush1.bf16.msra.mxu1 %v13747_v25  ;;  %v6401_v25 = vpack.c.bf16 %v14881_v24, %v6393_v14  ;;  %v13848_v24 = vld [vmem:[#allocation3 + $0x1a44] ss:$16 sps:$4 sm:$0xff]  }
 0x294   : > { %7256 = vmatpush1.bf16.msra.mxu0 %v13750_v28  ;;  %3336 = vmatprep.subr.bf16.mxu1 %v13755_v52  ;;  %v6405_v28 = vpack.c.bf16 %v6397_v57, %v6397_v57  ;;  %v6400_v52 = vld [vmem:[#allocation2 + $0x78] sm:$0x7]  ;;  %v13839_v57 = vld [vmem:[#allocation3 + $0xa2c] ss:$16 sps:$4 sm:$0xff]  }
 0x295   : > { %7257 = vmatprep.subr.bf16.mxu0 %v13758_v30  ;;  %v13813_v30 = vld [vmem:[#allocation3 + $0x9a8] ss:$16 sps:$4 sm:$0xff]  }
 0x297   : > { %3337 = vmatpush1.bf16.msra.mxu1 %v13753_v32  ;;  %v13816_v32 = vld [vmem:[#allocation3 + $0x19a0] ss:$16 sps:$4 sm:$0xff]  }
 0x298   : > { %7258 = vmatpush1.bf16.msra.mxu0 %v13756_v36  ;;  %3338 = vmatprep.subr.bf16.mxu1 %v13761_v37  ;;  %v14882_v36 = vld [vmem:[#allocation2 + $0x58] sm:$0xff] }
 0x299   : > { %7259 = vmatprep.subr.bf16.mxu0 %v13764_v38  ;;  %v6404_v37 = vpack.c.bf16 %v14882_v36, %v6396_v16  ;;  %v13821_v38 = vld [vmem:[#allocation3 + $0x9cc] ss:$16 sps:$4 sm:$0xff]   ;;  %v13842_v16 = vld [vmem:[#allocation3 + $0x1a24] ss:$16 sps:$4 sm:$0xff]  }
 0x29a   : > { %v13857_v36 = vld [vmem:[#allocation3 + $0xa8c] ss:$16 sps:$4 sm:$0xff]  }
 0x29b   : > { %3339 = vmatpush1.bf16.msra.mxu1 %v13759_v39  ;;  %v13824_v39 = vld [vmem:[#allocation3 + $0x19c4] ss:$16 sps:$4 sm:$0xff]  }
 0x29c   : > { %7260 = vmatpush1.bf16.msra.mxu0 %v13762_v60  ;;  %3340 = vmatprep.subr.bf16.mxu1 %v13767_v41  ;;  %v6408_v60 = vpack.c.bf16 %v6400_v52, %v6400_v52  ;;  %v6540_v41 = vshrl.u32 %v6401_v25, 16  ;;  %v13854_v52 = vld [vmem:[#allocation3 + $0x1a64] ss:$16 sps:$4 sm:$0xff]  }
 0x29d   : > { %7261 = vmatprep.subr.bf16.mxu0 %v13770_v40  ;;  %v6543_v40 = vshll.u32 %v6401_v25, 16  ;;  %v13843_v25 = vld [vmem:[#allocation3 + $0xa48] ss:$16 sps:$4 sm:$0xff]  }
 0x29f   : > { %3341 = vmatpush1.bf16.msra.mxu1 %v13765_v42  ;;  %v6548_v42 = vshrl.u32 %v6405_v28, 16 }
 0x2a0   : > { %7262 = vmatpush1.bf16.msra.mxu0 %v13768_v43  ;;  %3342 = vmatprep.subr.bf16.mxu1 %v13773_v44  ;;  %v6551_v43 = vshll.u32 %v6405_v28, 16  ;;  %v13819_v44 = vld [vmem:[#allocation3 + $0x9c8] ss:$16 sps:$4 sm:$0xff]   ;;  %v13846_v28 = vld [vmem:[#allocation3 + $0x1a40] ss:$16 sps:$4 sm:$0xff]  }
 0x2a1   : > { %7263 = vmatprep.subr.bf16.mxu0 %v13776_v46  ;;  %v13822_v46 = vld [vmem:[#allocation3 + $0x19c0] ss:$16 sps:$4 sm:$0xff]  }
 0x2a3   : > { %3343 = vmatpush1.bf16.msra.mxu1 %v13771_v50  ;;  %v6591_v50 = vshrl.u32 %v6404_v37, 16 }
 0x2a4   : > { %7264 = vmatpush1.bf16.msra.mxu0 %v13774_v47  ;;  %3344 = vmatprep.subr.bf16.mxu1 %v13779_v49  ;;  %v13827_v47 = vld [vmem:[#allocation3 + $0x9ec] ss:$16 sps:$4 sm:$0xff]   ;;  %v13830_v49 = vld [vmem:[#allocation3 + $0x19e4] ss:$16 sps:$4 sm:$0xff]  }
 0x2a5   : > { %7265 = vmatprep.subr.bf16.mxu0 %v13782_v56  ;;  %v6594_v56 = vshll.u32 %v6404_v37, 16  ;;  %v13860_v37 = vld [vmem:[#allocation3 + $0x1a84] ss:$16 sps:$4 sm:$0xff]  }
 0x2a7   : > { %3345 = vmatpush1.bf16.msra.mxu1 %v13777_v59  ;;  %v6599_v59 = vshrl.u32 %v6408_v60, 16 }
 0x2a8   : > { %7266 = vmatpush1.bf16.msra.mxu0 %v13780_v62  ;;  %3346 = vmatprep.subr.bf16.mxu1 %v13785_v0  ;;  %v6602_v62 = vshll.u32 %v6408_v60, 16  ;;  %v6542_v0 = vrot.slane %v6540_v41, 1  ;;  %v13863_v60 = vld [vmem:[#allocation3 + $0xaac] ss:$16 sps:$4 sm:$0xff]   ;;  %v13861_v41 = vld [vmem:[#allocation3 + $0xaa8] ss:$16 sps:$4 sm:$0xff]  }
 0x2a9   : > { %7267 = vmatprep.subr.bf16.mxu0 %v13788_v2  ;;  %v6545_v2 = vrot.slane %v6543_v40, 2  ;;  %v13864_v40 = vld [vmem:[#allocation3 + $0x1aa0] ss:$16 sps:$4 sm:$0xff]  }
 0x2ab   : > { %3347 = vmatpush1.bf16.msra.mxu1 %v13783_v3  ;;  %v6550_v3 = vrot.slane %v6548_v42, 1  ;;  %v13869_v42 = vld [vmem:[#allocation3 + $0xacc] ss:$16 sps:$4 sm:$0xff]  }
 0x2ac   : > { %7268 = vmatpush1.bf16.msra.mxu0 %v13786_v31  ;;  %3348 = vmatprep.subr.bf16.mxu1 %v13791_v5  ;;  %v6553_v31 = vrot.slane %v6551_v43, 2  ;;  %v13825_v5 = vld [vmem:[#allocation3 + $0x9e8] ss:$16 sps:$4 sm:$0xff]   ;;  %v13872_v43 = vld [vmem:[#allocation3 + $0x1ac4] ss:$16 sps:$4 sm:$0xff]  }
 0x2ad   : > { %7269 = vmatprep.subr.bf16.mxu0 %v13794_v6  ;;  %v13828_v6 = vld [vmem:[#allocation3 + $0x19e0] ss:$16 sps:$4 sm:$0xff]  }
 0x2af   : > { %3349 = vmatpush1.bf16.msra.mxu1 %v13789_v7  ;;  %v6593_v7 = vrot.slane %v6591_v50, 1  ;;  %v13870_v50 = vld [vmem:[#allocation3 + $0x1ac0] ss:$16 sps:$4 sm:$0xff]  }
 0x2b0   : > { %7270 = vmatpush1.bf16.msra.mxu0 %v13792_v8  ;;  %3350 = vmatprep.subr.bf16.mxu1 %v13797_v9  ;;  %v6596_v8 = vrot.slane %v6594_v56, 2  ;;  %v6601_v9 = vrot.slane %v6599_v59, 1  ;;  %v13875_v56 = vld [vmem:[#allocation3 + $0xaec] ss:$16 sps:$4 sm:$0xff]   ;;  %v13878_v59 = vld [vmem:[#allocation3 + $0x1ae4] ss:$16 sps:$4 sm:$0xff]  }
 0x2b1   : > { %7271 = vmatprep.subr.bf16.mxu0 %v13800_v10  ;;  %v6604_v10 = vrot.slane %v6602_v62, 2 }
 0x2b3   : > { %3351 = vmatpush1.bf16.msra.mxu1 %v13795_v19  ;;  %v13833_v19 = vld [vmem:[#allocation3 + $0xa0c] ss:$16 sps:$4 sm:$0xff]  }
 0x2b4   : > { %7272 = vmatpush1.bf16.msra.mxu0 %v13798_v53  ;;  %3352 = vmatprep.subr.bf16.mxu1 %v13803_v21  ;;  %v13836_v53 = vld [vmem:[#allocation3 + $0x1a04] ss:$16 sps:$4 sm:$0xff]   ;;  %v6546_v21 = vor.u32 %v6545_v2, %v6542_v0  ;;  %v13873_v0 = vld [vmem:[#allocation3 + $0xae8] ss:$16 sps:$4 sm:$0xff]   ;;  %v13876_v2 = vld [vmem:[#allocation3 + $0x1ae0] ss:$16 sps:$4 sm:$0xff]  }
 0x2b5   : > { %7273 = vmatprep.subr.bf16.mxu0 %v13806_v26  ;;  %v6554_v26 = vor.u32 %v6553_v31, %v6550_v3  ;;  %v13881_v3 = vld [vmem:[#allocation3 + $0xb0c] ss:$16 sps:$4 sm:$0xff]   ;;  %v13884_v31 = vld [vmem:[#allocation3 + $0x1b04] ss:$16 sps:$4 sm:$0xff]  }
 0x2b7   : > { %3353 = vmatpush1.bf16.msra.mxu1 %v13801_v11  ;;  %v13831_v11 = vld [vmem:[#allocation3 + $0xa08] ss:$16 sps:$4 sm:$0xff]   ;;  %v15419_v14 = vsel %vm6538_vm5, %v6546_v21, %v6554_v26  ;;  %v13894_v26 = vld [vmem:[#allocation3 + $0x1b40] ss:$16 sps:$4 sm:$0xff]  }
 0x2b8   : > { %7274 = vmatpush1.bf16.msra.mxu0 %v13804_v12  ;;  %3354 = vmatprep.subr.bf16.mxu1 %v13809_v33  ;;  %v13834_v12 = vld [vmem:[#allocation3 + $0x1a00] ss:$16 sps:$4 sm:$0xff]   ;;  %v6597_v33 = vor.u32 %v6596_v8, %v6593_v7  ;;  %v13887_v7 = vld [vmem:[#allocation3 + $0xb2c] ss:$16 sps:$4 sm:$0xff]   ;;  %v13890_v8 = vld [vmem:[#allocation3 + $0x1b24] ss:$16 sps:$4 sm:$0xff]  }
 0x2b9   : > { %7275 = vmatprep.subr.bf16.mxu0 %v13812_v13  ;;  %v6605_v13 = vor.u32 %v6604_v10, %v6601_v9  ;;  %v13885_v9 = vld [vmem:[#allocation3 + $0xb28] ss:$16 sps:$4 sm:$0xff]   ;;  %v13888_v10 = vld [vmem:[#allocation3 + $0x1b20] ss:$16 sps:$4 sm:$0xff]  }
 0x2ba   : > { %v13891_v21 = vld [vmem:[#allocation3 + $0xb48] ss:$16 sps:$4 sm:$0xff]  }
 0x2bb   : > { %3355 = vmatpush1.bf16.msra.mxu1 %v13807_v17  ;;  %v13837_v17 = vld [vmem:[#allocation3 + $0xa28] ss:$16 sps:$4 sm:$0xff]  }
 0x2bc   : > { %7276 = vmatpush1.bf16.msra.mxu0 %v13810_v18  ;;  %3356 = vmatprep.subr.bf16.mxu1 %v13815_v20  ;;  %v13840_v18 = vld [vmem:[#allocation3 + $0x1a20] ss:$16 sps:$4 sm:$0xff]   ;;  %v15424_v20 = vsel %vm6538_vm5, %v6597_v33, %v6605_v13  ;;  %v13897_v33 = vld [vmem:[#allocation3 + $0xb68] ss:$16 sps:$4 sm:$0xff]  }
 0x2bd   : > { %7277 = vmatprep.subr.bf16.mxu0 %v13818_v23  ;;  %v13845_v23 = vld [vmem:[#allocation3 + $0xa4c] ss:$16 sps:$4 sm:$0xff]   ;;  %v13900_v13 = vld [vmem:[#allocation3 + $0x1b60] ss:$16 sps:$4 sm:$0xff]  }
 0x2bf   : > { %3357 = vmatpush1.bf16.msra.mxu1 %v13813_v30  ;;  %v13849_v30 = vld [vmem:[#allocation3 + $0xa68] ss:$16 sps:$4 sm:$0xff]  }
 0x2c0   : > { %7278 = vmatpush1.bf16.msra.mxu0 %v13816_v32  ;;  %3358 = vmatprep.subr.bf16.mxu1 %v13821_v38  ;;  %v13852_v32 = vld [vmem:[#allocation3 + $0x1a60] ss:$16 sps:$4 sm:$0xff]   ;;  %v13855_v38 = vld [vmem:[#allocation3 + $0xa88] ss:$16 sps:$4 sm:$0xff]  }
 0x2c1   : > { %7279 = vmatprep.subr.bf16.mxu0 %v13824_v39  ;;  %v13858_v39 = vld [vmem:[#allocation3 + $0x1a80] ss:$16 sps:$4 sm:$0xff]  }
 0x2c3   : > { %3359 = vmatpush1.bf16.msra.mxu1 %v13819_v44 }
 0x2c4   : > { %7280 = vmatpush1.bf16.msra.mxu0 %v13822_v46  ;;  %3360 = vmatprep.subr.bf16.mxu1 %v13827_v47  ;;  %v13867_v46 = vld [vmem:[#allocation3 + $0xac8] ss:$16 sps:$4 sm:$0xff]  }
 0x2c5   : > { %7281 = vmatprep.subr.bf16.mxu0 %v13830_v49 }
 0x2c7   : > { %3361 = vmatpush1.bf16.msra.mxu1 %v13825_v5  ;;  %v13879_v5 = vld [vmem:[#allocation3 + $0xb08] ss:$16 sps:$4 sm:$0xff]  }
 0x2c8   : > { %7282 = vmatpush1.bf16.msra.mxu0 %v13828_v6  ;;  %3373 = vmatprep.subr.bf16.mxu1 %v13833_v19  ;;  %v13882_v6 = vld [vmem:[#allocation3 + $0x1b00] ss:$16 sps:$4 sm:$0xff]   ;;  %v13893_v19 = vld [vmem:[#allocation3 + $0xb4c] ss:$16 sps:$4 sm:$0xff]  }
 0x2c9   : > { %7294 = vmatprep.subr.bf16.mxu0 %v13836_v53  ;;  %v13896_v53 = vld [vmem:[#allocation3 + $0x1b44] ss:$16 sps:$4 sm:$0xff]  }
 0x2ca   : > { %3363 = vmatmul.mubr.bf16.vlgmr.msra.gmra.mrb[4].mxu1 %v15292_v55  ;;  %v13851_v55 = vld [vmem:[#allocation3 + $0xa6c] ss:$16 sps:$4 sm:$0xff]  }
 0x2cb   : > { %7284 = vmatmul.mubr.bf16.vlgmr.msra.gmra.mrb[0].mxu0 %v15419_v14  ;;  %3374 = vmatpush1.bf16.msra.mxu1 %v13831_v11  ;;  %v13899_v11 = vld [vmem:[#allocation3 + $0xb6c] ss:$16 sps:$4 sm:$0xff]  }
 0x2cc   : > { %7295 = vmatpush1.bf16.msra.mxu0 %v13834_v12  ;;  %3375 = vmatprep.subr.bf16.mxu1 %v13839_v57  ;;  %v13902_v12 = vld [vmem:[#allocation3 + $0x1b64] ss:$16 sps:$4 sm:$0xff]   ;;  %v13905_v57 = vld [vmem:[#allocation3 + $0xb8c] ss:$16 sps:$4 sm:$0xff]  }
 0x2cd   : > { %7296 = vmatprep.subr.bf16.mxu0 %v13842_v16  ;;  %7326 = vmatprep.mubr.bf16.mxu0 %v15424_v20  ;;  %v13908_v16 = vld [vmem:[#allocation3 + $0x1b84] ss:$16 sps:$4 sm:$0xff]  }
 0x2ce   : > { %3405 = vmatprep.mubr.bf16.mxu1 %v15316_v4  ;;  %v13866_v4 = vld [vmem:[#allocation3 + $0x1aa4] ss:$16 sps:$4 sm:$0xff]  }
 0x2cf   : > { %3376 = vmatpush1.bf16.msra.mxu1 %v13837_v17  ;;  %v6395_v17 = vld [vmem:[#allocation2 + $0x30] sm:$0xf8] }
 0x2d0   : > { %7297 = vmatpush1.bf16.msra.mxu0 %v13840_v18  ;;  %3377 = vmatprep.subr.bf16.mxu1 %v13845_v23  ;;  %v6399_v18 = vld [vmem:[#allocation2 + $0x70] sm:$0x7]  ;;  %v13903_v23 = vld [vmem:[#allocation3 + $0xb88] ss:$16 sps:$4 sm:$0xff]  }
 0x2d1   : > { %7298 = vmatprep.subr.bf16.mxu0 %v13848_v24  ;;  %v13906_v24 = vld [vmem:[#allocation3 + $0x1b80] ss:$16 sps:$4 sm:$0xff]  }
 0x2d3   : > { %3378 = vmatpush1.bf16.msra.mxu1 %v13843_v25  ;;  %v13911_v25 = vld [vmem:[#allocation3 + $0xbac] ss:$16 sps:$4 sm:$0xff]  }
 0x2d4   : > { %7299 = vmatpush1.bf16.msra.mxu0 %v13846_v28  ;;  %3379 = vmatprep.subr.bf16.mxu1 %v13851_v55  ;;  %v13914_v28 = vld [vmem:[#allocation3 + $0x1ba4] ss:$16 sps:$4 sm:$0xff]  }
 0x2d5   : > { %7300 = vmatprep.subr.bf16.mxu0 %v13854_v52  ;;  %v14883_v55 = vld [vmem:[#allocation2 + $0x50] sm:$0xff] }
 0x2d6   : > { %v6403_v52 = vpack.c.bf16 %v14883_v55, %v6395_v17  ;;  %v13953_v17 = vld [vmem:[#allocation3 + $0xd0c] ss:$16 sps:$4 sm:$0xff]  }
 0x2d7   : > { %3380 = vmatpush1.bf16.msra.mxu1 %v13849_v30  ;;  %v6407_v30 = vpack.c.bf16 %v6399_v18, %v6399_v18  ;;  %v13951_v18 = vld [vmem:[#allocation3 + $0xd08] ss:$16 sps:$4 sm:$0xff]   ;;  %v13962_v55 = vld [vmem:[#allocation3 + $0xd6c] ss:$16 sps:$4 sm:$0xff]  }
 0x2d8   : > { %7301 = vmatpush1.bf16.msra.mxu0 %v13852_v32  ;;  %3381 = vmatprep.subr.bf16.mxu1 %v13857_v36  ;;  %v13909_v32 = vld [vmem:[#allocation3 + $0xba8] ss:$16 sps:$4 sm:$0xff]   ;;  %v13912_v36 = vld [vmem:[#allocation3 + $0x1ba0] ss:$16 sps:$4 sm:$0xff]  }
 0x2d9   : > { %7302 = vmatprep.subr.bf16.mxu0 %v13860_v37  ;;  %v13917_v37 = vld [vmem:[#allocation3 + $0xbcc] ss:$16 sps:$4 sm:$0xff]  }
 0x2db   : > { %3382 = vmatpush1.bf16.msra.mxu1 %v13855_v38  ;;  %v13920_v38 = vld [vmem:[#allocation3 + $0x1bc4] ss:$16 sps:$4 sm:$0xff]  }
 0x2dc   : > { %7303 = vmatpush1.bf16.msra.mxu0 %v13858_v39  ;;  %3383 = vmatprep.subr.bf16.mxu1 %v13863_v60  ;;  %v6574_v39 = vshrl.u32 %v6403_v52, 16  ;;  %v6577_v60 = vshll.u32 %v6403_v52, 16  ;;  %v13960_v52 = vld [vmem:[#allocation3 + $0xd68] ss:$16 sps:$4 sm:$0xff]  }
 0x2dd   : > { %7304 = vmatprep.subr.bf16.mxu0 %v13866_v4  ;;  %v15428_v44 = vpop.f32.mrb[0].mxu1  ;;  %v6582_v4 = vshrl.u32 %v6407_v30, 16 }
 0x2de   : > { %v15430_v47 = vpop.f32.mrb[1].mxu1 }
 0x2df   : > { %v15432_v49 = vpop.f32.mrb[2].mxu1  ;;  %3384 = vmatpush1.bf16.msra.mxu1 %v13861_v41  ;;  %v6585_v41 = vshll.u32 %v6407_v30, 16  ;;  %v13965_v30 = vld [vmem:[#allocation3 + $0xd8c] ss:$16 sps:$4 sm:$0xff]  }
 0x2e0   : > { %7305 = vmatpush1.bf16.msra.mxu0 %v13864_v40  ;;  %v15434_v62 = vpop.f32.mrb[3].mxu1  ;;  %3385 = vmatprep.subr.bf16.mxu1 %v13869_v42  ;;  %v13915_v40 = vld [vmem:[#allocation3 + $0xbc8] ss:$16 sps:$4 sm:$0xff]   ;;  %v13918_v42 = vld [vmem:[#allocation3 + $0x1bc0] ss:$16 sps:$4 sm:$0xff]  }
 0x2e1   : > { %7306 = vmatprep.subr.bf16.mxu0 %v13872_v43  ;;  %v13923_v43 = vld [vmem:[#allocation3 + $0xbec] ss:$16 sps:$4 sm:$0xff]  }
 0x2e3   : > { %3386 = vmatpush1.bf16.msra.mxu1 %v13867_v46  ;;  %v13926_v46 = vld [vmem:[#allocation3 + $0x1be4] ss:$16 sps:$4 sm:$0xff]  }
 0x2e4   : > { %7307 = vmatpush1.bf16.msra.mxu0 %v13870_v50  ;;  %3387 = vmatprep.subr.bf16.mxu1 %v13875_v56  ;;  %v6576_v50 = vrot.slane %v6574_v39, 1  ;;  %v6579_v56 = vrot.slane %v6577_v60, 2  ;;  %v14067_v39 = vld [vmem:[#allocation7 + $0x214] ss:$8 sps:$4 sm:$0xff]   ;;  %v14065_v60 = vld [vmem:[#allocation7 + $0x210] ss:$8 sps:$4 sm:$0xff]  }
 0x2e5   : > { %7308 = vmatprep.subr.bf16.mxu0 %v13878_v59  ;;  %v6584_v59 = vrot.slane %v6582_v4, 1  ;;  %v13966_v4 = vld [vmem:[#allocation3 + $0xda8] ss:$16 sps:$4 sm:$0xff]  }
 0x2e7   : > { %3388 = vmatpush1.bf16.msra.mxu1 %v13873_v0  ;;  %v6587_v0 = vrot.slane %v6585_v41, 2  ;;  %v13971_v41 = vld [vmem:[#allocation3 + $0xdcc] ss:$16 sps:$4 sm:$0xff]  }
 0x2e8   : > { %7309 = vmatpush1.bf16.msra.mxu0 %v13876_v2  ;;  %3389 = vmatprep.subr.bf16.mxu1 %v13881_v3  ;;  %v13921_v2 = vld [vmem:[#allocation3 + $0xbe8] ss:$16 sps:$4 sm:$0xff]   ;;  %v13924_v3 = vld [vmem:[#allocation3 + $0x1be0] ss:$16 sps:$4 sm:$0xff]  }
 0x2e9   : > { %7310 = vmatprep.subr.bf16.mxu0 %v13884_v31  ;;  %v13929_v31 = vld [vmem:[#allocation3 + $0xc0c] ss:$16 sps:$4 sm:$0xff]  }
 0x2eb   : > { %3390 = vmatpush1.bf16.msra.mxu1 %v13879_v5  ;;  %v6580_v5 = vor.u32 %v6579_v56, %v6576_v50  ;;  %v14079_v50 = vld [vmem:[#allocation7 + $0x234] ss:$8 sps:$4 sm:$0xff]   ;;  %v14077_v56 = vld [vmem:[#allocation7 + $0x230] ss:$8 sps:$4 sm:$0xff]  }
 0x2ec   : > { %7311 = vmatpush1.bf16.msra.mxu0 %v13882_v6  ;;  %3391 = vmatprep.subr.bf16.mxu1 %v13887_v7  ;;  %v6588_v6 = vor.u32 %v6587_v0, %v6584_v59  ;;  %v13927_v7 = vld [vmem:[#allocation3 + $0xc08] ss:$16 sps:$4 sm:$0xff]   ;;  %v13977_v0 = vld [vmem:[#allocation3 + $0xe0c] ss:$16 sps:$4 sm:$0xff]  }
 0x2ed   : > { %7312 = vmatprep.subr.bf16.mxu0 %v13890_v8  ;;  %v13972_v59 = vld [vmem:[#allocation3 + $0xde8] ss:$16 sps:$4 sm:$0xff]  }
 0x2ee   : > { %v15437_v8 = vsel %vm6538_vm5, %v6580_v5, %v6588_v6  ;;  %v13980_v5 = vld [vmem:[#allocation3 + $0xe2c] ss:$16 sps:$4 sm:$0xff]   ;;  %v14091_v6 = vld [vmem:[#allocation7 + $0x254] ss:$8 sps:$4 sm:$0xff]  }
 0x2ef   : > { %3392 = vmatpush1.bf16.msra.mxu1 %v13885_v9  ;;  %v13932_v9 = vld [vmem:[#allocation3 + $0xc2c] ss:$16 sps:$4 sm:$0xff]  }
 0x2f0   : > { %7313 = vmatpush1.bf16.msra.mxu0 %v13888_v10  ;;  %3393 = vmatprep.subr.bf16.mxu1 %v13893_v19  ;;  %v13930_v10 = vld [vmem:[#allocation3 + $0xc28] ss:$16 sps:$4 sm:$0xff]   ;;  %v13935_v19 = vld [vmem:[#allocation3 + $0xc4c] ss:$16 sps:$4 sm:$0xff]  }
 0x2f1   : > { %7314 = vmatprep.subr.bf16.mxu0 %v13896_v53  ;;  %v13933_v53 = vld [vmem:[#allocation3 + $0xc48] ss:$16 sps:$4 sm:$0xff]  }
 0x2f3   : > { %3394 = vmatpush1.bf16.msra.mxu1 %v13891_v21  ;;  %v13938_v21 = vld [vmem:[#allocation3 + $0xc6c] ss:$16 sps:$4 sm:$0xff]  }
 0x2f4   : > { %7315 = vmatpush1.bf16.msra.mxu0 %v13894_v26  ;;  %3395 = vmatprep.subr.bf16.mxu1 %v13899_v11  ;;  %v13936_v26 = vld [vmem:[#allocation3 + $0xc68] ss:$16 sps:$4 sm:$0xff]   ;;  %v13941_v11 = vld [vmem:[#allocation3 + $0xc8c] ss:$16 sps:$4 sm:$0xff]  }
 0x2f5   : > { %7316 = vmatprep.subr.bf16.mxu0 %v13902_v12  ;;  %v13939_v12 = vld [vmem:[#allocation3 + $0xc88] ss:$16 sps:$4 sm:$0xff]  }
 0x2f7   : > { %3396 = vmatpush1.bf16.msra.mxu1 %v13897_v33  ;;  %v13944_v33 = vld [vmem:[#allocation3 + $0xcac] ss:$16 sps:$4 sm:$0xff]  }
 0x2f8   : > { %7317 = vmatpush1.bf16.msra.mxu0 %v13900_v13  ;;  %3397 = vmatprep.subr.bf16.mxu1 %v13905_v57  ;;  %v13947_v13 = vld [vmem:[#allocation3 + $0xccc] ss:$16 sps:$4 sm:$0xff]   ;;  %v13945_v57 = vld [vmem:[#allocation3 + $0xcc8] ss:$16 sps:$4 sm:$0xff]  }
 0x2f9   : > { %7318 = vmatprep.subr.bf16.mxu0 %v13908_v16  ;;  %v13948_v16 = vld [vmem:[#allocation3 + $0xce8] ss:$16 sps:$4 sm:$0xff]  }
 0x2fb   : > { %3398 = vmatpush1.bf16.msra.mxu1 %v13903_v23  ;;  %v13956_v23 = vld [vmem:[#allocation3 + $0xd2c] ss:$16 sps:$4 sm:$0xff]  }
 0x2fc   : > { %7319 = vmatpush1.bf16.msra.mxu0 %v13906_v24  ;;  %3399 = vmatprep.subr.bf16.mxu1 %v13911_v25  ;;  %v13954_v24 = vld [vmem:[#allocation3 + $0xd28] ss:$16 sps:$4 sm:$0xff]   ;;  %v13959_v25 = vld [vmem:[#allocation3 + $0xd4c] ss:$16 sps:$4 sm:$0xff]  }
 0x2fd   : > { %7320 = vmatprep.subr.bf16.mxu0 %v13914_v28  ;;  %v13957_v28 = vld [vmem:[#allocation3 + $0xd48] ss:$16 sps:$4 sm:$0xff]  }
 0x2ff   : > { %3400 = vmatpush1.bf16.msra.mxu1 %v13909_v32  ;;  %v14061_v32 = vld [vmem:[#allocation7 + $0x204] ss:$8 sps:$4 sm:$0xff]  }
 0x300   : > { %7321 = vmatpush1.bf16.msra.mxu0 %v13912_v36  ;;  %3401 = vmatprep.subr.bf16.mxu1 %v13917_v37  ;;  %v14059_v36 = vld [vmem:[#allocation7 + $0x200] ss:$8 sps:$4 sm:$0xff]   ;;  %v13963_v37 = vld [vmem:[#allocation3 + $0xd88] ss:$16 sps:$4 sm:$0xff]  }
 0x301   : > { %7322 = vmatprep.subr.bf16.mxu0 %v13920_v38  ;;  %v13968_v38 = vld [vmem:[#allocation3 + $0xdac] ss:$16 sps:$4 sm:$0xff]  }
 0x303   : > { %3402 = vmatpush1.bf16.msra.mxu1 %v13915_v40  ;;  %v14073_v40 = vld [vmem:[#allocation7 + $0x224] ss:$8 sps:$4 sm:$0xff]  }
 0x304   : > { %7323 = vmatpush1.bf16.msra.mxu0 %v13918_v42  ;;  %3403 = vmatprep.subr.bf16.mxu1 %v13923_v43  ;;  %v14071_v42 = vld [vmem:[#allocation7 + $0x220] ss:$8 sps:$4 sm:$0xff]   ;;  %v13969_v43 = vld [vmem:[#allocation3 + $0xdc8] ss:$16 sps:$4 sm:$0xff]  }
 0x305   : > { %7324 = vmatprep.subr.bf16.mxu0 %v13926_v46  ;;  %v13974_v46 = vld [vmem:[#allocation3 + $0xdec] ss:$16 sps:$4 sm:$0xff]  }
 0x307   : > { %3404 = vmatpush1.bf16.msra.mxu1 %v13921_v2  ;;  %v14085_v2 = vld [vmem:[#allocation7 + $0x244] ss:$8 sps:$4 sm:$0xff]  }
 0x308   : > { %7325 = vmatpush1.bf16.msra.mxu0 %v13924_v3  ;;  %4287 = vmatprep.subr.bf16.mxu1 %v13929_v31  ;;  %v14083_v3 = vld [vmem:[#allocation7 + $0x240] ss:$8 sps:$4 sm:$0xff]   ;;  %v13975_v31 = vld [vmem:[#allocation3 + $0xe08] ss:$16 sps:$4 sm:$0xff]  }
 0x309   : > { %8026 = vmatprep.subr.bf16.mxu0 %v14061_v32  ;;  %v14001_v32 = vld [vmem:[#allocation3 + $0xf0c] ss:$16 sps:$4 sm:$0xff]  }
 0x30a   : > { %3406 = vmatmul.mubr.bf16.vlgmr.msra.gmra.mrb[4].mxu1 %v15325_v48  ;;  %v13942_v48 = vld [vmem:[#allocation3 + $0xca8] ss:$16 sps:$4 sm:$0xff]  }
 0x30b   : > { %7327 = vmatmul.mubr.bf16.vlgmr.msra.gmra.mrb[0].mxu0 %v15437_v8  ;;  %4288 = vmatpush1.bf16.msra.mxu1 %v13927_v7  ;;  %v14089_v7 = vld [vmem:[#allocation7 + $0x250] ss:$8 sps:$4 sm:$0xff]  }
 0x30c   : > { %4319 = vmatprep.mubr.bf16.mxu1 %v15329_v54  ;;  %4289 = vmatprep.subr.bf16.mxu1 %v13932_v9  ;;  %v13950_v54 = vld [vmem:[#allocation3 + $0xcec] ss:$16 sps:$4 sm:$0xff]   ;;  %v13978_v9 = vld [vmem:[#allocation3 + $0xe28] ss:$16 sps:$4 sm:$0xff]  }
 0x30d   : > { %8027 = vmatpush1.bf16.msra.mxu0 %v14059_v36  ;;  %v14133_v36 = vld [vmem:[#allocation7 + $0x2c4] ss:$8 sps:$4 sm:$0xff]  }
 0x30e   : > { %8028 = vmatprep.subr.bf16.mxu0 %v14067_v39  ;;  %v14004_v39 = vld [vmem:[#allocation3 + $0xf2c] ss:$16 sps:$4 sm:$0xff]  }
 0x30f   : > { %4290 = vmatpush1.bf16.msra.mxu1 %v13930_v10  ;;  %v13983_v10 = vld [vmem:[#allocation3 + $0xe4c] ss:$16 sps:$4 sm:$0xff]  }
 0x310   : > { %4291 = vmatprep.subr.bf16.mxu1 %v13935_v19  ;;  %v14097_v19 = vld [vmem:[#allocation7 + $0x264] ss:$8 sps:$4 sm:$0xff]  }
 0x311   : > { %8029 = vmatpush1.bf16.msra.mxu0 %v14065_v60  ;;  %v14139_v60 = vld [vmem:[#allocation7 + $0x2d4] ss:$8 sps:$4 sm:$0xff]  }
 0x312   : > { %8030 = vmatprep.subr.bf16.mxu0 %v14073_v40  ;;  %v14007_v40 = vld [vmem:[#allocation3 + $0xf4c] ss:$16 sps:$4 sm:$0xff]  }
 0x313   : > { %4292 = vmatpush1.bf16.msra.mxu1 %v13933_v53  ;;  %v14095_v53 = vld [vmem:[#allocation7 + $0x260] ss:$8 sps:$4 sm:$0xff]  }
 0x314   : > { %4293 = vmatprep.subr.bf16.mxu1 %v13938_v21  ;;  %v13981_v21 = vld [vmem:[#allocation3 + $0xe48] ss:$16 sps:$4 sm:$0xff]  }
 0x315   : > { %8031 = vmatpush1.bf16.msra.mxu0 %v14071_v42  ;;  %v14145_v42 = vld [vmem:[#allocation7 + $0x2e4] ss:$8 sps:$4 sm:$0xff]  }
 0x316   : > { %8032 = vmatprep.subr.bf16.mxu0 %v14079_v50  ;;  %v14010_v50 = vld [vmem:[#allocation3 + $0xf6c] ss:$16 sps:$4 sm:$0xff]  }
 0x317   : > { %4294 = vmatpush1.bf16.msra.mxu1 %v13936_v26  ;;  %v13986_v26 = vld [vmem:[#allocation3 + $0xe6c] ss:$16 sps:$4 sm:$0xff]  }
 0x318   : > { %4295 = vmatprep.subr.bf16.mxu1 %v13941_v11  ;;  %v14103_v11 = vld [vmem:[#allocation7 + $0x274] ss:$8 sps:$4 sm:$0xff]  }
 0x319   : > { %8033 = vmatpush1.bf16.msra.mxu0 %v14077_v56  ;;  %v14151_v56 = vld [vmem:[#allocation7 + $0x2f4] ss:$8 sps:$4 sm:$0xff]  }
 0x31a   : > { %8034 = vmatprep.subr.bf16.mxu0 %v14085_v2  ;;  %v14013_v2 = vld [vmem:[#allocation3 + $0xf8c] ss:$16 sps:$4 sm:$0xff]  }
 0x31b   : > { %4296 = vmatpush1.bf16.msra.mxu1 %v13939_v12  ;;  %v14101_v12 = vld [vmem:[#allocation7 + $0x270] ss:$8 sps:$4 sm:$0xff]  }
 0x31c   : > { %4297 = vmatprep.subr.bf16.mxu1 %v13944_v33  ;;  %v13989_v33 = vld [vmem:[#allocation3 + $0xe8c] ss:$16 sps:$4 sm:$0xff]  }
 0x31d   : > { %8035 = vmatpush1.bf16.msra.mxu0 %v14083_v3  ;;  %v14011_v3 = vld [vmem:[#allocation3 + $0xf88] ss:$16 sps:$4 sm:$0xff]  }
 0x31e   : > { %8036 = vmatprep.subr.bf16.mxu0 %v14091_v6  ;;  %v14019_v6 = vld [vmem:[#allocation3 + $0xfcc] ss:$16 sps:$4 sm:$0xff]  }
 0x31f   : > { %4298 = vmatpush1.bf16.msra.mxu1 %v13942_v48  ;;  %v14107_v48 = vld [vmem:[#allocation7 + $0x280] ss:$8 sps:$4 sm:$0xff]  }
 0x320   : > { %4299 = vmatprep.subr.bf16.mxu1 %v13947_v13  ;;  %v13987_v13 = vld [vmem:[#allocation3 + $0xe88] ss:$16 sps:$4 sm:$0xff]  }
 0x321   : > { %8037 = vmatpush1.bf16.msra.mxu0 %v14089_v7  ;;  %v14017_v7 = vld [vmem:[#allocation3 + $0xfc8] ss:$16 sps:$4 sm:$0xff]  }
 0x322   : > { %8038 = vmatprep.subr.bf16.mxu0 %v14097_v19  ;;  %v14025_v19 = vld [vmem:[#allocation3 + $0x100c] ss:$16 sps:$4 sm:$0xff]  }
 0x323   : > { %4300 = vmatpush1.bf16.msra.mxu1 %v13945_v57  ;;  %v13992_v57 = vld [vmem:[#allocation3 + $0xeac] ss:$16 sps:$4 sm:$0xff]  }
 0x324   : > { %4301 = vmatprep.subr.bf16.mxu1 %v13950_v54  ;;  %v14115_v54 = vld [vmem:[#allocation7 + $0x294] ss:$8 sps:$4 sm:$0xff]  }
 0x325   : > { %8039 = vmatpush1.bf16.msra.mxu0 %v14095_v53  ;;  %v14023_v53 = vld [vmem:[#allocation3 + $0x1008] ss:$16 sps:$4 sm:$0xff]  }
 0x326   : > { %8040 = vmatprep.subr.bf16.mxu0 %v14103_v11  ;;  %v14031_v11 = vld [vmem:[#allocation3 + $0x104c] ss:$16 sps:$4 sm:$0xff]  }
 0x327   : > { %4302 = vmatpush1.bf16.msra.mxu1 %v13948_v16  ;;  %v13990_v16 = vld [vmem:[#allocation3 + $0xea8] ss:$16 sps:$4 sm:$0xff]  }
 0x328   : > { %4303 = vmatprep.subr.bf16.mxu1 %v13953_v17  ;;  %v14113_v17 = vld [vmem:[#allocation7 + $0x290] ss:$8 sps:$4 sm:$0xff]  }
 0x329   : > { %8041 = vmatpush1.bf16.msra.mxu0 %v14101_v12  ;;  %v14029_v12 = vld [vmem:[#allocation3 + $0x1048] ss:$16 sps:$4 sm:$0xff]  }
 0x32b   : > { %4304 = vmatpush1.bf16.msra.mxu1 %v13951_v18  ;;  %v13995_v18 = vld [vmem:[#allocation3 + $0xecc] ss:$16 sps:$4 sm:$0xff]  }
 0x32c   : > { %4305 = vmatprep.subr.bf16.mxu1 %v13956_v23  ;;  %v13993_v23 = vld [vmem:[#allocation3 + $0xec8] ss:$16 sps:$4 sm:$0xff]  }
 0x32f   : > { %4306 = vmatpush1.bf16.msra.mxu1 %v13954_v24  ;;  %v14119_v24 = vld [vmem:[#allocation7 + $0x2a0] ss:$8 sps:$4 sm:$0xff]  }
 0x330   : > { %4307 = vmatprep.subr.bf16.mxu1 %v13959_v25  ;;  %v14121_v25 = vld [vmem:[#allocation7 + $0x2a4] ss:$8 sps:$4 sm:$0xff]  }
 0x333   : > { %4308 = vmatpush1.bf16.msra.mxu1 %v13957_v28  ;;  %v13998_v28 = vld [vmem:[#allocation3 + $0xeec] ss:$16 sps:$4 sm:$0xff]  }
 0x334   : > { %4309 = vmatprep.subr.bf16.mxu1 %v13962_v55  ;;  %v14127_v55 = vld [vmem:[#allocation7 + $0x2b4] ss:$8 sps:$4 sm:$0xff]  }
 0x337   : > { %4310 = vmatpush1.bf16.msra.mxu1 %v13960_v52  ;;  %v14125_v52 = vld [vmem:[#allocation7 + $0x2b0] ss:$8 sps:$4 sm:$0xff]  }
 0x338   : > { %4311 = vmatprep.subr.bf16.mxu1 %v13965_v30  ;;  %v13996_v30 = vld [vmem:[#allocation3 + $0xee8] ss:$16 sps:$4 sm:$0xff]  }
 0x33b   : > { %4312 = vmatpush1.bf16.msra.mxu1 %v13963_v37  ;;  %v14131_v37 = vld [vmem:[#allocation7 + $0x2c0] ss:$8 sps:$4 sm:$0xff]  }
 0x33c   : > { %4313 = vmatprep.subr.bf16.mxu1 %v13968_v38  ;;  %v13999_v38 = vld [vmem:[#allocation3 + $0xf08] ss:$16 sps:$4 sm:$0xff]  }
 0x33f   : > { %4314 = vmatpush1.bf16.msra.mxu1 %v13966_v4  ;;  %v14137_v4 = vld [vmem:[#allocation7 + $0x2d0] ss:$8 sps:$4 sm:$0xff]  }
 0x340   : > { %4315 = vmatprep.subr.bf16.mxu1 %v13971_v41  ;;  %v14002_v41 = vld [vmem:[#allocation3 + $0xf28] ss:$16 sps:$4 sm:$0xff]  }
 0x343   : > { %4316 = vmatpush1.bf16.msra.mxu1 %v13969_v43  ;;  %v14143_v43 = vld [vmem:[#allocation7 + $0x2e0] ss:$8 sps:$4 sm:$0xff]  }
 0x344   : > { %4317 = vmatprep.subr.bf16.mxu1 %v13974_v46  ;;  %v14005_v46 = vld [vmem:[#allocation3 + $0xf48] ss:$16 sps:$4 sm:$0xff]  }
 0x347   : > { %4318 = vmatpush1.bf16.msra.mxu1 %v13972_v59  ;;  %v14149_v59 = vld [vmem:[#allocation7 + $0x2f0] ss:$8 sps:$4 sm:$0xff]  }
 0x348   : > { %4330 = vmatprep.subr.bf16.mxu1 %v13977_v0  ;;  %v14008_v0 = vld [vmem:[#allocation3 + $0xf68] ss:$16 sps:$4 sm:$0xff]  }
 0x34a   : > { %4320 = vmatmul.mubr.bf16.vlgmr.msra.gmra.mrb[4].mxu1 %v15338_v1  ;;  %v13984_v1 = vld [vmem:[#allocation3 + $0xe68] ss:$16 sps:$4 sm:$0xff]  }
 0x34b   : > { %4331 = vmatpush1.bf16.msra.mxu1 %v13975_v31  ;;  %4362 = vmatprep.mubr.bf16.mxu1 %v15342_v27  ;;  %v14109_v27 = vld [vmem:[#allocation7 + $0x284] ss:$8 sps:$4 sm:$0xff]   ;;  %v14016_v31 = vld [vmem:[#allocation3 + $0xfac] ss:$16 sps:$4 sm:$0xff]  }
 0x34c   : > { %4332 = vmatprep.subr.bf16.mxu1 %v13980_v5  ;;  %8042 = vmatprep.subr.bf16.mxu0 %v14109_v27  ;;  %v14014_v5 = vld [vmem:[#allocation3 + $0xfa8] ss:$16 sps:$4 sm:$0xff]   ;;  %v14037_v27 = vld [vmem:[#allocation3 + $0x108c] ss:$16 sps:$4 sm:$0xff]  }
 0x34d   : > { %8043 = vmatpush1.bf16.msra.mxu0 %v14107_v48  ;;  %v14035_v48 = vld [vmem:[#allocation3 + $0x1088] ss:$16 sps:$4 sm:$0xff]  }
 0x34e   : > { %8044 = vmatprep.subr.bf16.mxu0 %v14115_v54  ;;  %v14046_v54 = vld [vmem:[#allocation3 + $0x10ec] ss:$16 sps:$4 sm:$0xff]  }
 0x34f   : > { %4333 = vmatpush1.bf16.msra.mxu1 %v13978_v9  ;;  %v14022_v9 = vld [vmem:[#allocation3 + $0xfec] ss:$16 sps:$4 sm:$0xff]  }
 0x350   : > { %4334 = vmatprep.subr.bf16.mxu1 %v13983_v10  ;;  %v14020_v10 = vld [vmem:[#allocation3 + $0xfe8] ss:$16 sps:$4 sm:$0xff]  }
 0x351   : > { %8045 = vmatpush1.bf16.msra.mxu0 %v14113_v17  ;;  %v14049_v17 = vld [vmem:[#allocation3 + $0x110c] ss:$16 sps:$4 sm:$0xff]  }
 0x352   : > { %8046 = vmatprep.subr.bf16.mxu0 %v14121_v25  ;;  %v14055_v25 = vld [vmem:[#allocation3 + $0x114c] ss:$16 sps:$4 sm:$0xff]  }
 0x353   : > { %4335 = vmatpush1.bf16.msra.mxu1 %v13981_v21  ;;  %v14028_v21 = vld [vmem:[#allocation3 + $0x102c] ss:$16 sps:$4 sm:$0xff]  }
 0x354   : > { %4336 = vmatprep.subr.bf16.mxu1 %v13986_v26  ;;  %v14026_v26 = vld [vmem:[#allocation3 + $0x1028] ss:$16 sps:$4 sm:$0xff]  }
 0x355   : > { %8047 = vmatpush1.bf16.msra.mxu0 %v14119_v24  ;;  %v14050_v24 = vld [vmem:[#allocation3 + $0x1128] ss:$16 sps:$4 sm:$0xff]  }
 0x356   : > { %8048 = vmatprep.subr.bf16.mxu0 %v14127_v55  ;;  %v14058_v55 = vld [vmem:[#allocation3 + $0x116c] ss:$16 sps:$4 sm:$0xff]  }
 0x357   : > { %4337 = vmatpush1.bf16.msra.mxu1 %v13984_v1  ;;  %v14034_v1 = vld [vmem:[#allocation3 + $0x106c] ss:$16 sps:$4 sm:$0xff]  }
 0x358   : > { %4338 = vmatprep.subr.bf16.mxu1 %v13989_v33  ;;  %v14032_v33 = vld [vmem:[#allocation3 + $0x1068] ss:$16 sps:$4 sm:$0xff]  }
 0x359   : > { %8049 = vmatpush1.bf16.msra.mxu0 %v14125_v52  ;;  %v14056_v52 = vld [vmem:[#allocation3 + $0x1168] ss:$16 sps:$4 sm:$0xff]  }
 0x35a   : > { %8050 = vmatprep.subr.bf16.mxu0 %v14133_v36  ;;  %v14070_v36 = vld [vmem:[#allocation3 + $0x11ac] ss:$16 sps:$4 sm:$0xff]  }
 0x35b   : > { %4339 = vmatpush1.bf16.msra.mxu1 %v13987_v13  ;;  %v14040_v13 = vld [vmem:[#allocation3 + $0x10ac] ss:$16 sps:$4 sm:$0xff]  }
 0x35c   : > { %4340 = vmatprep.subr.bf16.mxu1 %v13992_v57  ;;  %v14043_v57 = vld [vmem:[#allocation3 + $0x10cc] ss:$16 sps:$4 sm:$0xff]  }
 0x35d   : > { %8051 = vmatpush1.bf16.msra.mxu0 %v14131_v37  ;;  %v14068_v37 = vld [vmem:[#allocation3 + $0x11a8] ss:$16 sps:$4 sm:$0xff]  }
 0x35e   : > { %8052 = vmatprep.subr.bf16.mxu0 %v14139_v60  ;;  %v14082_v60 = vld [vmem:[#allocation3 + $0x11ec] ss:$16 sps:$4 sm:$0xff]  }
 0x35f   : > { %4341 = vmatpush1.bf16.msra.mxu1 %v13990_v16  ;;  %v14044_v16 = vld [vmem:[#allocation3 + $0x10e8] ss:$16 sps:$4 sm:$0xff]  }
 0x360   : > { %4342 = vmatprep.subr.bf16.mxu1 %v13995_v18  ;;  %v14047_v18 = vld [vmem:[#allocation3 + $0x1108] ss:$16 sps:$4 sm:$0xff]  }
 0x361   : > { %8053 = vmatpush1.bf16.msra.mxu0 %v14137_v4  ;;  %v14080_v4 = vld [vmem:[#allocation3 + $0x11e8] ss:$16 sps:$4 sm:$0xff]  }
 0x362   : > { %8054 = vmatprep.subr.bf16.mxu0 %v14145_v42  ;;  %v14094_v42 = vld [vmem:[#allocation3 + $0x122c] ss:$16 sps:$4 sm:$0xff]  }
 0x363   : > { %4343 = vmatpush1.bf16.msra.mxu1 %v13993_v23  ;;  %v14052_v23 = vld [vmem:[#allocation3 + $0x112c] ss:$16 sps:$4 sm:$0xff]  }
 0x364   : > { %4344 = vmatprep.subr.bf16.mxu1 %v13998_v28  ;;  %v14053_v28 = vld [vmem:[#allocation3 + $0x1148] ss:$16 sps:$4 sm:$0xff]  }
 0x365   : > { %8055 = vmatpush1.bf16.msra.mxu0 %v14143_v43  ;;  %v14092_v43 = vld [vmem:[#allocation3 + $0x1228] ss:$16 sps:$4 sm:$0xff]  }
 0x366   : > { %8056 = vmatprep.subr.bf16.mxu0 %v14151_v56  ;;  %v14106_v56 = vld [vmem:[#allocation3 + $0x126c] ss:$16 sps:$4 sm:$0xff]  }
 0x367   : > { %4345 = vmatpush1.bf16.msra.mxu1 %v13996_v30  ;;  %v14064_v30 = vld [vmem:[#allocation3 + $0x118c] ss:$16 sps:$4 sm:$0xff]  }
 0x368   : > { %4346 = vmatprep.subr.bf16.mxu1 %v14001_v32  ;;  %v14062_v32 = vld [vmem:[#allocation3 + $0x1188] ss:$16 sps:$4 sm:$0xff]  }
 0x369   : > { %8057 = vmatpush1.bf16.msra.mxu0 %v14149_v59  ;;  %v7433_v59 = vlaneseq }
 0x36b   : > { %4347 = vmatpush1.bf16.msra.mxu1 %v13999_v38  ;;  %v14076_v38 = vld [vmem:[#allocation3 + $0x11cc] ss:$16 sps:$4 sm:$0xff]  }
 0x36c   : > { %4348 = vmatprep.subr.bf16.mxu1 %v14004_v39  ;;  %v14074_v39 = vld [vmem:[#allocation3 + $0x11c8] ss:$16 sps:$4 sm:$0xff]  }
 0x36f   : > { %4349 = vmatpush1.bf16.msra.mxu1 %v14002_v41  ;;  %v14088_v41 = vld [vmem:[#allocation3 + $0x120c] ss:$16 sps:$4 sm:$0xff]  }
 0x370   : > { %4350 = vmatprep.subr.bf16.mxu1 %v14007_v40  ;;  %v14086_v40 = vld [vmem:[#allocation3 + $0x1208] ss:$16 sps:$4 sm:$0xff]  }
 0x373   : > { %4351 = vmatpush1.bf16.msra.mxu1 %v14005_v46  ;;  %v14100_v46 = vld [vmem:[#allocation3 + $0x124c] ss:$16 sps:$4 sm:$0xff]  }
 0x374   : > { %4352 = vmatprep.subr.bf16.mxu1 %v14010_v50  ;;  %v14098_v50 = vld [vmem:[#allocation3 + $0x1248] ss:$16 sps:$4 sm:$0xff]  }
 0x377   : > { %4353 = vmatpush1.bf16.msra.mxu1 %v14008_v0  ;;  %v14104_v0 = vld [vmem:[#allocation3 + $0x1268] ss:$16 sps:$4 sm:$0xff]  }
 0x378   : > { %4354 = vmatprep.subr.bf16.mxu1 %v14013_v2  ;;  %v14112_v2 = vld [vmem:[#allocation3 + $0x128c] ss:$16 sps:$4 sm:$0xff]  }
 0x37b   : > { %4355 = vmatpush1.bf16.msra.mxu1 %v14011_v3  ;;  %v15448_v3 = vshrl.u32 %v7433_v59, 7 }
 0x37c   : > { %4356 = vmatprep.subr.bf16.mxu1 %v14016_v31  ;;  %v14110_v31 = vld [vmem:[#allocation3 + $0x1288] ss:$16 sps:$4 sm:$0xff]  }
 0x37f   : > { %4357 = vmatpush1.bf16.msra.mxu1 %v14014_v5  ;;  %v14118_v5 = vld [vmem:[#allocation3 + $0x12ac] ss:$16 sps:$4 sm:$0xff]  }
 0x380   : > { %4358 = vmatprep.subr.bf16.mxu1 %v14019_v6  ;;  %v7439_v6 = vsub.s32 1, %v15448_v3 }
 0x383   : > { %4359 = vmatpush1.bf16.msra.mxu1 %v14017_v7  ;;  %v14116_v7 = vld [vmem:[#allocation3 + $0x12a8] ss:$16 sps:$4 sm:$0xff]  }
 0x384   : > { %4360 = vmatprep.subr.bf16.mxu1 %v14022_v9 }
 0x387   : > { %4361 = vmatpush1.bf16.msra.mxu1 %v14020_v10  ;;  %v14124_v10 = vld [vmem:[#allocation3 + $0x12cc] ss:$16 sps:$4 sm:$0xff]  }
 0x388   : > { %5309 = vmatprep.subr.bf16.mxu1 %v14025_v19 }
 0x38a   : > { %4363 = vmatmul.mubr.bf16.vlgmr.msra.gmra.mrb[4].mxu1 %v15351_v35  ;;  %v14038_v35 = vld [vmem:[#allocation3 + $0x10a8] ss:$16 sps:$4 sm:$0xff]  }
 0x38b   : > { %5310 = vmatpush1.bf16.msra.mxu1 %v14023_v53  ;;  %5341 = vmatprep.mubr.bf16.mxu1 %v15359_v45  ;;  %v14041_v45 = vld [vmem:[#allocation3 + $0x10c8] ss:$16 sps:$4 sm:$0xff]  }
 0x38c   : > { %5311 = vmatprep.subr.bf16.mxu1 %v14028_v21 }
 0x38f   : > { %5312 = vmatpush1.bf16.msra.mxu1 %v14026_v26 }
 0x390   : > { %5313 = vmatprep.subr.bf16.mxu1 %v14031_v11 }
 0x393   : > { %5314 = vmatpush1.bf16.msra.mxu1 %v14029_v12 }
 0x394   : > { %5315 = vmatprep.subr.bf16.mxu1 %v14034_v1  ;;  %v14122_v1 = vld [vmem:[#allocation3 + $0x12c8] ss:$16 sps:$4 sm:$0xff]  }
 0x397   : > { %5316 = vmatpush1.bf16.msra.mxu1 %v14032_v33 }
 0x398   : > { %5317 = vmatprep.subr.bf16.mxu1 %v14037_v27 }
 0x39b   : > { %5318 = vmatpush1.bf16.msra.mxu1 %v14035_v48 }
 0x39c   : > { %5319 = vmatprep.subr.bf16.mxu1 %v14040_v13  ;;  %v14130_v13 = vld [vmem:[#allocation3 + $0x12ec] ss:$16 sps:$4 sm:$0xff]  }
 0x39f   : > { %5320 = vmatpush1.bf16.msra.mxu1 %v14038_v35 }
 0x3a0   : > { %5321 = vmatprep.subr.bf16.mxu1 %v14043_v57 }
 0x3a3   : > { %5322 = vmatpush1.bf16.msra.mxu1 %v14041_v45 }
 0x3a4   : > { %5323 = vmatprep.subr.bf16.mxu1 %v14046_v54  ;;  %v14136_v54 = vld [vmem:[#allocation3 + $0x130c] ss:$16 sps:$4 sm:$0xff]  }
 0x3a7   : > { %5324 = vmatpush1.bf16.msra.mxu1 %v14044_v16  ;;  %v7554_v16 = vld [vmem:[#allocation2 + $0x8] sm:$0x80] }
 0x3a8   : > { %5325 = vmatprep.subr.bf16.mxu1 %v14049_v17  ;;  %v14134_v17 = vld [vmem:[#allocation3 + $0x1308] ss:$16 sps:$4 sm:$0xff]  }
 0x3ab   : > { %5326 = vmatpush1.bf16.msra.mxu1 %v14047_v18 }
 0x3ac   : > { %5327 = vmatprep.subr.bf16.mxu1 %v14052_v23  ;;  %v14142_v23 = vld [vmem:[#allocation3 + $0x132c] ss:$16 sps:$4 sm:$0xff]  }
 0x3af   : > { %5328 = vmatpush1.bf16.msra.mxu1 %v14050_v24  ;;  %v14140_v24 = vld [vmem:[#allocation3 + $0x1328] ss:$16 sps:$4 sm:$0xff]  }
 0x3b0   : > { %5329 = vmatprep.subr.bf16.mxu1 %v14055_v25 }
 0x3b3   : > { %5330 = vmatpush1.bf16.msra.mxu1 %v14053_v28 }
 0x3b4   : > { %5331 = vmatprep.subr.bf16.mxu1 %v14058_v55 }
 0x3b7   : > { %5332 = vmatpush1.bf16.msra.mxu1 %v14056_v52  ;;  %v14148_v52 = vld [vmem:[#allocation3 + $0x134c] ss:$16 sps:$4 sm:$0xff]  }
 0x3b8   : > { %5333 = vmatprep.subr.bf16.mxu1 %v14064_v30 }
 0x3bb   : > { %5334 = vmatpush1.bf16.msra.mxu1 %v14062_v32 }
 0x3bc   : > { %5335 = vmatprep.subr.bf16.mxu1 %v14070_v36 }
 0x3bf   : > { %5336 = vmatpush1.bf16.msra.mxu1 %v14068_v37 }
 0x3c0   : > { %5337 = vmatprep.subr.bf16.mxu1 %v14076_v38 }
 0x3c3   : > { %5338 = vmatpush1.bf16.msra.mxu1 %v14074_v39 }
 0x3c4   : > { %5339 = vmatprep.subr.bf16.mxu1 %v14082_v60 }
 0x3c7   : > { %5340 = vmatpush1.bf16.msra.mxu1 %v14080_v4  ;;  %v14146_v4 = vld [vmem:[#allocation3 + $0x1348] ss:$16 sps:$4 sm:$0xff]  }
 0x3c8   : > { %5352 = vmatprep.subr.bf16.mxu1 %v14088_v41 }
 0x3ca   : > { %5342 = vmatmul.mubr.bf16.vlgmr.msra.gmra.mrb[4].mxu1 %v15368_v61  ;;  %v7435_v61 = vsub.s32 0, %v15448_v3 }
 0x3cb   : > { %5353 = vmatpush1.bf16.msra.mxu1 %v14086_v40  ;;  %5384 = vmatprep.mubr.bf16.mxu1 %v15376_v51  ;;  %v15451_v51 = vld [vmem:[#allocation5] sm:$0xf] }
 0x3cc   : > { %5354 = vmatprep.subr.bf16.mxu1 %v14094_v42  ;;  %v7436_v9 = vrot.slane %v15451_v51, %v7435_v61  ;;  %v7440_v53 = vrot.slane %v15451_v51, %v7439_v6 }
 0x3cf   : > { %5355 = vmatpush1.bf16.msra.mxu1 %v14092_v43 }
 0x3d0   : > { %5356 = vmatprep.subr.bf16.mxu1 %v14100_v46  ;;  %v14154_v46 = vld [vmem:[#allocation3 + $0x136c] ss:$16 sps:$4 sm:$0xff]  }
 0x3d3   : > { %5357 = vmatpush1.bf16.msra.mxu1 %v14098_v50 }
 0x3d4   : > { %5358 = vmatprep.subr.bf16.mxu1 %v14106_v56 }
 0x3d7   : > { %5359 = vmatpush1.bf16.msra.mxu1 %v14104_v0 }
 0x3d8   : > { %5360 = vmatprep.subr.bf16.mxu1 %v14112_v2 }
 0x3db   : > { %5361 = vmatpush1.bf16.msra.mxu1 %v14110_v31 }
 0x3dc   : > { %5362 = vmatprep.subr.bf16.mxu1 %v14118_v5 }
 0x3de   : > { %v7328_v19 = vpop.f32.mrb[0].mxu0 }
 0x3df   : > { %v12763_v21 = vadd.f32 %v7328_v19, %v15428_v44  ;;  %v7330_v26 = vpop.f32.mrb[1].mxu0  ;;  %5363 = vmatpush1.bf16.msra.mxu1 %v14116_v7  ;;  %v14152_v7 = vld [vmem:[#allocation3 + $0x1368] ss:$16 sps:$4 sm:$0xff]  }
 0x3e0   : > { %v12764_v11 = vadd.f32 %v7330_v26, %v15430_v47  ;;  %v7332_v12 = vpop.f32.mrb[2].mxu0  ;;  %5364 = vmatprep.subr.bf16.mxu1 %v14124_v10  ;;  %v14128_v47 = vld [vmem:[#allocation3 + $0x12e8] ss:$16 sps:$4 sm:$0xff]  }
 0x3e1   : > { %v7453_v33 = vadd.f32 %v12763_v21, %v7436_v9  ;;  %v12765_v27 = vadd.f32 %v7332_v12, %v15432_v49  ;;  %v7334_v48 = vpop.f32.mrb[3].mxu0  ;;  %v7553_v49 = vld [vmem:[#allocation2] sm:$0x80]  ;;  %v14160_v12 = vld [vmem:[#allocation3 + $0x13ac] ss:$16 sps:$4 sm:$0xff]  }
 0x3e2   : > { %v15463_v35 = vadd.f32 %v12764_v11, %v7440_v53  ;;  %v12766_v57 = vadd.f32 %v7334_v48, %v15434_v62  ;;  %v14155_v11 = vld [vmem:[#allocation3 + $0x1388] ss:$16 sps:$4 sm:$0xff]   ;;  %v14166_v48 = vld [vmem:[#allocation3 + $0x13ec] ss:$16 sps:$4 sm:$0xff]  }
 0x3e3   : > { %7461 = vst [vmem:[#allocation2 + $0x20] sm:$0xff] %v7453_v33  ;;  %v7457_v45 = vadd.f32 %v12765_v27, %v7436_v9  ;;  %5365 = vmatpush1.bf16.msra.mxu1 %v14122_v1  ;;  %v7561_v62 = vpack.c.bf16 %v7453_v33, %v7553_v49  ;;  %v14158_v1 = vld [vmem:[#allocation3 + $0x13a8] ss:$16 sps:$4 sm:$0xff]   ;;  %v14163_v33 = vld [vmem:[#allocation3 + $0x13cc] ss:$16 sps:$4 sm:$0xff]  }
 0x3e4   : > { %7462 = vst [vmem:[#allocation2 + $0x28] sm:$0xff] %v15463_v35  ;;  %v7458_v44 = vadd.f32 %v12766_v57, %v7440_v53  ;;  %5366 = vmatprep.subr.bf16.mxu1 %v14130_v13  ;;  %v7562_v18 = vpack.c.bf16 %v15463_v35, %v7554_v16  ;;  %v14157_v53 = vld [vmem:[#allocation3 + $0x138c] ss:$16 sps:$4 sm:$0xff]   ;;  %v14161_v27 = vld [vmem:[#allocation3 + $0x13c8] ss:$16 sps:$4 sm:$0xff]  }
 0x3e5   : > { %7465 = vst [vmem:[#allocation2 + $0x40] sm:$0xff] %v7457_v45  ;;  %v7635_v36 = vshrl.u32 %v7561_v62, 16  ;;  %v7638_v37 = vshll.u32 %v7561_v62, 16  ;;  %v14164_v13 = vld [vmem:[#allocation3 + $0x13e8] ss:$16 sps:$4 sm:$0xff]  }
 0x3e6   : > { %7466 = vst [vmem:[#allocation2 + $0x48] sm:$0xff] %v7458_v44  ;;  %v7652_v25 = vshrl.u32 %v7562_v18, 16  ;;  %v7655_v28 = vshll.u32 %v7562_v18, 16  ;;  %v14169_v57 = vld [vmem:[#allocation3 + $0x140c] ss:$16 sps:$4 sm:$0xff]  }
 0x3e7   : > { %5367 = vmatpush1.bf16.msra.mxu1 %v14128_v47  ;;  %v7637_v50 = vrot.slane %v7635_v36, 3  ;;  %v7640_v56 = vrot.slane %v7638_v37, 4  ;;  %v14167_v45 = vld [vmem:[#allocation3 + $0x1408] ss:$16 sps:$4 sm:$0xff]   ;;  %v14172_v44 = vld [vmem:[#allocation3 + $0x142c] ss:$16 sps:$4 sm:$0xff]  }
 0x3e8   : > { %5368 = vmatprep.subr.bf16.mxu1 %v14136_v54  ;;  %v7654_v41 = vrot.slane %v7652_v25, 3  ;;  %v7657_v40 = vrot.slane %v7655_v28, 4  ;;  %v14170_v47 = vld [vmem:[#allocation3 + $0x1428] ss:$16 sps:$4 sm:$0xff]   ;;  %v14175_v54 = vld [vmem:[#allocation3 + $0x144c] ss:$16 sps:$4 sm:$0xff]  }
 0x3e9   : > { %v7641_v19 = vor.u32 %v7640_v56, %v7637_v50  ;;  %v14173_v16 = vld [vmem:[#allocation3 + $0x1448] ss:$16 sps:$4 sm:$0xff]   ;;  %v14178_v49 = vld [vmem:[#allocation3 + $0x146c] ss:$16 sps:$4 sm:$0xff]  }
 0x3ea   : > { %v7658_v9 = vor.u32 %v7657_v40, %v7654_v41  ;;  %v14181_v18 = vld [vmem:[#allocation3 + $0x148c] ss:$16 sps:$4 sm:$0xff]   ;;  %v14188_v28 = vld [vmem:[#allocation3 + $0x14e8] ss:$16 sps:$4 sm:$0xff]  }
 0x3eb   : > { %5369 = vmatpush1.bf16.msra.mxu1 %v14134_v17  ;;  %v14176_v17 = vld [vmem:[#allocation3 + $0x1468] ss:$16 sps:$4 sm:$0xff]   ;;  %v14184_v62 = vld [vmem:[#allocation3 + $0x14ac] ss:$16 sps:$4 sm:$0xff]  }
 0x3ec   : > { %v7557_v55 = vld [vmem:[#allocation2 + $0x40] sm:$0x7f]  ;;  %5370 = vmatprep.subr.bf16.mxu1 %v14142_v23  ;;  %v14179_v23 = vld [vmem:[#allocation3 + $0x1488] ss:$16 sps:$4 sm:$0xff]   ;;  %v14190_v25 = vld [vmem:[#allocation3 + $0x14ec] ss:$16 sps:$4 sm:$0xff]  }
 0x3ed   : > { %v7558_v30 = vld [vmem:[#allocation2 + $0x48] sm:$0x7f]  ;;  %v7565_v32 = vpack.c.bf16 %v7557_v55, %v7557_v55 }
 0x3ee   : > { %v7566_v38 = vpack.c.bf16 %v7558_v30, %v7558_v30  ;;  %v14193_v55 = vld [vmem:[#allocation3 + $0x150c] ss:$16 sps:$4 sm:$0xff]   ;;  %v14197_v37 = vld [vmem:[#allocation3 + $0x1548] ss:$16 sps:$4 sm:$0xff]  }
 0x3ef   : > { %v7643_v39 = vshrl.u32 %v7565_v32, 16  ;;  %v7646_v60 = vshll.u32 %v7565_v32, 16  ;;  %5371 = vmatpush1.bf16.msra.mxu1 %v14140_v24  ;;  %v14187_v24 = vld [vmem:[#allocation3 + $0x14cc] ss:$16 sps:$4 sm:$0xff]   ;;  %v14194_v32 = vld [vmem:[#allocation3 + $0x1528] ss:$16 sps:$4 sm:$0xff]  }
 0x3f0   : > { %v7660_v42 = vshrl.u32 %v7566_v38, 16  ;;  %v7663_v43 = vshll.u32 %v7566_v38, 16  ;;  %5372 = vmatprep.subr.bf16.mxu1 %v14148_v52  ;;  %v14191_v52 = vld [vmem:[#allocation3 + $0x1508] ss:$16 sps:$4 sm:$0xff]   ;;  %v14196_v30 = vld [vmem:[#allocation3 + $0x152c] ss:$16 sps:$4 sm:$0xff]  }
 0x3f1   : > { %v7645_v59 = vrot.slane %v7643_v39, 3  ;;  %v7648_v0 = vrot.slane %v7646_v60, 4  ;;  %v14199_v36 = vld [vmem:[#allocation3 + $0x154c] ss:$16 sps:$4 sm:$0xff]   ;;  %v14200_v39 = vld [vmem:[#allocation3 + $0x1568] ss:$16 sps:$4 sm:$0xff]  }
 0x3f2   : > { %v7662_v2 = vrot.slane %v7660_v42, 3  ;;  %v7665_v31 = vrot.slane %v7663_v43, 4  ;;  %v14202_v38 = vld [vmem:[#allocation3 + $0x156c] ss:$16 sps:$4 sm:$0xff]   ;;  %v14206_v40 = vld [vmem:[#allocation3 + $0x15a8] ss:$16 sps:$4 sm:$0xff]  }
 0x3f3   : > { %v7649_v5 = vor.u32 %v7648_v0, %v7645_v59  ;;  %5373 = vmatpush1.bf16.msra.mxu1 %v14146_v4  ;;  %v14205_v60 = vld [vmem:[#allocation3 + $0x158c] ss:$16 sps:$4 sm:$0xff]   ;;  %v14203_v4 = vld [vmem:[#allocation3 + $0x1588] ss:$16 sps:$4 sm:$0xff]  }
 0x3f4   : > { %v7666_v10 = vor.u32 %v7665_v31, %v7662_v2  ;;  %5374 = vmatprep.subr.bf16.mxu1 %v14154_v46  ;;  %v14208_v41 = vld [vmem:[#allocation3 + $0x15ac] ss:$16 sps:$4 sm:$0xff]   ;;  %v14209_v43 = vld [vmem:[#allocation3 + $0x15c8] ss:$16 sps:$4 sm:$0xff]  }
 0x3f5   : > { %v7650_v26 = vsel %vm2531_vm0, %v7641_v19, %v7649_v5  ;;  %v14211_v42 = vld [vmem:[#allocation3 + $0x15cc] ss:$16 sps:$4 sm:$0xff]   ;;  %v14212_v50 = vld [vmem:[#allocation3 + $0x15e8] ss:$16 sps:$4 sm:$0xff]  }
 0x3f6   : > { %v7667_v21 = vsel %vm2531_vm0, %v7658_v9, %v7666_v10  ;;  %v14214_v46 = vld [vmem:[#allocation3 + $0x15ec] ss:$16 sps:$4 sm:$0xff]   ;;  %v14215_v59 = vld [vmem:[#allocation3 + $0x1608] ss:$16 sps:$4 sm:$0xff]  }
 0x3f7   : > { %8058 = vmatprep.mubr.bf16.mxu0 %v7667_v21  ;;  %5375 = vmatpush1.bf16.msra.mxu1 %v14152_v7  ;;  %v14217_v56 = vld [vmem:[#allocation3 + $0x160c] ss:$16 sps:$4 sm:$0xff]   ;;  %v14218_v2 = vld [vmem:[#allocation3 + $0x1628] ss:$16 sps:$4 sm:$0xff]  }
 0x3f8   : > { %8059 = vmatmul.mubr.bf16.vlgmr.msra.gmra.mrb[4].mxu0 %v7650_v26  ;;  %5376 = vmatprep.subr.bf16.mxu1 %v14157_v53  ;;  %v14220_v0 = vld [vmem:[#allocation3 + $0x162c] ss:$16 sps:$4 sm:$0xff]   ;;  %v14221_v5 = vld [vmem:[#allocation3 + $0x1648] ss:$16 sps:$4 sm:$0xff]  }
 0x3f9   : > { %v14223_v31 = vld [vmem:[#allocation3 + $0x164c] ss:$16 sps:$4 sm:$0xff]   ;;  %v14224_v9 = vld [vmem:[#allocation3 + $0x1668] ss:$16 sps:$4 sm:$0xff]  }
 0x3fa   : > { %v14226_v7 = vld [vmem:[#allocation3 + $0x166c] ss:$16 sps:$4 sm:$0xff]   ;;  %v14227_v19 = vld [vmem:[#allocation3 + $0x1688] ss:$16 sps:$4 sm:$0xff]  }
 0x3fb   : > { %5377 = vmatpush1.bf16.msra.mxu1 %v14155_v11  ;;  %v14229_v10 = vld [vmem:[#allocation3 + $0x168c] ss:$16 sps:$4 sm:$0xff]   ;;  %v14236_v11 = vld [vmem:[#allocation3 + $0x16e8] ss:$16 sps:$4 sm:$0xff]  }
 0x3fc   : > { %5378 = vmatprep.subr.bf16.mxu1 %v14160_v12  ;;  %v14232_v53 = vld [vmem:[#allocation3 + $0x16ac] ss:$16 sps:$4 sm:$0xff]  }
 0x3fd   : > { %v14235_v21 = vld [vmem:[#allocation3 + $0x16cc] ss:$16 sps:$4 sm:$0xff]  }
 0x3fe   : > { %v14238_v26 = vld [vmem:[#allocation3 + $0x16ec] ss:$16 sps:$4 sm:$0xff]  }
 0x3ff   : > { %5379 = vmatpush1.bf16.msra.mxu1 %v14158_v1  ;;  %v14241_v12 = vld [vmem:[#allocation3 + $0x170c] ss:$16 sps:$4 sm:$0xff]   ;;  %v14239_v1 = vld [vmem:[#allocation3 + $0x1708] ss:$16 sps:$4 sm:$0xff]  }
 0x400   : > { %5380 = vmatprep.subr.bf16.mxu1 %v14163_v33  ;;  %v14244_v33 = vld [vmem:[#allocation3 + $0x172c] ss:$16 sps:$4 sm:$0xff]  }
 0x403   : > { %5381 = vmatpush1.bf16.msra.mxu1 %v14161_v27  ;;  %v14242_v27 = vld [vmem:[#allocation3 + $0x1728] ss:$16 sps:$4 sm:$0xff]  }
 0x404   : > { %5382 = vmatprep.subr.bf16.mxu1 %v14166_v48  ;;  %v14247_v48 = vld [vmem:[#allocation3 + $0x174c] ss:$16 sps:$4 sm:$0xff]  }
 0x407   : > { %5383 = vmatpush1.bf16.msra.mxu1 %v14164_v13  ;;  %v14245_v13 = vld [vmem:[#allocation3 + $0x1748] ss:$16 sps:$4 sm:$0xff]  }
 0x408   : > { %6299 = vmatprep.subr.bf16.mxu1 %v14169_v57  ;;  %v14250_v57 = vld [vmem:[#allocation3 + $0x176c] ss:$16 sps:$4 sm:$0xff]  }
 0x40a   : > { %5385 = vmatmul.mubr.bf16.vlgmr.msra.gmra.mrb[4].mxu1 %v15388_v58  ;;  %v14182_v58 = vld [vmem:[#allocation3 + $0x14a8] ss:$16 sps:$4 sm:$0xff]  }
 0x40b   : > { %6300 = vmatpush1.bf16.msra.mxu1 %v14167_v45  ;;  %6331 = vmatprep.mubr.bf16.mxu1 %v15393_v63  ;;  %v14185_v63 = vld [vmem:[#allocation3 + $0x14c8] ss:$16 sps:$4 sm:$0xff]  }
 0x40c   : > { %6301 = vmatprep.subr.bf16.mxu1 %v14172_v44  ;;  %v14248_v45 = vld [vmem:[#allocation3 + $0x1768] ss:$16 sps:$4 sm:$0xff]   ;;  %v14253_v44 = vld [vmem:[#allocation3 + $0x178c] ss:$16 sps:$4 sm:$0xff]  }
 0x40f   : > { %6302 = vmatpush1.bf16.msra.mxu1 %v14170_v47  ;;  %v14251_v47 = vld [vmem:[#allocation3 + $0x1788] ss:$16 sps:$4 sm:$0xff]  }
 0x410   : > { %6303 = vmatprep.subr.bf16.mxu1 %v14175_v54  ;;  %v14256_v54 = vld [vmem:[#allocation3 + $0x17ac] ss:$16 sps:$4 sm:$0xff]  }
 0x413   : > { %6304 = vmatpush1.bf16.msra.mxu1 %v14173_v16  ;;  %v14254_v16 = vld [vmem:[#allocation3 + $0x17a8] ss:$16 sps:$4 sm:$0xff]  }
 0x414   : > { %6305 = vmatprep.subr.bf16.mxu1 %v14178_v49  ;;  %v14259_v49 = vld [vmem:[#allocation3 + $0x17cc] ss:$16 sps:$4 sm:$0xff]  }
 0x417   : > { %6306 = vmatpush1.bf16.msra.mxu1 %v14176_v17  ;;  %v14257_v17 = vld [vmem:[#allocation3 + $0x17c8] ss:$16 sps:$4 sm:$0xff]  }
 0x418   : > { %6307 = vmatprep.subr.bf16.mxu1 %v14181_v18  ;;  %v14262_v18 = vld [vmem:[#allocation3 + $0x17ec] ss:$16 sps:$4 sm:$0xff]  }
 0x41b   : > { %6308 = vmatpush1.bf16.msra.mxu1 %v14179_v23  ;;  %v14260_v23 = vld [vmem:[#allocation3 + $0x17e8] ss:$16 sps:$4 sm:$0xff]  }
 0x41c   : > { %6309 = vmatprep.subr.bf16.mxu1 %v14184_v62  ;;  %v14265_v62 = vld [vmem:[#allocation3 + $0x180c] ss:$16 sps:$4 sm:$0xff]  }
 0x41f   : > { %6310 = vmatpush1.bf16.msra.mxu1 %v14182_v58  ;;  %v14263_v58 = vld [vmem:[#allocation3 + $0x1808] ss:$16 sps:$4 sm:$0xff]  }
 0x420   : > { %6311 = vmatprep.subr.bf16.mxu1 %v14187_v24  ;;  %v14268_v24 = vld [vmem:[#allocation3 + $0x182c] ss:$16 sps:$4 sm:$0xff]  }
 0x423   : > { %6312 = vmatpush1.bf16.msra.mxu1 %v14185_v63  ;;  %v14359_v63 = vld [vmem:[#allocation7 + $0x300] ss:$8 sps:$4 sm:$0xff]  }
 0x424   : > { %6313 = vmatprep.subr.bf16.mxu1 %v14190_v25  ;;  %v14361_v25 = vld [vmem:[#allocation7 + $0x304] ss:$8 sps:$4 sm:$0xff]  }
 0x425   : > { %8069 = vmatprep.subr.bf16.mxu0 %v14361_v25  ;;  %v14322_v25 = vld [vmem:[#allocation3 + $0x1a6c] ss:$16 sps:$4 sm:$0xff]  }
 0x426   : > { %8070 = vmatpush1.bf16.msra.mxu0 %v14359_v63  ;;  %v14317_v63 = vld [vmem:[#allocation3 + $0x1a48] ss:$16 sps:$4 sm:$0xff]  }
 0x427   : > { %6314 = vmatpush1.bf16.msra.mxu1 %v14188_v28  ;;  %v14266_v28 = vld [vmem:[#allocation3 + $0x1828] ss:$16 sps:$4 sm:$0xff]  }
 0x428   : > { %6315 = vmatprep.subr.bf16.mxu1 %v14193_v55  ;;  %v14364_v55 = vld [vmem:[#allocation7 + $0x314] ss:$8 sps:$4 sm:$0xff]  }
 0x429   : > { %8071 = vmatprep.subr.bf16.mxu0 %v14364_v55  ;;  %v14325_v55 = vld [vmem:[#allocation3 + $0x1a8c] ss:$16 sps:$4 sm:$0xff]  }
 0x42b   : > { %6316 = vmatpush1.bf16.msra.mxu1 %v14191_v52  ;;  %v14271_v52 = vld [vmem:[#allocation3 + $0x184c] ss:$16 sps:$4 sm:$0xff]  }
 0x42c   : > { %6317 = vmatprep.subr.bf16.mxu1 %v14196_v30  ;;  %v14362_v30 = vld [vmem:[#allocation7 + $0x310] ss:$8 sps:$4 sm:$0xff]  }
 0x42d   : > { %8072 = vmatpush1.bf16.msra.mxu0 %v14362_v30  ;;  %v14328_v30 = vld [vmem:[#allocation3 + $0x1aac] ss:$16 sps:$4 sm:$0xff]  }
 0x42f   : > { %6318 = vmatpush1.bf16.msra.mxu1 %v14194_v32  ;;  %v14367_v32 = vld [vmem:[#allocation7 + $0x324] ss:$8 sps:$4 sm:$0xff]  }
 0x430   : > { %6319 = vmatprep.subr.bf16.mxu1 %v14199_v36  ;;  %v14269_v36 = vld [vmem:[#allocation3 + $0x1848] ss:$16 sps:$4 sm:$0xff]   ;;  %8073 = vmatprep.subr.bf16.mxu0 %v14367_v32  ;;  %v14331_v32 = vld [vmem:[#allocation3 + $0x1acc] ss:$16 sps:$4 sm:$0xff]  }
 0x433   : > { %6320 = vmatpush1.bf16.msra.mxu1 %v14197_v37  ;;  %v14274_v37 = vld [vmem:[#allocation3 + $0x186c] ss:$16 sps:$4 sm:$0xff]  }
 0x434   : > { %6321 = vmatprep.subr.bf16.mxu1 %v14202_v38  ;;  %v14370_v38 = vld [vmem:[#allocation7 + $0x334] ss:$8 sps:$4 sm:$0xff]  }
 0x437   : > { %6322 = vmatpush1.bf16.msra.mxu1 %v14200_v39  ;;  %v14272_v39 = vld [vmem:[#allocation3 + $0x1868] ss:$16 sps:$4 sm:$0xff]  }
 0x438   : > { %6323 = vmatprep.subr.bf16.mxu1 %v14205_v60  ;;  %v14368_v60 = vld [vmem:[#allocation7 + $0x330] ss:$8 sps:$4 sm:$0xff]  }
 0x43b   : > { %6324 = vmatpush1.bf16.msra.mxu1 %v14203_v4  ;;  %v14373_v4 = vld [vmem:[#allocation7 + $0x344] ss:$8 sps:$4 sm:$0xff]  }
 0x43c   : > { %6325 = vmatprep.subr.bf16.mxu1 %v14208_v41  ;;  %v14275_v41 = vld [vmem:[#allocation3 + $0x1888] ss:$16 sps:$4 sm:$0xff]  }
 0x43f   : > { %6326 = vmatpush1.bf16.msra.mxu1 %v14206_v40  ;;  %v14280_v40 = vld [vmem:[#allocation3 + $0x18ac] ss:$16 sps:$4 sm:$0xff]  }
 0x440   : > { %6327 = vmatprep.subr.bf16.mxu1 %v14211_v42  ;;  %v14371_v42 = vld [vmem:[#allocation7 + $0x340] ss:$8 sps:$4 sm:$0xff]  }
 0x443   : > { %6328 = vmatpush1.bf16.msra.mxu1 %v14209_v43  ;;  %v14376_v43 = vld [vmem:[#allocation7 + $0x354] ss:$8 sps:$4 sm:$0xff]  }
 0x444   : > { %6329 = vmatprep.subr.bf16.mxu1 %v14214_v46  ;;  %v14278_v46 = vld [vmem:[#allocation3 + $0x18a8] ss:$16 sps:$4 sm:$0xff]  }
 0x447   : > { %6330 = vmatpush1.bf16.msra.mxu1 %v14212_v50  ;;  %v14283_v50 = vld [vmem:[#allocation3 + $0x18cc] ss:$16 sps:$4 sm:$0xff]  }
 0x448   : > { %6342 = vmatprep.subr.bf16.mxu1 %v14217_v56  ;;  %v14374_v56 = vld [vmem:[#allocation7 + $0x350] ss:$8 sps:$4 sm:$0xff]  }
 0x44a   : > { %6332 = vmatmul.mubr.bf16.vlgmr.msra.gmra.mrb[4].mxu1 %v15398_v29  ;;  %v14230_v29 = vld [vmem:[#allocation3 + $0x16a8] ss:$16 sps:$4 sm:$0xff]  }
 0x44b   : > { %6343 = vmatpush1.bf16.msra.mxu1 %v14215_v59  ;;  %6374 = vmatprep.mubr.bf16.mxu1 %v15403_v34  ;;  %v14233_v34 = vld [vmem:[#allocation3 + $0x16c8] ss:$16 sps:$4 sm:$0xff]  }
 0x44c   : > { %6344 = vmatprep.subr.bf16.mxu1 %v14220_v0  ;;  %v14379_v59 = vld [vmem:[#allocation7 + $0x364] ss:$8 sps:$4 sm:$0xff]  }
 0x44d   : > { %v14281_v0 = vld [vmem:[#allocation3 + $0x18c8] ss:$16 sps:$4 sm:$0xff]  }
 0x44f   : > { %6345 = vmatpush1.bf16.msra.mxu1 %v14218_v2  ;;  %v14286_v2 = vld [vmem:[#allocation3 + $0x18ec] ss:$16 sps:$4 sm:$0xff]  }
 0x450   : > { %6346 = vmatprep.subr.bf16.mxu1 %v14223_v31  ;;  %v14377_v31 = vld [vmem:[#allocation7 + $0x360] ss:$8 sps:$4 sm:$0xff]  }
 0x453   : > { %6347 = vmatpush1.bf16.msra.mxu1 %v14221_v5  ;;  %v14382_v5 = vld [vmem:[#allocation7 + $0x374] ss:$8 sps:$4 sm:$0xff]  }
 0x454   : > { %6348 = vmatprep.subr.bf16.mxu1 %v14226_v7  ;;  %v14284_v7 = vld [vmem:[#allocation3 + $0x18e8] ss:$16 sps:$4 sm:$0xff]  }
 0x457   : > { %6349 = vmatpush1.bf16.msra.mxu1 %v14224_v9  ;;  %v14289_v9 = vld [vmem:[#allocation3 + $0x190c] ss:$16 sps:$4 sm:$0xff]  }
 0x458   : > { %6350 = vmatprep.subr.bf16.mxu1 %v14229_v10  ;;  %v14380_v10 = vld [vmem:[#allocation7 + $0x370] ss:$8 sps:$4 sm:$0xff]  }
 0x45b   : > { %6351 = vmatpush1.bf16.msra.mxu1 %v14227_v19  ;;  %v14385_v19 = vld [vmem:[#allocation7 + $0x384] ss:$8 sps:$4 sm:$0xff]  }
 0x45c   : > { %6352 = vmatprep.subr.bf16.mxu1 %v14232_v53  ;;  %v14287_v53 = vld [vmem:[#allocation3 + $0x1908] ss:$16 sps:$4 sm:$0xff]  }
 0x45f   : > { %6353 = vmatpush1.bf16.msra.mxu1 %v14230_v29  ;;  %v14292_v29 = vld [vmem:[#allocation3 + $0x192c] ss:$16 sps:$4 sm:$0xff]  }
 0x460   : > { %6354 = vmatprep.subr.bf16.mxu1 %v14235_v21  ;;  %v14383_v21 = vld [vmem:[#allocation7 + $0x380] ss:$8 sps:$4 sm:$0xff]  }
 0x463   : > { %6355 = vmatpush1.bf16.msra.mxu1 %v14233_v34  ;;  %v14388_v34 = vld [vmem:[#allocation7 + $0x394] ss:$8 sps:$4 sm:$0xff]  }
 0x464   : > { %6356 = vmatprep.subr.bf16.mxu1 %v14238_v26  ;;  %v14290_v26 = vld [vmem:[#allocation3 + $0x1928] ss:$16 sps:$4 sm:$0xff]  }
 0x467   : > { %6357 = vmatpush1.bf16.msra.mxu1 %v14236_v11  ;;  %v14295_v11 = vld [vmem:[#allocation3 + $0x194c] ss:$16 sps:$4 sm:$0xff]  }
 0x468   : > { %6358 = vmatprep.subr.bf16.mxu1 %v14241_v12  ;;  %v14386_v12 = vld [vmem:[#allocation7 + $0x390] ss:$8 sps:$4 sm:$0xff]  }
 0x46b   : > { %6359 = vmatpush1.bf16.msra.mxu1 %v14239_v1  ;;  %v14391_v1 = vld [vmem:[#allocation7 + $0x3a4] ss:$8 sps:$4 sm:$0xff]  }
 0x46c   : > { %6360 = vmatprep.subr.bf16.mxu1 %v14244_v33  ;;  %v14293_v33 = vld [vmem:[#allocation3 + $0x1948] ss:$16 sps:$4 sm:$0xff]  }
 0x46f   : > { %6361 = vmatpush1.bf16.msra.mxu1 %v14242_v27  ;;  %v14298_v27 = vld [vmem:[#allocation3 + $0x196c] ss:$16 sps:$4 sm:$0xff]  }
 0x470   : > { %6362 = vmatprep.subr.bf16.mxu1 %v14247_v48  ;;  %v14389_v48 = vld [vmem:[#allocation7 + $0x3a0] ss:$8 sps:$4 sm:$0xff]  }
 0x473   : > { %6363 = vmatpush1.bf16.msra.mxu1 %v14245_v13  ;;  %v14296_v13 = vld [vmem:[#allocation3 + $0x1968] ss:$16 sps:$4 sm:$0xff]  }
 0x474   : > { %6364 = vmatprep.subr.bf16.mxu1 %v14250_v57  ;;  %v14301_v57 = vld [vmem:[#allocation3 + $0x198c] ss:$16 sps:$4 sm:$0xff]  }
 0x477   : > { %6365 = vmatpush1.bf16.msra.mxu1 %v14248_v45  ;;  %v14299_v45 = vld [vmem:[#allocation3 + $0x1988] ss:$16 sps:$4 sm:$0xff]  }
 0x478   : > { %6366 = vmatprep.subr.bf16.mxu1 %v14253_v44  ;;  %v14304_v44 = vld [vmem:[#allocation3 + $0x19ac] ss:$16 sps:$4 sm:$0xff]  }
 0x47b   : > { %6367 = vmatpush1.bf16.msra.mxu1 %v14251_v47  ;;  %v14302_v47 = vld [vmem:[#allocation3 + $0x19a8] ss:$16 sps:$4 sm:$0xff]  }
 0x47c   : > { %6368 = vmatprep.subr.bf16.mxu1 %v14256_v54  ;;  %v14307_v54 = vld [vmem:[#allocation3 + $0x19cc] ss:$16 sps:$4 sm:$0xff]  }
 0x47f   : > { %6369 = vmatpush1.bf16.msra.mxu1 %v14254_v16  ;;  %v14305_v16 = vld [vmem:[#allocation3 + $0x19c8] ss:$16 sps:$4 sm:$0xff]  }
 0x480   : > { %6370 = vmatprep.subr.bf16.mxu1 %v14259_v49  ;;  %v14310_v49 = vld [vmem:[#allocation3 + $0x19ec] ss:$16 sps:$4 sm:$0xff]  }
 0x483   : > { %6371 = vmatpush1.bf16.msra.mxu1 %v14257_v17  ;;  %v14308_v17 = vld [vmem:[#allocation3 + $0x19e8] ss:$16 sps:$4 sm:$0xff]  }
 0x484   : > { %6372 = vmatprep.subr.bf16.mxu1 %v14262_v18  ;;  %v14313_v18 = vld [vmem:[#allocation3 + $0x1a0c] ss:$16 sps:$4 sm:$0xff]  }
 0x487   : > { %6373 = vmatpush1.bf16.msra.mxu1 %v14260_v23  ;;  %v14311_v23 = vld [vmem:[#allocation3 + $0x1a08] ss:$16 sps:$4 sm:$0xff]  }
 0x488   : > { %7337 = vmatprep.subr.bf16.mxu1 %v14265_v62  ;;  %v14316_v62 = vld [vmem:[#allocation3 + $0x1a2c] ss:$16 sps:$4 sm:$0xff]  }
 0x48a   : > { %6375 = vmatmul.mubr.bf16.vlgmr.msra.gmra.mrb[4].mxu1 %v15409_v15  ;;  %v14365_v15 = vld [vmem:[#allocation7 + $0x320] ss:$8 sps:$4 sm:$0xff]  }
 0x48b   : > { %7338 = vmatpush1.bf16.msra.mxu1 %v14263_v58  ;;  %7369 = vmatprep.mubr.bf16.mxu1 %v15414_v22  ;;  %v14277_v22 = vld [vmem:[#allocation3 + $0x188c] ss:$16 sps:$4 sm:$0xff]   ;;  %v14314_v58 = vld [vmem:[#allocation3 + $0x1a28] ss:$16 sps:$4 sm:$0xff]  }
 0x48c   : > { %7339 = vmatprep.subr.bf16.mxu1 %v14268_v24  ;;  %8074 = vmatpush1.bf16.msra.mxu0 %v14365_v15  ;;  %v14319_v24 = vld [vmem:[#allocation3 + $0x1a4c] ss:$16 sps:$4 sm:$0xff]  }
 0x48d   : > { %8075 = vmatprep.subr.bf16.mxu0 %v14370_v38  ;;  %v14337_v15 = vld [vmem:[#allocation3 + $0x1b0c] ss:$16 sps:$4 sm:$0xff]   ;;  %v14335_v38 = vld [vmem:[#allocation3 + $0x1b08] ss:$16 sps:$4 sm:$0xff]  }
 0x48f   : > { %7340 = vmatpush1.bf16.msra.mxu1 %v14266_v28  ;;  %v14320_v28 = vld [vmem:[#allocation3 + $0x1a68] ss:$16 sps:$4 sm:$0xff]  }
 0x490   : > { %7341 = vmatprep.subr.bf16.mxu1 %v14271_v52  ;;  %8076 = vmatpush1.bf16.msra.mxu0 %v14368_v60  ;;  %v14323_v52 = vld [vmem:[#allocation3 + $0x1a88] ss:$16 sps:$4 sm:$0xff]   ;;  %v14343_v60 = vld [vmem:[#allocation3 + $0x1b4c] ss:$16 sps:$4 sm:$0xff]  }
 0x491   : > { %8077 = vmatprep.subr.bf16.mxu0 %v14373_v4  ;;  %v14341_v4 = vld [vmem:[#allocation3 + $0x1b48] ss:$16 sps:$4 sm:$0xff]  }
 0x493   : > { %7342 = vmatpush1.bf16.msra.mxu1 %v14269_v36  ;;  %v14334_v36 = vld [vmem:[#allocation3 + $0x1aec] ss:$16 sps:$4 sm:$0xff]  }
 0x494   : > { %7343 = vmatprep.subr.bf16.mxu1 %v14274_v37  ;;  %8078 = vmatpush1.bf16.msra.mxu0 %v14371_v42  ;;  %v14332_v37 = vld [vmem:[#allocation3 + $0x1ae8] ss:$16 sps:$4 sm:$0xff]   ;;  %v14349_v42 = vld [vmem:[#allocation3 + $0x1b8c] ss:$16 sps:$4 sm:$0xff]  }
 0x495   : > { %8079 = vmatprep.subr.bf16.mxu0 %v14376_v43  ;;  %v14347_v43 = vld [vmem:[#allocation3 + $0x1b88] ss:$16 sps:$4 sm:$0xff]  }
 0x497   : > { %7344 = vmatpush1.bf16.msra.mxu1 %v14272_v39  ;;  %v14340_v39 = vld [vmem:[#allocation3 + $0x1b2c] ss:$16 sps:$4 sm:$0xff]  }
 0x498   : > { %7345 = vmatprep.subr.bf16.mxu1 %v14277_v22  ;;  %8080 = vmatpush1.bf16.msra.mxu0 %v14374_v56  ;;  %v14338_v22 = vld [vmem:[#allocation3 + $0x1b28] ss:$16 sps:$4 sm:$0xff]   ;;  %v14355_v56 = vld [vmem:[#allocation3 + $0x1bcc] ss:$16 sps:$4 sm:$0xff]  }
 0x499   : > { %8081 = vmatprep.subr.bf16.mxu0 %v14379_v59  ;;  %v14353_v59 = vld [vmem:[#allocation3 + $0x1bc8] ss:$16 sps:$4 sm:$0xff]  }
 0x49b   : > { %7346 = vmatpush1.bf16.msra.mxu1 %v14275_v41  ;;  %v14346_v41 = vld [vmem:[#allocation3 + $0x1b6c] ss:$16 sps:$4 sm:$0xff]  }
 0x49c   : > { %7347 = vmatprep.subr.bf16.mxu1 %v14280_v40  ;;  %8082 = vmatpush1.bf16.msra.mxu0 %v14377_v31  ;;  %v14344_v40 = vld [vmem:[#allocation3 + $0x1b68] ss:$16 sps:$4 sm:$0xff]  }
 0x49d   : > { %8083 = vmatprep.subr.bf16.mxu0 %v14382_v5  ;;  %v14394_v31 = vld [vmem:[#allocation7 + $0x3b4] ss:$8 sps:$4 sm:$0xff]   ;;  %v14392_v5 = vld [vmem:[#allocation7 + $0x3b0] ss:$8 sps:$4 sm:$0xff]  }
 0x49f   : > { %7348 = vmatpush1.bf16.msra.mxu1 %v14278_v46  ;;  %v14352_v46 = vld [vmem:[#allocation3 + $0x1bac] ss:$16 sps:$4 sm:$0xff]  }
 0x4a0   : > { %7349 = vmatprep.subr.bf16.mxu1 %v14283_v50  ;;  %8084 = vmatpush1.bf16.msra.mxu0 %v14380_v10  ;;  %v14350_v50 = vld [vmem:[#allocation3 + $0x1ba8] ss:$16 sps:$4 sm:$0xff]  }
 0x4a1   : > { %8085 = vmatprep.subr.bf16.mxu0 %v14385_v19  ;;  %v14400_v10 = vld [vmem:[#allocation7 + $0x3d4] ss:$8 sps:$4 sm:$0xff]   ;;  %v14398_v19 = vld [vmem:[#allocation7 + $0x3d0] ss:$8 sps:$4 sm:$0xff]  }
 0x4a3   : > { %7350 = vmatpush1.bf16.msra.mxu1 %v14281_v0  ;;  %v14358_v0 = vld [vmem:[#allocation3 + $0x1bec] ss:$16 sps:$4 sm:$0xff]  }
 0x4a4   : > { %7351 = vmatprep.subr.bf16.mxu1 %v14286_v2  ;;  %8086 = vmatpush1.bf16.msra.mxu0 %v14383_v21  ;;  %v14356_v2 = vld [vmem:[#allocation3 + $0x1be8] ss:$16 sps:$4 sm:$0xff]  }
 0x4a5   : > { %8087 = vmatprep.subr.bf16.mxu0 %v14388_v34  ;;  %v14406_v21 = vld [vmem:[#allocation7 + $0x3f4] ss:$8 sps:$4 sm:$0xff]   ;;  %v14404_v34 = vld [vmem:[#allocation7 + $0x3f0] ss:$8 sps:$4 sm:$0xff]  }
 0x4a7   : > { %7352 = vmatpush1.bf16.msra.mxu1 %v14284_v7  ;;  %v14397_v7 = vld [vmem:[#allocation7 + $0x3c4] ss:$8 sps:$4 sm:$0xff]  }
 0x4a8   : > { %7353 = vmatprep.subr.bf16.mxu1 %v14289_v9  ;;  %8088 = vmatpush1.bf16.msra.mxu0 %v14386_v12  ;;  %v14395_v9 = vld [vmem:[#allocation7 + $0x3c0] ss:$8 sps:$4 sm:$0xff]  }
 0x4a9   : > { %8089 = vmatprep.subr.bf16.mxu0 %v14391_v1 }
 0x4ab   : > { %7354 = vmatpush1.bf16.msra.mxu1 %v14287_v53  ;;  %v14403_v53 = vld [vmem:[#allocation7 + $0x3e4] ss:$8 sps:$4 sm:$0xff]  }
 0x4ac   : > { %7355 = vmatprep.subr.bf16.mxu1 %v14292_v29  ;;  %8090 = vmatpush1.bf16.msra.mxu0 %v14389_v48  ;;  %v14401_v29 = vld [vmem:[#allocation7 + $0x3e0] ss:$8 sps:$4 sm:$0xff]  }
 0x4ad   : > { %8091 = vmatprep.subr.bf16.mxu0 %v14394_v31 }
 0x4af   : > { %7356 = vmatpush1.bf16.msra.mxu1 %v14290_v26  ;;  %v7443_v26 = vsub.s32 2, %v15448_v3 }
 0x4b0   : > { %7357 = vmatprep.subr.bf16.mxu1 %v14295_v11  ;;  %8092 = vmatpush1.bf16.msra.mxu0 %v14392_v5  ;;  %v7447_v11 = vsub.s32 3, %v15448_v3  ;;  %v14412_v5 = vld [vmem:[#allocation7 + $0x14] ss:$8 sps:$4 sm:$0xff]  }
 0x4b1   : > { %8093 = vmatprep.subr.bf16.mxu0 %v14397_v7  ;;  %v7444_v12 = vrot.slane %v15451_v51, %v7443_v26  ;;  %v14422_v26 = vld [vmem:[#allocation7 + $0x50] ss:$8 sps:$4 sm:$0xff]  }
 0x4b2   : > { %v7448_v1 = vrot.slane %v15451_v51, %v7447_v11  ;;  %v14427_v11 = vld [vmem:[#allocation7 + $0x64] ss:$8 sps:$4 sm:$0xff]  }
 0x4b3   : > { %7358 = vmatpush1.bf16.msra.mxu1 %v14293_v33 }
 0x4b4   : > { %7359 = vmatprep.subr.bf16.mxu1 %v14298_v27  ;;  %8094 = vmatpush1.bf16.msra.mxu0 %v14395_v9 }
 0x4b5   : > { %8095 = vmatprep.subr.bf16.mxu0 %v14400_v10  ;;  %v14410_v10 = vld [vmem:[#allocation7 + $0x10] ss:$8 sps:$4 sm:$0xff]  }
 0x4b7   : > { %7360 = vmatpush1.bf16.msra.mxu1 %v14296_v13 }
 0x4b8   : > { %7361 = vmatprep.subr.bf16.mxu1 %v14301_v57  ;;  %8096 = vmatpush1.bf16.msra.mxu0 %v14398_v19  ;;  %v14413_v19 = vld [vmem:[#allocation7 + $0x20] ss:$8 sps:$4 sm:$0xff]  }
 0x4b9   : > { %8097 = vmatprep.subr.bf16.mxu0 %v14403_v53  ;;  %v14418_v53 = vld [vmem:[#allocation7 + $0x34] ss:$8 sps:$4 sm:$0xff]  }
 0x4bb   : > { %7362 = vmatpush1.bf16.msra.mxu1 %v14299_v45 }
 0x4bc   : > { %7363 = vmatprep.subr.bf16.mxu1 %v14304_v44  ;;  %8098 = vmatpush1.bf16.msra.mxu0 %v14401_v29  ;;  %v14416_v29 = vld [vmem:[#allocation7 + $0x30] ss:$8 sps:$4 sm:$0xff]  }
 0x4bd   : > { %8099 = vmatprep.subr.bf16.mxu0 %v14406_v21  ;;  %v14421_v21 = vld [vmem:[#allocation7 + $0x44] ss:$8 sps:$4 sm:$0xff]  }
 0x4bf   : > { %7364 = vmatpush1.bf16.msra.mxu1 %v14302_v47 }
 0x4c0   : > { %7365 = vmatprep.subr.bf16.mxu1 %v14307_v54  ;;  %8100 = vmatpush1.bf16.msra.mxu0 %v14404_v34  ;;  %v7556_v54 = vld [vmem:[#allocation2 + $0x18] sm:$0x80]  ;;  %v14419_v34 = vld [vmem:[#allocation7 + $0x40] ss:$8 sps:$4 sm:$0xff]  }
 0x4c3   : > { %7366 = vmatpush1.bf16.msra.mxu1 %v14305_v16  ;;  %v7555_v16 = vld [vmem:[#allocation2 + $0x10] sm:$0x80] }
 0x4c4   : > { %7367 = vmatprep.subr.bf16.mxu1 %v14310_v49 }
 0x4c7   : > { %7368 = vmatpush1.bf16.msra.mxu1 %v14308_v17 }
 0x4c8   : > { %7380 = vmatprep.subr.bf16.mxu1 %v14313_v18 }
 0x4ca   : > { %7370 = vmatmul.mubr.bf16.vlgmr.msra.gmra.mrb[4].mxu1 %v15419_v14  ;;  %v14326_v14 = vld [vmem:[#allocation3 + $0x1aa8] ss:$16 sps:$4 sm:$0xff]  }
 0x4cb   : > { %7381 = vmatpush1.bf16.msra.mxu1 %v14311_v23  ;;  %7412 = vmatprep.mubr.bf16.mxu1 %v15424_v20  ;;  %v14329_v20 = vld [vmem:[#allocation3 + $0x1ac8] ss:$16 sps:$4 sm:$0xff]  }
 0x4cc   : > { %7382 = vmatprep.subr.bf16.mxu1 %v14316_v62 }
 0x4cf   : > { %7383 = vmatpush1.bf16.msra.mxu1 %v14314_v58 }
 0x4d0   : > { %7384 = vmatprep.subr.bf16.mxu1 %v14319_v24  ;;  %v7478_v24 = vld [vmem:[#allocation2 + $0x48] sm:$0x3f] }
 0x4d3   : > { %7385 = vmatpush1.bf16.msra.mxu1 %v14317_v63 }
 0x4d4   : > { %7386 = vmatprep.subr.bf16.mxu1 %v14322_v25 }
 0x4d7   : > { %7387 = vmatpush1.bf16.msra.mxu1 %v14320_v28 }
 0x4d8   : > { %7388 = vmatprep.subr.bf16.mxu1 %v14325_v55 }
 0x4db   : > { %7389 = vmatpush1.bf16.msra.mxu1 %v14323_v52 }
 0x4dc   : > { %7390 = vmatprep.subr.bf16.mxu1 %v14328_v30 }
 0x4df   : > { %7391 = vmatpush1.bf16.msra.mxu1 %v14326_v14 }
 0x4e0   : > { %7392 = vmatprep.subr.bf16.mxu1 %v14331_v32  ;;  %v7470_v32 = vld [vmem:[#allocation2 + $0x8] sm:$0xc0] }
 0x4e3   : > { %7393 = vmatpush1.bf16.msra.mxu1 %v14329_v20  ;;  %v7486_v20 = vpack.c.bf16 %v7478_v24, %v7478_v24  ;;  %v14448_v24 = vld [vmem:[#allocation7 + $0xd4] ss:$8 sps:$4 sm:$0xff]  }
 0x4e4   : > { %7394 = vmatprep.subr.bf16.mxu1 %v14334_v36 }
 0x4e7   : > { %7395 = vmatpush1.bf16.msra.mxu1 %v14332_v37 }
 0x4e8   : > { %7396 = vmatprep.subr.bf16.mxu1 %v14337_v15 }
 0x4eb   : > { %7397 = vmatpush1.bf16.msra.mxu1 %v14335_v38 }
 0x4ec   : > { %7398 = vmatprep.subr.bf16.mxu1 %v14340_v39 }
 0x4ef   : > { %7399 = vmatpush1.bf16.msra.mxu1 %v14338_v22 }
 0x4f0   : > { %7400 = vmatprep.subr.bf16.mxu1 %v14343_v60 }
 0x4f3   : > { %7401 = vmatpush1.bf16.msra.mxu1 %v14341_v4 }
 0x4f4   : > { %7402 = vmatprep.subr.bf16.mxu1 %v14346_v41 }
 0x4f7   : > { %7403 = vmatpush1.bf16.msra.mxu1 %v14344_v40 }
 0x4f8   : > { %7404 = vmatprep.subr.bf16.mxu1 %v14349_v42  ;;  %v7482_v42 = vpack.c.bf16 %v15463_v35, %v7470_v32  ;;  %v14415_v35 = vld [vmem:[#allocation7 + $0x24] ss:$8 sps:$4 sm:$0xff]  }
 0x4fa   : > { %v8123_v31 = vrot.slane %v7482_v42, 3 }
 0x4fb   : > { %7405 = vmatpush1.bf16.msra.mxu1 %v14347_v43 }
 0x4fc   : > { %7406 = vmatprep.subr.bf16.mxu1 %v14352_v46 }
 0x4ff   : > { %7407 = vmatpush1.bf16.msra.mxu1 %v14350_v50 }
 0x500   : > { %7408 = vmatprep.subr.bf16.mxu1 %v14355_v56  ;;  %v8124_v56 = vrot.slane %v7486_v20, 3  ;;  %v7472_v20 = vld [vmem:[#allocation2 + $0x18] sm:$0xc0] }
 0x502   : > { %v8125_v9 = vsel %vm672_vm1, %v8123_v31, %v8124_v56  ;;  %v14458_v56 = vld [vmem:[#allocation7 + $0x110] ss:$8 sps:$4 sm:$0xff]  }
 0x503   : > { %7409 = vmatpush1.bf16.msra.mxu1 %v14353_v59  ;;  %v14407_v59 = vld [vmem:[#allocation7] ss:$8 sps:$4 sm:$0xff]   ;;  %v14464_v31 = vld [vmem:[#allocation7 + $0x130] ss:$8 sps:$4 sm:$0xff]  }
 0x504   : > { %7410 = vmatprep.subr.bf16.mxu1 %v14358_v0 }
 0x507   : > { %7411 = vmatpush1.bf16.msra.mxu1 %v14356_v2 }
 0x50a   : > { %7413 = vmatmul.mubr.bf16.vlgmr.msra.gmra.mrb[4].mxu1 %v15437_v8  ;;  %v14409_v8 = vld [vmem:[#allocation7 + $0x4] ss:$8 sps:$4 sm:$0xff]  }
 0x50b   : > { %8456 = vmatprep.subr.bf16.mxu0 %v14409_v8  ;;  %v14424_v8 = vld [vmem:[#allocation7 + $0x54] ss:$8 sps:$4 sm:$0xff]  }
 0x5dd   : > { %v7414_v33 = vpop.f32.mrb[4].mxu1 }
 0x5de   : > { %v15483_v27 = vadd.f32 %v7444_v12, %v7414_v33  ;;  %v7416_v48 = vpop.f32.mrb[5].mxu1  ;;  %v14428_v33 = vld [vmem:[#allocation7 + $0x70] ss:$8 sps:$4 sm:$0xff]  }
 0x5df   : > { %v15485_v13 = vadd.f32 %v7448_v1, %v7416_v48  ;;  %v7418_v57 = vpop.f32.mrb[6].mxu1  ;;  %v14433_v48 = vld [vmem:[#allocation7 + $0x84] ss:$8 sps:$4 sm:$0xff]  }
 0x5e0   : > { %7463 = vst [vmem:[#allocation2 + $0x30] sm:$0xff] %v15483_v27  ;;  %v15488_v45 = vadd.f32 %v7444_v12, %v7418_v57  ;;  %v7420_v44 = vpop.f32.mrb[7].mxu1  ;;  %v7563_v18 = vpack.c.bf16 %v15483_v27, %v7555_v16  ;;  %v14425_v12 = vld [vmem:[#allocation7 + $0x60] ss:$8 sps:$4 sm:$0xff]   ;;  %v14439_v16 = vld [vmem:[#allocation7 + $0xa4] ss:$8 sps:$4 sm:$0xff]  }
 0x5e1   : > { %7464 = vst [vmem:[#allocation2 + $0x38] sm:$0xff] %v15485_v13  ;;  %v15491_v47 = vadd.f32 %v7448_v1, %v7420_v44  ;;  %v7564_v17 = vpack.c.bf16 %v15485_v13, %v7556_v54  ;;  %v14430_v1 = vld [vmem:[#allocation7 + $0x74] ss:$8 sps:$4 sm:$0xff]   ;;  %v14431_v57 = vld [vmem:[#allocation7 + $0x80] ss:$8 sps:$4 sm:$0xff]  }
 0x5e2   : > { %7467 = vst [vmem:[#allocation2 + $0x50] sm:$0xff] %v15488_v45  ;;  %v8548_v51 = vpack.c.bf16 %v15488_v45, %v15483_v27  ;;  %v7669_v28 = vshrl.u32 %v7563_v18, 16  ;;  %v7672_v55 = vshll.u32 %v7563_v18, 16  ;;  %v14436_v44 = vld [vmem:[#allocation7 + $0x94] ss:$8 sps:$4 sm:$0xff]  }
 0x5e3   : > { %7468 = vst [vmem:[#allocation2 + $0x58] sm:$0xff] %v15491_v47  ;;  %v8549_v49 = vpack.c.bf16 %v15491_v47, %v15485_v13  ;;  %v7686_v23 = vshrl.u32 %v7564_v17, 16  ;;  %v7689_v62 = vshll.u32 %v7564_v17, 16  ;;  %v14434_v54 = vld [vmem:[#allocation7 + $0x90] ss:$8 sps:$4 sm:$0xff]  }
 0x5e4   : > { %v7671_v39 = vrot.slane %v7669_v28, 3  ;;  %v7674_v22 = vrot.slane %v7672_v55, 4  ;;  %v14437_v17 = vld [vmem:[#allocation7 + $0xa0] ss:$8 sps:$4 sm:$0xff]   ;;  %v14442_v18 = vld [vmem:[#allocation7 + $0xb4] ss:$8 sps:$4 sm:$0xff]  }
 0x5e5   : > { %v7688_v36 = vrot.slane %v7686_v23, 3  ;;  %v7691_v37 = vrot.slane %v7689_v62, 4  ;;  %v14440_v23 = vld [vmem:[#allocation7 + $0xb0] ss:$8 sps:$4 sm:$0xff]   ;;  %v14445_v62 = vld [vmem:[#allocation7 + $0xc4] ss:$8 sps:$4 sm:$0xff]  }
 0x5e6   : > { %v7675_v0 = vor.u32 %v7674_v22, %v7671_v39  ;;  %v7477_v28 = vld [vmem:[#allocation2 + $0x40] sm:$0x3f]  ;;  %v14457_v39 = vld [vmem:[#allocation7 + $0x104] ss:$8 sps:$4 sm:$0xff]   ;;  %v7484_v22 = vpack.c.bf16 %v15485_v13, %v7472_v20  ;;  %v14614_v45 = vld [vmem:[#allocation7 + $0x650] ss:$8 sps:$4 sm:$0xff]  }
 0x5e7   : > { %v7692_v46 = vor.u32 %v7691_v37, %v7688_v36  ;;  %v14449_v55 = vld [vmem:[#allocation7 + $0xe0] ss:$8 sps:$4 sm:$0xff]   ;;  %v7485_v32 = vpack.c.bf16 %v7477_v28, %v7477_v28  ;;  %v14452_v37 = vld [vmem:[#allocation7 + $0xf0] ss:$8 sps:$4 sm:$0xff]   ;;  %v14571_v13 = vld [vmem:[#allocation7 + $0x564] ss:$8 sps:$4 sm:$0xff]  }
 0x5e8   : > { %v8129_v42 = vrot.slane %v7484_v22, 3  ;;  %v14885_v20 = vld [vmem:[#allocation2 + $0x28] sm:$0xff]  ;;  %v14514_v22 = vld [vmem:[#allocation7 + $0x434] ss:$8 sps:$4 sm:$0xff]  }
 0x5e9   : > { %v7559_v58 = vld [vmem:[#allocation2 + $0x50] sm:$0x7f]  ;;  %v14569_v47 = vld [vmem:[#allocation7 + $0x560] ss:$8 sps:$4 sm:$0xff]  }
 0x5ea   : > { %v7560_v63 = vld [vmem:[#allocation2 + $0x58] sm:$0x7f]  ;;  %v7567_v25 = vpack.c.bf16 %v7559_v58, %v7559_v58  ;;  %v14443_v58 = vld [vmem:[#allocation7 + $0xc0] ss:$8 sps:$4 sm:$0xff]  }
 0x5eb   : > { %v7568_v52 = vpack.c.bf16 %v7560_v63, %v7560_v63  ;;  %v14446_v63 = vld [vmem:[#allocation7 + $0xd0] ss:$8 sps:$4 sm:$0xff]  }
 0x5ec   : > { %v7677_v30 = vshrl.u32 %v7567_v25, 16  ;;  %v7680_v14 = vshll.u32 %v7567_v25, 16  ;;  %v14451_v25 = vld [vmem:[#allocation7 + $0xe4] ss:$8 sps:$4 sm:$0xff]  }
 0x5ed   : > { %v7694_v15 = vshrl.u32 %v7568_v52, 16  ;;  %v7697_v38 = vshll.u32 %v7568_v52, 16  ;;  %v7480_v52 = vld [vmem:[#allocation2 + $0x58] sm:$0x3f] }
 0x5ee   : > { %v7679_v60 = vrot.slane %v7677_v30, 3  ;;  %v7682_v4 = vrot.slane %v7680_v14, 4  ;;  %v14454_v30 = vld [vmem:[#allocation7 + $0xf4] ss:$8 sps:$4 sm:$0xff]   ;;  %v7469_v14 = vld [vmem:[#allocation2] sm:$0xc0]  ;;  %v7488_v36 = vpack.c.bf16 %v7480_v52, %v7480_v52 }
 0x5ef   : > { %v7696_v41 = vrot.slane %v7694_v15, 3  ;;  %v7699_v40 = vrot.slane %v7697_v38, 4  ;;  %v15505_v15 = vld [vmem:[#allocation2 + $0x20] sm:$0xff] }
 0x5f0   : > { %v7683_v43 = vor.u32 %v7682_v4, %v7679_v60  ;;  %v7481_v38 = vpack.c.bf16 %v15505_v15, %v7469_v14  ;;  %v8121_v60 = vrot.slane %v7485_v32, 3  ;;  %v8130_v4 = vrot.slane %v7488_v36, 3  ;;  %v14508_v14 = vld [vmem:[#allocation7 + $0x414] ss:$8 sps:$4 sm:$0xff]  }
 0x5f1   : > { %v7700_v50 = vor.u32 %v7699_v40, %v7696_v41  ;;  %v14455_v40 = vld [vmem:[#allocation7 + $0x100] ss:$8 sps:$4 sm:$0xff]  }
 0x5f2   : > { %v7684_v7 = vsel %vm2531_vm0, %v7675_v0, %v7683_v43  ;;  %v8120_v41 = vrot.slane %v7481_v38, 3  ;;  %v14460_v43 = vld [vmem:[#allocation7 + $0x114] ss:$8 sps:$4 sm:$0xff]   ;;  %v14461_v0 = vld [vmem:[#allocation7 + $0x120] ss:$8 sps:$4 sm:$0xff]  }
 0x5f3   : > { %v7701_v2 = vsel %vm2531_vm0, %v7692_v46, %v7700_v50  ;;  %v8131_v50 = vsel %vm672_vm1, %v8129_v42, %v8130_v4  ;;  %v14511_v38 = vld [vmem:[#allocation7 + $0x424] ss:$8 sps:$4 sm:$0xff]   ;;  %v14518_v42 = vld [vmem:[#allocation7 + $0x450] ss:$8 sps:$4 sm:$0xff]  }
 0x5f4   : > { %8101 = vmatprep.mubr.bf16.mxu0 %v7701_v2  ;;  %v8122_v46 = vsel %vm672_vm1, %v8120_v41, %v8121_v60  ;;  %v14466_v2 = vld [vmem:[#allocation7 + $0x134] ss:$8 sps:$4 sm:$0xff]   ;;  %v14512_v60 = vld [vmem:[#allocation7 + $0x430] ss:$8 sps:$4 sm:$0xff]   ;;  %v14517_v4 = vld [vmem:[#allocation7 + $0x444] ss:$8 sps:$4 sm:$0xff]  }
 0x5f5   : > { %8102 = vmatmul.mubr.bf16.vlgmr.msra.gmra.mrb[4].mxu0 %v7684_v7  ;;  %v14467_v7 = vld [vmem:[#allocation7 + $0x140] ss:$8 sps:$4 sm:$0xff]  }
 0x5f6   : > { %8457 = vmatpush1.bf16.msra.mxu0 %v14407_v59  ;;  %8488 = vmatprep.mubr.bf16.mxu0 %v8125_v9  ;;  %v14463_v59 = vld [vmem:[#allocation7 + $0x124] ss:$8 sps:$4 sm:$0xff]   ;;  %v14472_v9 = vld [vmem:[#allocation7 + $0x154] ss:$8 sps:$4 sm:$0xff]   ;;  %v14515_v41 = vld [vmem:[#allocation7 + $0x440] ss:$8 sps:$4 sm:$0xff]  }
 0x5f7   : > { %8458 = vmatprep.subr.bf16.mxu0 %v14412_v5  ;;  %v14469_v5 = vld [vmem:[#allocation7 + $0x144] ss:$8 sps:$4 sm:$0xff]  }
 0x5fa   : > { %8459 = vmatpush1.bf16.msra.mxu0 %v14410_v10  ;;  %v14470_v10 = vld [vmem:[#allocation7 + $0x150] ss:$8 sps:$4 sm:$0xff]  }
 0x5fb   : > { %8460 = vmatprep.subr.bf16.mxu0 %v14415_v35  ;;  %v14475_v35 = vld [vmem:[#allocation7 + $0x164] ss:$8 sps:$4 sm:$0xff]  }
 0x5fe   : > { %8461 = vmatpush1.bf16.msra.mxu0 %v14413_v19  ;;  %v14473_v19 = vld [vmem:[#allocation7 + $0x160] ss:$8 sps:$4 sm:$0xff]  }
 0x5ff   : > { %8462 = vmatprep.subr.bf16.mxu0 %v14418_v53  ;;  %v14478_v53 = vld [vmem:[#allocation7 + $0x174] ss:$8 sps:$4 sm:$0xff]  }
 0x602   : > { %8463 = vmatpush1.bf16.msra.mxu0 %v14416_v29  ;;  %v14476_v29 = vld [vmem:[#allocation7 + $0x170] ss:$8 sps:$4 sm:$0xff]  }
 0x603   : > { %8464 = vmatprep.subr.bf16.mxu0 %v14421_v21  ;;  %v14481_v21 = vld [vmem:[#allocation7 + $0x184] ss:$8 sps:$4 sm:$0xff]  }
 0x606   : > { %8465 = vmatpush1.bf16.msra.mxu0 %v14419_v34  ;;  %v14479_v34 = vld [vmem:[#allocation7 + $0x180] ss:$8 sps:$4 sm:$0xff]  }
 0x607   : > { %8466 = vmatprep.subr.bf16.mxu0 %v14424_v8  ;;  %v14484_v8 = vld [vmem:[#allocation7 + $0x194] ss:$8 sps:$4 sm:$0xff]  }
 0x60a   : > { %8467 = vmatpush1.bf16.msra.mxu0 %v14422_v26  ;;  %v14482_v26 = vld [vmem:[#allocation7 + $0x190] ss:$8 sps:$4 sm:$0xff]  }
 0x60b   : > { %8468 = vmatprep.subr.bf16.mxu0 %v14427_v11  ;;  %v14487_v11 = vld [vmem:[#allocation7 + $0x1a4] ss:$8 sps:$4 sm:$0xff]  }
 0x60e   : > { %8469 = vmatpush1.bf16.msra.mxu0 %v14425_v12  ;;  %v14485_v12 = vld [vmem:[#allocation7 + $0x1a0] ss:$8 sps:$4 sm:$0xff]  }
 0x60f   : > { %8470 = vmatprep.subr.bf16.mxu0 %v14430_v1  ;;  %v14490_v1 = vld [vmem:[#allocation7 + $0x1b4] ss:$8 sps:$4 sm:$0xff]  }
 0x612   : > { %8471 = vmatpush1.bf16.msra.mxu0 %v14428_v33  ;;  %v14488_v33 = vld [vmem:[#allocation7 + $0x1b0] ss:$8 sps:$4 sm:$0xff]  }
 0x613   : > { %8472 = vmatprep.subr.bf16.mxu0 %v14433_v48  ;;  %v14493_v48 = vld [vmem:[#allocation7 + $0x1c4] ss:$8 sps:$4 sm:$0xff]  }
 0x616   : > { %8473 = vmatpush1.bf16.msra.mxu0 %v14431_v57  ;;  %v14491_v57 = vld [vmem:[#allocation7 + $0x1c0] ss:$8 sps:$4 sm:$0xff]  }
 0x617   : > { %8474 = vmatprep.subr.bf16.mxu0 %v14436_v44  ;;  %v14496_v44 = vld [vmem:[#allocation7 + $0x1d4] ss:$8 sps:$4 sm:$0xff]  }
 0x61a   : > { %8475 = vmatpush1.bf16.msra.mxu0 %v14434_v54  ;;  %v14494_v54 = vld [vmem:[#allocation7 + $0x1d0] ss:$8 sps:$4 sm:$0xff]  }
 0x61b   : > { %8476 = vmatprep.subr.bf16.mxu0 %v14439_v16  ;;  %v14499_v16 = vld [vmem:[#allocation7 + $0x1e4] ss:$8 sps:$4 sm:$0xff]  }
 0x61e   : > { %8477 = vmatpush1.bf16.msra.mxu0 %v14437_v17  ;;  %v7479_v17 = vld [vmem:[#allocation2 + $0x50] sm:$0x3f] }
 0x61f   : > { %8478 = vmatprep.subr.bf16.mxu0 %v14442_v18  ;;  %v14497_v18 = vld [vmem:[#allocation7 + $0x1e0] ss:$8 sps:$4 sm:$0xff]  }
 0x622   : > { %8479 = vmatpush1.bf16.msra.mxu0 %v14440_v23  ;;  %v14502_v23 = vld [vmem:[#allocation7 + $0x1f4] ss:$8 sps:$4 sm:$0xff]  }
 0x623   : > { %8480 = vmatprep.subr.bf16.mxu0 %v14445_v62  ;;  %v7471_v62 = vld [vmem:[#allocation2 + $0x10] sm:$0xc0] }
 0x626   : > { %8481 = vmatpush1.bf16.msra.mxu0 %v14443_v58  ;;  %v7487_v58 = vpack.c.bf16 %v7479_v17, %v7479_v17  ;;  %v14560_v17 = vld [vmem:[#allocation7 + $0x530] ss:$8 sps:$4 sm:$0xff]  }
 0x627   : > { %8482 = vmatprep.subr.bf16.mxu0 %v14448_v24  ;;  %v14500_v24 = vld [vmem:[#allocation7 + $0x1f0] ss:$8 sps:$4 sm:$0xff]  }
 0x628   : > { %v8127_v28 = vrot.slane %v7487_v58, 3  ;;  %v14572_v58 = vld [vmem:[#allocation7 + $0x570] ss:$8 sps:$4 sm:$0xff]  }
 0x62a   : > { %8483 = vmatpush1.bf16.msra.mxu0 %v14446_v63  ;;  %v7483_v63 = vpack.c.bf16 %v15483_v27, %v7471_v62  ;;  %v14566_v62 = vld [vmem:[#allocation7 + $0x550] ss:$8 sps:$4 sm:$0xff]   ;;  %v14616_v27 = vld [vmem:[#allocation7 + $0x654] ss:$8 sps:$4 sm:$0xff]  }
 0x62b   : > { %8484 = vmatprep.subr.bf16.mxu0 %v14451_v25  ;;  %v14505_v25 = vld [vmem:[#allocation7 + $0x404] ss:$8 sps:$4 sm:$0xff]  }
 0x62c   : > { %v8126_v52 = vrot.slane %v7483_v63, 3  ;;  %v14575_v63 = vld [vmem:[#allocation7 + $0x580] ss:$8 sps:$4 sm:$0xff]  }
 0x62e   : > { %8485 = vmatpush1.bf16.msra.mxu0 %v14449_v55  ;;  %v15512_v55 = vld [vmem:[#allocation2 + $0x48] sm:$0xff]  ;;  %v8128_v32 = vsel %vm672_vm1, %v8126_v52, %v8127_v28  ;;  %v14578_v28 = vld [vmem:[#allocation7 + $0x590] ss:$8 sps:$4 sm:$0xff]  }
 0x62f   : > { %8486 = vmatprep.subr.bf16.mxu0 %v14454_v30  ;;  %v14503_v30 = vld [vmem:[#allocation7 + $0x400] ss:$8 sps:$4 sm:$0xff]   ;;  %v8547_v36 = vpack.c.bf16 %v15512_v55, %v14885_v20  ;;  %v14583_v52 = vld [vmem:[#allocation7 + $0x5a4] ss:$8 sps:$4 sm:$0xff]  }
 0x630   : > { %v14589_v20 = vld [vmem:[#allocation7 + $0x5c4] ss:$8 sps:$4 sm:$0xff]  }
 0x632   : > { %8487 = vmatpush1.bf16.msra.mxu0 %v14452_v37  ;;  %v14506_v37 = vld [vmem:[#allocation7 + $0x410] ss:$8 sps:$4 sm:$0xff]  }
 0x633   : > { %8499 = vmatprep.subr.bf16.mxu0 %v14457_v39  ;;  %v14509_v39 = vld [vmem:[#allocation7 + $0x420] ss:$8 sps:$4 sm:$0xff]  }
 0x635   : > { %8489 = vmatmul.mubr.bf16.vlgmr.msra.gmra.mrb[4].mxu0 %v8122_v46  ;;  %v14521_v46 = vld [vmem:[#allocation7 + $0x460] ss:$8 sps:$4 sm:$0xff]  }
 0x636   : > { %8500 = vmatpush1.bf16.msra.mxu0 %v14455_v40  ;;  %8531 = vmatprep.mubr.bf16.mxu0 %v8131_v50  ;;  %v14520_v40 = vld [vmem:[#allocation7 + $0x454] ss:$8 sps:$4 sm:$0xff]  }
 0x637   : > { %8501 = vmatprep.subr.bf16.mxu0 %v14460_v43  ;;  %v14523_v43 = vld [vmem:[#allocation7 + $0x464] ss:$8 sps:$4 sm:$0xff]   ;;  %v14526_v50 = vld [vmem:[#allocation7 + $0x474] ss:$8 sps:$4 sm:$0xff]  }
 0x63a   : > { %8502 = vmatpush1.bf16.msra.mxu0 %v14458_v56  ;;  %v14524_v56 = vld [vmem:[#allocation7 + $0x470] ss:$8 sps:$4 sm:$0xff]  }
 0x63b   : > { %8503 = vmatprep.subr.bf16.mxu0 %v14463_v59  ;;  %v14529_v59 = vld [vmem:[#allocation7 + $0x484] ss:$8 sps:$4 sm:$0xff]  }
 0x63e   : > { %8504 = vmatpush1.bf16.msra.mxu0 %v14461_v0  ;;  %v14527_v0 = vld [vmem:[#allocation7 + $0x480] ss:$8 sps:$4 sm:$0xff]  }
 0x63f   : > { %8505 = vmatprep.subr.bf16.mxu0 %v14466_v2  ;;  %v14532_v2 = vld [vmem:[#allocation7 + $0x494] ss:$8 sps:$4 sm:$0xff]  }
 0x642   : > { %8506 = vmatpush1.bf16.msra.mxu0 %v14464_v31  ;;  %v14530_v31 = vld [vmem:[#allocation7 + $0x490] ss:$8 sps:$4 sm:$0xff]  }
 0x643   : > { %8507 = vmatprep.subr.bf16.mxu0 %v14469_v5  ;;  %v14535_v5 = vld [vmem:[#allocation7 + $0x4a4] ss:$8 sps:$4 sm:$0xff]  }
 0x646   : > { %8508 = vmatpush1.bf16.msra.mxu0 %v14467_v7  ;;  %v14533_v7 = vld [vmem:[#allocation7 + $0x4a0] ss:$8 sps:$4 sm:$0xff]  }
 0x647   : > { %8509 = vmatprep.subr.bf16.mxu0 %v14472_v9  ;;  %v14538_v9 = vld [vmem:[#allocation7 + $0x4b4] ss:$8 sps:$4 sm:$0xff]  }
 0x64a   : > { %8510 = vmatpush1.bf16.msra.mxu0 %v14470_v10  ;;  %v14536_v10 = vld [vmem:[#allocation7 + $0x4b0] ss:$8 sps:$4 sm:$0xff]  }
 0x64b   : > { %8511 = vmatprep.subr.bf16.mxu0 %v14475_v35  ;;  %v14541_v35 = vld [vmem:[#allocation7 + $0x4c4] ss:$8 sps:$4 sm:$0xff]  }
 0x64e   : > { %8512 = vmatpush1.bf16.msra.mxu0 %v14473_v19  ;;  %v14539_v19 = vld [vmem:[#allocation7 + $0x4c0] ss:$8 sps:$4 sm:$0xff]  }
 0x64f   : > { %8513 = vmatprep.subr.bf16.mxu0 %v14478_v53  ;;  %v14544_v53 = vld [vmem:[#allocation7 + $0x4d4] ss:$8 sps:$4 sm:$0xff]  }
 0x652   : > { %8514 = vmatpush1.bf16.msra.mxu0 %v14476_v29  ;;  %v14542_v29 = vld [vmem:[#allocation7 + $0x4d0] ss:$8 sps:$4 sm:$0xff]  }
 0x653   : > { %8515 = vmatprep.subr.bf16.mxu0 %v14481_v21  ;;  %v14547_v21 = vld [vmem:[#allocation7 + $0x4e4] ss:$8 sps:$4 sm:$0xff]  }
 0x656   : > { %8516 = vmatpush1.bf16.msra.mxu0 %v14479_v34  ;;  %v14545_v34 = vld [vmem:[#allocation7 + $0x4e0] ss:$8 sps:$4 sm:$0xff]  }
 0x657   : > { %8517 = vmatprep.subr.bf16.mxu0 %v14484_v8  ;;  %v14550_v8 = vld [vmem:[#allocation7 + $0x4f4] ss:$8 sps:$4 sm:$0xff]  }
 0x65a   : > { %8518 = vmatpush1.bf16.msra.mxu0 %v14482_v26  ;;  %v14548_v26 = vld [vmem:[#allocation7 + $0x4f0] ss:$8 sps:$4 sm:$0xff]  }
 0x65b   : > { %8519 = vmatprep.subr.bf16.mxu0 %v14487_v11  ;;  %v14553_v11 = vld [vmem:[#allocation7 + $0x504] ss:$8 sps:$4 sm:$0xff]  }
 0x65e   : > { %8520 = vmatpush1.bf16.msra.mxu0 %v14485_v12  ;;  %v15516_v12 = vld [vmem:[#allocation2 + $0x40] sm:$0xff] }
 0x65f   : > { %8521 = vmatprep.subr.bf16.mxu0 %v14490_v1  ;;  %v14551_v1 = vld [vmem:[#allocation7 + $0x500] ss:$8 sps:$4 sm:$0xff]  }
 0x662   : > { %8522 = vmatpush1.bf16.msra.mxu0 %v14488_v33  ;;  %v8546_v33 = vpack.c.bf16 %v15516_v12, %v15505_v15  ;;  %v14563_v15 = vld [vmem:[#allocation7 + $0x540] ss:$8 sps:$4 sm:$0xff]  }
 0x663   : > { %8523 = vmatprep.subr.bf16.mxu0 %v14493_v48  ;;  %v14556_v48 = vld [vmem:[#allocation7 + $0x514] ss:$8 sps:$4 sm:$0xff]  }
 0x666   : > { %8524 = vmatpush1.bf16.msra.mxu0 %v14491_v57  ;;  %v14554_v57 = vld [vmem:[#allocation7 + $0x510] ss:$8 sps:$4 sm:$0xff]  }
 0x667   : > { %8525 = vmatprep.subr.bf16.mxu0 %v14496_v44  ;;  %v14559_v44 = vld [vmem:[#allocation7 + $0x524] ss:$8 sps:$4 sm:$0xff]  }
 0x66a   : > { %8526 = vmatpush1.bf16.msra.mxu0 %v14494_v54  ;;  %v14557_v54 = vld [vmem:[#allocation7 + $0x520] ss:$8 sps:$4 sm:$0xff]  }
 0x66b   : > { %8527 = vmatprep.subr.bf16.mxu0 %v14499_v16  ;;  %v14562_v16 = vld [vmem:[#allocation7 + $0x534] ss:$8 sps:$4 sm:$0xff]  }
 0x66e   : > { %8528 = vmatpush1.bf16.msra.mxu0 %v14497_v18  ;;  %v14565_v18 = vld [vmem:[#allocation7 + $0x544] ss:$8 sps:$4 sm:$0xff]  }
 0x66f   : > { %8529 = vmatprep.subr.bf16.mxu0 %v14502_v23  ;;  %v14568_v23 = vld [vmem:[#allocation7 + $0x554] ss:$8 sps:$4 sm:$0xff]  }
 0x672   : > { %8530 = vmatpush1.bf16.msra.mxu0 %v14500_v24  ;;  %v14577_v24 = vld [vmem:[#allocation7 + $0x584] ss:$8 sps:$4 sm:$0xff]  }
 0x673   : > { %8935 = vmatprep.subr.bf16.mxu0 %v14505_v25  ;;  %v14580_v25 = vld [vmem:[#allocation7 + $0x594] ss:$8 sps:$4 sm:$0xff]  }
 0x675   : > { %8532 = vmatmul.mubr.bf16.vlgmr.msra.gmra.mrb[4].mxu0 %v8128_v32  ;;  %v14584_v32 = vld [vmem:[#allocation7 + $0x5b0] ss:$8 sps:$4 sm:$0xff]  }
 0x676   : > { %8936 = vmatpush1.bf16.msra.mxu0 %v14503_v30  ;;  %8967 = vmatprep.mubr.bf16.mxu0 %v8547_v36  ;;  %v14581_v30 = vld [vmem:[#allocation7 + $0x5a0] ss:$8 sps:$4 sm:$0xff]  }
 0x677   : > { %8937 = vmatprep.subr.bf16.mxu0 %v14508_v14  ;;  %v14586_v14 = vld [vmem:[#allocation7 + $0x5b4] ss:$8 sps:$4 sm:$0xff]   ;;  %v14587_v36 = vld [vmem:[#allocation7 + $0x5c0] ss:$8 sps:$4 sm:$0xff]  }
 0x67a   : > { %8938 = vmatpush1.bf16.msra.mxu0 %v14506_v37  ;;  %v14592_v37 = vld [vmem:[#allocation7 + $0x5d4] ss:$8 sps:$4 sm:$0xff]  }
 0x67b   : > { %8939 = vmatprep.subr.bf16.mxu0 %v14511_v38  ;;  %v9026_v38 = vld [vmem:[#allocation2 + $0x28] sm:$0xfe] }
 0x67e   : > { %8940 = vmatpush1.bf16.msra.mxu0 %v14509_v39  ;;  %v9038_v39 = vpack.c.bf16 %v15512_v55, %v9026_v38 }
 0x67f   : > { %8941 = vmatprep.subr.bf16.mxu0 %v14514_v22  ;;  %v14590_v22 = vld [vmem:[#allocation7 + $0x5d0] ss:$8 sps:$4 sm:$0xff]  }
 0x682   : > { %8942 = vmatpush1.bf16.msra.mxu0 %v14512_v60  ;;  %v9034_v60 = vld [vmem:[#allocation2 + $0x68] sm:$0x1] }
 0x683   : > { %8943 = vmatprep.subr.bf16.mxu0 %v14517_v4  ;;  %v14595_v4 = vld [vmem:[#allocation7 + $0x5e4] ss:$8 sps:$4 sm:$0xff]  }
 0x686   : > { %8944 = vmatpush1.bf16.msra.mxu0 %v14515_v41  ;;  %v9042_v41 = vpack.c.bf16 %v9034_v60, %v9034_v60  ;;  %v14644_v60 = vld [vmem:[#allocation7 + $0x6f0] ss:$8 sps:$4 sm:$0xff]  }
 0x687   : > { %8945 = vmatprep.subr.bf16.mxu0 %v14520_v40  ;;  %v9125_v40 = vshll.u32 %v9038_v39, 16 }
 0x68a   : > { %8946 = vmatpush1.bf16.msra.mxu0 %v14518_v42  ;;  %v14593_v42 = vld [vmem:[#allocation7 + $0x5e0] ss:$8 sps:$4 sm:$0xff]  }
 0x68b   : > { %8947 = vmatprep.subr.bf16.mxu0 %v14523_v43  ;;  %v14598_v43 = vld [vmem:[#allocation7 + $0x5f4] ss:$8 sps:$4 sm:$0xff]  }
 0x68e   : > { %8948 = vmatpush1.bf16.msra.mxu0 %v14521_v46  ;;  %v9127_v46 = vrot.slane %v9125_v40, 1 }
 0x68f   : > { %8949 = vmatprep.subr.bf16.mxu0 %v14526_v50  ;;  %v9130_v50 = vshll.u32 %v9042_v41, 16  ;;  %v14649_v41 = vld [vmem:[#allocation7 + $0x704] ss:$8 sps:$4 sm:$0xff]  }
 0x692   : > { %8950 = vmatpush1.bf16.msra.mxu0 %v14524_v56  ;;  %v14596_v56 = vld [vmem:[#allocation7 + $0x5f0] ss:$8 sps:$4 sm:$0xff]  }
 0x693   : > { %8951 = vmatprep.subr.bf16.mxu0 %v14529_v59  ;;  %v14601_v59 = vld [vmem:[#allocation7 + $0x604] ss:$8 sps:$4 sm:$0xff]  }
 0x696   : > { %8952 = vmatpush1.bf16.msra.mxu0 %v14527_v0  ;;  %v9123_v0 = vshrl.u32 %v9038_v39, 16 }
 0x697   : > { %8953 = vmatprep.subr.bf16.mxu0 %v14532_v2 }
 0x698   : > { %v9128_v2 = vor.u32 %v9127_v46, %v9123_v0 }
 0x69a   : > { %8954 = vmatpush1.bf16.msra.mxu0 %v14530_v31  ;;  %v9132_v31 = vrot.slane %v9130_v50, 1 }
 0x69b   : > { %8955 = vmatprep.subr.bf16.mxu0 %v14535_v5  ;;  %v14599_v5 = vld [vmem:[#allocation7 + $0x600] ss:$8 sps:$4 sm:$0xff]  }
 0x69e   : > { %8956 = vmatpush1.bf16.msra.mxu0 %v14533_v7  ;;  %v14604_v7 = vld [vmem:[#allocation7 + $0x614] ss:$8 sps:$4 sm:$0xff]  }
 0x69f   : > { %8957 = vmatprep.subr.bf16.mxu0 %v14538_v9  ;;  %v9133_v9 = vsel %vm4530_vm3, %v9128_v2, %v9132_v31  ;;  %v14650_v31 = vld [vmem:[#allocation7 + $0x710] ss:$8 sps:$4 sm:$0xff]  }
 0x6a2   : > { %8958 = vmatpush1.bf16.msra.mxu0 %v14536_v10  ;;  %v14602_v10 = vld [vmem:[#allocation7 + $0x610] ss:$8 sps:$4 sm:$0xff]  }
 0x6a3   : > { %8959 = vmatprep.subr.bf16.mxu0 %v14541_v35  ;;  %v14607_v35 = vld [vmem:[#allocation7 + $0x624] ss:$8 sps:$4 sm:$0xff]  }
 0x6a6   : > { %8960 = vmatpush1.bf16.msra.mxu0 %v14539_v19  ;;  %v14605_v19 = vld [vmem:[#allocation7 + $0x620] ss:$8 sps:$4 sm:$0xff]  }
 0x6a7   : > { %8961 = vmatprep.subr.bf16.mxu0 %v14544_v53  ;;  %v14610_v53 = vld [vmem:[#allocation7 + $0x634] ss:$8 sps:$4 sm:$0xff]  }
 0x6aa   : > { %8962 = vmatpush1.bf16.msra.mxu0 %v14542_v29  ;;  %v14608_v29 = vld [vmem:[#allocation7 + $0x630] ss:$8 sps:$4 sm:$0xff]  }
 0x6ab   : > { %8963 = vmatprep.subr.bf16.mxu0 %v14547_v21  ;;  %v14613_v21 = vld [vmem:[#allocation7 + $0x644] ss:$8 sps:$4 sm:$0xff]  }
 0x6ae   : > { %8964 = vmatpush1.bf16.msra.mxu0 %v14545_v34  ;;  %v14611_v34 = vld [vmem:[#allocation7 + $0x640] ss:$8 sps:$4 sm:$0xff]  }
 0x6af   : > { %8965 = vmatprep.subr.bf16.mxu0 %v14550_v8  ;;  %v14617_v8 = vld [vmem:[#allocation7 + $0x660] ss:$8 sps:$4 sm:$0xff]  }
 0x6b2   : > { %8966 = vmatpush1.bf16.msra.mxu0 %v14548_v26  ;;  %v14622_v26 = vld [vmem:[#allocation7 + $0x674] ss:$8 sps:$4 sm:$0xff]  }
 0x6b3   : > { %8978 = vmatprep.subr.bf16.mxu0 %v14553_v11  ;;  %v14620_v11 = vld [vmem:[#allocation7 + $0x670] ss:$8 sps:$4 sm:$0xff]  }
 0x6b5   : > { %8968 = vmatmul.mubr.bf16.vlgmr.msra.gmra.mrb[4].mxu0 %v8546_v33  ;;  %v14623_v33 = vld [vmem:[#allocation7 + $0x680] ss:$8 sps:$4 sm:$0xff]  }
 0x6b6   : > { %8979 = vmatpush1.bf16.msra.mxu0 %v14551_v1  ;;  %9010 = vmatprep.mubr.bf16.mxu0 %v8549_v49  ;;  %v14574_v49 = vld [vmem:[#allocation7 + $0x574] ss:$8 sps:$4 sm:$0xff]   ;;  %v14625_v1 = vld [vmem:[#allocation7 + $0x684] ss:$8 sps:$4 sm:$0xff]  }
 0x6b7   : > { %8980 = vmatprep.subr.bf16.mxu0 %v14556_v48  ;;  %v14628_v48 = vld [vmem:[#allocation7 + $0x694] ss:$8 sps:$4 sm:$0xff]  }
 0x6ba   : > { %8981 = vmatpush1.bf16.msra.mxu0 %v14554_v57  ;;  %v14626_v57 = vld [vmem:[#allocation7 + $0x690] ss:$8 sps:$4 sm:$0xff]  }
 0x6bb   : > { %8982 = vmatprep.subr.bf16.mxu0 %v14559_v44  ;;  %v14631_v44 = vld [vmem:[#allocation7 + $0x6a4] ss:$8 sps:$4 sm:$0xff]  }
 0x6be   : > { %8983 = vmatpush1.bf16.msra.mxu0 %v14557_v54  ;;  %v14629_v54 = vld [vmem:[#allocation7 + $0x6a0] ss:$8 sps:$4 sm:$0xff]  }
 0x6bf   : > { %8984 = vmatprep.subr.bf16.mxu0 %v14562_v16  ;;  %v14634_v16 = vld [vmem:[#allocation7 + $0x6b4] ss:$8 sps:$4 sm:$0xff]  }
 0x6c2   : > { %8985 = vmatpush1.bf16.msra.mxu0 %v14560_v17  ;;  %v14632_v17 = vld [vmem:[#allocation7 + $0x6b0] ss:$8 sps:$4 sm:$0xff]  }
 0x6c3   : > { %8986 = vmatprep.subr.bf16.mxu0 %v14565_v18  ;;  %v14637_v18 = vld [vmem:[#allocation7 + $0x6c4] ss:$8 sps:$4 sm:$0xff]  }
 0x6c6   : > { %8987 = vmatpush1.bf16.msra.mxu0 %v14563_v15  ;;  %v14635_v15 = vld [vmem:[#allocation7 + $0x6c0] ss:$8 sps:$4 sm:$0xff]  }
 0x6c7   : > { %8988 = vmatprep.subr.bf16.mxu0 %v14568_v23  ;;  %v15528_v23 = vld [vmem:[#allocation2 + $0x58] sm:$0xff] }
 0x6ca   : > { %8989 = vmatpush1.bf16.msra.mxu0 %v14566_v62  ;;  %v14640_v62 = vld [vmem:[#allocation7 + $0x6d4] ss:$8 sps:$4 sm:$0xff]  }
 0x6cb   : > { %8990 = vmatprep.subr.bf16.mxu0 %v14571_v13  ;;  %v9025_v13 = vld [vmem:[#allocation2 + $0x20] sm:$0xfe] }
 0x6ce   : > { %8991 = vmatpush1.bf16.msra.mxu0 %v14569_v47  ;;  %v9037_v47 = vpack.c.bf16 %v15516_v12, %v9025_v13  ;;  %v14686_v13 = vld [vmem:[#allocation7 + $0x7d0] ss:$8 sps:$4 sm:$0xff]  }
 0x6cf   : > { %8992 = vmatprep.subr.bf16.mxu0 %v14574_v49  ;;  %v9028_v49 = vld [vmem:[#allocation2 + $0x38] sm:$0xfe] }
 0x6d2   : > { %8993 = vmatpush1.bf16.msra.mxu0 %v14572_v58  ;;  %v9033_v58 = vld [vmem:[#allocation2 + $0x60] sm:$0x1] }
 0x6d3   : > { %8994 = vmatprep.subr.bf16.mxu0 %v14577_v24  ;;  %v9040_v24 = vpack.c.bf16 %v15528_v23, %v9028_v49 }
 0x6d5   : > { %v9147_v40 = vshrl.u32 %v9040_v24, 16 }
 0x6d6   : > { %8995 = vmatpush1.bf16.msra.mxu0 %v14575_v63  ;;  %v14638_v63 = vld [vmem:[#allocation7 + $0x6d0] ss:$8 sps:$4 sm:$0xff]  }
 0x6d7   : > { %8996 = vmatprep.subr.bf16.mxu0 %v14580_v25  ;;  %v9036_v25 = vld [vmem:[#allocation2 + $0x78] sm:$0x1] }
 0x6da   : > { %8997 = vmatpush1.bf16.msra.mxu0 %v14578_v28  ;;  %v14643_v28 = vld [vmem:[#allocation7 + $0x6e4] ss:$8 sps:$4 sm:$0xff]  }
 0x6db   : > { %8998 = vmatprep.subr.bf16.mxu0 %v14583_v52  ;;  %v9041_v52 = vpack.c.bf16 %v9033_v58, %v9033_v58 }
 0x6dd   : > { %v9118_v38 = vshll.u32 %v9041_v52, 16 }
 0x6de   : > { %8999 = vmatpush1.bf16.msra.mxu0 %v14581_v30  ;;  %v9113_v30 = vshll.u32 %v9037_v47, 16 }
 0x6df   : > { %9000 = vmatprep.subr.bf16.mxu0 %v14586_v14  ;;  %v9044_v14 = vpack.c.bf16 %v9036_v25, %v9036_v25  ;;  %v14694_v25 = vld [vmem:[#allocation7 + $0x7f4] ss:$8 sps:$4 sm:$0xff]  }
 0x6e2   : > { %9001 = vmatpush1.bf16.msra.mxu0 %v14584_v32  ;;  %v9149_v32 = vshll.u32 %v9040_v24, 16  ;;  %v14689_v24 = vld [vmem:[#allocation7 + $0x7e0] ss:$8 sps:$4 sm:$0xff]  }
 0x6e3   : > { %9002 = vmatprep.subr.bf16.mxu0 %v14589_v20  ;;  %v14641_v20 = vld [vmem:[#allocation7 + $0x6e0] ss:$8 sps:$4 sm:$0xff]  }
 0x6e4   : > { %v9151_v39 = vrot.slane %v9149_v32, 1 }
 0x6e6   : > { %9003 = vmatpush1.bf16.msra.mxu0 %v14587_v36  ;;  %v14646_v36 = vld [vmem:[#allocation7 + $0x6f4] ss:$8 sps:$4 sm:$0xff]   ;;  %v9152_v46 = vor.u32 %v9151_v39, %v9147_v40 }
 0x6e7   : > { %9004 = vmatprep.subr.bf16.mxu0 %v14592_v37  ;;  %v9115_v37 = vrot.slane %v9113_v30, 1  ;;  %v9573_v30 = vld [vmem:[#allocation2 + $0x28] sm:$0xfc] }
 0x6ea   : > { %9005 = vmatpush1.bf16.msra.mxu0 %v14590_v22  ;;  %v9154_v22 = vshll.u32 %v9044_v14, 16  ;;  %v9581_v14 = vpack.c.bf16 %v15512_v55, %v9573_v30  ;;  %v14791_v55 = vld [vmem:[%s15840_s5 + $0xc0] sm:$0xff]  }
 0x6eb   : > { %9006 = vmatprep.subr.bf16.mxu0 %v14595_v4  ;;  %v9111_v4 = vshrl.u32 %v9037_v47, 16  ;;  %v14691_v47 = vld [vmem:[#allocation7 + $0x7e4] ss:$8 sps:$4 sm:$0xff]   ;;  %12653 = vmatprep.subr.bf16.mxu1 %v14791_v55 }
 0x6ec   : > { %v9156_v50 = vrot.slane %v9154_v22, 1  ;;  %v9664_v22 = vrot.slane %v9581_v14, 1  ;;  %v14763_v55 = vld [vmem:[#allocation7 + $0x964] ss:$8 sps:$4 sm:$0xff]  }
 0x6ee   : > { %9007 = vmatpush1.bf16.msra.mxu0 %v14593_v42  ;;  %v9116_v42 = vor.u32 %v9115_v37, %v9111_v4  ;;  %v9157_v2 = vsel %vm4530_vm3, %v9152_v46, %v9156_v50  ;;  %v14697_v37 = vld [vmem:[#allocation7 + $0x804] ss:$8 sps:$4 sm:$0xff]   ;;  %v14695_v4 = vld [vmem:[#allocation7 + $0x800] ss:$8 sps:$4 sm:$0xff]   ;;  %v14698_v50 = vld [vmem:[#allocation7 + $0x810] ss:$8 sps:$4 sm:$0xff]  }
 0x6ef   : > { %9008 = vmatprep.subr.bf16.mxu0 %v14598_v43  ;;  %v9120_v43 = vrot.slane %v9118_v38, 1  ;;  %v14793_v46 = vld [vmem:[%s15840_s5 + $0xc8] sm:$0xff]  }
 0x6f1   : > { %v9121_v0 = vsel %vm4530_vm3, %v9116_v42, %v9120_v43  ;;  %v14792_v43 = vld [vmem:[%s15840_s5 + $0x80] sm:$0xff]  }
 0x6f2   : > { %9009 = vmatpush1.bf16.msra.mxu0 %v14596_v56  ;;  %v14647_v56 = vld [vmem:[#allocation7 + $0x700] ss:$8 sps:$4 sm:$0xff]   ;;  %12654 = vmatpush3.bf16.msra.mxu1 %v14792_v43 }
 0x6f3   : > { %9482 = vmatprep.subr.bf16.mxu0 %v14601_v59  ;;  %v14652_v59 = vld [vmem:[#allocation7 + $0x714] ss:$8 sps:$4 sm:$0xff]   ;;  %12655 = vmatprep.subr.bf16.mxu1 %v14793_v46  ;;  %v14761_v43 = vld [vmem:[#allocation7 + $0x960] ss:$8 sps:$4 sm:$0xff]  }
 0x6f4   : > { %v14766_v46 = vld [vmem:[#allocation7 + $0x974] ss:$8 sps:$4 sm:$0xff]  }
 0x6f5   : > { %9011 = vmatmul.mubr.bf16.vlgmr.msra.gmra.mrb[4].mxu0 %v8548_v51  ;;  %v14619_v51 = vld [vmem:[#allocation7 + $0x664] ss:$8 sps:$4 sm:$0xff]  }
 0x6f6   : > { %9483 = vmatpush1.bf16.msra.mxu0 %v14599_v5  ;;  %9514 = vmatprep.mubr.bf16.mxu0 %v9133_v9  ;;  %v14655_v5 = vld [vmem:[#allocation7 + $0x724] ss:$8 sps:$4 sm:$0xff]   ;;  %v14658_v9 = vld [vmem:[#allocation7 + $0x734] ss:$8 sps:$4 sm:$0xff]  }
 0x6f7   : > { %9484 = vmatprep.subr.bf16.mxu0 %v14604_v7  ;;  %v14653_v7 = vld [vmem:[#allocation7 + $0x720] ss:$8 sps:$4 sm:$0xff]  }
 0x6fa   : > { %9485 = vmatpush1.bf16.msra.mxu0 %v14602_v10  ;;  %v14656_v10 = vld [vmem:[#allocation7 + $0x730] ss:$8 sps:$4 sm:$0xff]  }
 0x6fb   : > { %9486 = vmatprep.subr.bf16.mxu0 %v14607_v35  ;;  %v14661_v35 = vld [vmem:[#allocation7 + $0x744] ss:$8 sps:$4 sm:$0xff]  }
 0x6fe   : > { %9487 = vmatpush1.bf16.msra.mxu0 %v14605_v19  ;;  %v14659_v19 = vld [vmem:[#allocation7 + $0x740] ss:$8 sps:$4 sm:$0xff]  }
 0x6ff   : > { %9488 = vmatprep.subr.bf16.mxu0 %v14610_v53  ;;  %v14664_v53 = vld [vmem:[#allocation7 + $0x754] ss:$8 sps:$4 sm:$0xff]  }
 0x702   : > { %9489 = vmatpush1.bf16.msra.mxu0 %v14608_v29  ;;  %v14662_v29 = vld [vmem:[#allocation7 + $0x750] ss:$8 sps:$4 sm:$0xff]  }
 0x703   : > { %9490 = vmatprep.subr.bf16.mxu0 %v14613_v21  ;;  %v14667_v21 = vld [vmem:[#allocation7 + $0x764] ss:$8 sps:$4 sm:$0xff]  }
 0x706   : > { %9491 = vmatpush1.bf16.msra.mxu0 %v14611_v34  ;;  %v14665_v34 = vld [vmem:[#allocation7 + $0x760] ss:$8 sps:$4 sm:$0xff]  }
 0x707   : > { %9492 = vmatprep.subr.bf16.mxu0 %v14616_v27  ;;  %v14670_v27 = vld [vmem:[#allocation7 + $0x774] ss:$8 sps:$4 sm:$0xff]  }
 0x70a   : > { %9493 = vmatpush1.bf16.msra.mxu0 %v14614_v45  ;;  %v14668_v45 = vld [vmem:[#allocation7 + $0x770] ss:$8 sps:$4 sm:$0xff]  }
 0x70b   : > { %9494 = vmatprep.subr.bf16.mxu0 %v14619_v51  ;;  %v14673_v51 = vld [vmem:[#allocation7 + $0x784] ss:$8 sps:$4 sm:$0xff]  }
 0x70e   : > { %9495 = vmatpush1.bf16.msra.mxu0 %v14617_v8  ;;  %v14671_v8 = vld [vmem:[#allocation7 + $0x780] ss:$8 sps:$4 sm:$0xff]  }
 0x70f   : > { %9496 = vmatprep.subr.bf16.mxu0 %v14622_v26  ;;  %v14676_v26 = vld [vmem:[#allocation7 + $0x794] ss:$8 sps:$4 sm:$0xff]  }
 0x712   : > { %9497 = vmatpush1.bf16.msra.mxu0 %v14620_v11  ;;  %v14674_v11 = vld [vmem:[#allocation7 + $0x790] ss:$8 sps:$4 sm:$0xff]  }
 0x713   : > { %9498 = vmatprep.subr.bf16.mxu0 %v14625_v1  ;;  %v14679_v1 = vld [vmem:[#allocation7 + $0x7a4] ss:$8 sps:$4 sm:$0xff]  }
 0x716   : > { %9499 = vmatpush1.bf16.msra.mxu0 %v14623_v33  ;;  %v14677_v33 = vld [vmem:[#allocation7 + $0x7a0] ss:$8 sps:$4 sm:$0xff]  }
 0x717   : > { %9500 = vmatprep.subr.bf16.mxu0 %v14628_v48  ;;  %v14682_v48 = vld [vmem:[#allocation7 + $0x7b4] ss:$8 sps:$4 sm:$0xff]  }
 0x71a   : > { %9501 = vmatpush1.bf16.msra.mxu0 %v14626_v57  ;;  %v14680_v57 = vld [vmem:[#allocation7 + $0x7b0] ss:$8 sps:$4 sm:$0xff]  }
 0x71b   : > { %9502 = vmatprep.subr.bf16.mxu0 %v14631_v44  ;;  %v14685_v44 = vld [vmem:[#allocation7 + $0x7c4] ss:$8 sps:$4 sm:$0xff]  }
 0x71e   : > { %9503 = vmatpush1.bf16.msra.mxu0 %v14629_v54  ;;  %v15534_v54 = vld [vmem:[#allocation2 + $0x50] sm:$0xff] }
 0x71f   : > { %9504 = vmatprep.subr.bf16.mxu0 %v14634_v16  ;;  %v14683_v16 = vld [vmem:[#allocation7 + $0x7c0] ss:$8 sps:$4 sm:$0xff]  }
 0x722   : > { %9505 = vmatpush1.bf16.msra.mxu0 %v14632_v17  ;;  %v14688_v17 = vld [vmem:[#allocation7 + $0x7d4] ss:$8 sps:$4 sm:$0xff]  }
 0x723   : > { %9506 = vmatprep.subr.bf16.mxu0 %v14637_v18  ;;  %v9027_v18 = vld [vmem:[#allocation2 + $0x30] sm:$0xfe] }
 0x726   : > { %9507 = vmatpush1.bf16.msra.mxu0 %v14635_v15  ;;  %v9039_v15 = vpack.c.bf16 %v15534_v54, %v9027_v18  ;;  %v14737_v18 = vld [vmem:[#allocation7 + $0x8e0] ss:$8 sps:$4 sm:$0xff]  }
 0x727   : > { %9508 = vmatprep.subr.bf16.mxu0 %v14640_v62  ;;  %v9035_v62 = vld [vmem:[#allocation2 + $0x70] sm:$0x1] }
 0x728   : > { %v9043_v49 = vpack.c.bf16 %v9035_v62, %v9035_v62  ;;  %v9137_v58 = vshll.u32 %v9039_v15, 16  ;;  %v14742_v62 = vld [vmem:[#allocation7 + $0x8f4] ss:$8 sps:$4 sm:$0xff]  }
 0x72a   : > { %9509 = vmatpush1.bf16.msra.mxu0 %v14638_v63  ;;  %v9577_v63 = vld [vmem:[#allocation2 + $0x68] sm:$0x3]  ;;  %v9142_v52 = vshll.u32 %v9043_v49, 16 }
 0x72b   : > { %9510 = vmatprep.subr.bf16.mxu0 %v14643_v28  ;;  %v9139_v28 = vrot.slane %v9137_v58, 1  ;;  %v9585_v32 = vpack.c.bf16 %v9577_v63, %v9577_v63  ;;  %v9575_v58 = vld [vmem:[#allocation2 + $0x38] sm:$0xfc] }
 0x72c   : > { %v9144_v39 = vrot.slane %v9142_v52, 1 }
 0x72e   : > { %9511 = vmatpush1.bf16.msra.mxu0 %v14641_v20  ;;  %v14692_v20 = vld [vmem:[#allocation7 + $0x7f0] ss:$8 sps:$4 sm:$0xff]  }
 0x72f   : > { %9512 = vmatprep.subr.bf16.mxu0 %v14646_v36  ;;  %v9135_v36 = vshrl.u32 %v9039_v15, 16  ;;  %v9579_v15 = vld [vmem:[#allocation2 + $0x78] sm:$0x3] }
 0x730   : > { %v9587_v63 = vpack.c.bf16 %v9579_v15, %v9579_v15  ;;  %v14803_v15 = vld [vmem:[%s15840_s5 + $0xf0] sm:$0xff]  }
 0x731   : > { %v9140_v38 = vor.u32 %v9139_v28, %v9135_v36  ;;  %v14745_v28 = vld [vmem:[#allocation7 + $0x904] ss:$8 sps:$4 sm:$0xff]   ;;  %v14748_v36 = vld [vmem:[#allocation7 + $0x914] ss:$8 sps:$4 sm:$0xff]  }
 0x732   : > { %9513 = vmatpush1.bf16.msra.mxu0 %v14644_v60  ;;  %v9665_v60 = vrot.slane %v9585_v32, 1  ;;  %v9671_v32 = vrot.slane %v9587_v63, 1 }
 0x733   : > { %9525 = vmatprep.subr.bf16.mxu0 %v14649_v41  ;;  %v14700_v41 = vld [vmem:[#allocation7 + $0x814] ss:$8 sps:$4 sm:$0xff]   ;;  %v9145_v40 = vsel %vm4530_vm3, %v9140_v38, %v9144_v39  ;;  %v14751_v38 = vld [vmem:[#allocation7 + $0x924] ss:$8 sps:$4 sm:$0xff]   ;;  %v14749_v39 = vld [vmem:[#allocation7 + $0x920] ss:$8 sps:$4 sm:$0xff]  }
 0x734   : > { %v9666_v42 = vsel %vm5556_vm4, %v9664_v22, %v9665_v60  ;;  %v14754_v22 = vld [vmem:[#allocation7 + $0x934] ss:$8 sps:$4 sm:$0xff]   ;;  %v14752_v60 = vld [vmem:[#allocation7 + $0x930] ss:$8 sps:$4 sm:$0xff]  }
 0x735   : > { %9515 = vmatmul.mubr.bf16.vlgmr.msra.gmra.mrb[4].mxu0 %v9121_v0  ;;  %v14795_v0 = vld [vmem:[%s15840_s5 + $0xd0] sm:$0xff]  }
 0x736   : > { %9526 = vmatpush1.bf16.msra.mxu0 %v14647_v56  ;;  %9557 = vmatprep.mubr.bf16.mxu0 %v9157_v2  ;;  %v14703_v56 = vld [vmem:[#allocation7 + $0x824] ss:$8 sps:$4 sm:$0xff]   ;;  %v14701_v2 = vld [vmem:[#allocation7 + $0x820] ss:$8 sps:$4 sm:$0xff]  }
 0x737   : > { %9527 = vmatprep.subr.bf16.mxu0 %v14652_v59  ;;  %v14794_v59 = vld [vmem:[%s15840_s5 + $0x88] sm:$0xff]  }
 0x738   : > { %12656 = vmatpush3.bf16.msra.mxu1 %v14794_v59  ;;  %v14767_v59 = vld [vmem:[#allocation7 + $0x980] ss:$8 sps:$4 sm:$0xff]  }
 0x739   : > { %12657 = vmatprep.subr.bf16.mxu1 %v14795_v0  ;;  %v14772_v0 = vld [vmem:[#allocation7 + $0x994] ss:$8 sps:$4 sm:$0xff]  }
 0x73a   : > { %9528 = vmatpush1.bf16.msra.mxu0 %v14650_v31  ;;  %v14706_v31 = vld [vmem:[#allocation7 + $0x834] ss:$8 sps:$4 sm:$0xff]  }
 0x73b   : > { %9529 = vmatprep.subr.bf16.mxu0 %v14655_v5  ;;  %v14704_v5 = vld [vmem:[#allocation7 + $0x830] ss:$8 sps:$4 sm:$0xff]  }
 0x73e   : > { %9530 = vmatpush1.bf16.msra.mxu0 %v14653_v7  ;;  %v14709_v7 = vld [vmem:[#allocation7 + $0x844] ss:$8 sps:$4 sm:$0xff]  }
 0x73f   : > { %9531 = vmatprep.subr.bf16.mxu0 %v14658_v9  ;;  %v14707_v9 = vld [vmem:[#allocation7 + $0x840] ss:$8 sps:$4 sm:$0xff]  }
 0x742   : > { %9532 = vmatpush1.bf16.msra.mxu0 %v14656_v10  ;;  %v14712_v10 = vld [vmem:[#allocation7 + $0x854] ss:$8 sps:$4 sm:$0xff]  }
 0x743   : > { %9533 = vmatprep.subr.bf16.mxu0 %v14661_v35  ;;  %v14710_v35 = vld [vmem:[#allocation7 + $0x850] ss:$8 sps:$4 sm:$0xff]  }
 0x746   : > { %9534 = vmatpush1.bf16.msra.mxu0 %v14659_v19  ;;  %v14715_v19 = vld [vmem:[#allocation7 + $0x864] ss:$8 sps:$4 sm:$0xff]  }
 0x747   : > { %9535 = vmatprep.subr.bf16.mxu0 %v14664_v53  ;;  %v14713_v53 = vld [vmem:[#allocation7 + $0x860] ss:$8 sps:$4 sm:$0xff]  }
 0x74a   : > { %9536 = vmatpush1.bf16.msra.mxu0 %v14662_v29  ;;  %v14718_v29 = vld [vmem:[#allocation7 + $0x874] ss:$8 sps:$4 sm:$0xff]  }
 0x74b   : > { %9537 = vmatprep.subr.bf16.mxu0 %v14667_v21  ;;  %v14716_v21 = vld [vmem:[#allocation7 + $0x870] ss:$8 sps:$4 sm:$0xff]  }
 0x74e   : > { %9538 = vmatpush1.bf16.msra.mxu0 %v14665_v34  ;;  %v14721_v34 = vld [vmem:[#allocation7 + $0x884] ss:$8 sps:$4 sm:$0xff]  }
 0x74f   : > { %9539 = vmatprep.subr.bf16.mxu0 %v14670_v27  ;;  %v14719_v27 = vld [vmem:[#allocation7 + $0x880] ss:$8 sps:$4 sm:$0xff]  }
 0x752   : > { %9540 = vmatpush1.bf16.msra.mxu0 %v14668_v45  ;;  %v14724_v45 = vld [vmem:[#allocation7 + $0x894] ss:$8 sps:$4 sm:$0xff]  }
 0x753   : > { %9541 = vmatprep.subr.bf16.mxu0 %v14673_v51  ;;  %v14722_v51 = vld [vmem:[#allocation7 + $0x890] ss:$8 sps:$4 sm:$0xff]  }
 0x756   : > { %9542 = vmatpush1.bf16.msra.mxu0 %v14671_v8  ;;  %v14727_v8 = vld [vmem:[#allocation7 + $0x8a4] ss:$8 sps:$4 sm:$0xff]  }
 0x757   : > { %9543 = vmatprep.subr.bf16.mxu0 %v14676_v26  ;;  %v14725_v26 = vld [vmem:[#allocation7 + $0x8a0] ss:$8 sps:$4 sm:$0xff]  }
 0x75a   : > { %9544 = vmatpush1.bf16.msra.mxu0 %v14674_v11  ;;  %v14730_v11 = vld [vmem:[#allocation7 + $0x8b4] ss:$8 sps:$4 sm:$0xff]  }
 0x75b   : > { %9545 = vmatprep.subr.bf16.mxu0 %v14679_v1  ;;  %v14728_v1 = vld [vmem:[#allocation7 + $0x8b0] ss:$8 sps:$4 sm:$0xff]  }
 0x75e   : > { %9546 = vmatpush1.bf16.msra.mxu0 %v14677_v33  ;;  %v14733_v33 = vld [vmem:[#allocation7 + $0x8c4] ss:$8 sps:$4 sm:$0xff]  }
 0x75f   : > { %9547 = vmatprep.subr.bf16.mxu0 %v14682_v48  ;;  %v14731_v48 = vld [vmem:[#allocation7 + $0x8c0] ss:$8 sps:$4 sm:$0xff]  }
 0x762   : > { %9548 = vmatpush1.bf16.msra.mxu0 %v14680_v57  ;;  %v14736_v57 = vld [vmem:[#allocation7 + $0x8d4] ss:$8 sps:$4 sm:$0xff]  }
 0x763   : > { %9549 = vmatprep.subr.bf16.mxu0 %v14685_v44  ;;  %v14734_v44 = vld [vmem:[#allocation7 + $0x8d0] ss:$8 sps:$4 sm:$0xff]  }
 0x766   : > { %9550 = vmatpush1.bf16.msra.mxu0 %v14683_v16  ;;  %v14739_v16 = vld [vmem:[#allocation7 + $0x8e4] ss:$8 sps:$4 sm:$0xff]  }
 0x767   : > { %9551 = vmatprep.subr.bf16.mxu0 %v14688_v17  ;;  %v9576_v17 = vld [vmem:[#allocation2 + $0x60] sm:$0x3] }
 0x768   : > { %v9584_v49 = vpack.c.bf16 %v9576_v17, %v9576_v17  ;;  %v14801_v17 = vld [vmem:[%s15840_s5 + $0xe8] sm:$0xff]  }
 0x76a   : > { %9552 = vmatpush1.bf16.msra.mxu0 %v14686_v13  ;;  %v9572_v13 = vld [vmem:[#allocation2 + $0x20] sm:$0xfc]  ;;  %v9662_v30 = vrot.slane %v9584_v49, 1 }
 0x76b   : > { %9553 = vmatprep.subr.bf16.mxu0 %v14691_v47  ;;  %v9580_v47 = vpack.c.bf16 %v15516_v12, %v9572_v13  ;;  %v14805_v13 = vld [vmem:[%s15840_s5 + $0xf8] sm:$0xff]   ;;  %v14807_v49 = vld [vmem:[%s15840_s5 + $0x40] sm:$0xff]  }
 0x76d   : > { %v9661_v52 = vrot.slane %v9580_v47, 1  ;;  %v14806_v47 = vld [vmem:[%s15840_s5 + $0xb8] sm:$0xff]  }
 0x76e   : > { %9554 = vmatpush1.bf16.msra.mxu0 %v14689_v24  ;;  %v9583_v24 = vpack.c.bf16 %v15528_v23, %v9575_v58  ;;  %v14746_v23 = vld [vmem:[#allocation7 + $0x910] ss:$8 sps:$4 sm:$0xff]   ;;  %v10087_v58 = vld [vmem:[#allocation8] sm:$0x3] }
 0x76f   : > { %9555 = vmatprep.subr.bf16.mxu0 %v14694_v25  ;;  %v14740_v25 = vld [vmem:[#allocation7 + $0x8f0] ss:$8 sps:$4 sm:$0xff]   ;;  %v10096_v63 = vrot.slane %v10087_v58, %v7439_v6  ;;  %v10149_v6 = vld [vmem:[#allocation2] sm:$0x80] }
 0x770   : > { %v9670_v14 = vrot.slane %v9583_v24, 1  ;;  %v10092_v24 = vrot.slane %v10087_v58, %v7435_v61  ;;  %v10150_v61 = vld [vmem:[#allocation2 + $0x8] sm:$0x80]  ;;  %v14821_v58 = vld [vmem:[%s15840_s5 + $0x78] sm:$0xff]  }
 0x772   : > { %9556 = vmatpush1.bf16.msra.mxu0 %v14692_v20  ;;  %v14743_v20 = vld [vmem:[#allocation7 + $0x900] ss:$8 sps:$4 sm:$0xff]   ;;  %v9672_v12 = vsel %vm5556_vm4, %v9670_v14, %v9671_v32 }
 0x773   : > { %9997 = vmatprep.subr.bf16.mxu0 %v14697_v37  ;;  %v9663_v37 = vsel %vm5556_vm4, %v9661_v52, %v9662_v30 }
 0x775   : > { %9558 = vmatmul.mubr.bf16.vlgmr.msra.gmra.mrb[4].mxu0 %v9145_v40  ;;  %v14760_v40 = vld [vmem:[#allocation7 + $0x954] ss:$8 sps:$4 sm:$0xff]  }
 0x776   : > { %9998 = vmatpush1.bf16.msra.mxu0 %v14695_v4  ;;  %10029 = vmatprep.mubr.bf16.mxu0 %v9666_v42  ;;  %v14757_v4 = vld [vmem:[#allocation7 + $0x944] ss:$8 sps:$4 sm:$0xff]   ;;  %v14758_v42 = vld [vmem:[#allocation7 + $0x950] ss:$8 sps:$4 sm:$0xff]  }
 0x777   : > { %9999 = vmatprep.subr.bf16.mxu0 %v14700_v41  ;;  %v14755_v41 = vld [vmem:[#allocation7 + $0x940] ss:$8 sps:$4 sm:$0xff]  }
 0x77a   : > { %10000 = vmatpush1.bf16.msra.mxu0 %v14698_v50  ;;  %v14764_v50 = vld [vmem:[#allocation7 + $0x970] ss:$8 sps:$4 sm:$0xff]  }
 0x77b   : > { %10001 = vmatprep.subr.bf16.mxu0 %v14703_v56  ;;  %v14769_v56 = vld [vmem:[#allocation7 + $0x984] ss:$8 sps:$4 sm:$0xff]  }
 0x77e   : > { %10002 = vmatpush1.bf16.msra.mxu0 %v14701_v2  ;;  %v14770_v2 = vld [vmem:[#allocation7 + $0x990] ss:$8 sps:$4 sm:$0xff]  }
 0x77f   : > { %10003 = vmatprep.subr.bf16.mxu0 %v14706_v31  ;;  %v14775_v31 = vld [vmem:[#allocation7 + $0x9a4] ss:$8 sps:$4 sm:$0xff]  }
 0x782   : > { %10004 = vmatpush1.bf16.msra.mxu0 %v14704_v5  ;;  %v14773_v5 = vld [vmem:[#allocation7 + $0x9a0] ss:$8 sps:$4 sm:$0xff]  }
 0x783   : > { %10005 = vmatprep.subr.bf16.mxu0 %v14709_v7  ;;  %v14778_v7 = vld [vmem:[#allocation7 + $0x9b4] ss:$8 sps:$4 sm:$0xff]  }
 0x786   : > { %10006 = vmatpush1.bf16.msra.mxu0 %v14707_v9  ;;  %v14776_v9 = vld [vmem:[#allocation7 + $0x9b0] ss:$8 sps:$4 sm:$0xff]  }
 0x787   : > { %10007 = vmatprep.subr.bf16.mxu0 %v14712_v10  ;;  %v14781_v10 = vld [vmem:[#allocation7 + $0x9c4] ss:$8 sps:$4 sm:$0xff]  }
 0x78a   : > { %10008 = vmatpush1.bf16.msra.mxu0 %v14710_v35  ;;  %v14779_v35 = vld [vmem:[#allocation7 + $0x9c0] ss:$8 sps:$4 sm:$0xff]  }
 0x78b   : > { %10009 = vmatprep.subr.bf16.mxu0 %v14715_v19  ;;  %v14784_v19 = vld [vmem:[#allocation7 + $0x9d4] ss:$8 sps:$4 sm:$0xff]  }
 0x78e   : > { %10010 = vmatpush1.bf16.msra.mxu0 %v14713_v53  ;;  %v14782_v53 = vld [vmem:[#allocation7 + $0x9d0] ss:$8 sps:$4 sm:$0xff]  }
 0x78f   : > { %10011 = vmatprep.subr.bf16.mxu0 %v14718_v29  ;;  %v14787_v29 = vld [vmem:[#allocation7 + $0x9e4] ss:$8 sps:$4 sm:$0xff]  }
 0x792   : > { %10012 = vmatpush1.bf16.msra.mxu0 %v14716_v21  ;;  %v9578_v21 = vld [vmem:[#allocation2 + $0x70] sm:$0x3] }
 0x793   : > { %10013 = vmatprep.subr.bf16.mxu0 %v14721_v34  ;;  %v14785_v34 = vld [vmem:[#allocation7 + $0x9e0] ss:$8 sps:$4 sm:$0xff]  }
 0x796   : > { %10014 = vmatpush1.bf16.msra.mxu0 %v14719_v27  ;;  %v14790_v27 = vld [vmem:[#allocation7 + $0x9f4] ss:$8 sps:$4 sm:$0xff]  }
 0x797   : > { %10015 = vmatprep.subr.bf16.mxu0 %v14724_v45  ;;  %v9574_v45 = vld [vmem:[#allocation2 + $0x30] sm:$0xfc] }
 0x79a   : > { %10016 = vmatpush1.bf16.msra.mxu0 %v14722_v51  ;;  %v9582_v51 = vpack.c.bf16 %v15534_v54, %v9574_v45  ;;  %v14798_v54 = vld [vmem:[%s15840_s5 + $0x98] sm:$0xff]  }
 0x79b   : > { %10017 = vmatprep.subr.bf16.mxu0 %v14727_v8  ;;  %v9586_v8 = vpack.c.bf16 %v9578_v21, %v9578_v21 }
 0x79e   : > { %10018 = vmatpush1.bf16.msra.mxu0 %v14725_v26  ;;  %v14788_v26 = vld [vmem:[#allocation7 + $0x9f0] ss:$8 sps:$4 sm:$0xff]  }
 0x79f   : > { %10019 = vmatprep.subr.bf16.mxu0 %v14730_v11  ;;  %v9667_v11 = vrot.slane %v9582_v51, 1  ;;  %v14808_v51 = vld [vmem:[%s15840_s5] sm:$0xff]  }
 0x7a2   : > { %10020 = vmatpush1.bf16.msra.mxu0 %v14728_v1  ;;  %v9668_v1 = vrot.slane %v9586_v8, 1 }
 0x7a3   : > { %10021 = vmatprep.subr.bf16.mxu0 %v14733_v33 }
 0x7a4   : > { %v9669_v33 = vsel %vm5556_vm4, %v9667_v11, %v9668_v1  ;;  %v14809_v11 = vld [vmem:[%s15840_s5 + $0x48] sm:$0xff]  }
 0x7a6   : > { %10022 = vmatpush1.bf16.msra.mxu0 %v14731_v48  ;;  %v14796_v48 = vld [vmem:[%s15840_s5 + $0x90] sm:$0xff]  }
 0x7a7   : > { %10023 = vmatprep.subr.bf16.mxu0 %v14736_v57  ;;  %12658 = vmatpush3.bf16.msra.mxu1 %v14796_v48  ;;  %v14797_v57 = vld [vmem:[%s15840_s5 + $0xd8] sm:$0xff]   ;;  %v14810_v48 = vld [vmem:[%s15840_s5 + $0x8] sm:$0xff]  }
 0x7a8   : > { %12659 = vmatprep.subr.bf16.mxu1 %v14797_v57  ;;  %v14811_v57 = vld [vmem:[%s15840_s5 + $0x50] sm:$0xff]  }
 0x7aa   : > { %10024 = vmatpush1.bf16.msra.mxu0 %v14734_v44  ;;  %v14799_v44 = vld [vmem:[%s15840_s5 + $0xe0] sm:$0xff]  }
 0x7ab   : > { %10025 = vmatprep.subr.bf16.mxu0 %v14739_v16  ;;  %12660 = vmatpush3.bf16.msra.mxu1 %v14798_v54  ;;  %v14800_v16 = vld [vmem:[%s15840_s5 + $0xa0] sm:$0xff]   ;;  %v14812_v54 = vld [vmem:[%s15840_s5 + $0x10] sm:$0xff]  }
 0x7ac   : > { %12661 = vmatprep.subr.bf16.mxu1 %v14799_v44  ;;  %v14813_v44 = vld [vmem:[%s15840_s5 + $0x58] sm:$0xff]  }
 0x7ae   : > { %10026 = vmatpush1.bf16.msra.mxu0 %v14737_v18  ;;  %v14802_v18 = vld [vmem:[%s15840_s5 + $0xa8] sm:$0xff]  }
 0x7af   : > { %10027 = vmatprep.subr.bf16.mxu0 %v14742_v62  ;;  %12662 = vmatpush3.bf16.msra.mxu1 %v14800_v16  ;;  %v14804_v62 = vld [vmem:[%s15840_s5 + $0xb0] sm:$0xff]   ;;  %v14814_v16 = vld [vmem:[%s15840_s5 + $0x18] sm:$0xff]  }
 0x7b0   : > { %12663 = vmatprep.subr.bf16.mxu1 %v14801_v17  ;;  %v14815_v17 = vld [vmem:[%s15840_s5 + $0x60] sm:$0xff]  }
 0x7b2   : > { %10028 = vmatpush1.bf16.msra.mxu0 %v14740_v25 }
 0x7b3   : > { %10040 = vmatprep.subr.bf16.mxu0 %v14745_v28  ;;  %12664 = vmatpush3.bf16.msra.mxu1 %v14802_v18  ;;  %v14816_v18 = vld [vmem:[%s15840_s5 + $0x20] sm:$0xff]  }
 0x7b4   : > { %12665 = vmatprep.subr.bf16.mxu1 %v14803_v15  ;;  %v14817_v15 = vld [vmem:[%s15840_s5 + $0x68] sm:$0xff]  }
 0x7b5   : > { %10030 = vmatmul.mubr.bf16.vlgmr.msra.gmra.mrb[4].mxu0 %v9663_v37 }
 0x7b6   : > { %10041 = vmatpush1.bf16.msra.mxu0 %v14743_v20  ;;  %10072 = vmatprep.mubr.bf16.mxu0 %v9672_v12 }
 0x7b7   : > { %10042 = vmatprep.subr.bf16.mxu0 %v14748_v36  ;;  %12666 = vmatpush3.bf16.msra.mxu1 %v14804_v62  ;;  %v14818_v62 = vld [vmem:[%s15840_s5 + $0x28] sm:$0xff]  }
 0x7b8   : > { %12667 = vmatprep.subr.bf16.mxu1 %v14805_v13  ;;  %v14819_v13 = vld [vmem:[%s15840_s5 + $0x70] sm:$0xff]  }
 0x7ba   : > { %10043 = vmatpush1.bf16.msra.mxu0 %v14746_v23 }
 0x7bb   : > { %10044 = vmatprep.subr.bf16.mxu0 %v14751_v38  ;;  %12668 = vmatpush3.bf16.msra.mxu1 %v14806_v47 }
 0x7bc   : > { %12675 = vmatprep.subr.bf16.mxu1 %v14807_v49  ;;  %v14820_v49 = vld [vmem:[%s15840_s5 + $0x30] sm:$0xff]  }
 0x7be   : > { %10045 = vmatpush1.bf16.msra.mxu0 %v14749_v39 }
 0x7bf   : > { %10046 = vmatprep.subr.bf16.mxu0 %v14754_v22 }
 0x7c2   : > { %10047 = vmatpush1.bf16.msra.mxu0 %v14752_v60 }
 0x7c3   : > { %10048 = vmatprep.subr.bf16.mxu0 %v14757_v4 }
 0x7c6   : > { %10049 = vmatpush1.bf16.msra.mxu0 %v14755_v41 }
 0x7c7   : > { %10050 = vmatprep.subr.bf16.mxu0 %v14760_v40 }
 0x7ca   : > { %10051 = vmatpush1.bf16.msra.mxu0 %v14758_v42 }
 0x7cb   : > { %10052 = vmatprep.subr.bf16.mxu0 %v14763_v55 }
 0x7ce   : > { %10053 = vmatpush1.bf16.msra.mxu0 %v14761_v43 }
 0x7cf   : > { %10054 = vmatprep.subr.bf16.mxu0 %v14766_v46 }
 0x7d2   : > { %10055 = vmatpush1.bf16.msra.mxu0 %v14764_v50 }
 0x7d3   : > { %10056 = vmatprep.subr.bf16.mxu0 %v14769_v56  ;;  %v10108_v56 = vld [vmem:[#allocation2 + $0x8] sm:$0xc0] }
 0x7d6   : > { %10057 = vmatpush1.bf16.msra.mxu0 %v14767_v59 }
 0x7d7   : > { %10058 = vmatprep.subr.bf16.mxu0 %v14772_v0 }
 0x7da   : > { %10059 = vmatpush1.bf16.msra.mxu0 %v14770_v2 }
 0x7db   : > { %10060 = vmatprep.subr.bf16.mxu0 %v14775_v31 }
 0x7de   : > { %10061 = vmatpush1.bf16.msra.mxu0 %v14773_v5 }
 0x7df   : > { %10062 = vmatprep.subr.bf16.mxu0 %v14778_v7 }
 0x7e2   : > { %10063 = vmatpush1.bf16.msra.mxu0 %v14776_v9 }
 0x7e3   : > { %10064 = vmatprep.subr.bf16.mxu0 %v14781_v10 }
 0x7e6   : > { %10065 = vmatpush1.bf16.msra.mxu0 %v14779_v35 }
 0x7e7   : > { %10066 = vmatprep.subr.bf16.mxu0 %v14784_v19 }
 0x7ea   : > { %10067 = vmatpush1.bf16.msra.mxu0 %v14782_v53 }
 0x7eb   : > { %10068 = vmatprep.subr.bf16.mxu0 %v14787_v29 }
 0x7ee   : > { %10069 = vmatpush1.bf16.msra.mxu0 %v14785_v34 }
 0x7ef   : > { %10070 = vmatprep.subr.bf16.mxu0 %v14790_v27 }
 0x7f2   : > { %10071 = vmatpush1.bf16.msra.mxu0 %v14788_v26 }
 0x7f5   : > { %10073 = vmatmul.mubr.bf16.vlgmr.msra.gmra.mrb[4].mxu0 %v9669_v33 }
 0x8c8   : > { %v10074_v25 = vpop.f32.mrb[4].mxu0 }
 0x8c9   : > { %v15601_v28 = vadd.f32 %v10092_v24, %v10074_v25  ;;  %v10076_v52 = vpop.f32.mrb[5].mxu0  ;;  %v14822_v25 = vld [vmem:[%s15840_s5 + $0x38] sm:$0xff]  }
 0x8ca   : > { %v15603_v30 = vadd.f32 %v10096_v63, %v10076_v52  ;;  %v10078_v14 = vpop.f32.mrb[6].mxu0 }
 0x8cb   : > { %10103 = vst [vmem:[#allocation2 + $0x20] sm:$0xff] %v15601_v28  ;;  %v15606_v32 = vadd.f32 %v10092_v24, %v10078_v14  ;;  %v10080_v20 = vpop.f32.mrb[7].mxu0  ;;  %v10153_v23 = vpack.c.bf16 %v15601_v28, %v10149_v6  ;;  %v10107_v24 = vld [vmem:[#allocation2] sm:$0xc0] }
 0x8cc   : > { %10104 = vst [vmem:[#allocation2 + $0x28] sm:$0xff] %v15603_v30  ;;  %v15609_v36 = vadd.f32 %v10096_v63, %v10080_v20  ;;  %v10154_v12 = vpack.c.bf16 %v15603_v30, %v10150_v61  ;;  %v10114_v53 = vpack.c.bf16 %v15603_v30, %v10108_v56  ;;  %v10113_v52 = vpack.c.bf16 %v15601_v28, %v10107_v24  ;;  %v14823_v14 = vld [vmem:[%s15840_s5 + $0x140] sm:$0xff]  }
 0x8cd   : > { %10105 = vst [vmem:[#allocation2 + $0x40] sm:$0xff] %v15606_v32  ;;  %v10514_v3 = vpack.c.bf16 %v15606_v32, %v15601_v28  ;;  %v10191_v41 = vshrl.u32 %v10153_v23, 16  ;;  %v10194_v40 = vshll.u32 %v10153_v23, 16  ;;  %v14824_v6 = vld [vmem:[%s15840_s5 + $0x100] sm:$0xff]   ;;  %v14845_v28 = vld [vmem:[%s15840_s5 + $0x1d8] sm:$0xff]  }
 0x8ce   : > { %10106 = vst [vmem:[#allocation2 + $0x48] sm:$0xff] %v15609_v36  ;;  %v10515_v37 = vpack.c.bf16 %v15609_v36, %v15603_v30  ;;  %v10208_v38 = vshrl.u32 %v10154_v12, 16  ;;  %v10211_v39 = vshll.u32 %v10154_v12, 16  ;;  %v10370_v26 = vrot.slane %v10114_v53, 3  ;;  %v14825_v12 = vld [vmem:[%s15840_s5 + $0x148] sm:$0xff]   ;;  %v14829_v30 = vld [vmem:[%s15840_s5 + $0x158] sm:$0xff]  }
 0x8cf   : > { %v10193_v5 = vrot.slane %v10191_v41, 3  ;;  %v10196_v7 = vrot.slane %v10194_v40, 4  ;;  %v10367_v61 = vrot.slane %v10113_v52, 3  ;;  %v14833_v40 = vld [vmem:[%s15840_s5 + $0x168] sm:$0xff]   ;;  %v14855_v24 = vld [vmem:[%s15840_s5 + $0x240] sm:$0xff]  }
 0x8d0   : > { %v10210_v43 = vrot.slane %v10208_v38, 3  ;;  %v10213_v59 = vrot.slane %v10211_v39, 4  ;;  %v14826_v38 = vld [vmem:[%s15840_s5 + $0x108] sm:$0xff]   ;;  %v14827_v39 = vld [vmem:[%s15840_s5 + $0x150] sm:$0xff]  }
 0x8d1   : > { %v10197_v45 = vor.u32 %v10196_v7, %v10193_v5  ;;  %v14838_v5 = vld [vmem:[%s15840_s5 + $0x138] sm:$0xff]   ;;  %v14839_v7 = vld [vmem:[%s15840_s5 + $0x1c0] sm:$0xff]   ;;  %v14841_v53 = vld [vmem:[%s15840_s5 + $0x1c8] sm:$0xff]  }
 0x8d2   : > { %v10214_v21 = vor.u32 %v10213_v59, %v10210_v43  ;;  %v10693_v43 = vld [vmem:[#allocation2 + $0x68] sm:$0x1]  ;;  %v14836_v59 = vld [vmem:[%s15840_s5 + $0x130] sm:$0xff]  }
 0x8d3   : > { %v10689_v41 = vld [vmem:[#allocation2 + $0x28] sm:$0xfe] }
 0x8d4   : > { %v10151_v22 = vld [vmem:[#allocation2 + $0x40] sm:$0x7f] }
 0x8d5   : > { %v10152_v60 = vld [vmem:[#allocation2 + $0x48] sm:$0x7f]  ;;  %v10155_v4 = vpack.c.bf16 %v10151_v22, %v10151_v22  ;;  %v10111_v47 = vld [vmem:[#allocation2 + $0x40] sm:$0x3f]  ;;  %v14828_v22 = vld [vmem:[%s15840_s5 + $0x110] sm:$0xff]  }
 0x8d6   : > { %v10112_v42 = vld [vmem:[#allocation2 + $0x48] sm:$0x3f]  ;;  %v10156_v55 = vpack.c.bf16 %v10152_v60, %v10152_v60  ;;  %v10115_v63 = vpack.c.bf16 %v10111_v47, %v10111_v47  ;;  %v14831_v60 = vld [vmem:[%s15840_s5 + $0x160] sm:$0xff]  }
 0x8d7   : > { %v10199_v46 = vshrl.u32 %v10155_v4, 16  ;;  %v10202_v50 = vshll.u32 %v10155_v4, 16  ;;  %v10116_v31 = vpack.c.bf16 %v10112_v42, %v10112_v42  ;;  %v14832_v4 = vld [vmem:[%s15840_s5 + $0x120] sm:$0xff]   ;;  %v10695_v42 = vpack.c.bf16 %v15609_v36, %v10689_v41  ;;  %v14867_v41 = vld [vmem:[%s15840_s5 + $0x270] sm:$0xff]  }
 0x8d8   : > { %v10216_v0 = vshrl.u32 %v10156_v55, 16  ;;  %v10219_v2 = vshll.u32 %v10156_v55, 16  ;;  %v10368_v20 = vrot.slane %v10115_v63, 3  ;;  %v14834_v55 = vld [vmem:[%s15840_s5 + $0x128] sm:$0xff]  }
 0x8d9   : > { %v10201_v9 = vrot.slane %v10199_v46, 3  ;;  %v10204_v10 = vrot.slane %v10202_v50, 4  ;;  %v10371_v27 = vrot.slane %v10116_v31, 3  ;;  %v14835_v46 = vld [vmem:[%s15840_s5 + $0x170] sm:$0xff]   ;;  %v10697_v50 = vpack.c.bf16 %v10693_v43, %v10693_v43  ;;  %v14869_v43 = vld [vmem:[%s15840_s5 + $0x278] sm:$0xff]  }
 0x8da   : > { %v10218_v35 = vrot.slane %v10216_v0, 3  ;;  %v10221_v19 = vrot.slane %v10219_v2, 4  ;;  %v10369_v23 = vsel %vm672_vm1, %v10367_v61, %v10368_v20  ;;  %v10746_v56 = vshll.u32 %v10695_v42, 16  ;;  %v14837_v0 = vld [vmem:[%s15840_s5 + $0x178] sm:$0xff]   ;;  %v14857_v20 = vld [vmem:[%s15840_s5 + $0x248] sm:$0xff]  }
 0x8db   : > { %v10205_v29 = vor.u32 %v10204_v10, %v10201_v9  ;;  %v10372_v33 = vsel %vm672_vm1, %v10370_v26, %v10371_v27  ;;  %v10751_v31 = vshll.u32 %v10697_v50, 16  ;;  %v10744_v9 = vshrl.u32 %v10695_v42, 16  ;;  %v14844_v27 = vld [vmem:[%s15840_s5 + $0x190] sm:$0xff]   ;;  %v14849_v26 = vld [vmem:[%s15840_s5 + $0x1e8] sm:$0xff]   ;;  %v10898_v42 = vld [vmem:[#allocation2 + $0x60] sm:$0x3] }
 0x8dc   : > { %v10222_v34 = vor.u32 %v10221_v19, %v10218_v35  ;;  %v10748_v2 = vrot.slane %v10746_v56, 1  ;;  %v14840_v19 = vld [vmem:[%s15840_s5 + $0x180] sm:$0xff]   ;;  %v10902_v50 = vpack.c.bf16 %v10898_v42, %v10898_v42  ;;  %v14870_v56 = vld [vmem:[%s15840_s5 + $0x238] sm:$0xff]  }
 0x8dd   : > { %v10206_v1 = vsel %vm2531_vm0, %v10197_v45, %v10205_v29  ;;  %v10753_v35 = vrot.slane %v10751_v31, 1  ;;  %v14847_v45 = vld [vmem:[%s15840_s5 + $0x1e0] sm:$0xff]  }
 0x8de   : > { %v10223_v8 = vsel %vm2531_vm0, %v10214_v21, %v10222_v34  ;;  %v10749_v10 = vor.u32 %v10748_v2, %v10744_v9  ;;  %v14842_v21 = vld [vmem:[%s15840_s5 + $0x188] sm:$0xff]   ;;  %v14843_v34 = vld [vmem:[%s15840_s5 + $0x1d0] sm:$0xff]  }
 0x8df   : > { %10354 = vmatprep.mubr.bf16.mxu1 %v10223_v8  ;;  %v14848_v8 = vld [vmem:[%s15840_s5 + $0x1a0] sm:$0xff]  }
 0x8e0   : > { %10355 = vmatmul.mubr.bf16.vlgmr.msra.gmra.mrb[8].mxu1 %v10206_v1  ;;  %v10754_v29 = vsel %vm4530_vm3, %v10749_v10, %v10753_v35  ;;  %v10692_v1 = vld [vmem:[#allocation2 + $0x60] sm:$0x1] }
 0x8e1   : > { %12676 = vmatpush3.bf16.msra.mxu1 %v14808_v51  ;;  %10503 = vmatprep.mubr.bf16.mxu1 %v10372_v33  ;;  %v10688_v51 = vld [vmem:[#allocation2 + $0x20] sm:$0xfe]  ;;  %v14850_v33 = vld [vmem:[%s15840_s5 + $0x1a8] sm:$0xff]  }
 0x8e2   : > { %12677 = vmatprep.subr.bf16.mxu1 %v14809_v11  ;;  %v10694_v11 = vpack.c.bf16 %v15606_v32, %v10688_v51 }
 0x8e5   : > { %12678 = vmatpush3.bf16.msra.mxu1 %v14810_v48  ;;  %v14851_v48 = vld [vmem:[%s15840_s5 + $0x1f0] sm:$0xff]  }
 0x8e6   : > { %12679 = vmatprep.subr.bf16.mxu1 %v14811_v57  ;;  %v10696_v57 = vpack.c.bf16 %v10692_v1, %v10692_v1 }
 0x8e9   : > { %12680 = vmatpush3.bf16.msra.mxu1 %v14812_v54  ;;  %v10734_v54 = vshll.u32 %v10694_v11, 16 }
 0x8ea   : > { %12681 = vmatprep.subr.bf16.mxu1 %v14813_v44  ;;  %v14852_v44 = vld [vmem:[%s15840_s5 + $0x1b0] sm:$0xff]  }
 0x8ed   : > { %12682 = vmatpush3.bf16.msra.mxu1 %v14814_v16  ;;  %v10897_v16 = vld [vmem:[#allocation2 + $0x28] sm:$0xfc] }
 0x8ee   : > { %12683 = vmatprep.subr.bf16.mxu1 %v14815_v17  ;;  %v10899_v17 = vld [vmem:[#allocation2 + $0x68] sm:$0x3] }
 0x8ef   : > { %v10903_v47 = vpack.c.bf16 %v10899_v17, %v10899_v17 }
 0x8f1   : > { %12684 = vmatpush3.bf16.msra.mxu1 %v14816_v18  ;;  %v14853_v18 = vld [vmem:[%s15840_s5 + $0x1f8] sm:$0xff]  }
 0x8f2   : > { %12685 = vmatprep.subr.bf16.mxu1 %v14817_v15  ;;  %v10736_v15 = vrot.slane %v10734_v54, 1 }
 0x8f5   : > { %12686 = vmatpush3.bf16.msra.mxu1 %v14818_v62  ;;  %v10739_v62 = vshll.u32 %v10696_v57, 16 }
 0x8f6   : > { %12687 = vmatprep.subr.bf16.mxu1 %v14819_v13  ;;  %v10901_v13 = vpack.c.bf16 %v15609_v36, %v10897_v16  ;;  %v14856_v36 = vld [vmem:[%s15840_s5 + $0x200] sm:$0xff]  }
 0x8f8   : > { %v10944_v52 = vrot.slane %v10901_v13, 1 }
 0x8f9   : > { %12688 = vmatpush3.bf16.msra.mxu1 %v14820_v49  ;;  %v14854_v49 = vld [vmem:[%s15840_s5 + $0x1b8] sm:$0xff]  }
 0x8fa   : > { %12689 = vmatprep.subr.bf16.mxu1 %v14821_v58  ;;  %v10732_v58 = vshrl.u32 %v10694_v11, 16 }
 0x8fc   : > { %v10737_v63 = vor.u32 %v10736_v15, %v10732_v58  ;;  %v12648_v58 = vld [vmem:[#allocation10] ss:$0 sm:$0xff] }
 0x8fd   : > { %12690 = vmatpush3.bf16.msra.mxu1 %v14822_v25  ;;  %v10741_v25 = vrot.slane %v10739_v62, 1 }
 0x8fe   : > { %12697 = vmatprep.subr.bf16.mxu1 %v14823_v14  ;;  %v10945_v14 = vrot.slane %v10903_v47, 1 }
 0x8ff   : > { %v10742_v61 = vsel %vm4530_vm3, %v10737_v63, %v10741_v25 }
 0x900   : > { %10504 = vmatmul.mubr.bf16.vlgmr.msra.gmra.mrb[12].mxu1 %v10369_v23  ;;  %v14859_v23 = vld [vmem:[%s15840_s5 + $0x250] sm:$0xff]  }
 0x901   : > { %12698 = vmatpush3.bf16.msra.mxu1 %v14824_v6  ;;  %10677 = vmatprep.mubr.bf16.mxu1 %v10515_v37  ;;  %v14830_v37 = vld [vmem:[%s15840_s5 + $0x118] sm:$0xff]   ;;  %v10946_v6 = vsel %vm5556_vm4, %v10944_v52, %v10945_v14 }
 0x902   : > { %12699 = vmatprep.subr.bf16.mxu1 %v14825_v12  ;;  %v14858_v12 = vld [vmem:[%s15840_s5 + $0x208] sm:$0xff]  }
 0x905   : > { %12700 = vmatpush3.bf16.msra.mxu1 %v14826_v38  ;;  %v14860_v38 = vld [vmem:[%s15840_s5 + $0x210] sm:$0xff]  }
 0x906   : > { %12701 = vmatprep.subr.bf16.mxu1 %v14827_v39  ;;  %v14861_v39 = vld [vmem:[%s15840_s5 + $0x258] sm:$0xff]  }
 0x909   : > { %12702 = vmatpush3.bf16.msra.mxu1 %v14828_v22  ;;  %v14862_v22 = vld [vmem:[%s15840_s5 + $0x218] sm:$0xff]  }
 0x90a   : > { %12703 = vmatprep.subr.bf16.mxu1 %v14829_v30  ;;  %v14863_v30 = vld [vmem:[%s15840_s5 + $0x260] sm:$0xff]  }
 0x90d   : > { %12704 = vmatpush3.bf16.msra.mxu1 %v14830_v37  ;;  %v14864_v37 = vld [vmem:[%s15840_s5 + $0x220] sm:$0xff]  }
 0x90e   : > { %12705 = vmatprep.subr.bf16.mxu1 %v14831_v60  ;;  %v14865_v60 = vld [vmem:[%s15840_s5 + $0x268] sm:$0xff]  }
 0x911   : > { %12706 = vmatpush3.bf16.msra.mxu1 %v14832_v4  ;;  %v14866_v4 = vld [vmem:[%s15840_s5 + $0x228] sm:$0xff]  }
 0x912   : > { %12707 = vmatprep.subr.bf16.mxu1 %v14833_v40  ;;  %v10896_v40 = vld [vmem:[#allocation2 + $0x20] sm:$0xfc] }
 0x915   : > { %12708 = vmatpush3.bf16.msra.mxu1 %v14834_v55  ;;  %v14868_v55 = vld [vmem:[%s15840_s5 + $0x230] sm:$0xff]  }
 0x916   : > { %12709 = vmatprep.subr.bf16.mxu1 %v14835_v46  ;;  %v10900_v46 = vpack.c.bf16 %v15606_v32, %v10896_v40 }
 0x919   : > { %12710 = vmatpush3.bf16.msra.mxu1 %v14836_v59  ;;  %v10941_v59 = vrot.slane %v10900_v46, 1 }
 0x91a   : > { %12711 = vmatprep.subr.bf16.mxu1 %v14837_v0  ;;  %v10942_v0 = vrot.slane %v10902_v50, 1 }
 0x91c   : > { %v10943_v2 = vsel %vm5556_vm4, %v10941_v59, %v10942_v0 }
 0x91d   : > { %12712 = vmatpush3.bf16.msra.mxu1 %v14838_v5 }
 0x91e   : > { %12719 = vmatprep.subr.bf16.mxu1 %v14839_v7 }
 0x920   : > { %10678 = vmatmul.mubr.bf16.vlgmr.msra.gmra.mrb[16].mxu1 %v10514_v3  ;;  %v14846_v3 = vld [vmem:[%s15840_s5 + $0x198] sm:$0xff]  }
 0x921   : > { %12720 = vmatpush3.bf16.msra.mxu1 %v14840_v19  ;;  %10885 = vmatprep.mubr.bf16.mxu1 %v10754_v29 }
 0x922   : > { %12721 = vmatprep.subr.bf16.mxu1 %v14841_v53 }
 0x925   : > { %12722 = vmatpush3.bf16.msra.mxu1 %v14842_v21 }
 0x926   : > { %12723 = vmatprep.subr.bf16.mxu1 %v14843_v34 }
 0x929   : > { %12724 = vmatpush3.bf16.msra.mxu1 %v14844_v27 }
 0x92a   : > { %12725 = vmatprep.subr.bf16.mxu1 %v14845_v28 }
 0x92d   : > { %12726 = vmatpush3.bf16.msra.mxu1 %v14846_v3 }
 0x92e   : > { %12727 = vmatprep.subr.bf16.mxu1 %v14847_v45 }
 0x931   : > { %12728 = vmatpush3.bf16.msra.mxu1 %v14848_v8 }
 0x932   : > { %12729 = vmatprep.subr.bf16.mxu1 %v14849_v26 }
 0x935   : > { %12730 = vmatpush3.bf16.msra.mxu1 %v14850_v33 }
 0x936   : > { %12731 = vmatprep.subr.bf16.mxu1 %v14851_v48 }
 0x939   : > { %12732 = vmatpush3.bf16.msra.mxu1 %v14852_v44 }
 0x93a   : > { %12733 = vmatprep.subr.bf16.mxu1 %v14853_v18 }
 0x93d   : > { %12734 = vmatpush3.bf16.msra.mxu1 %v14854_v49 }
 0x93e   : > { %12741 = vmatprep.subr.bf16.mxu1 %v14855_v24 }
 0x940   : > { %10886 = vmatmul.mubr.bf16.vlgmr.msra.gmra.mrb[20].mxu1 %v10742_v61 }
 0x941   : > { %12742 = vmatpush3.bf16.msra.mxu1 %v14856_v36  ;;  %11077 = vmatprep.mubr.bf16.mxu1 %v10946_v6 }
 0x942   : > { %12743 = vmatprep.subr.bf16.mxu1 %v14857_v20 }
 0x945   : > { %12744 = vmatpush3.bf16.msra.mxu1 %v14858_v12 }
 0x946   : > { %12745 = vmatprep.subr.bf16.mxu1 %v14859_v23 }
 0x949   : > { %12746 = vmatpush3.bf16.msra.mxu1 %v14860_v38 }
 0x94a   : > { %12747 = vmatprep.subr.bf16.mxu1 %v14861_v39 }
 0x94d   : > { %12748 = vmatpush3.bf16.msra.mxu1 %v14862_v22 }
 0x94e   : > { %12749 = vmatprep.subr.bf16.mxu1 %v14863_v30 }
 0x951   : > { %12750 = vmatpush3.bf16.msra.mxu1 %v14864_v37 }
 0x952   : > { %12751 = vmatprep.subr.bf16.mxu1 %v14865_v60 }
 0x955   : > { %12752 = vmatpush3.bf16.msra.mxu1 %v14866_v4 }
 0x956   : > { %12753 = vmatprep.subr.bf16.mxu1 %v14867_v41 }
 0x959   : > { %12754 = vmatpush3.bf16.msra.mxu1 %v14868_v55 }
 0x95a   : > { %12755 = vmatprep.subr.bf16.mxu1 %v14869_v43 }
 0x95d   : > { %12756 = vmatpush3.bf16.msra.mxu1 %v14870_v56 }
 0x960   : > { %11078 = vmatmul.mubr.bf16.vlgmr.msra.gmra.mrb[24].mxu1 %v10943_v2 }
 0x9b3   : > { %v12669_v31 = vpop.f32.mrb[8].mxu1 }
 0x9b4   : > { %v12670_v5 = vpop.f32.mrb[9].mxu1 }
 0x9b5   : > { %v12671_v7 = vadd.f32 %v12670_v5, %v12669_v31  ;;  %v12672_v9 = vpop.f32.mrb[10].mxu1 }
 0x9b6   : > { %v12673_v10 = vpop.f32.mrb[11].mxu1 }
 0x9b7   : > { %v12674_v35 = vadd.f32 %v12673_v10, %v12672_v9 }
 0x9d3   : > { %v12691_v32 = vpop.f32.mrb[12].mxu1 }
 0x9d4   : > { %v12692_v19 = vpop.f32.mrb[13].mxu1 }
 0x9d5   : > { %v12693_v53 = vadd.f32 %v12692_v19, %v12691_v32  ;;  %v12694_v29 = vpop.f32.mrb[14].mxu1 }
 0x9d6   : > { %v12695_v21 = vpop.f32.mrb[15].mxu1 }
 0x9d7   : > { %v10506_v34 = vadd.f32 %v12693_v53, %v12671_v7  ;;  %v12696_v27 = vadd.f32 %v12695_v21, %v12694_v29 }
 0x9d9   : > { %v10509_v28 = vadd.f32 %v12696_v27, %v12674_v35 }
 0x9f3   : > { %v12713_v3 = vpop.f32.mrb[16].mxu1 }
 0x9f4   : > { %v12714_v45 = vpop.f32.mrb[17].mxu1 }
 0x9f5   : > { %v12715_v51 = vadd.f32 %v12714_v45, %v12713_v3  ;;  %v12716_v8 = vpop.f32.mrb[18].mxu1 }
 0x9f6   : > { %v12717_v26 = vpop.f32.mrb[19].mxu1 }
 0x9f7   : > { %v10686_v11 = vadd.f32 %v12715_v51, %v10506_v34  ;;  %v12718_v1 = vadd.f32 %v12717_v26, %v12716_v8 }
 0x9f9   : > { %v10687_v33 = vadd.f32 %v12718_v1, %v10509_v28 }
 0xa13   : > { %v12735_v48 = vpop.f32.mrb[20].mxu1 }
 0xa14   : > { %v12736_v57 = vpop.f32.mrb[21].mxu1 }
 0xa15   : > { %v12737_v54 = vadd.f32 %v12736_v57, %v12735_v48  ;;  %v12738_v44 = vpop.f32.mrb[22].mxu1 }
 0xa16   : > { %v12739_v16 = vpop.f32.mrb[23].mxu1 }
 0xa17   : > { %v10894_v17 = vadd.f32 %v12737_v54, %v10686_v11  ;;  %v12740_v18 = vadd.f32 %v12739_v16, %v12738_v44 }
 0xa19   : > { %v10895_v15 = vadd.f32 %v12740_v18, %v10687_v33 }
 0xa33   : > { %v12757_v62 = vpop.f32.mrb[24].mxu1 }
 0xa34   : > { %v12758_v13 = vpop.f32.mrb[25].mxu1 }
 0xa35   : > { %v12759_v47 = vadd.f32 %v12758_v13, %v12757_v62  ;;  %v12760_v49 = vpop.f32.mrb[26].mxu1 }
 0xa36   : > { %v12761_v24 = vpop.f32.mrb[27].mxu1 }
 0xa37   : > { %v11086_v63 = vadd.f32 %v12759_v47, %v10894_v17  ;;  %v12762_v25 = vadd.f32 %v12761_v24, %v12760_v49 }
 0xa39   : > { %v11095_v52 = vadd.f32 %v12648_v58, %v11086_v63  ;;  %v11087_v14 = vadd.f32 %v12762_v25, %v10895_v15 }
 0xa3b   : > { %11098 = vst.msk [vmem:[%s345_s21] sm:$0xff] %vm11097_vm6, %v11095_v52  ;;  %v11096_v36 = vadd.f32 %v12648_v58, %v11087_v14 }
 0xa3d   : > { %11099 = vst.msk [vmem:[%s345_s21 + $0x8] sm:$0xff] %vm11097_vm6, %v11096_v36 }
 0xa3e PF: > { %s20_s24 = sadd.s32 1, %s15044_s24  }
 0xa3f   : > { %p17_p6 = scmp.ge.s32.totalorder %s20_s24, 4  }
 0xa41   :  { %19 = sbr.rel (!%p17_p6) target bundleno = 3 (0x3), region = 113 }
 0xa48   :  { %11121 = vsyncpa [#allocation4], 1 }
 0xa49   :  { %11123 = vsyncpa [#allocation4 + $0x1], 1 }
 0xa4a   :  { %11124 = vsyncpa [#allocation6], 1 }
 0xa4b   :  { %11125 = vsyncpa [#allocation9], 1 }

</bundles_post_ra>
